<compile_context>
chip_gen: v7x
topology: tpu7x:2x2x1
jax: 0.10.0
libtpu: 0.0.40
codegen_flags: <defaults>
</compile_context>

<pallas_src>
import functools

import jax
import jax.numpy as jnp
from jax.experimental import pallas as pl
from jax.experimental.pallas import tpu as pltpu


def _round_up(x, m):
    return ((x + m - 1) // m) * m


def _pick_k_tile(K, cap=1024):
    """Largest multiple-of-128 divisor of K that is <= cap, else whole K."""
    if K % 128 == 0:
        for d in range(cap // 128, 0, -1):
            t = 128 * d
            if K % t == 0:
                return t
    return K


# ---------------------------------------------------------------------------
# Kernel 1: fused conv(5x5, pad=2) + 2x2/stride-2 max-pool + bias + ReLU.
# Each branch gets a stacked patch operand p:(4, tm, K) (4 pool-window
# offsets); one long matmul against w:(K, OC), then max over the 4 offsets,
# bias, ReLU.  With n_branch=2 the two results are concatenated along lanes
# into a single lane-dense (tm, 128) store.
# ---------------------------------------------------------------------------
def _make_conv_pool_kernel(n_branch):
    def kernel(*refs):
        o_ref = refs[-1]
        outs = []
        for i in range(n_branch):
            p = refs[i][...]                         # (4, tm, K) bf16
            w = refs[n_branch + i][...]              # (K, OC)    bf16
            b = refs[2 * n_branch + i][...]          # (1, OC)    f32
            four, tm, K = p.shape
            acc = jnp.dot(p.reshape(four * tm, K), w,
                          preferred_element_type=jnp.float32)
            acc = acc.reshape(four, tm, -1)
            pooled = jnp.max(acc, axis=0) + b        # bias once, after the max
            outs.append(jnp.maximum(pooled, 0.0))    # ReLU once
        out = outs[0] if n_branch == 1 else jnp.concatenate(outs, axis=-1)
        o_ref[...] = out.astype(o_ref.dtype)
    return kernel


def _pool_offset_patches(xp, Ho, Wo, ph, pw):
    """im2col patches for conv-output pixels (2*oh+ph, 2*ow+pw).

    xp is the zero-padded NHWC input (pad=2). Columns are ordered (kh, kw, c)
    to match the weight-matrix row layout.
    """
    B, _, _, C = xp.shape
    cols = []
    for kh in range(5):
        for kw in range(5):
            cols.append(xp[:, ph + kh: ph + kh + 2 * Ho: 2,
                              pw + kw: pw + kw + 2 * Wo: 2, :])
    return jnp.concatenate(cols, axis=-1).reshape(B * Ho * Wo, 25 * C)


def conv5x5_relu_pool(xs, ws, bs):
    """Fused conv+pool for one or two branches sharing the same geometry.

    xs: list of (B,H,W,C) bf16 inputs;  ws: list of (25*C, OC) bf16;
    bs: list of (1, OC) f32.  Returns (B, H//2, W//2, sum(OC)) bf16.
    """
    n = len(xs)
    B, H, W, _ = xs[0].shape
    Ho, Wo = H // 2, W // 2
    Mp = B * Ho * Wo
    tm = min(512, _round_up(Mp, 8))          # M tile: <=512 rows, sublane-aligned
    Mpad = _round_up(Mp, tm)

    patch_stacks = []
    for x in xs:
        xp = jnp.pad(x, ((0, 0), (2, 2), (2, 2), (0, 0)))
        stk = jnp.stack([_pool_offset_patches(xp, Ho, Wo, ph, pw)
                         for ph in (0, 1) for pw in (0, 1)], axis=0)  # (4,Mp,K)
        if Mpad != Mp:
            stk = jnp.pad(stk, ((0, 0), (0, Mpad - Mp), (0, 0)))
        patch_stacks.append(stk)

    K = patch_stacks[0].shape[-1]
    OCs = [w.shape[1] for w in ws]
    OC_total = sum(OCs)

    in_specs = ([pl.BlockSpec((4, tm, K), lambda i: (0, i, 0)) for _ in range(n)]
                + [pl.BlockSpec(w.shape, lambda i: (0, 0)) for w in ws]
                + [pl.BlockSpec(b.shape, lambda i: (0, 0)) for b in bs])

    out = pl.pallas_call(
        _make_conv_pool_kernel(n),
        out_shape=jax.ShapeDtypeStruct((Mpad, OC_total), jnp.bfloat16),
        grid=(Mpad // tm,),
        in_specs=in_specs,
        out_specs=pl.BlockSpec((tm, OC_total), lambda i: (i, 0)),
        compiler_params=pltpu.CompilerParams(
            dimension_semantics=("parallel",)),
    )(*patch_stacks, *ws, *bs)
    return out[:Mp].reshape(B, Ho, Wo, OC_total)


# ---------------------------------------------------------------------------
# Kernel 2: fused two-layer head  out = (x @ W1 + b1) @ W2 + b2  [+ softmax]
# Grid over the K (reduction) axis of the first matmul; f32 accumulator in
# VMEM scratch; second matmul + bias (+ exact softmax) in the finalize step.
# ---------------------------------------------------------------------------
def _mlp_head_kernel(x_ref, w1_ref, b1_ref, w2_ref, b2_ref, o_ref, acc_ref, *,
                     softmax):
    k = pl.program_id(0)

    @pl.when(k == 0)
    def _():
        acc_ref[...] = jnp.zeros_like(acc_ref)

    acc_ref[...] += jnp.dot(x_ref[...], w1_ref[...],
                            preferred_element_type=jnp.float32)

    @pl.when(k == pl.num_programs(0) - 1)
    def _():
        h = (acc_ref[...] + b1_ref[...]).astype(w2_ref.dtype)   # no ReLU (matches torch)
        out = jnp.dot(h, w2_ref[...], preferred_element_type=jnp.float32)
        out = out + b2_ref[...]
        if softmax:
            m = jnp.max(out, axis=-1, keepdims=True)
            e = jnp.exp(out - m)
            out = e / jnp.sum(e, axis=-1, keepdims=True)        # exact divide
        o_ref[...] = out.astype(o_ref.dtype)


def mlp_head(x, w1, b1, w2, b2, softmax=False):
    """x:(M,K) bf16, w1:(K,H) bf16, b1:(1,H) f32, w2:(H,N) bf16, b2:(1,N) f32."""
    M, K = x.shape
    H = w1.shape[1]
    N = w2.shape[1]
    tk = _pick_k_tile(K)
    nk = K // tk
    return pl.pallas_call(
        functools.partial(_mlp_head_kernel, softmax=softmax),
        out_shape=jax.ShapeDtypeStruct((M, N), jnp.float32),
        grid=(nk,),
        in_specs=[
            pl.BlockSpec((M, tk), lambda k: (0, k)),
            pl.BlockSpec((tk, H), lambda k: (k, 0)),
            pl.BlockSpec((1, H), lambda k: (0, 0)),
            pl.BlockSpec((H, N), lambda k: (0, 0)),
            pl.BlockSpec((1, N), lambda k: (0, 0)),
        ],
        out_specs=pl.BlockSpec((M, N), lambda k: (0, 0)),
        scratch_shapes=[pltpu.VMEM((M, H), jnp.float32)],
        compiler_params=pltpu.CompilerParams(
            dimension_semantics=("arbitrary",)),
    )(x, w1, b1, w2, b2)


# ---------------------------------------------------------------------------
# Parameters: synthetic PyTorch-layout init + one-time kernel-layout prepare.
# ---------------------------------------------------------------------------
def init_params_torch_layout(key):
    """Synthetic params in PyTorch layouts (Conv2d OIHW, Linear (out,in))."""
    ks = jax.random.split(key, 16)

    def conv_p(kw, kb, oc, ic):
        return (0.05 * jax.random.normal(kw, (oc, ic, 5, 5), jnp.float32),
                0.05 * jax.random.normal(kb, (oc,), jnp.float32))

    def lin_p(kw, kb, out_f, in_f):
        return (0.02 * jax.random.normal(kw, (out_f, in_f), jnp.float32),
                0.02 * jax.random.normal(kb, (out_f,), jnp.float32))

    p = {}
    p["g_cov1_w"], p["g_cov1_b"] = conv_p(ks[0], ks[1], 32, 1)
    p["g_cov2_w"], p["g_cov2_b"] = conv_p(ks[2], ks[3], 64, 32)
    p["l_cov1_w"], p["l_cov1_b"] = conv_p(ks[4], ks[5], 32, 1)
    p["l_cov2_w"], p["l_cov2_b"] = conv_p(ks[6], ks[7], 64, 32)
    p["clf1_w"], p["clf1_b"] = lin_p(ks[8], ks[9], 512, 64 * 7 * 7 * 2)
    p["clf2_w"], p["clf2_b"] = lin_p(ks[10], ks[11], 10, 512)
    p["critic1_w"], p["critic1_b"] = lin_p(ks[12], ks[13], 512, 64 * 7 * 7)
    p["critic2_w"], p["critic2_b"] = lin_p(ks[14], ks[15], 10, 512)
    return p


def prepare_params(raw):
    """One-time layout/dtype conversion (done outside the jitted forward)."""
    def conv_mat(w_oihw):
        oc, ic = w_oihw.shape[0], w_oihw.shape[1]
        # rows ordered (kh, kw, c) to match the patch column layout
        return (jnp.transpose(w_oihw, (2, 3, 1, 0))
                .reshape(25 * ic, oc).astype(jnp.bfloat16))

    def row(b):
        return jnp.asarray(b, jnp.float32).reshape(1, -1)

    Hc = Wc = 7
    C2 = 64
    hw = jnp.arange(Hc * Wc)                               # h*7 + w
    cg = jnp.arange(C2)
    # torch flatten of (C,H,W): index = c*49 + (h*7 + w)
    perm_g = cg[None, :] * (Hc * Wc) + hw[:, None]         # (49, 64)
    perm_l = perm_g + C2 * Hc * Wc                         # l half offset 3136
    # merged stage-2 output flattens as (h, w, [g_c | l_c]) -> 128 lanes per hw
    perm_clf = jnp.concatenate([perm_g, perm_l], axis=1).reshape(-1)   # (6272,)
    perm_critic = perm_g.reshape(-1)                                    # (3136,)

    p = {}
    # merged stage-1 conv: g channels 0..31, l channels 32..63
    p["cov1_w"] = jnp.concatenate(
        [conv_mat(raw["g_cov1_w"]), conv_mat(raw["l_cov1_w"])], axis=1)
    p["cov1_b"] = jnp.concatenate(
        [row(raw["g_cov1_b"]), row(raw["l_cov1_b"])], axis=1)
    p["g_cov2_w"], p["g_cov2_b"] = conv_mat(raw["g_cov2_w"]), row(raw["g_cov2_b"])
    p["l_cov2_w"], p["l_cov2_b"] = conv_mat(raw["l_cov2_w"]), row(raw["l_cov2_b"])

    # clf1: (in, out), rows permuted to the (h, w, [g|l]) flatten order
    clf1_t = jnp.asarray(raw["clf1_w"]).T                  # (6272, 512)
    p["clf1_w"] = clf1_t[perm_clf, :].astype(jnp.bfloat16)
    p["clf1_b"] = row(raw["clf1_b"])
    p["clf2_w"] = jnp.asarray(raw["clf2_w"]).T.astype(jnp.bfloat16)
    p["clf2_b"] = row(raw["clf2_b"])

    # critic1: rows permuted to (h, w, c) order and K zero-padded to a
    # multiple of 512 (3136 -> 3584) so the head K-tiles (tk=896, nk=4).
    crit1_t = jnp.asarray(raw["critic1_w"]).T              # (3136, 512)
    crit1 = crit1_t[perm_critic, :]
    kpad = _round_up(crit1.shape[0], 512)
    p["critic1_w"] = jnp.pad(
        crit1, ((0, kpad - crit1.shape[0]), (0, 0))).astype(jnp.bfloat16)
    p["critic1_b"] = row(raw["critic1_b"])
    p["critic2_w"] = jnp.asarray(raw["critic2_w"]).T.astype(jnp.bfloat16)
    p["critic2_b"] = row(raw["critic2_b"])
    return p


# ---------------------------------------------------------------------------
# Forward pass (mirrors MNIST.forward)
# ---------------------------------------------------------------------------
@jax.jit
def mnist_forward(x_nchw, params):
    B = x_nchw.shape[0]
    x = jnp.transpose(x_nchw, (0, 2, 3, 1)).astype(jnp.bfloat16)    # NHWC bf16

    # stage 1: g_cov1 and l_cov1 share the input -> one 64-channel conv+pool
    s1 = conv5x5_relu_pool([x], [params["cov1_w"]], [params["cov1_b"]])  # (B,14,14,64)
    g1, l1 = s1[..., :32], s1[..., 32:]

    # stage 2: both branches in one kernel, lane-dense (.., 128) output
    s2 = conv5x5_relu_pool(
        [g1, l1],
        [params["g_cov2_w"], params["l_cov2_w"]],
        [params["g_cov2_b"], params["l_cov2_b"]])                    # (B,7,7,128)

    # classifier head: feature is a plain reshape (weights pre-permuted)
    feature = s2.reshape(B, 7 * 7 * 128)                             # (B, 6272)
    clf2_out = mlp_head(feature, params["clf1_w"], params["clf1_b"],
                        params["clf2_w"], params["clf2_b"], softmax=False)

    # critic head: shared weights for g and l -> batch rows, run once
    g_flat = s2[..., :64].reshape(B, 7 * 7 * 64)                     # (h,w,c) order
    l_flat = s2[..., 64:].reshape(B, 7 * 7 * 64)
    critic_in = jnp.concatenate([g_flat, l_flat], axis=0)            # (2B, 3136)
    kpad = params["critic1_w"].shape[0]
    critic_in = jnp.pad(critic_in, ((0, 0), (0, kpad - critic_in.shape[1])))
    critic_out = mlp_head(critic_in,
                          params["critic1_w"], params["critic1_b"],
                          params["critic2_w"], params["critic2_b"],
                          softmax=True)                              # (2B, 10)
    return critic_out[:B], critic_out[B:], clf2_out


# ---------------------------------------------------------------------------
# Pure-JAX reference (mirrors the PyTorch module, f32) for validation.
# ---------------------------------------------------------------------------
def mnist_forward_ref(x_nchw, raw):
    def conv(x, w, b):
        y = jax.lax.conv_general_dilated(
            x, w, (1, 1), ((2, 2), (2, 2)),
            dimension_numbers=("NCHW", "OIHW", "NCHW"))
        return jax.nn.relu(y + b.reshape(1, -1, 1, 1))

    def pool(x):
        return jax.lax.reduce_window(x, -jnp.inf, jax.lax.max,
                                     (1, 1, 2, 2), (1, 1, 2, 2), "VALID")

    B = x_nchw.shape[0]
    g = pool(conv(x_nchw, raw["g_cov1_w"], raw["g_cov1_b"]))
    g = pool(conv(g, raw["g_cov2_w"], raw["g_cov2_b"]))
    l = pool(conv(x_nchw, raw["l_cov1_w"], raw["l_cov1_b"]))
    l = pool(conv(l, raw["l_cov2_w"], raw["l_cov2_b"]))
    gf, lf = g.reshape(B, -1), l.reshape(B, -1)
    feat = jnp.concatenate([gf, lf], axis=-1)
    clf1 = jnp.dot(feat, raw["clf1_w"].T, precision="highest") + raw["clf1_b"]
    clf2 = jnp.dot(clf1, raw["clf2_w"].T, precision="highest") + raw["clf2_b"]

    def critic(z):
        c1 = jnp.dot(z, raw["critic1_w"].T, precision="highest") + raw["critic1_b"]
        c2 = jnp.dot(c1, raw["critic2_w"].T, precision="highest") + raw["critic2_b"]
        return jax.nn.softmax(c2, axis=1)

    return critic(gf), critic(lf), clf2


if __name__ == "__main__":
    key = jax.random.PRNGKey(0)
    pkey, xkey = jax.random.split(key)
    raw_params = init_params_torch_layout(pkey)
    params = prepare_params(raw_params)

    # MNIST geometry is fixed by the Linear dims (64*7*7) -> 28x28 input.
    x = jax.random.normal(xkey, (2, 1, 28, 28), jnp.float32)

    g_critic2, l_critic2, clf2 = mnist_forward(x, params)
    jax.block_until_ready((g_critic2, l_critic2, clf2))

    assert g_critic2.shape == (2, 10)
    assert l_critic2.shape == (2, 10)
    assert clf2.shape == (2, 10)

    # validate against the pure-JAX reference (bf16 kernels -> loose tolerance)
    g_ref, l_ref, clf_ref = mnist_forward_ref(x, raw_params)
    assert float(jnp.max(jnp.abs(g_critic2 - g_ref))) < 3e-2
    assert float(jnp.max(jnp.abs(l_critic2 - l_ref))) < 3e-2
    assert float(jnp.max(jnp.abs(clf2 - clf_ref))) < 5e-2
    assert jnp.allclose(jnp.sum(g_critic2, axis=1), 1.0, atol=1e-3)
    assert jnp.allclose(jnp.sum(l_critic2, axis=1), 1.0, atol=1e-3)

    print("KERNEL_OK")
</pallas_src>

<mosaic_0001>
module attributes {stable_mosaic.version = 11 : i64} {
  func.func @kernel(%arg0: i32, %arg1: memref<4x392x25xbf16, #tpu.memory_space<vmem>>, %arg2: memref<25x64xbf16, #tpu.memory_space<vmem>>, %arg3: memref<1x64xf32, #tpu.memory_space<vmem>>, %arg4: memref<392x64xbf16, #tpu.memory_space<vmem>>) attributes {dimension_semantics = [#tpu.dimension_semantics<parallel>], iteration_bounds = array<i64: 1>, scalar_prefetch = 0 : i64, scratch_operands = 0 : i64, tpu.core_type = #tpu.core_type<tc>, window_params = [{transform_indices = @transform_0, window_bounds = array<i64: 4, 392, 25>}, {pipeline_mode = #tpu.pipeline_mode<synchronous>, transform_indices = @transform_1, window_bounds = array<i64: 25, 64>}, {pipeline_mode = #tpu.pipeline_mode<synchronous>, transform_indices = @transform_2, window_bounds = array<i64: 1, 64>}, {transform_indices = @transform_3, window_bounds = array<i64: 392, 64>}]} {
    %c0 = arith.constant 0 : index
    %c0_0 = arith.constant 0 : index
    %c0_1 = arith.constant 0 : index
    %0 = vector.load %arg1[%c0, %c0_0, %c0_1] : memref<4x392x25xbf16, #tpu.memory_space<vmem>>, vector<4x392x25xbf16>
    %c0_2 = arith.constant 0 : index
    %c0_3 = arith.constant 0 : index
    %1 = vector.load %arg2[%c0_2, %c0_3] : memref<25x64xbf16, #tpu.memory_space<vmem>>, vector<25x64xbf16>
    %c0_4 = arith.constant 0 : index
    %c0_5 = arith.constant 0 : index
    %2 = vector.load %arg3[%c0_4, %c0_5] : memref<1x64xf32, #tpu.memory_space<vmem>>, vector<1x64xf32>
    %3 = vector.shape_cast %0 : vector<4x392x25xbf16> to vector<1568x25xbf16>
    %cst = arith.constant dense<0.000000e+00> : vector<1568x64xf32>
    %4 = tpu.matmul %3, %1, %cst {dimension_numbers = #tpu.dot_dimension_numbers<[1], [0], [0], [1], [0, 0, 1, 1], [], []>} : vector<1568x25xbf16>, vector<25x64xbf16>, vector<1568x64xf32> -> vector<1568x64xf32>
    %5 = vector.shape_cast %4 : vector<1568x64xf32> to vector<4x392x64xf32>
    %cst_6 = arith.constant dense<0xFF800000> : vector<392x64xf32>
    %6 = vector.multi_reduction <maximumf>, %5, %cst_6 [0] : vector<4x392x64xf32> to vector<392x64xf32>
    %7 = vector.broadcast %2 : vector<1x64xf32> to vector<392x64xf32>
    %8 = arith.addf %6, %7 : vector<392x64xf32>
    %cst_7 = arith.constant 0.000000e+00 : f32
    %9 = vector.broadcast %cst_7 : f32 to vector<392x64xf32>
    %10 = arith.maximumf %8, %9 : vector<392x64xf32>
    %11 = arith.truncf %10 : vector<392x64xf32> to vector<392x64xbf16>
    %c0_8 = arith.constant 0 : index
    %c0_9 = arith.constant 0 : index
    %12 = vector.load %arg4[%c0_8, %c0_9] : memref<392x64xbf16, #tpu.memory_space<vmem>>, vector<392x64xbf16>
    tpu.vector_store %arg4[%c0_8, %c0_9], %11 {strides = array<i32>} : memref<392x64xbf16, #tpu.memory_space<vmem>>, vector<392x64xbf16>,
    return
  }
  func.func @transform_0(%arg0: i32) -> (i32, i32, i32) {
    %c0_i32 = arith.constant 0 : i32
    %c0_i32_0 = arith.constant 0 : i32
    %c0_i32_1 = arith.constant 0 : i32
    return %c0_i32, %arg0, %c0_i32_0 : i32, i32, i32
  }
  func.func @transform_1(%arg0: i32) -> (i32, i32) {
    %c0_i32 = arith.constant 0 : i32
    %c0_i32_0 = arith.constant 0 : i32
    %c0_i32_1 = arith.constant 0 : i32
    return %c0_i32, %c0_i32_0 : i32, i32
  }
  func.func @transform_2(%arg0: i32) -> (i32, i32) {
    %c0_i32 = arith.constant 0 : i32
    %c0_i32_0 = arith.constant 0 : i32
    %c0_i32_1 = arith.constant 0 : i32
    return %c0_i32, %c0_i32_0 : i32, i32
  }
  func.func @transform_3(%arg0: i32) -> (i32, i32) {
    %c0_i32 = arith.constant 0 : i32
    %c0_i32_0 = arith.constant 0 : i32
    return %arg0, %c0_i32 : i32, i32
  }
}

module attributes {stable_mosaic.version = 11 : i64} {
  func.func @kernel(%arg0: i32, %arg1: memref<4x104x800xbf16, #tpu.memory_space<vmem>>, %arg2: memref<4x104x800xbf16, #tpu.memory_space<vmem>>, %arg3: memref<800x64xbf16, #tpu.memory_space<vmem>>, %arg4: memref<800x64xbf16, #tpu.memory_space<vmem>>, %arg5: memref<1x64xf32, #tpu.memory_space<vmem>>, %arg6: memref<1x64xf32, #tpu.memory_space<vmem>>, %arg7: memref<104x128xbf16, #tpu.memory_space<vmem>>) attributes {dimension_semantics = [#tpu.dimension_semantics<parallel>], iteration_bounds = array<i64: 1>, scalar_prefetch = 0 : i64, scratch_operands = 0 : i64, tpu.core_type = #tpu.core_type<tc>, window_params = [{transform_indices = @transform_0, window_bounds = array<i64: 4, 104, 800>}, {transform_indices = @transform_1, window_bounds = array<i64: 4, 104, 800>}, {pipeline_mode = #tpu.pipeline_mode<synchronous>, transform_indices = @transform_2, window_bounds = array<i64: 800, 64>}, {pipeline_mode = #tpu.pipeline_mode<synchronous>, transform_indices = @transform_3, window_bounds = array<i64: 800, 64>}, {pipeline_mode = #tpu.pipeline_mode<synchronous>, transform_indices = @transform_4, window_bounds = array<i64: 1, 64>}, {pipeline_mode = #tpu.pipeline_mode<synchronous>, transform_indices = @transform_5, window_bounds = array<i64: 1, 64>}, {transform_indices = @transform_6, window_bounds = array<i64: 104, 128>}]} {
    %c0 = arith.constant 0 : index
    %c0_0 = arith.constant 0 : index
    %c0_1 = arith.constant 0 : index
    %0 = vector.load %arg1[%c0, %c0_0, %c0_1] : memref<4x104x800xbf16, #tpu.memory_space<vmem>>, vector<4x104x800xbf16>
    %c0_2 = arith.constant 0 : index
    %c0_3 = arith.constant 0 : index
    %1 = vector.load %arg3[%c0_2, %c0_3] : memref<800x64xbf16, #tpu.memory_space<vmem>>, vector<800x64xbf16>
    %c0_4 = arith.constant 0 : index
    %c0_5 = arith.constant 0 : index
    %2 = vector.load %arg5[%c0_4, %c0_5] : memref<1x64xf32, #tpu.memory_space<vmem>>, vector<1x64xf32>
    %3 = vector.shape_cast %0 : vector<4x104x800xbf16> to vector<416x800xbf16>
    %cst = arith.constant dense<0.000000e+00> : vector<416x64xf32>
    %4 = tpu.matmul %3, %1, %cst {dimension_numbers = #tpu.dot_dimension_numbers<[1], [0], [0], [1], [0, 0, 1, 1], [], []>} : vector<416x800xbf16>, vector<800x64xbf16>, vector<416x64xf32> -> vector<416x64xf32>
    %5 = vector.shape_cast %4 : vector<416x64xf32> to vector<4x104x64xf32>
    %cst_6 = arith.constant dense<0xFF800000> : vector<104x64xf32>
    %6 = vector.multi_reduction <maximumf>, %5, %cst_6 [0] : vector<4x104x64xf32> to vector<104x64xf32>
    %7 = vector.broadcast %2 : vector<1x64xf32> to vector<104x64xf32>
    %8 = arith.addf %6, %7 : vector<104x64xf32>
    %cst_7 = arith.constant 0.000000e+00 : f32
    %9 = vector.broadcast %cst_7 : f32 to vector<104x64xf32>
    %10 = arith.maximumf %8, %9 : vector<104x64xf32>
    %c0_8 = arith.constant 0 : index
    %c0_9 = arith.constant 0 : index
    %c0_10 = arith.constant 0 : index
    %11 = vector.load %arg2[%c0_8, %c0_9, %c0_10] : memref<4x104x800xbf16, #tpu.memory_space<vmem>>, vector<4x104x800xbf16>
    %c0_11 = arith.constant 0 : index
    %c0_12 = arith.constant 0 : index
    %12 = vector.load %arg4[%c0_11, %c0_12] : memref<800x64xbf16, #tpu.memory_space<vmem>>, vector<800x64xbf16>
    %c0_13 = arith.constant 0 : index
    %c0_14 = arith.constant 0 : index
    %13 = vector.load %arg6[%c0_13, %c0_14] : memref<1x64xf32, #tpu.memory_space<vmem>>, vector<1x64xf32>
    %14 = vector.shape_cast %11 : vector<4x104x800xbf16> to vector<416x800xbf16>
    %cst_15 = arith.constant dense<0.000000e+00> : vector<416x64xf32>
    %15 = tpu.matmul %14, %12, %cst_15 {dimension_numbers = #tpu.dot_dimension_numbers<[1], [0], [0], [1], [0, 0, 1, 1], [], []>} : vector<416x800xbf16>, vector<800x64xbf16>, vector<416x64xf32> -> vector<416x64xf32>
    %16 = vector.shape_cast %15 : vector<416x64xf32> to vector<4x104x64xf32>
    %cst_16 = arith.constant dense<0xFF800000> : vector<104x64xf32>
    %17 = vector.multi_reduction <maximumf>, %16, %cst_16 [0] : vector<4x104x64xf32> to vector<104x64xf32>
    %18 = vector.broadcast %13 : vector<1x64xf32> to vector<104x64xf32>
    %19 = arith.addf %17, %18 : vector<104x64xf32>
    %cst_17 = arith.constant 0.000000e+00 : f32
    %20 = vector.broadcast %cst_17 : f32 to vector<104x64xf32>
    %21 = arith.maximumf %19, %20 : vector<104x64xf32>
    %22 = tpu.concatenate %10, %21 in 1 : vector<104x64xf32>, vector<104x64xf32> -> vector<104x128xf32>
    %23 = arith.truncf %22 : vector<104x128xf32> to vector<104x128xbf16>
    %c0_18 = arith.constant 0 : index
    %c0_19 = arith.constant 0 : index
    %24 = vector.load %arg7[%c0_18, %c0_19] : memref<104x128xbf16, #tpu.memory_space<vmem>>, vector<104x128xbf16>
    tpu.vector_store %arg7[%c0_18, %c0_19], %23 {strides = array<i32>} : memref<104x128xbf16, #tpu.memory_space<vmem>>, vector<104x128xbf16>,
    return
  }
  func.func @transform_0(%arg0: i32) -> (i32, i32, i32) {
    %c0_i32 = arith.constant 0 : i32
    %c0_i32_0 = arith.constant 0 : i32
    %c0_i32_1 = arith.constant 0 : i32
    return %c0_i32, %arg0, %c0_i32_0 : i32, i32, i32
  }
  func.func @transform_1(%arg0: i32) -> (i32, i32, i32) {
    %c0_i32 = arith.constant 0 : i32
    %c0_i32_0 = arith.constant 0 : i32
    %c0_i32_1 = arith.constant 0 : i32
    return %c0_i32, %arg0, %c0_i32_0 : i32, i32, i32
  }
  func.func @transform_2(%arg0: i32) -> (i32, i32) {
    %c0_i32 = arith.constant 0 : i32
    %c0_i32_0 = arith.constant 0 : i32
    %c0_i32_1 = arith.constant 0 : i32
    return %c0_i32, %c0_i32_0 : i32, i32
  }
  func.func @transform_3(%arg0: i32) -> (i32, i32) {
    %c0_i32 = arith.constant 0 : i32
    %c0_i32_0 = arith.constant 0 : i32
    %c0_i32_1 = arith.constant 0 : i32
    return %c0_i32, %c0_i32_0 : i32, i32
  }
  func.func @transform_4(%arg0: i32) -> (i32, i32) {
    %c0_i32 = arith.constant 0 : i32
    %c0_i32_0 = arith.constant 0 : i32
    %c0_i32_1 = arith.constant 0 : i32
    return %c0_i32, %c0_i32_0 : i32, i32
  }
  func.func @transform_5(%arg0: i32) -> (i32, i32) {
    %c0_i32 = arith.constant 0 : i32
    %c0_i32_0 = arith.constant 0 : i32
    %c0_i32_1 = arith.constant 0 : i32
    return %c0_i32, %c0_i32_0 : i32, i32
  }
  func.func @transform_6(%arg0: i32) -> (i32, i32) {
    %c0_i32 = arith.constant 0 : i32
    %c0_i32_0 = arith.constant 0 : i32
    return %arg0, %c0_i32 : i32, i32
  }
}

module attributes {stable_mosaic.version = 11 : i64} {
  func.func @_mlp_head_kernel(%arg0: i32, %arg1: memref<4x896xbf16, #tpu.memory_space<vmem>>, %arg2: memref<896x512xbf16, #tpu.memory_space<vmem>>, %arg3: memref<1x512xf32, #tpu.memory_space<vmem>>, %arg4: memref<512x10xbf16, #tpu.memory_space<vmem>>, %arg5: memref<1x10xf32, #tpu.memory_space<vmem>>, %arg6: memref<4x10xf32, #tpu.memory_space<vmem>>, %arg7: memref<4x512xf32, #tpu.memory_space<vmem>>) attributes {dimension_semantics = [#tpu.dimension_semantics<arbitrary>], iteration_bounds = array<i64: 4>, scalar_prefetch = 0 : i64, scratch_operands = 1 : i64, tpu.core_type = #tpu.core_type<tc>, window_params = [{transform_indices = @transform_0, window_bounds = array<i64: 4, 896>}, {transform_indices = @transform_1, window_bounds = array<i64: 896, 512>}, {pipeline_mode = #tpu.pipeline_mode<synchronous>, transform_indices = @transform_2, window_bounds = array<i64: 1, 512>}, {pipeline_mode = #tpu.pipeline_mode<synchronous>, transform_indices = @transform_3, window_bounds = array<i64: 512, 10>}, {pipeline_mode = #tpu.pipeline_mode<synchronous>, transform_indices = @transform_4, window_bounds = array<i64: 1, 10>}, {pipeline_mode = #tpu.pipeline_mode<synchronous>, transform_indices = @transform_5, window_bounds = array<i64: 4, 10>}]} {
    %c0_i32 = arith.constant 0 : i32
    %0 = arith.cmpi eq, %arg0, %c0_i32 : i32
    %1 = arith.extui %0 : i1 to i32
    %c0_i32_0 = arith.constant 0 : i32
    %2 = arith.cmpi ne, %1, %c0_i32_0 : i32
    scf.if %2 {
      %cst_9 = arith.constant 0.000000e+00 : f32
      %12 = vector.broadcast %cst_9 : f32 to vector<4x512xf32>
      %c0_10 = arith.constant 0 : index
      %c0_11 = arith.constant 0 : index
      %13 = vector.load %arg7[%c0_10, %c0_11] : memref<4x512xf32, #tpu.memory_space<vmem>>, vector<4x512xf32>
      tpu.vector_store %arg7[%c0_10, %c0_11], %12 {strides = array<i32>} : memref<4x512xf32, #tpu.memory_space<vmem>>, vector<4x512xf32>,
    } else {
    }
    %c0 = arith.constant 0 : index
    %c0_1 = arith.constant 0 : index
    %3 = vector.load %arg7[%c0, %c0_1] : memref<4x512xf32, #tpu.memory_space<vmem>>, vector<4x512xf32>
    %c0_2 = arith.constant 0 : index
    %c0_3 = arith.constant 0 : index
    %4 = vector.load %arg1[%c0_2, %c0_3] : memref<4x896xbf16, #tpu.memory_space<vmem>>, vector<4x896xbf16>
    %c0_4 = arith.constant 0 : index
    %c0_5 = arith.constant 0 : index
    %5 = vector.load %arg2[%c0_4, %c0_5] : memref<896x512xbf16, #tpu.memory_space<vmem>>, vector<896x512xbf16>
    %cst = arith.constant dense<0.000000e+00> : vector<4x512xf32>
    %6 = tpu.matmul %4, %5, %cst {dimension_numbers = #tpu.dot_dimension_numbers<[1], [0], [0], [1], [0, 0, 1, 1], [], []>} : vector<4x896xbf16>, vector<896x512xbf16>, vector<4x512xf32> -> vector<4x512xf32>
    %7 = arith.addf %3, %6 : vector<4x512xf32>
    %c0_6 = arith.constant 0 : index
    %c0_7 = arith.constant 0 : index
    %8 = vector.load %arg7[%c0_6, %c0_7] : memref<4x512xf32, #tpu.memory_space<vmem>>, vector<4x512xf32>
    tpu.vector_store %arg7[%c0_6, %c0_7], %7 {strides = array<i32>} : memref<4x512xf32, #tpu.memory_space<vmem>>, vector<4x512xf32>,
    %c3_i32 = arith.constant 3 : i32
    %9 = arith.cmpi eq, %arg0, %c3_i32 : i32
    %10 = arith.extui %9 : i1 to i32
    %c0_i32_8 = arith.constant 0 : i32
    %11 = arith.cmpi ne, %10, %c0_i32_8 : i32
    scf.if %11 {
      %c0_9 = arith.constant 0 : index
      %c0_10 = arith.constant 0 : index
      %12 = vector.load %arg7[%c0_9, %c0_10] : memref<4x512xf32, #tpu.memory_space<vmem>>, vector<4x512xf32>
      %c0_11 = arith.constant 0 : index
      %c0_12 = arith.constant 0 : index
      %13 = vector.load %arg3[%c0_11, %c0_12] : memref<1x512xf32, #tpu.memory_space<vmem>>, vector<1x512xf32>
      %14 = vector.broadcast %13 : vector<1x512xf32> to vector<4x512xf32>
      %15 = arith.addf %12, %14 : vector<4x512xf32>
      %16 = arith.truncf %15 : vector<4x512xf32> to vector<4x512xbf16>
      %c0_13 = arith.constant 0 : index
      %c0_14 = arith.constant 0 : index
      %17 = vector.load %arg4[%c0_13, %c0_14] : memref<512x10xbf16, #tpu.memory_space<vmem>>, vector<512x10xbf16>
      %cst_15 = arith.constant dense<0.000000e+00> : vector<4x10xf32>
      %18 = tpu.matmul %16, %17, %cst_15 {dimension_numbers = #tpu.dot_dimension_numbers<[1], [0], [0], [1], [0, 0, 1, 1], [], []>} : vector<4x512xbf16>, vector<512x10xbf16>, vector<4x10xf32> -> vector<4x10xf32>
      %c0_16 = arith.constant 0 : index
      %c0_17 = arith.constant 0 : index
      %19 = vector.load %arg5[%c0_16, %c0_17] : memref<1x10xf32, #tpu.memory_space<vmem>>, vector<1x10xf32>
      %20 = vector.broadcast %19 : vector<1x10xf32> to vector<4x10xf32>
      %21 = arith.addf %18, %20 : vector<4x10xf32>
      %cst_18 = arith.constant dense<0xFF800000> : vector<4xf32>
      %22 = vector.multi_reduction <maximumf>, %21, %cst_18 [1] : vector<4x10xf32> to vector<4xf32>
      %23 = vector.shape_cast %22 : vector<4xf32> to vector<4x1xf32>
      %24 = vector.broadcast %23 : vector<4x1xf32> to vector<4x10xf32>
      %25 = arith.subf %21, %24 : vector<4x10xf32>
      %26 = math.exp %25 : vector<4x10xf32>
      %cst_19 = arith.constant dense<0.000000e+00> : vector<4xf32>
      %27 = vector.multi_reduction <add>, %26, %cst_19 [1] : vector<4x10xf32> to vector<4xf32>
      %28 = vector.shape_cast %27 : vector<4xf32> to vector<4x1xf32>
      %29 = vector.broadcast %28 : vector<4x1xf32> to vector<4x10xf32>
      %30 = arith.divf %26, %29 : vector<4x10xf32>
      %c0_20 = arith.constant 0 : index
      %c0_21 = arith.constant 0 : index
      %31 = vector.load %arg6[%c0_20, %c0_21] : memref<4x10xf32, #tpu.memory_space<vmem>>, vector<4x10xf32>
      tpu.vector_store %arg6[%c0_20, %c0_21], %30 {strides = array<i32>} : memref<4x10xf32, #tpu.memory_space<vmem>>, vector<4x10xf32>,
    } else {
    }
    return
  }
  func.func @transform_0(%arg0: i32) -> (i32, i32) {
    %c0_i32 = arith.constant 0 : i32
    %c0_i32_0 = arith.constant 0 : i32
    return %c0_i32, %arg0 : i32, i32
  }
  func.func @transform_1(%arg0: i32) -> (i32, i32) {
    %c0_i32 = arith.constant 0 : i32
    %c0_i32_0 = arith.constant 0 : i32
    return %arg0, %c0_i32 : i32, i32
  }
  func.func @transform_2(%arg0: i32) -> (i32, i32) {
    %c0_i32 = arith.constant 0 : i32
    %c0_i32_0 = arith.constant 0 : i32
    %c0_i32_1 = arith.constant 0 : i32
    return %c0_i32, %c0_i32_0 : i32, i32
  }
  func.func @transform_3(%arg0: i32) -> (i32, i32) {
    %c0_i32 = arith.constant 0 : i32
    %c0_i32_0 = arith.constant 0 : i32
    %c0_i32_1 = arith.constant 0 : i32
    return %c0_i32, %c0_i32_0 : i32, i32
  }
  func.func @transform_4(%arg0: i32) -> (i32, i32) {
    %c0_i32 = arith.constant 0 : i32
    %c0_i32_0 = arith.constant 0 : i32
    %c0_i32_1 = arith.constant 0 : i32
    return %c0_i32, %c0_i32_0 : i32, i32
  }
  func.func @transform_5(%arg0: i32) -> (i32, i32) {
    %c0_i32 = arith.constant 0 : i32
    %c0_i32_0 = arith.constant 0 : i32
    %c0_i32_1 = arith.constant 0 : i32
    return %c0_i32, %c0_i32_0 : i32, i32
  }
}

module attributes {stable_mosaic.version = 11 : i64} {
  func.func @_mlp_head_kernel(%arg0: i32, %arg1: memref<2x896xbf16, #tpu.memory_space<vmem>>, %arg2: memref<896x512xbf16, #tpu.memory_space<vmem>>, %arg3: memref<1x512xf32, #tpu.memory_space<vmem>>, %arg4: memref<512x10xbf16, #tpu.memory_space<vmem>>, %arg5: memref<1x10xf32, #tpu.memory_space<vmem>>, %arg6: memref<2x10xf32, #tpu.memory_space<vmem>>, %arg7: memref<2x512xf32, #tpu.memory_space<vmem>>) attributes {dimension_semantics = [#tpu.dimension_semantics<arbitrary>], iteration_bounds = array<i64: 7>, scalar_prefetch = 0 : i64, scratch_operands = 1 : i64, tpu.core_type = #tpu.core_type<tc>, window_params = [{transform_indices = @transform_0, window_bounds = array<i64: 2, 896>}, {transform_indices = @transform_1, window_bounds = array<i64: 896, 512>}, {pipeline_mode = #tpu.pipeline_mode<synchronous>, transform_indices = @transform_2, window_bounds = array<i64: 1, 512>}, {pipeline_mode = #tpu.pipeline_mode<synchronous>, transform_indices = @transform_3, window_bounds = array<i64: 512, 10>}, {pipeline_mode = #tpu.pipeline_mode<synchronous>, transform_indices = @transform_4, window_bounds = array<i64: 1, 10>}, {pipeline_mode = #tpu.pipeline_mode<synchronous>, transform_indices = @transform_5, window_bounds = array<i64: 2, 10>}]} {
    %c0_i32 = arith.constant 0 : i32
    %0 = arith.cmpi eq, %arg0, %c0_i32 : i32
    %1 = arith.extui %0 : i1 to i32
    %c0_i32_0 = arith.constant 0 : i32
    %2 = arith.cmpi ne, %1, %c0_i32_0 : i32
    scf.if %2 {
      %cst_9 = arith.constant 0.000000e+00 : f32
      %12 = vector.broadcast %cst_9 : f32 to vector<2x512xf32>
      %c0_10 = arith.constant 0 : index
      %c0_11 = arith.constant 0 : index
      %13 = vector.load %arg7[%c0_10, %c0_11] : memref<2x512xf32, #tpu.memory_space<vmem>>, vector<2x512xf32>
      tpu.vector_store %arg7[%c0_10, %c0_11], %12 {strides = array<i32>} : memref<2x512xf32, #tpu.memory_space<vmem>>, vector<2x512xf32>,
    } else {
    }
    %c0 = arith.constant 0 : index
    %c0_1 = arith.constant 0 : index
    %3 = vector.load %arg7[%c0, %c0_1] : memref<2x512xf32, #tpu.memory_space<vmem>>, vector<2x512xf32>
    %c0_2 = arith.constant 0 : index
    %c0_3 = arith.constant 0 : index
    %4 = vector.load %arg1[%c0_2, %c0_3] : memref<2x896xbf16, #tpu.memory_space<vmem>>, vector<2x896xbf16>
    %c0_4 = arith.constant 0 : index
    %c0_5 = arith.constant 0 : index
    %5 = vector.load %arg2[%c0_4, %c0_5] : memref<896x512xbf16, #tpu.memory_space<vmem>>, vector<896x512xbf16>
    %cst = arith.constant dense<0.000000e+00> : vector<2x512xf32>
    %6 = tpu.matmul %4, %5, %cst {dimension_numbers = #tpu.dot_dimension_numbers<[1], [0], [0], [1], [0, 0, 1, 1], [], []>} : vector<2x896xbf16>, vector<896x512xbf16>, vector<2x512xf32> -> vector<2x512xf32>
    %7 = arith.addf %3, %6 : vector<2x512xf32>
    %c0_6 = arith.constant 0 : index
    %c0_7 = arith.constant 0 : index
    %8 = vector.load %arg7[%c0_6, %c0_7] : memref<2x512xf32, #tpu.memory_space<vmem>>, vector<2x512xf32>
    tpu.vector_store %arg7[%c0_6, %c0_7], %7 {strides = array<i32>} : memref<2x512xf32, #tpu.memory_space<vmem>>, vector<2x512xf32>,
    %c6_i32 = arith.constant 6 : i32
    %9 = arith.cmpi eq, %arg0, %c6_i32 : i32
    %10 = arith.extui %9 : i1 to i32
    %c0_i32_8 = arith.constant 0 : i32
    %11 = arith.cmpi ne, %10, %c0_i32_8 : i32
    scf.if %11 {
      %c0_9 = arith.constant 0 : index
      %c0_10 = arith.constant 0 : index
      %12 = vector.load %arg7[%c0_9, %c0_10] : memref<2x512xf32, #tpu.memory_space<vmem>>, vector<2x512xf32>
      %c0_11 = arith.constant 0 : index
      %c0_12 = arith.constant 0 : index
      %13 = vector.load %arg3[%c0_11, %c0_12] : memref<1x512xf32, #tpu.memory_space<vmem>>, vector<1x512xf32>
      %14 = vector.broadcast %13 : vector<1x512xf32> to vector<2x512xf32>
      %15 = arith.addf %12, %14 : vector<2x512xf32>
      %16 = arith.truncf %15 : vector<2x512xf32> to vector<2x512xbf16>
      %c0_13 = arith.constant 0 : index
      %c0_14 = arith.constant 0 : index
      %17 = vector.load %arg4[%c0_13, %c0_14] : memref<512x10xbf16, #tpu.memory_space<vmem>>, vector<512x10xbf16>
      %cst_15 = arith.constant dense<0.000000e+00> : vector<2x10xf32>
      %18 = tpu.matmul %16, %17, %cst_15 {dimension_numbers = #tpu.dot_dimension_numbers<[1], [0], [0], [1], [0, 0, 1, 1], [], []>} : vector<2x512xbf16>, vector<512x10xbf16>, vector<2x10xf32> -> vector<2x10xf32>
      %c0_16 = arith.constant 0 : index
      %c0_17 = arith.constant 0 : index
      %19 = vector.load %arg5[%c0_16, %c0_17] : memref<1x10xf32, #tpu.memory_space<vmem>>, vector<1x10xf32>
      %20 = vector.broadcast %19 : vector<1x10xf32> to vector<2x10xf32>
      %21 = arith.addf %18, %20 : vector<2x10xf32>
      %c0_18 = arith.constant 0 : index
      %c0_19 = arith.constant 0 : index
      %22 = vector.load %arg6[%c0_18, %c0_19] : memref<2x10xf32, #tpu.memory_space<vmem>>, vector<2x10xf32>
      tpu.vector_store %arg6[%c0_18, %c0_19], %21 {strides = array<i32>} : memref<2x10xf32, #tpu.memory_space<vmem>>, vector<2x10xf32>,
    } else {
    }
    return
  }
  func.func @transform_0(%arg0: i32) -> (i32, i32) {
    %c0_i32 = arith.constant 0 : i32
    %c0_i32_0 = arith.constant 0 : i32
    return %c0_i32, %arg0 : i32, i32
  }
  func.func @transform_1(%arg0: i32) -> (i32, i32) {
    %c0_i32 = arith.constant 0 : i32
    %c0_i32_0 = arith.constant 0 : i32
    return %arg0, %c0_i32 : i32, i32
  }
  func.func @transform_2(%arg0: i32) -> (i32, i32) {
    %c0_i32 = arith.constant 0 : i32
    %c0_i32_0 = arith.constant 0 : i32
    %c0_i32_1 = arith.constant 0 : i32
    return %c0_i32, %c0_i32_0 : i32, i32
  }
  func.func @transform_3(%arg0: i32) -> (i32, i32) {
    %c0_i32 = arith.constant 0 : i32
    %c0_i32_0 = arith.constant 0 : i32
    %c0_i32_1 = arith.constant 0 : i32
    return %c0_i32, %c0_i32_0 : i32, i32
  }
  func.func @transform_4(%arg0: i32) -> (i32, i32) {
    %c0_i32 = arith.constant 0 : i32
    %c0_i32_0 = arith.constant 0 : i32
    %c0_i32_1 = arith.constant 0 : i32
    return %c0_i32, %c0_i32_0 : i32, i32
  }
  func.func @transform_5(%arg0: i32) -> (i32, i32) {
    %c0_i32 = arith.constant 0 : i32
    %c0_i32_0 = arith.constant 0 : i32
    %c0_i32_1 = arith.constant 0 : i32
    return %c0_i32, %c0_i32_0 : i32, i32
  }
}

</mosaic_0001>

<bundles_post_ra>
// kernel: mnist_forward.4
= control target key start
LH: loop header
LB: loop body
LE: loop exit
PB: predicated region body
PF: predicated region fallthrough
CT: control target
= control target key end

     0   :  { %vm1012_vm0 = vcmask 1043456   ;;  %vm1013_vm1 = vcmask 1044480   ;;  %vm717_vm2 = vcmask 203776   ;;  %v3238_v1 = vmov 65535   ;;  %s4735_s1 = inlined_call_operand.vmem [shape: bf16[25,64], index: 1, kind: input, shape index: {}]   ;;  %s4736_s0 = inlined_call_operand.vmem [shape: bf16[4,392,25], index: 0, kind: input, shape index: {}]   ;;  %s4737_s2 = inlined_call_operand.vmem [shape: f32[1,64], index: 2, kind: input, shape index: {}]   ;;  %s4738_s3 = inlined_call_operand.vmem [shape: bf16[392,64], index: 3, kind: output, shape index: {}]  }
   0x1   :  { %v3137_v0 = vld [vmem:[%s4735_s1] sm:$0xff]   ;;  %v1014_v2 = vsel %vm1012_vm0, 4294967295, %v3238_v1  ;;  %v3138_v3 = vld [vmem:[%s4735_s1 + $0x8] sm:$0x1f]   ;;  %v3141_v7 = vld [vmem:[%s4736_s0 + $0x190] sm:$0xff]   ;;  %vm1836_vm3 = vcmask 523264  }
   0x2   :  { %2932 = vmatprep.subr.bf16.mxu0 %v3137_v0  ;;  %3132 = vmatprep.subr.bf16.mxu1 %v3137_v0  ;;  %v1015_v4 = vsel %vm1013_vm1, %v1014_v2, 0  ;;  %v3139_v5 = vld [vmem:[%s4736_s0] sm:$0xff]   ;;  %v3140_v8 = vld [vmem:[%s4736_s0 + $0x8] sm:$0xff]   ;;  %v3142_v9 = vld [vmem:[%s4736_s0 + $0x198] sm:$0xff]   ;;  %vm2481_vm4 = vcmask 519168  }
   0x3   :  { %2933 = vmatpush3.bf16.msra.mxu0 %v3137_v0  ;;  %3134 = vmatpush3.bf16.msra.mxu1 %v3137_v0  ;;  %v1017_v6 = vand.u32 %v3138_v3, %v1015_v4  ;;  %v3143_v10 = vld [vmem:[%s4736_s0 + $0x10] sm:$0xff]   ;;  %v3145_v11 = vld [vmem:[%s4736_s0 + $0x1a0] sm:$0xff]   ;;  %v3144_v12 = vld [vmem:[%s4736_s0 + $0x18] sm:$0xff]  }
   0x4   :  { %2936 = vmatprep.mubr.msk.bf16.mxu0 %vm717_vm2, %v3139_v5  ;;  %3036 = vmatprep.mubr.msk.bf16.mxu1 %vm717_vm2, %v3141_v7  ;;  %v3146_v13 = vld [vmem:[%s4736_s0 + $0x1a8] sm:$0xff]   ;;  %v3147_v14 = vld [vmem:[%s4736_s0 + $0x20] sm:$0xff]   ;;  %v3149_v15 = vld [vmem:[%s4736_s0 + $0x1b0] sm:$0xff]  }
   0x5   :  { %2934 = vmatprep.subr.bf16.mxu0 %v1017_v6  ;;  %3133 = vmatprep.subr.bf16.mxu1 %v1017_v6  ;;  %v3148_v16 = vld [vmem:[%s4736_s0 + $0x28] sm:$0xff]   ;;  %v3150_v17 = vld [vmem:[%s4736_s0 + $0x1b8] sm:$0xff]   ;;  %v3151_v18 = vld [vmem:[%s4736_s0 + $0x30] sm:$0xff]  }
   0x6   :  { %v3153_v19 = vld [vmem:[%s4736_s0 + $0x1c0] sm:$0xff]   ;;  %v3152_v20 = vld [vmem:[%s4736_s0 + $0x38] sm:$0xff]   ;;  %v3154_v21 = vld [vmem:[%s4736_s0 + $0x1c8] sm:$0xff]  }
   0x7   :  { %2935 = vmatpush3.bf16.msra.mxu0 %v1017_v6  ;;  %3135 = vmatpush3.bf16.msra.mxu1 %v1017_v6  ;;  %v3155_v22 = vld [vmem:[%s4736_s0 + $0x40] sm:$0xff]   ;;  %v3157_v23 = vld [vmem:[%s4736_s0 + $0x1d0] sm:$0xff]   ;;  %v3156_v24 = vld [vmem:[%s4736_s0 + $0x48] sm:$0xff]  }
   0x8   :  { %v3158_v25 = vld [vmem:[%s4736_s0 + $0x1d8] sm:$0xff]   ;;  %v3159_v26 = vld [vmem:[%s4736_s0 + $0x50] sm:$0xff]   ;;  %v3161_v27 = vld [vmem:[%s4736_s0 + $0x1e0] sm:$0xff]  }
   0x9   :  { %v3160_v28 = vld [vmem:[%s4736_s0 + $0x58] sm:$0xff]   ;;  %v3162_v29 = vld [vmem:[%s4736_s0 + $0x1e8] sm:$0xff]   ;;  %v3163_v30 = vld [vmem:[%s4736_s0 + $0x60] sm:$0xff]  }
   0xa   :  { %2937 = vmatmul.mubr.msk.bf16.vlgmr.msra.gmra.mrb[0].mxu0 %vm717_vm2, %v3140_v8  ;;  %3037 = vmatmul.mubr.msk.bf16.vlgmr.msra.gmra.mrb[0].mxu1 %vm717_vm2, %v3142_v9  ;;  %v3165_v31 = vld [vmem:[%s4736_s0 + $0x1f0] sm:$0xff]   ;;  %v3164_v32 = vld [vmem:[%s4736_s0 + $0x68] sm:$0xff]   ;;  %v3166_v33 = vld [vmem:[%s4736_s0 + $0x1f8] sm:$0xff]  }
   0xb   :  { %2940 = vmatprep.mubr.msk.bf16.mxu0 %vm717_vm2, %v3143_v10  ;;  %3040 = vmatprep.mubr.msk.bf16.mxu1 %vm717_vm2, %v3145_v11  ;;  %v3167_v34 = vld [vmem:[%s4736_s0 + $0x70] sm:$0xff]   ;;  %v3169_v35 = vld [vmem:[%s4736_s0 + $0x200] sm:$0xff]   ;;  %v3168_v36 = vld [vmem:[%s4736_s0 + $0x78] sm:$0xff]  }
   0xc   :  { %v3170_v37 = vld [vmem:[%s4736_s0 + $0x208] sm:$0xff]   ;;  %v3171_v38 = vld [vmem:[%s4736_s0 + $0x80] sm:$0xff]   ;;  %v3173_v39 = vld [vmem:[%s4736_s0 + $0x210] sm:$0xff]  }
   0xd   :  { %v3172_v40 = vld [vmem:[%s4736_s0 + $0x88] sm:$0xff]   ;;  %v3174_v41 = vld [vmem:[%s4736_s0 + $0x218] sm:$0xff]   ;;  %v3175_v42 = vld [vmem:[%s4736_s0 + $0x90] sm:$0xff]  }
   0xe   :  { %v3177_v43 = vld [vmem:[%s4736_s0 + $0x220] sm:$0xff]   ;;  %v3176_v44 = vld [vmem:[%s4736_s0 + $0x98] sm:$0xff]   ;;  %v3178_v45 = vld [vmem:[%s4736_s0 + $0x228] sm:$0xff]  }
   0xf   :  { %v3179_v46 = vld [vmem:[%s4736_s0 + $0xa0] sm:$0xff]   ;;  %v3181_v47 = vld [vmem:[%s4736_s0 + $0x230] sm:$0xff]   ;;  %v3180_v48 = vld [vmem:[%s4736_s0 + $0xa8] sm:$0xff]  }
  0x10   :  { %v3182_v49 = vld [vmem:[%s4736_s0 + $0x238] sm:$0xff]   ;;  %v3183_v50 = vld [vmem:[%s4736_s0 + $0xb0] sm:$0xff]   ;;  %v3185_v51 = vld [vmem:[%s4736_s0 + $0x240] sm:$0xff]  }
  0x11   :  { %v3184_v52 = vld [vmem:[%s4736_s0 + $0xb8] sm:$0xff]   ;;  %v3186_v53 = vld [vmem:[%s4736_s0 + $0x248] sm:$0xff]   ;;  %v3187_v54 = vld [vmem:[%s4736_s0 + $0xc0] sm:$0xff]  }
  0x12   :  { %2941 = vmatmul.mubr.msk.bf16.gmra.mrb[4].mxu0 %vm717_vm2, %v3144_v12  ;;  %3041 = vmatmul.mubr.msk.bf16.gmra.mrb[4].mxu1 %vm717_vm2, %v3146_v13  ;;  %v3189_v55 = vld [vmem:[%s4736_s0 + $0x250] sm:$0xff]   ;;  %v3188_v56 = vld [vmem:[%s4736_s0 + $0xc8] sm:$0xff]   ;;  %v3190_v57 = vld [vmem:[%s4736_s0 + $0x258] sm:$0xff]  }
  0x13   :  { %2944 = vmatprep.mubr.msk.bf16.mxu0 %vm717_vm2, %v3147_v14  ;;  %3044 = vmatprep.mubr.msk.bf16.mxu1 %vm717_vm2, %v3149_v15  ;;  %v3191_v58 = vld [vmem:[%s4736_s0 + $0xd0] sm:$0xff]   ;;  %v3193_v59 = vld [vmem:[%s4736_s0 + $0x260] sm:$0xff]   ;;  %v3192_v60 = vld [vmem:[%s4736_s0 + $0xd8] sm:$0xff]  }
  0x14   :  { %v3194_v61 = vld [vmem:[%s4736_s0 + $0x268] sm:$0xff]   ;;  %v3195_v62 = vld [vmem:[%s4736_s0 + $0xe0] sm:$0xff]   ;;  %v3197_v63 = vld [vmem:[%s4736_s0 + $0x270] sm:$0xff]  }
  0x15   :  { %v3196_v0 = vld [vmem:[%s4736_s0 + $0xe8] sm:$0xff]   ;;  %v3198_v1 = vld [vmem:[%s4736_s0 + $0x278] sm:$0xff]   ;;  %v3199_v2 = vld [vmem:[%s4736_s0 + $0xf0] sm:$0xff]  }
  0x16   :  { %v3201_v3 = vld [vmem:[%s4736_s0 + $0x280] sm:$0xff]   ;;  %v3200_v4 = vld [vmem:[%s4736_s0 + $0xf8] sm:$0xff]   ;;  %v3202_v5 = vld [vmem:[%s4736_s0 + $0x288] sm:$0xff]  }
  0x17   :  { %v3203_v6 = vld [vmem:[%s4736_s0 + $0x100] sm:$0xff]   ;;  %v3205_v7 = vld [vmem:[%s4736_s0 + $0x290] sm:$0xff]   ;;  %v3204_v8 = vld [vmem:[%s4736_s0 + $0x108] sm:$0xff]  }
  0x18   :  { %v3206_v9 = vld [vmem:[%s4736_s0 + $0x298] sm:$0xff]   ;;  %v3207_v10 = vld [vmem:[%s4736_s0 + $0x110] sm:$0xff]   ;;  %v3209_v11 = vld [vmem:[%s4736_s0 + $0x2a0] sm:$0xff]  }
  0x19   :  { %v3208_v12 = vld [vmem:[%s4736_s0 + $0x118] sm:$0xff]   ;;  %v3210_v13 = vld [vmem:[%s4736_s0 + $0x2a8] sm:$0xff]   ;;  %v3211_v14 = vld [vmem:[%s4736_s0 + $0x120] sm:$0xff]  }
  0x1a   :  { %2945 = vmatmul.mubr.msk.bf16.gmra.mrb[8].mxu0 %vm717_vm2, %v3148_v16  ;;  %3045 = vmatmul.mubr.msk.bf16.gmra.mrb[8].mxu1 %vm717_vm2, %v3150_v17  ;;  %v3213_v15 = vld [vmem:[%s4736_s0 + $0x2b0] sm:$0xff]   ;;  %v3212_v16 = vld [vmem:[%s4736_s0 + $0x128] sm:$0xff]   ;;  %v3214_v17 = vld [vmem:[%s4736_s0 + $0x2b8] sm:$0xff]  }
  0x1b   :  { %2948 = vmatprep.mubr.msk.bf16.mxu0 %vm717_vm2, %v3151_v18  ;;  %3048 = vmatprep.mubr.msk.bf16.mxu1 %vm717_vm2, %v3153_v19  ;;  %v3215_v18 = vld [vmem:[%s4736_s0 + $0x130] sm:$0xff]   ;;  %v3217_v19 = vld [vmem:[%s4736_s0 + $0x2c0] sm:$0xff]  }
  0x22   :  { %2949 = vmatmul.mubr.msk.bf16.gmra.mrb[12].mxu0 %vm717_vm2, %v3152_v20  ;;  %3049 = vmatmul.mubr.msk.bf16.gmra.mrb[12].mxu1 %vm717_vm2, %v3154_v21  ;;  %v3216_v20 = vld [vmem:[%s4736_s0 + $0x138] sm:$0xff]   ;;  %v3218_v21 = vld [vmem:[%s4736_s0 + $0x2c8] sm:$0xff]  }
  0x23   :  { %2952 = vmatprep.mubr.msk.bf16.mxu0 %vm717_vm2, %v3155_v22  ;;  %3052 = vmatprep.mubr.msk.bf16.mxu1 %vm717_vm2, %v3157_v23  ;;  %v3219_v22 = vld [vmem:[%s4736_s0 + $0x140] sm:$0xff]   ;;  %v3221_v23 = vld [vmem:[%s4736_s0 + $0x2d0] sm:$0xff]  }
  0x2a   :  { %2953 = vmatmul.mubr.msk.bf16.gmra.mrb[16].mxu0 %vm717_vm2, %v3156_v24  ;;  %3053 = vmatmul.mubr.msk.bf16.gmra.mrb[16].mxu1 %vm717_vm2, %v3158_v25  ;;  %v3220_v24 = vld [vmem:[%s4736_s0 + $0x148] sm:$0xff]   ;;  %v3222_v25 = vld [vmem:[%s4736_s0 + $0x2d8] sm:$0xff]  }
  0x2b   :  { %2956 = vmatprep.mubr.msk.bf16.mxu0 %vm717_vm2, %v3159_v26  ;;  %3056 = vmatprep.mubr.msk.bf16.mxu1 %vm717_vm2, %v3161_v27  ;;  %v3223_v26 = vld [vmem:[%s4736_s0 + $0x150] sm:$0xff]   ;;  %v3225_v27 = vld [vmem:[%s4736_s0 + $0x2e0] sm:$0xff]  }
  0x32   :  { %2957 = vmatmul.mubr.msk.bf16.gmra.mrb[20].mxu0 %vm717_vm2, %v3160_v28  ;;  %3057 = vmatmul.mubr.msk.bf16.gmra.mrb[20].mxu1 %vm717_vm2, %v3162_v29  ;;  %v3224_v28 = vld [vmem:[%s4736_s0 + $0x158] sm:$0xff]   ;;  %v3226_v29 = vld [vmem:[%s4736_s0 + $0x2e8] sm:$0xff]  }
  0x33   :  { %2960 = vmatprep.mubr.msk.bf16.mxu0 %vm717_vm2, %v3163_v30  ;;  %3060 = vmatprep.mubr.msk.bf16.mxu1 %vm717_vm2, %v3165_v31  ;;  %v3227_v30 = vld [vmem:[%s4736_s0 + $0x160] sm:$0xff]   ;;  %v3229_v31 = vld [vmem:[%s4736_s0 + $0x2f0] sm:$0xff]  }
  0x3a   :  { %2961 = vmatmul.mubr.msk.bf16.gmra.mrb[24].mxu0 %vm717_vm2, %v3164_v32  ;;  %3061 = vmatmul.mubr.msk.bf16.gmra.mrb[24].mxu1 %vm717_vm2, %v3166_v33  ;;  %v3228_v32 = vld [vmem:[%s4736_s0 + $0x168] sm:$0xff]   ;;  %v3230_v33 = vld [vmem:[%s4736_s0 + $0x2f8] sm:$0xff]  }
  0x3b   :  { %2964 = vmatprep.mubr.msk.bf16.mxu0 %vm717_vm2, %v3167_v34  ;;  %3064 = vmatprep.mubr.msk.bf16.mxu1 %vm717_vm2, %v3169_v35  ;;  %v3231_v34 = vld [vmem:[%s4736_s0 + $0x170] sm:$0xff]   ;;  %v3233_v35 = vld [vmem:[%s4736_s0 + $0x300] sm:$0xff]  }
  0x42   :  { %2965 = vmatmul.mubr.msk.bf16.gmra.mrb[28].mxu0 %vm717_vm2, %v3168_v36  ;;  %3065 = vmatmul.mubr.msk.bf16.gmra.mrb[28].mxu1 %vm717_vm2, %v3170_v37  ;;  %v3232_v36 = vld [vmem:[%s4736_s0 + $0x178] sm:$0xff]   ;;  %v3234_v37 = vld [vmem:[%s4736_s0 + $0x308] sm:$0xff]  }
  0x43   :  { %2968 = vmatprep.mubr.msk.bf16.mxu0 %vm717_vm2, %v3171_v38  ;;  %3068 = vmatprep.mubr.msk.bf16.mxu1 %vm717_vm2, %v3173_v39  ;;  %v3235_v38 = vld [vmem:[%s4736_s0 + $0x180] sm:$0xff]   ;;  %v3236_v39 = vld [vmem:[%s4736_s0 + $0x188] sm:$0xff]  }
  0x4a   :  { %2969 = vmatmul.mubr.msk.bf16.gmra.mrb[32].mxu0 %vm717_vm2, %v3172_v40  ;;  %3069 = vmatmul.mubr.msk.bf16.gmra.mrb[32].mxu1 %vm717_vm2, %v3174_v41 }
  0x4b   :  { %2972 = vmatprep.mubr.msk.bf16.mxu0 %vm717_vm2, %v3175_v42  ;;  %3072 = vmatprep.mubr.msk.bf16.mxu1 %vm717_vm2, %v3177_v43 }
  0x52   :  { %2973 = vmatmul.mubr.msk.bf16.gmra.mrb[36].mxu0 %vm717_vm2, %v3176_v44  ;;  %3073 = vmatmul.mubr.msk.bf16.gmra.mrb[36].mxu1 %vm717_vm2, %v3178_v45 }
  0x53   :  { %2976 = vmatprep.mubr.msk.bf16.mxu0 %vm717_vm2, %v3179_v46  ;;  %3076 = vmatprep.mubr.msk.bf16.mxu1 %vm717_vm2, %v3181_v47 }
  0x5a   :  { %2977 = vmatmul.mubr.msk.bf16.gmra.mrb[40].mxu0 %vm717_vm2, %v3180_v48  ;;  %3077 = vmatmul.mubr.msk.bf16.gmra.mrb[40].mxu1 %vm717_vm2, %v3182_v49 }
  0x5b   :  { %2980 = vmatprep.mubr.msk.bf16.mxu0 %vm717_vm2, %v3183_v50  ;;  %3080 = vmatprep.mubr.msk.bf16.mxu1 %vm717_vm2, %v3185_v51 }
  0x62   :  { %2981 = vmatmul.mubr.msk.bf16.gmra.mrb[44].mxu0 %vm717_vm2, %v3184_v52  ;;  %3081 = vmatmul.mubr.msk.bf16.gmra.mrb[44].mxu1 %vm717_vm2, %v3186_v53 }
  0x63   :  { %2984 = vmatprep.mubr.msk.bf16.mxu0 %vm717_vm2, %v3187_v54  ;;  %3084 = vmatprep.mubr.msk.bf16.mxu1 %vm717_vm2, %v3189_v55 }
  0x6a   :  { %2985 = vmatmul.mubr.msk.bf16.gmra.mrb[48].mxu0 %vm717_vm2, %v3188_v56  ;;  %3085 = vmatmul.mubr.msk.bf16.gmra.mrb[48].mxu1 %vm717_vm2, %v3190_v57 }
  0x6b   :  { %2988 = vmatprep.mubr.msk.bf16.mxu0 %vm717_vm2, %v3191_v58  ;;  %3088 = vmatprep.mubr.msk.bf16.mxu1 %vm717_vm2, %v3193_v59 }
  0x72   :  { %2989 = vmatmul.mubr.msk.bf16.gmra.mrb[52].mxu0 %vm717_vm2, %v3192_v60  ;;  %3089 = vmatmul.mubr.msk.bf16.gmra.mrb[52].mxu1 %vm717_vm2, %v3194_v61 }
  0x73   :  { %2992 = vmatprep.mubr.msk.bf16.mxu0 %vm717_vm2, %v3195_v62  ;;  %3092 = vmatprep.mubr.msk.bf16.mxu1 %vm717_vm2, %v3197_v63 }
  0x7a   :  { %2993 = vmatmul.mubr.msk.bf16.gmra.mrb[56].mxu0 %vm717_vm2, %v3196_v0  ;;  %3093 = vmatmul.mubr.msk.bf16.gmra.mrb[56].mxu1 %vm717_vm2, %v3198_v1 }
  0x7b   :  { %2996 = vmatprep.mubr.msk.bf16.mxu0 %vm717_vm2, %v3199_v2  ;;  %3096 = vmatprep.mubr.msk.bf16.mxu1 %vm717_vm2, %v3201_v3 }
  0x82   :  { %2997 = vmatmul.mubr.msk.bf16.gmra.mrb[60].mxu0 %vm717_vm2, %v3200_v4  ;;  %3097 = vmatmul.mubr.msk.bf16.gmra.mrb[60].mxu1 %vm717_vm2, %v3202_v5 }
  0x83   :  { %3000 = vmatprep.mubr.msk.bf16.mxu0 %vm717_vm2, %v3203_v6  ;;  %3100 = vmatprep.mubr.msk.bf16.mxu1 %vm717_vm2, %v3205_v7 }
  0x8a   :  { %3001 = vmatmul.mubr.msk.bf16.gmra.mrb[64].mxu0 %vm717_vm2, %v3204_v8  ;;  %3101 = vmatmul.mubr.msk.bf16.gmra.mrb[64].mxu1 %vm717_vm2, %v3206_v9 }
  0x8b   :  { %3004 = vmatprep.mubr.msk.bf16.mxu0 %vm717_vm2, %v3207_v10  ;;  %3104 = vmatprep.mubr.msk.bf16.mxu1 %vm717_vm2, %v3209_v11 }
  0x92   :  { %3005 = vmatmul.mubr.msk.bf16.gmra.mrb[68].mxu0 %vm717_vm2, %v3208_v12  ;;  %3105 = vmatmul.mubr.msk.bf16.gmra.mrb[68].mxu1 %vm717_vm2, %v3210_v13 }
  0x93   :  { %3008 = vmatprep.mubr.msk.bf16.mxu0 %vm717_vm2, %v3211_v14  ;;  %3108 = vmatprep.mubr.msk.bf16.mxu1 %vm717_vm2, %v3213_v15 }
  0x9a   :  { %3009 = vmatmul.mubr.msk.bf16.gmra.mrb[72].mxu0 %vm717_vm2, %v3212_v16  ;;  %3109 = vmatmul.mubr.msk.bf16.gmra.mrb[72].mxu1 %vm717_vm2, %v3214_v17 }
  0x9b   :  { %3012 = vmatprep.mubr.msk.bf16.mxu0 %vm717_vm2, %v3215_v18  ;;  %3112 = vmatprep.mubr.msk.bf16.mxu1 %vm717_vm2, %v3217_v19 }
  0xa2   :  { %3013 = vmatmul.mubr.msk.bf16.gmra.mrb[76].mxu0 %vm717_vm2, %v3216_v20  ;;  %3113 = vmatmul.mubr.msk.bf16.gmra.mrb[76].mxu1 %vm717_vm2, %v3218_v21 }
  0xa3   :  { %3016 = vmatprep.mubr.msk.bf16.mxu0 %vm717_vm2, %v3219_v22  ;;  %3116 = vmatprep.mubr.msk.bf16.mxu1 %vm717_vm2, %v3221_v23 }
  0xaa   :  { %3017 = vmatmul.mubr.msk.bf16.gmra.mrb[80].mxu0 %vm717_vm2, %v3220_v24  ;;  %3117 = vmatmul.mubr.msk.bf16.gmra.mrb[80].mxu1 %vm717_vm2, %v3222_v25 }
  0xab   :  { %3020 = vmatprep.mubr.msk.bf16.mxu0 %vm717_vm2, %v3223_v26  ;;  %3120 = vmatprep.mubr.msk.bf16.mxu1 %vm717_vm2, %v3225_v27 }
  0xb2   :  { %3021 = vmatmul.mubr.msk.bf16.gmra.mrb[84].mxu0 %vm717_vm2, %v3224_v28  ;;  %3121 = vmatmul.mubr.msk.bf16.gmra.mrb[84].mxu1 %vm717_vm2, %v3226_v29 }
  0xb3   :  { %3024 = vmatprep.mubr.msk.bf16.mxu0 %vm717_vm2, %v3227_v30  ;;  %3124 = vmatprep.mubr.msk.bf16.mxu1 %vm717_vm2, %v3229_v31 }
  0xba   :  { %3025 = vmatmul.mubr.msk.bf16.gmra.mrb[88].mxu0 %vm717_vm2, %v3228_v32  ;;  %3125 = vmatmul.mubr.msk.bf16.gmra.mrb[88].mxu1 %vm717_vm2, %v3230_v33 }
  0xbb   :  { %3028 = vmatprep.mubr.msk.bf16.mxu0 %vm717_vm2, %v3231_v34  ;;  %3128 = vmatprep.mubr.msk.bf16.mxu1 %vm717_vm2, %v3233_v35 }
  0xc2   :  { %3029 = vmatmul.mubr.msk.bf16.gmra.mrb[92].mxu0 %vm717_vm2, %v3232_v36  ;;  %3129 = vmatmul.mubr.msk.bf16.gmra.mrb[92].mxu1 %vm717_vm2, %v3234_v37 }
  0xc3   :  { %3032 = vmatprep.mubr.msk.bf16.mxu0 %vm717_vm2, %v3235_v38 }
  0xca   :  { %3033 = vmatmul.mubr.msk.bf16.gmra.mrb[96].mxu0 %vm717_vm2, %v3236_v39 }
  0xdd   :  { %v3657_v40 = vpop.f32.mrb[0].mxu0  ;;  %v3659_v41 = vpop.f32.mrb[0].mxu1 }
  0xde   :  { %v3661_v42 = vpop.f32.mrb[1].mxu0  ;;  %v3663_v43 = vpop.f32.mrb[1].mxu1 }
  0xdf   :  { %v3665_v44 = vpop.f32.mrb[2].mxu0  ;;  %v3667_v45 = vpop.f32.mrb[2].mxu1 }
  0xe0   :  { %v3669_v46 = vpop.f32.mrb[3].mxu0  ;;  %v3671_v47 = vpop.f32.mrb[3].mxu1 }
  0xe5   :  { %v3673_v48 = vpop.f32.mrb[4].mxu0  ;;  %v3675_v49 = vpop.f32.mrb[4].mxu1 }
  0xe6   :  { %v3677_v50 = vpop.f32.mrb[5].mxu0  ;;  %v3679_v51 = vpop.f32.mrb[5].mxu1 }
  0xe7   :  { %v3681_v52 = vpop.f32.mrb[6].mxu0  ;;  %v3683_v53 = vpop.f32.mrb[6].mxu1 }
  0xe8   :  { %v3685_v54 = vpop.f32.mrb[7].mxu0  ;;  %v3687_v55 = vpop.f32.mrb[7].mxu1 }
  0xed   :  { %v3689_v56 = vpop.f32.mrb[8].mxu0  ;;  %v3691_v57 = vpop.f32.mrb[8].mxu1 }
  0xee   :  { %v3693_v58 = vpop.f32.mrb[9].mxu0  ;;  %v3695_v59 = vpop.f32.mrb[9].mxu1 }
  0xef   :  { %v3697_v60 = vpop.f32.mrb[10].mxu0  ;;  %v3699_v61 = vpop.f32.mrb[10].mxu1 }
  0xf0   :  { %v3701_v62 = vpop.f32.mrb[11].mxu0  ;;  %v3703_v63 = vpop.f32.mrb[11].mxu1 }
  0xf5   :  { %v3705_v0 = vpop.f32.mrb[12].mxu0  ;;  %v3707_v1 = vpop.f32.mrb[12].mxu1 }
  0xf6   :  { %v3709_v2 = vpop.f32.mrb[13].mxu0  ;;  %v3711_v3 = vpop.f32.mrb[13].mxu1 }
  0xf7   :  { %v3713_v4 = vpop.f32.mrb[14].mxu0  ;;  %v3715_v5 = vpop.f32.mrb[14].mxu1 }
  0xf8   :  { %v3717_v6 = vpop.f32.mrb[15].mxu0  ;;  %v3719_v7 = vpop.f32.mrb[15].mxu1 }
  0xfd   :  { %v3721_v8 = vpop.f32.mrb[16].mxu0  ;;  %v3723_v9 = vpop.f32.mrb[16].mxu1 }
  0xfe   :  { %v3725_v10 = vpop.f32.mrb[17].mxu0  ;;  %v3727_v11 = vpop.f32.mrb[17].mxu1 }
  0xff   :  { %v3729_v12 = vpop.f32.mrb[18].mxu0  ;;  %v3731_v13 = vpop.f32.mrb[18].mxu1 }
 0x100   :  { %v3733_v14 = vpop.f32.mrb[19].mxu0  ;;  %v3735_v15 = vpop.f32.mrb[19].mxu1 }
 0x105   :  { %v3737_v16 = vpop.f32.mrb[20].mxu0  ;;  %v3739_v17 = vpop.f32.mrb[20].mxu1 }
 0x106   :  { %v3741_v18 = vpop.f32.mrb[21].mxu0  ;;  %v3743_v19 = vpop.f32.mrb[21].mxu1 }
 0x107   :  { %v3745_v20 = vpop.f32.mrb[22].mxu0  ;;  %v3747_v21 = vpop.f32.mrb[22].mxu1 }
 0x108   :  { %v3749_v22 = vpop.f32.mrb[23].mxu0  ;;  %v3751_v23 = vpop.f32.mrb[23].mxu1 }
 0x10d   :  { %v3753_v24 = vpop.f32.mrb[24].mxu0  ;;  %v3755_v25 = vpop.f32.mrb[24].mxu1 }
 0x10e   :  { %v3757_v26 = vpop.f32.mrb[25].mxu0  ;;  %v3759_v27 = vpop.f32.mrb[25].mxu1 }
 0x10f   :  { %4743 = vst [vmem:[#allocation2_spill] sm:$0xff] %v3759_v27  ;;  %v3761_v28 = vpop.f32.mrb[26].mxu0  ;;  %v3763_v29 = vpop.f32.mrb[26].mxu1 }
 0x110   :  { %4744 = vst [vmem:[#allocation3_spill] sm:$0xff] %v3763_v29  ;;  %v3765_v30 = vpop.f32.mrb[27].mxu0  ;;  %v3767_v31 = vpop.f32.mrb[27].mxu1 }
 0x111   :  { %4745 = vst [vmem:[#allocation4_spill] sm:$0xff] %v3767_v31 }
 0x115   :  { %v3769_v32 = vpop.f32.mrb[28].mxu0  ;;  %v3771_v33 = vpop.f32.mrb[28].mxu1 }
 0x116   :  { %4746 = vst [vmem:[#allocation5_spill] sm:$0xff] %v3769_v32  ;;  %4747 = vst [vmem:[#allocation6_spill] sm:$0xff] %v3771_v33  ;;  %v3773_v34 = vpop.f32.mrb[29].mxu0  ;;  %v3775_v35 = vpop.f32.mrb[29].mxu1 }
 0x117   :  { %4748 = vst [vmem:[#allocation7_spill] sm:$0xff] %v3773_v34  ;;  %4749 = vst [vmem:[#allocation8_spill] sm:$0xff] %v3775_v35  ;;  %v3777_v36 = vpop.f32.mrb[30].mxu0  ;;  %v3779_v37 = vpop.f32.mrb[30].mxu1 }
 0x118   :  { %4750 = vst [vmem:[#allocation9_spill] sm:$0xff] %v3777_v36  ;;  %4751 = vst [vmem:[#allocation10_spill] sm:$0xff] %v3779_v37  ;;  %v3781_v38 = vpop.f32.mrb[31].mxu0  ;;  %v3783_v39 = vpop.f32.mrb[31].mxu1 }
 0x119   :  { %4752 = vst [vmem:[#allocation11_spill] sm:$0xff] %v3781_v38  ;;  %4753 = vst [vmem:[#allocation12_spill] sm:$0xff] %v3783_v39 }
 0x11d   :  { %v3785_v29 = vpop.f32.mrb[32].mxu0  ;;  %v3787_v27 = vpop.f32.mrb[32].mxu1 }
 0x11e   :  { %4754 = vst [vmem:[#allocation13_spill] sm:$0xff] %v3785_v29  ;;  %4755 = vst [vmem:[#allocation14_spill] sm:$0xff] %v3787_v27  ;;  %v3789_v31 = vpop.f32.mrb[33].mxu0  ;;  %v3791_v32 = vpop.f32.mrb[33].mxu1 }
 0x11f   :  { %4756 = vst [vmem:[#allocation15_spill] sm:$0xff] %v3789_v31  ;;  %4757 = vst [vmem:[#allocation16_spill] sm:$0xff] %v3791_v32  ;;  %v3793_v33 = vpop.f32.mrb[34].mxu0  ;;  %v3795_v34 = vpop.f32.mrb[34].mxu1 }
 0x120   :  { %4758 = vst [vmem:[#allocation17_spill] sm:$0xff] %v3793_v33  ;;  %4759 = vst [vmem:[#allocation18_spill] sm:$0xff] %v3795_v34  ;;  %v3797_v35 = vpop.f32.mrb[35].mxu0  ;;  %v3799_v36 = vpop.f32.mrb[35].mxu1 }
 0x121   :  { %4760 = vst [vmem:[#allocation19_spill] sm:$0xff] %v3799_v36 }
 0x125   :  { %v3801_v37 = vpop.f32.mrb[36].mxu0  ;;  %v3803_v38 = vpop.f32.mrb[36].mxu1 }
 0x126   :  { %4761 = vst [vmem:[#allocation20_spill] sm:$0xff] %v3803_v38  ;;  %v3805_v39 = vpop.f32.mrb[37].mxu0  ;;  %v3807_v29 = vpop.f32.mrb[37].mxu1  ;;  %v3823_v38 = vsel %vm1836_vm3, %v3657_v40, -inf  ;;  %v3843_v40 = vsel %vm1836_vm3, %v3669_v46, -inf  ;;  %v3863_v46 = vsel %vm1836_vm3, %v3677_v50, -inf }
 0x127   :  { %4762 = vst [vmem:[#allocation21_spill] sm:$0xff] %v3807_v29  ;;  %v3809_v27 = vpop.f32.mrb[38].mxu0  ;;  %v3811_v31 = vpop.f32.mrb[38].mxu1  ;;  %v3827_v29 = vsel %vm1836_vm3, %v3661_v42, -inf  ;;  %4771 = vst [vmem:[#allocation30_spill] sm:$0xff] %v3843_v40  ;;  %v3847_v42 = vsel %vm1836_vm3, %v3663_v43, -inf }
 0x128   :  { %4763 = vst [vmem:[#allocation22_spill] sm:$0xff] %v3811_v31  ;;  %v3813_v32 = vpop.f32.mrb[39].mxu0  ;;  %v3815_v33 = vpop.f32.mrb[39].mxu1  ;;  %4768 = vst [vmem:[#allocation27_spill] sm:$0xff] %v3827_v29  ;;  %v3831_v31 = vsel %vm1836_vm3, %v3659_v41, -inf  ;;  %v3851_v41 = vsel %vm1836_vm3, %v3667_v45, -inf }
 0x129   :  { %4764 = vst [vmem:[#allocation23_spill] sm:$0xff] %v3813_v32  ;;  %4765 = vst [vmem:[#allocation24_spill] sm:$0xff] %v3815_v33  ;;  %v3867_v43 = vsel %vm1836_vm3, %v3671_v47, -inf  ;;  %v3871_v45 = vsel %vm1836_vm3, %v3675_v49, -inf  ;;  %v3883_v50 = vsel %vm1836_vm3, %v3685_v54, -inf  ;;  %v3887_v47 = vsel %vm1836_vm3, %v3679_v51, -inf }
 0x12a   :  { %4769 = vst [vmem:[#allocation28_spill] sm:$0xff] %v3831_v31  ;;  %4772 = vst [vmem:[#allocation31_spill] sm:$0xff] %v3851_v41  ;;  %v3891_v49 = vsel %vm1836_vm3, %v3683_v53, -inf  ;;  %v3903_v54 = vsel %vm1836_vm3, %v3687_v55, -inf  ;;  %v3907_v51 = vsel %vm1836_vm3, %v3691_v57, -inf  ;;  %v3911_v53 = vsel %vm1836_vm3, %v3697_v60, -inf }
 0x12b   :  { %4773 = vst [vmem:[#allocation32_spill] sm:$0xff] %v3871_v45  ;;  %v3895_v45 = vsel %vm1836_vm3, %v3689_v56, -inf  ;;  %4774 = vst [vmem:[#allocation33_spill] sm:$0xff] %v3907_v51  ;;  %v3915_v56 = vsel %vm1836_vm3, %v3701_v62, -inf  ;;  %v3923_v55 = vsel %vm1836_vm3, %v3699_v61, -inf  ;;  %v3927_v57 = vsel %vm1836_vm3, %v3705_v0, -inf }
 0x12c   :  { %v3931_v60 = vsel %vm1836_vm3, %v3709_v2, -inf  ;;  %v3935_v62 = vsel %vm1836_vm3, %v3703_v63, -inf  ;;  %v3943_v61 = vsel %vm1836_vm3, %v3713_v4, -inf  ;;  %v3947_v0 = vsel %vm1836_vm3, %v3717_v6, -inf }
 0x12d   :  { %v3817_v34 = vpop.f32.mrb[40].mxu0  ;;  %v3819_v36 = vpop.f32.mrb[40].mxu1  ;;  %v3951_v2 = vsel %vm1836_vm3, %v3711_v3, -inf  ;;  %v3955_v63 = vsel %vm1836_vm3, %v3715_v5, -inf  ;;  %v3963_v4 = vsel %vm1836_vm3, %v3721_v8, -inf  ;;  %v3967_v6 = vsel %vm1836_vm3, %v3725_v10, -inf }
 0x12e   :  { %4766 = vst [vmem:[#allocation25_spill] sm:$0xff] %v3817_v34  ;;  %4767 = vst [vmem:[#allocation26_spill] sm:$0xff] %v3819_v36  ;;  %v3833_v32 = vpop.f32.mrb[41].mxu0  ;;  %v3835_v33 = vpop.f32.mrb[41].mxu1  ;;  %v3839_v34 = vsel %vm1836_vm3, %v3665_v44, -inf  ;;  %v3859_v44 = vsel %vm1836_vm3, %v3673_v48, -inf }
 0x12f   :  { %4770 = vst [vmem:[#allocation29_spill] sm:$0xff] %v3839_v34  ;;  %v3853_v31 = vpop.f32.mrb[42].mxu0  ;;  %v3855_v36 = vpop.f32.mrb[42].mxu1  ;;  %v3879_v48 = vsel %vm1836_vm3, %v3681_v52, -inf  ;;  %v3899_v52 = vsel %vm1836_vm3, %v3693_v58, -inf  ;;  %v3919_v58 = vsel %vm1836_vm3, %v3695_v59, -inf }
 0x130   :  { %v3873_v41 = vpop.f32.mrb[43].mxu0  ;;  %v3875_v34 = vpop.f32.mrb[43].mxu1  ;;  %v3939_v59 = vsel %vm1836_vm3, %v3707_v1, -inf  ;;  %4776 = vst [vmem:[#allocation35_spill] sm:$0xff] %v3955_v63  ;;  %v3971_v3 = vsel %vm1836_vm3, %v3719_v7, -inf  ;;  %v3975_v5 = vsel %vm1836_vm3, %v3723_v9, -inf }
 0x131   :  { %4775 = vst [vmem:[#allocation34_spill] sm:$0xff] %v3939_v59  ;;  %4778 = vst [vmem:[#allocation37_spill] sm:$0xff] %v3975_v5  ;;  %v3983_v8 = vsel %vm1836_vm3, %v3729_v12, -inf  ;;  %v3987_v10 = vsel %vm1836_vm3, %v3733_v14, -inf  ;;  %v3991_v7 = vsel %vm1836_vm3, %v3727_v11, -inf  ;;  %v3995_v9 = vsel %vm1836_vm3, %v3731_v13, -inf }
 0x132   :  { %4779 = vst [vmem:[#allocation38_spill] sm:$0xff] %v3983_v8  ;;  %4780 = vst [vmem:[#allocation39_spill] sm:$0xff] %v3995_v9  ;;  %v4003_v12 = vsel %vm1836_vm3, %v3737_v16, -inf  ;;  %v4007_v14 = vsel %vm1836_vm3, %v3741_v18, -inf  ;;  %v4011_v11 = vsel %vm1836_vm3, %v3735_v15, -inf  ;;  %v4015_v13 = vsel %vm1836_vm3, %v3739_v17, -inf }
 0x133   :  { %4781 = vst [vmem:[#allocation40_spill] sm:$0xff] %v4007_v14  ;;  %4782 = vst [vmem:[#allocation41_spill] sm:$0xff] %v4015_v13  ;;  %v4023_v16 = vsel %vm1836_vm3, %v3745_v20, -inf  ;;  %v4027_v18 = vsel %vm1836_vm3, %v3749_v22, -inf  ;;  %v4031_v15 = vsel %vm1836_vm3, %v3743_v19, -inf  ;;  %v4035_v17 = vsel %vm1836_vm3, %v3747_v21, -inf }
 0x134   :  { %4783 = vst [vmem:[#allocation42_spill] sm:$0xff] %v4023_v16  ;;  %4784 = vst [vmem:[#allocation43_spill] sm:$0xff] %v4031_v15  ;;  %v4039_v13 = vsel %vm1836_vm3, %v3753_v24, -inf  ;;  %v4043_v20 = vsel %vm1836_vm3, %v3757_v26, -inf  ;;  %v4047_v22 = vsel %vm1836_vm3, %v3751_v23, -inf  ;;  %v4051_v19 = vsel %vm1836_vm3, %v3755_v25, -inf }
 0x135   :  { %v3957_v51 = vpop.f32.mrb[44].mxu0  ;;  %v3959_v1 = vpop.f32.mrb[44].mxu1  ;;  %4785 = vst [vmem:[#allocation44_spill] sm:$0xff] %v4035_v17  ;;  %4786 = vst [vmem:[#allocation45_spill] sm:$0xff] %v4039_v13  ;;  %v4055_v21 = vsel %vm1836_vm3, %v3761_v28, -inf  ;;  %v4059_v24 = vsel %vm1836_vm3, %v3765_v30, -inf }
 0x136   :  { %4777 = vst [vmem:[#allocation36_spill] sm:$0xff] %v3959_v1  ;;  %v3977_v59 = vpop.f32.mrb[45].mxu0  ;;  %v3979_v63 = vpop.f32.mrb[45].mxu1  ;;  %4787 = vst [vmem:[#allocation46_spill] sm:$0xff] %v4043_v20  ;;  %v4792_v17 = vld [vmem:[#allocation2_spill] sm:$0xff]  ;;  %v4794_v20 = vld [vmem:[#allocation3_spill] sm:$0xff] }
 0x137   :  { %v3997_v1 = vpop.f32.mrb[46].mxu0  ;;  %v3999_v5 = vpop.f32.mrb[46].mxu1  ;;  %4788 = vst [vmem:[#allocation47_spill] sm:$0xff] %v4047_v22  ;;  %4789 = vst [vmem:[#allocation48_spill] sm:$0xff] %v4051_v19  ;;  %v4063_v26 = vsel %vm1836_vm3, %v4792_v17, -inf  ;;  %v4067_v23 = vsel %vm1836_vm3, %v4794_v20, -inf }
 0x138   :  { %v4017_v9 = vpop.f32.mrb[47].mxu0  ;;  %v4019_v8 = vpop.f32.mrb[47].mxu1  ;;  %4790 = vst [vmem:[#allocation49_spill] sm:$0xff] %v4055_v21  ;;  %4791 = vst [vmem:[#allocation50_spill] sm:$0xff] %v4059_v24  ;;  %v4796_v22 = vld [vmem:[#allocation5_spill] sm:$0xff]  ;;  %v4798_v19 = vld [vmem:[#allocation7_spill] sm:$0xff] }
 0x139   :  { %4793 = vst [vmem:[#allocation2_spill] sm:$0xff] %v4063_v26  ;;  %4795 = vst [vmem:[#allocation3_spill] sm:$0xff] %v4067_v23  ;;  %v4071_v25 = vsel %vm1836_vm3, %v4796_v22, -inf  ;;  %v4075_v28 = vsel %vm1836_vm3, %v4798_v19, -inf  ;;  %v4800_v21 = vld [vmem:[#allocation4_spill] sm:$0xff]  ;;  %v4802_v13 = vld [vmem:[#allocation6_spill] sm:$0xff] }
 0x13a   :  { %4797 = vst [vmem:[#allocation5_spill] sm:$0xff] %v4071_v25  ;;  %4799 = vst [vmem:[#allocation7_spill] sm:$0xff] %v4075_v28  ;;  %v4079_v30 = vsel %vm1836_vm3, %v4800_v21, -inf  ;;  %v4083_v17 = vsel %vm1836_vm3, %v4802_v13, -inf  ;;  %v4804_v26 = vld [vmem:[#allocation9_spill] sm:$0xff]  ;;  %v4806_v23 = vld [vmem:[#allocation11_spill] sm:$0xff] }
 0x13b   :  { %4801 = vst [vmem:[#allocation4_spill] sm:$0xff] %v4079_v30  ;;  %4803 = vst [vmem:[#allocation6_spill] sm:$0xff] %v4083_v17  ;;  %v4087_v20 = vsel %vm1836_vm3, %v4804_v26, -inf  ;;  %v4091_v22 = vsel %vm1836_vm3, %v4806_v23, -inf  ;;  %v4808_v25 = vld [vmem:[#allocation8_spill] sm:$0xff]  ;;  %v4810_v28 = vld [vmem:[#allocation10_spill] sm:$0xff] }
 0x13c   :  { %4805 = vst [vmem:[#allocation9_spill] sm:$0xff] %v4087_v20  ;;  %4807 = vst [vmem:[#allocation11_spill] sm:$0xff] %v4091_v22  ;;  %v4095_v19 = vsel %vm1836_vm3, %v4808_v25, -inf  ;;  %v4099_v21 = vsel %vm1836_vm3, %v4810_v28, -inf  ;;  %v4812_v13 = vld [vmem:[#allocation13_spill] sm:$0xff]  ;;  %v4814_v26 = vld [vmem:[#allocation12_spill] sm:$0xff] }
 0x13d   :  { %4809 = vst [vmem:[#allocation8_spill] sm:$0xff] %v4095_v19  ;;  %4811 = vst [vmem:[#allocation10_spill] sm:$0xff] %v4099_v21  ;;  %v2986_v30 = vpop.f32.mrb[48].mxu0  ;;  %v3086_v16 = vpop.f32.mrb[48].mxu1  ;;  %v4103_v17 = vsel %vm1836_vm3, %v4812_v13, -inf  ;;  %v4107_v20 = vsel %vm1836_vm3, %v4814_v26, -inf }
 0x13e   :  { %4813 = vst [vmem:[#allocation13_spill] sm:$0xff] %v4103_v17  ;;  %4815 = vst [vmem:[#allocation12_spill] sm:$0xff] %v4107_v20  ;;  %v4816_v23 = vld [vmem:[#allocation14_spill] sm:$0xff]  ;;  %v4114_v25 = vsel %vm1836_vm3, %v2986_v30, -inf  ;;  %v4116_v19 = vpop.f32.mrb[49].mxu0  ;;  %v4118_v28 = vpop.f32.mrb[49].mxu1 }
 0x13f   :  { %v4111_v22 = vsel %vm1836_vm3, %v4816_v23, -inf  ;;  %4818 = vst [vmem:[#allocation51_spill] sm:$0xff] %v4114_v25  ;;  %v4819_v21 = vld [vmem:[#allocation15_spill] sm:$0xff]  ;;  %v4821_v13 = vld [vmem:[#allocation17_spill] sm:$0xff]  ;;  %v4823_v26 = vld [vmem:[#allocation16_spill] sm:$0xff]  ;;  %v2987_v23 = vpop.f32.mrb[50].mxu0 }
 0x140   :  { %4817 = vst [vmem:[#allocation14_spill] sm:$0xff] %v4111_v22  ;;  %v4122_v24 = vsel %vm1836_vm3, %v4819_v21, -inf  ;;  %v4126_v17 = vsel %vm1836_vm3, %v4821_v13, -inf  ;;  %v4130_v20 = vsel %vm1836_vm3, %v4823_v26, -inf  ;;  %v4134_v22 = vpop.f32.mrb[50].mxu1  ;;  %v4138_v15 = vsel %vm1836_vm3, %v3797_v35, -inf }
 0x141   :  { %4820 = vst [vmem:[#allocation15_spill] sm:$0xff] %v4122_v24  ;;  %4822 = vst [vmem:[#allocation17_spill] sm:$0xff] %v4126_v17  ;;  %v4825_v21 = vld [vmem:[#allocation18_spill] sm:$0xff]  ;;  %v4826_v13 = vld [vmem:[#allocation19_spill] sm:$0xff]  ;;  %v1852_v26 = vsel %vm1836_vm3, %v2987_v23, -inf  ;;  %v1648_v14 = vpop.f32.mrb[51].mxu1 }
 0x142   :  { %4824 = vst [vmem:[#allocation16_spill] sm:$0xff] %v4130_v20  ;;  %v4142_v24 = vsel %vm1836_vm3, %v4825_v21, -inf  ;;  %v4146_v17 = vsel %vm1836_vm3, %v4826_v13, -inf  ;;  %v1248_v20 = vpop.f32.mrb[51].mxu0  ;;  %v4151_v30 = vsel %vm1836_vm3, %v3801_v37, -inf  ;;  %v4829_v25 = vld [vmem:[#allocation20_spill] sm:$0xff]  ;;  %v1853_v40 = vmax.f32 %v3823_v38, %v1852_v26 }
 0x143   :  { %4827 = vst [vmem:[#allocation18_spill] sm:$0xff] %v4146_v17  ;;  %4828 = vst [vmem:[#allocation19_spill] sm:$0xff] %v4151_v30  ;;  %v4155_v35 = vsel %vm1836_vm3, %v4829_v25, -inf  ;;  %v4159_v21 = vsel %vm1836_vm3, %v1248_v20, -inf  ;;  %v4163_v13 = vsel %vm1836_vm3, %v3805_v39, -inf  ;;  %v4832_v23 = vld [vmem:[#allocation21_spill] sm:$0xff] }
 0x144   :  { %4830 = vst [vmem:[#allocation20_spill] sm:$0xff] %v4155_v35  ;;  %4831 = vst [vmem:[#allocation52_spill] sm:$0xff] %v4159_v21  ;;  %v4167_v17 = vsel %vm1836_vm3, %v4832_v23, -inf  ;;  %v1856_v30 = vsel %vm1836_vm3, %v1648_v14, -inf  ;;  %v4174_v38 = vsel %vm1836_vm3, %v3809_v27, -inf  ;;  %v4833_v20 = vld [vmem:[#allocation23_spill] sm:$0xff]  ;;  %v1855_v23 = vmax.f32 %v1853_v40, %v3847_v42 }
 0x145   :  { %v4178_v25 = vsel %vm1836_vm3, %v4833_v20, -inf  ;;  %v4834_v39 = vld [vmem:[#allocation22_spill] sm:$0xff]  ;;  %v4836_v35 = vld [vmem:[#allocation25_spill] sm:$0xff]  ;;  %v4191_v14 = vsel %vm1836_vm3, %v3833_v32, -inf  ;;  %v4839_v27 = vld [vmem:[#allocation24_spill] sm:$0xff]  ;;  %v4208_v42 = vsel %vm1836_vm3, %v3853_v31, -inf }
 0x146   :  { %v4182_v26 = vsel %vm1836_vm3, %v4834_v39, -inf  ;;  %v4187_v37 = vsel %vm1836_vm3, %v4836_v35, -inf  ;;  %4838 = vst [vmem:[#allocation22_spill] sm:$0xff] %v4191_v14  ;;  %v4195_v21 = vsel %vm1836_vm3, %v4839_v27, -inf  ;;  %v4841_v20 = vld [vmem:[#allocation26_spill] sm:$0xff]  ;;  %v4212_v32 = vsel %vm1836_vm3, %v3835_v33, -inf }
 0x147   :  { %4835 = vst [vmem:[#allocation21_spill] sm:$0xff] %v4182_v26  ;;  %4837 = vst [vmem:[#allocation23_spill] sm:$0xff] %v4187_v37  ;;  %v4199_v29 = vsel %vm1836_vm3, %v4841_v20, -inf  ;;  %v4204_v40 = vld [vmem:[%s4737_s2] ss:$0 sm:$0xff]  ;;  %v4216_v35 = vsel %vm1836_vm3, %v3855_v36, -inf  ;;  %v1857_v39 = vmax.f32 %v1855_v23, %v1856_v30 }
 0x148   :  { %4840 = vst [vmem:[#allocation25_spill] sm:$0xff] %v4195_v21  ;;  %4842 = vst [vmem:[#allocation24_spill] sm:$0xff] %v4199_v29  ;;  %v2990_v27 = vpop.f32.mrb[52].mxu0  ;;  %v3090_v20 = vpop.f32.mrb[52].mxu1  ;;  %v4220_v29 = vsel %vm1836_vm3, %v3873_v41, -inf  ;;  %v4224_v26 = vsel %vm1836_vm3, %v3957_v51, -inf }
 0x149   :  { %4843 = vst [vmem:[#allocation26_spill] sm:$0xff] %v4208_v42  ;;  %4844 = vst [vmem:[#allocation53_spill] sm:$0xff] %v4212_v32  ;;  %v4228_v31 = vsel %vm1836_vm3, %v3875_v34, -inf  ;;  %v1873_v33 = vsel %vm1836_vm3, %v2990_v27, -inf  ;;  %v1261_v42 = vpop.f32.mrb[53].mxu0  ;;  %v1661_v36 = vpop.f32.mrb[53].mxu1  ;;  %v2188_v23 = vadd.f32 %v4204_v40, %v1857_v39 }
 0x14a   :  { %4845 = vst [vmem:[#allocation54_spill] sm:$0xff] %v4216_v35  ;;  %4846 = vst [vmem:[#allocation55_spill] sm:$0xff] %v4224_v26  ;;  %v4233_v30 = vsel %vm1836_vm3, %v3977_v59, -inf  ;;  %v1874_v41 = vmax.f32 %v3883_v50, %v1873_v33  ;;  %v1859_v35 = vsel %vm1836_vm3, %v1261_v42, -inf  ;;  %v2991_v51 = vpop.f32.mrb[54].mxu0  ;;  %v4238_v26 = vpop.f32.mrb[54].mxu1 }
 0x14b   :  { %4847 = vst [vmem:[#allocation56_spill] sm:$0xff] %v4228_v31  ;;  %4848 = vst [vmem:[#allocation57_spill] sm:$0xff] %v4233_v30  ;;  %v1863_v34 = vsel %vm1836_vm3, %v3086_v16, -inf  ;;  %v4849_v31 = vld [vmem:[#allocation29_spill] sm:$0xff]  ;;  %v1880_v27 = vsel %vm1836_vm3, %v2991_v51, -inf  ;;  %v1264_v14 = vpop.f32.mrb[55].mxu0 }
 0x14c   :  { %v1860_v32 = vmax.f32 %v4849_v31, %v1859_v35  ;;  %v1877_v21 = vsel %vm1836_vm3, %v1661_v36, -inf  ;;  %v1664_v59 = vpop.f32.mrb[55].mxu1  ;;  %v2237_v30 = vmax.f32 %v2188_v23, 0.0  ;;  %v1881_v39 = vmax.f32 %v3859_v44, %v1880_v27  ;;  %v4850_v33 = vld [vmem:[#allocation31_spill] sm:$0xff] }
 0x14d   :  { %v1866_v50 = vsel %vm1836_vm3, %v1264_v14, -inf  ;;  %v1876_v42 = vmax.f32 %v1874_v41, %v4850_v33  ;;  %v4249_v37 = vsel %vm1836_vm3, %v3979_v63, -inf  ;;  %v1884_v31 = vsel %vm1836_vm3, %v1664_v59, -inf }
 0x14e   :  { %v1862_v16 = vmax.f32 %v1860_v32, %v3867_v43  ;;  %v1867_v35 = vmax.f32 %v3863_v46, %v1866_v50  ;;  %v4256_v36 = vsel %vm1836_vm3, %v3997_v1, -inf  ;;  %v2785_v23 = vpack.c.bf16 %v2237_v30, %v2237_v30  ;;  %v4851_v46 = vld [vmem:[#allocation28_spill] sm:$0xff] }
 0x14f   :  { %v1878_v44 = vmax.f32 %v1876_v42, %v1877_v21  ;;  %v1883_v14 = vmax.f32 %v1881_v39, %v3887_v47  ;;  %v4261_v41 = vsel %vm1836_vm3, %v4017_v9, -inf  ;;  %v4265_v63 = vsel %vm1836_vm3, %v3999_v5, -inf  ;;  %v2994_v5 = vpop.f32.mrb[56].mxu0  ;;  %v3094_v21 = vpop.f32.mrb[56].mxu1 }
 0x150   :  { %v1864_v43 = vmax.f32 %v1862_v16, %v1863_v34  ;;  %v1869_v32 = vmax.f32 %v1867_v35, %v4851_v46  ;;  %v4270_v51 = vsel %vm1836_vm3, %v4019_v8, -inf  ;;  %v1870_v1 = vsel %vm1836_vm3, %v4134_v22, -inf  ;;  %2484 = vst.msk [vmem:[%s4738_s3 + $0x8] sm:$0xf] %vm2481_vm4, %v2785_v23  ;;  %v1277_v59 = vpop.f32.mrb[57].mxu0  ;;  %v1677_v39 = vpop.f32.mrb[57].mxu1 }
 0x151   :  { %v2191_v47 = vadd.f32 %v4204_v40, %v1878_v44  ;;  %v1885_v9 = vmax.f32 %v1883_v14, %v1884_v31  ;;  %v1891_v27 = vsel %vm1836_vm3, %v3090_v20, -inf  ;;  %v1901_v8 = vsel %vm1836_vm3, %v2994_v5, -inf  ;;  %v2995_v16 = vpop.f32.mrb[58].mxu0  ;;  %v4285_v35 = vpop.f32.mrb[58].mxu1 }
 0x152   :  { %v2189_v30 = vadd.f32 %v4204_v40, %v1864_v43  ;;  %v1871_v34 = vmax.f32 %v1869_v32, %v1870_v1  ;;  %v1902_v33 = vmax.f32 %v3915_v56, %v1901_v8  ;;  %v1887_v42 = vsel %vm1836_vm3, %v1277_v59, -inf  ;;  %v1280_v14 = vpop.f32.mrb[59].mxu0  ;;  %v1680_v43 = vpop.f32.mrb[59].mxu1  ;;  %v4852_v59 = vld [vmem:[#allocation32_spill] sm:$0xff] }
 0x153   :  { %v2240_v22 = vmax.f32 %v2191_v47, 0.0  ;;  %v2192_v50 = vadd.f32 %v4204_v40, %v1885_v9  ;;  %v1888_v44 = vmax.f32 %v3879_v48, %v1887_v42  ;;  %v1908_v20 = vsel %vm1836_vm3, %v2995_v16, -inf }
 0x154   :  { %v2238_v31 = vmax.f32 %v2189_v30, 0.0  ;;  %v2190_v23 = vadd.f32 %v4204_v40, %v1871_v34  ;;  %v1909_v1 = vmax.f32 %v3895_v45, %v1908_v20  ;;  %v1894_v56 = vsel %vm1836_vm3, %v1280_v14, -inf }
 0x155   :  { %v2788_v46 = vpack.c.bf16 %v2240_v22, %v2240_v22  ;;  %v2241_v32 = vmax.f32 %v2192_v50, 0.0  ;;  %v1890_v5 = vmax.f32 %v1888_v44, %v3903_v54  ;;  %v1895_v30 = vmax.f32 %v3899_v52, %v1894_v56  ;;  %v3098_v42 = vpop.f32.mrb[60].mxu1 }
 0x156   :  { %v2786_v47 = vpack.c.bf16 %v2238_v31, %v2238_v31  ;;  %v2239_v9 = vmax.f32 %v2190_v23, 0.0  ;;  %v4296_v34 = vsel %vm1836_vm3, %v4116_v19, -inf  ;;  %v1904_v45 = vmax.f32 %v1902_v33, %v3891_v49  ;;  %v1693_v23 = vpop.f32.mrb[61].mxu1 }
 0x157   :  { %2487 = vst.msk [vmem:[%s4738_s3 + $0x14] sm:$0xf] %vm2481_vm4, %v2788_v46  ;;  %v2789_v48 = vpack.c.bf16 %v2241_v32, %v2241_v32  ;;  %v1905_v8 = vsel %vm1836_vm3, %v1677_v39, -inf  ;;  %v1892_v54 = vmax.f32 %v1890_v5, %v1891_v27  ;;  %v1897_v19 = vmax.f32 %v1895_v30, %v4852_v59  ;;  %v2998_v27 = vpop.f32.mrb[60].mxu0  ;;  %v4331_v32 = vpop.f32.mrb[62].mxu1 }
 0x158   :  { %2485 = vst.msk [vmem:[%s4738_s3 + $0xc] sm:$0xf] %vm2481_vm4, %v2786_v47  ;;  %v2787_v52 = vpack.c.bf16 %v2239_v9, %v2239_v9  ;;  %v1911_v22 = vmax.f32 %v1909_v1, %v3919_v58  ;;  %v4312_v50 = vsel %vm1836_vm3, %v4118_v28, -inf  ;;  %v1898_v49 = vsel %vm1836_vm3, %v4238_v26, -inf  ;;  %v1293_v31 = vpop.f32.mrb[61].mxu0  ;;  %v1696_v30 = vpop.f32.mrb[63].mxu1 }
 0x159   :  { %2488 = vst.msk [vmem:[%s4738_s3 + $0x18] sm:$0xf] %vm2481_vm4, %v2789_v48  ;;  %v1906_v39 = vmax.f32 %v1904_v45, %v1905_v8  ;;  %v1912_v33 = vsel %vm1836_vm3, %v1680_v43, -inf  ;;  %v2193_v58 = vadd.f32 %v4204_v40, %v1892_v54  ;;  %v1899_v28 = vmax.f32 %v1897_v19, %v1898_v49  ;;  %v2999_v46 = vpop.f32.mrb[62].mxu0 }
 0x15a   :  { %2486 = vst.msk [vmem:[%s4738_s3 + $0x10] sm:$0xf] %vm2481_vm4, %v2787_v52  ;;  %v1913_v16 = vmax.f32 %v1911_v22, %v1912_v33  ;;  %v1929_v26 = vsel %vm1836_vm3, %v2998_v27, -inf  ;;  %v1919_v44 = vsel %vm1836_vm3, %v3094_v21, -inf  ;;  %v1915_v43 = vsel %vm1836_vm3, %v1293_v31, -inf  ;;  %v1296_v5 = vpop.f32.mrb[63].mxu0 }
 0x15b   :  { %v2195_v20 = vadd.f32 %v4204_v40, %v1906_v39  ;;  %v1930_v14 = vmax.f32 %v3947_v0, %v1929_v26  ;;  %v2242_v1 = vmax.f32 %v2193_v58, 0.0  ;;  %v2194_v56 = vadd.f32 %v4204_v40, %v1899_v28 }
 0x15c   :  { %v2196_v47 = vadd.f32 %v4204_v40, %v1913_v16  ;;  %v1916_v9 = vmax.f32 %v3911_v53, %v1915_v43  ;;  %v1936_v21 = vsel %vm1836_vm3, %v2999_v46, -inf  ;;  %v1922_v45 = vsel %vm1836_vm3, %v1296_v5, -inf }
 0x15d   :  { %v2244_v48 = vmax.f32 %v2195_v20, 0.0  ;;  %v1932_v0 = vmax.f32 %v1930_v14, %v3923_v55  ;;  %v2790_v8 = vpack.c.bf16 %v2242_v1, %v2242_v1  ;;  %v2243_v52 = vmax.f32 %v2194_v56, 0.0  ;;  %v3002_v16 = vpop.f32.mrb[64].mxu0  ;;  %v3102_v26 = vpop.f32.mrb[64].mxu1 }
 0x15e   :  { %v2245_v54 = vmax.f32 %v2196_v47, 0.0  ;;  %v1918_v59 = vmax.f32 %v1916_v9, %v3935_v62  ;;  %v1937_v22 = vmax.f32 %v3927_v57, %v1936_v21  ;;  %v1923_v49 = vmax.f32 %v3931_v60, %v1922_v45  ;;  %v4853_v60 = vld [vmem:[#allocation33_spill] sm:$0xff]  ;;  %v1709_v20 = vpop.f32.mrb[65].mxu1 }
 0x15f   :  { %v2792_v19 = vpack.c.bf16 %v2244_v48, %v2244_v48  ;;  %v1933_v53 = vsel %vm1836_vm3, %v1693_v23, -inf  ;;  %2489 = vst.msk [vmem:[%s4738_s3 + $0x1c] sm:$0xf] %vm2481_vm4, %v2790_v8  ;;  %v2791_v39 = vpack.c.bf16 %v2243_v52, %v2243_v52  ;;  %v1926_v57 = vsel %vm1836_vm3, %v4285_v35, -inf  ;;  %v4370_v47 = vpop.f32.mrb[66].mxu1 }
 0x160   :  { %v2793_v33 = vpack.c.bf16 %v2245_v54, %v2245_v54  ;;  %v1920_v55 = vmax.f32 %v1918_v59, %v1919_v44  ;;  %v1934_v27 = vmax.f32 %v1932_v0, %v1933_v53  ;;  %v1925_v62 = vmax.f32 %v1923_v49, %v4853_v60  ;;  %v1309_v44 = vpop.f32.mrb[65].mxu0  ;;  %v1712_v21 = vpop.f32.mrb[67].mxu1  ;;  %v4854_v49 = vld [vmem:[#allocation35_spill] sm:$0xff] }
 0x161   :  { %2491 = vst.msk [vmem:[%s4738_s3 + $0x24] sm:$0xf] %vm2481_vm4, %v2792_v19  ;;  %v1939_v58 = vmax.f32 %v1937_v22, %v3951_v2  ;;  %v1940_v28 = vsel %vm1836_vm3, %v1696_v30, -inf  ;;  %2490 = vst.msk [vmem:[%s4738_s3 + $0x20] sm:$0xf] %vm2481_vm4, %v2791_v39  ;;  %v1947_v31 = vsel %vm1836_vm3, %v3098_v42, -inf }
 0x162   :  { %2492 = vst.msk [vmem:[%s4738_s3 + $0x28] sm:$0xf] %vm2481_vm4, %v2793_v33  ;;  %v2197_v35 = vadd.f32 %v4204_v40, %v1920_v55  ;;  %v2199_v2 = vadd.f32 %v4204_v40, %v1934_v27  ;;  %v1957_v23 = vsel %vm1836_vm3, %v3002_v16, -inf  ;;  %v1927_v14 = vmax.f32 %v1925_v62, %v1926_v57  ;;  %v3003_v56 = vpop.f32.mrb[66].mxu0 }
 0x163   :  { %v1941_v43 = vmax.f32 %v1939_v58, %v1940_v28  ;;  %v1958_v46 = vmax.f32 %v3987_v10, %v1957_v23  ;;  %v1943_v1 = vsel %vm1836_vm3, %v1309_v44, -inf  ;;  %v1964_v42 = vsel %vm1836_vm3, %v3003_v56, -inf  ;;  %v1312_v48 = vpop.f32.mrb[67].mxu0 }
 0x164   :  { %v2246_v9 = vmax.f32 %v2197_v35, 0.0  ;;  %v2248_v5 = vmax.f32 %v2199_v2, 0.0  ;;  %v1944_v30 = vmax.f32 %v3943_v61, %v1943_v1  ;;  %v2198_v45 = vadd.f32 %v4204_v40, %v1927_v14 }
 0x165   :  { %v2200_v0 = vadd.f32 %v4204_v40, %v1941_v43  ;;  %v1965_v8 = vmax.f32 %v3963_v4, %v1964_v42  ;;  %v1950_v10 = vsel %vm1836_vm3, %v1312_v48, -inf  ;;  %v1960_v53 = vmax.f32 %v1958_v46, %v4854_v49  ;;  %v3006_v58 = vpop.f32.mrb[68].mxu0  ;;  %v3106_v28 = vpop.f32.mrb[68].mxu1 }
 0x166   :  { %v2794_v52 = vpack.c.bf16 %v2246_v9, %v2246_v9  ;;  %v2796_v54 = vpack.c.bf16 %v2248_v5, %v2248_v5  ;;  %v1946_v59 = vmax.f32 %v1944_v30, %v3971_v3  ;;  %v1951_v19 = vmax.f32 %v3967_v6, %v1950_v10  ;;  %v4855_v3 = vld [vmem:[#allocation34_spill] sm:$0xff]  ;;  %v1325_v44 = vpop.f32.mrb[69].mxu0 }
 0x167   :  { %v2247_v22 = vmax.f32 %v2198_v45, 0.0  ;;  %v2249_v61 = vmax.f32 %v2200_v0, 0.0  ;;  %v1961_v39 = vsel %vm1836_vm3, %v1709_v20, -inf  ;;  %v1954_v4 = vsel %vm1836_vm3, %v4331_v32, -inf  ;;  %v1725_v32 = vpop.f32.mrb[69].mxu1  ;;  %v3007_v43 = vpop.f32.mrb[70].mxu0 }
 0x168   :  { %2493 = vst.msk [vmem:[%s4738_s3 + $0x2c] sm:$0xf] %vm2481_vm4, %v2794_v52  ;;  %2495 = vst.msk [vmem:[%s4738_s3 + $0x34] sm:$0xf] %vm2481_vm4, %v2796_v54  ;;  %v1948_v6 = vmax.f32 %v1946_v59, %v1947_v31  ;;  %v1953_v33 = vmax.f32 %v1951_v19, %v4855_v3  ;;  %v1967_v55 = vmax.f32 %v1965_v8, %v3991_v7  ;;  %v1968_v62 = vsel %vm1836_vm3, %v1712_v21, -inf  ;;  %v4409_v46 = vpop.f32.mrb[70].mxu1 }
 0x169   :  { %v2795_v27 = vpack.c.bf16 %v2247_v22, %v2247_v22  ;;  %v2797_v57 = vpack.c.bf16 %v2249_v61, %v2249_v61  ;;  %v1962_v60 = vmax.f32 %v1960_v53, %v1961_v39  ;;  %v1985_v23 = vsel %vm1836_vm3, %v3006_v58, -inf  ;;  %v4856_v5 = vld [vmem:[#allocation38_spill] sm:$0xff]  ;;  %v1328_v42 = vpop.f32.mrb[71].mxu0  ;;  %v1728_v48 = vpop.f32.mrb[71].mxu1  ;;  %v4858_v22 = vld [vmem:[#allocation40_spill] sm:$0xff] }
 0x16a   :  { %v2201_v16 = vadd.f32 %v4204_v40, %v1948_v6  ;;  %v1955_v35 = vmax.f32 %v1953_v33, %v1954_v4  ;;  %v1969_v2 = vmax.f32 %v1967_v55, %v1968_v62  ;;  %v1975_v7 = vsel %vm1836_vm3, %v3102_v26, -inf  ;;  %v4860_v33 = vld [vmem:[#allocation43_spill] sm:$0xff] }
 0x16b   :  { %2494 = vst.msk [vmem:[%s4738_s3 + $0x30] sm:$0xf] %vm2481_vm4, %v2795_v27  ;;  %2496 = vst.msk [vmem:[%s4738_s3 + $0x38] sm:$0xf] %vm2481_vm4, %v2797_v57  ;;  %v2203_v31 = vadd.f32 %v4204_v40, %v1962_v60  ;;  %v1986_v20 = vmax.f32 %v4027_v18, %v1985_v23  ;;  %v1971_v14 = vsel %vm1836_vm3, %v1325_v44, -inf  ;;  %v1992_v26 = vsel %vm1836_vm3, %v3007_v43, -inf }
 0x16c   :  { %v2250_v1 = vmax.f32 %v2201_v16, 0.0  ;;  %v2202_v56 = vadd.f32 %v4204_v40, %v1955_v35  ;;  %v2204_v9 = vadd.f32 %v4204_v40, %v1969_v2  ;;  %v1972_v30 = vmax.f32 %v4856_v5, %v1971_v14  ;;  %v4857_v18 = vld [vmem:[#allocation39_spill] sm:$0xff] }
 0x16d   :  { %v2252_v21 = vmax.f32 %v2203_v31, 0.0  ;;  %v1978_v45 = vsel %vm1836_vm3, %v1328_v42, -inf  ;;  %v1988_v0 = vmax.f32 %v1986_v20, %v4857_v18  ;;  %v1993_v19 = vmax.f32 %v4003_v12, %v1992_v26  ;;  %v3010_v57 = vpop.f32.mrb[72].mxu0  ;;  %v3110_v60 = vpop.f32.mrb[72].mxu1 }
 0x16e   :  { %v2798_v8 = vpack.c.bf16 %v2250_v1, %v2250_v1  ;;  %v2251_v10 = vmax.f32 %v2202_v56, 0.0  ;;  %v2253_v52 = vmax.f32 %v2204_v9, 0.0  ;;  %v1974_v54 = vmax.f32 %v1972_v30, %v4011_v11  ;;  %v4859_v11 = vld [vmem:[#allocation37_spill] sm:$0xff]  ;;  %v1341_v35 = vpop.f32.mrb[73].mxu0  ;;  %v1741_v2 = vpop.f32.mrb[73].mxu1  ;;  %v4862_v56 = vld [vmem:[#allocation42_spill] sm:$0xff] }
 0x16f   :  { %v2800_v59 = vpack.c.bf16 %v2252_v21, %v2252_v21  ;;  %v1979_v61 = vmax.f32 %v4858_v22, %v1978_v45  ;;  %v1989_v49 = vsel %vm1836_vm3, %v1725_v32, -inf  ;;  %v1982_v12 = vsel %vm1836_vm3, %v4370_v47, -inf  ;;  %v4861_v32 = vld [vmem:[#allocation50_spill] sm:$0xff]  ;;  %v3011_v20 = vpop.f32.mrb[74].mxu0  ;;  %v4448_v14 = vpop.f32.mrb[74].mxu1  ;;  %v4863_v21 = vld [vmem:[#allocation45_spill] sm:$0xff] }
 0x170   :  { %2497 = vst.msk [vmem:[%s4738_s3 + $0x3c] sm:$0xf] %vm2481_vm4, %v2798_v8  ;;  %v2799_v53 = vpack.c.bf16 %v2251_v10, %v2251_v10  ;;  %v2801_v39 = vpack.c.bf16 %v2253_v52, %v2253_v52  ;;  %v1976_v4 = vmax.f32 %v1974_v54, %v1975_v7  ;;  %v1990_v6 = vmax.f32 %v1988_v0, %v1989_v49  ;;  %v1344_v5 = vpop.f32.mrb[75].mxu0  ;;  %v1744_v30 = vpop.f32.mrb[75].mxu1  ;;  %v4864_v8 = vld [vmem:[#allocation47_spill] sm:$0xff]  ;;  %v4865_v52 = vld [vmem:[#allocation46_spill] sm:$0xff] }
 0x171   :  { %2499 = vst.msk [vmem:[%s4738_s3 + $0x44] sm:$0xf] %vm2481_vm4, %v2800_v59  ;;  %v1981_v3 = vmax.f32 %v1979_v61, %v4859_v11  ;;  %v1995_v55 = vmax.f32 %v1993_v19, %v4860_v33  ;;  %v1996_v27 = vsel %vm1836_vm3, %v1728_v48, -inf  ;;  %v2003_v62 = vsel %vm1836_vm3, %v3106_v28, -inf  ;;  %v4866_v22 = vld [vmem:[#allocation44_spill] sm:$0xff] }
 0x172   :  { %2498 = vst.msk [vmem:[%s4738_s3 + $0x40] sm:$0xf] %vm2481_vm4, %v2799_v53  ;;  %2500 = vst.msk [vmem:[%s4738_s3 + $0x48] sm:$0xf] %vm2481_vm4, %v2801_v39  ;;  %v2205_v47 = vadd.f32 %v4204_v40, %v1976_v4  ;;  %v2207_v58 = vadd.f32 %v4204_v40, %v1990_v6  ;;  %v2013_v16 = vsel %vm1836_vm3, %v3010_v57, -inf  ;;  %v1999_v31 = vsel %vm1836_vm3, %v1341_v35, -inf }
 0x173   :  { %v1983_v23 = vmax.f32 %v1981_v3, %v1982_v12  ;;  %v1997_v44 = vmax.f32 %v1995_v55, %v1996_v27  ;;  %v2014_v7 = vmax.f32 %v4861_v32, %v2013_v16  ;;  %v2000_v9 = vmax.f32 %v4862_v56, %v1999_v31  ;;  %v4867_v4 = vld [vmem:[#allocation41_spill] sm:$0xff]  ;;  %v4868_v12 = vld [vmem:[#allocation2_spill] sm:$0xff]  ;;  %v4869_v32 = vld [vmem:[#allocation11_spill] sm:$0xff] }
 0x174   :  { %v2254_v43 = vmax.f32 %v2205_v47, 0.0  ;;  %v2256_v1 = vmax.f32 %v2207_v58, 0.0  ;;  %v2020_v28 = vsel %vm1836_vm3, %v3011_v20, -inf  ;;  %v2006_v45 = vsel %vm1836_vm3, %v1344_v5, -inf }
 0x175   :  { %v2206_v42 = vadd.f32 %v4204_v40, %v1983_v23  ;;  %v2208_v48 = vadd.f32 %v4204_v40, %v1997_v44  ;;  %v2021_v26 = vmax.f32 %v4863_v21, %v2020_v28  ;;  %v2002_v10 = vmax.f32 %v2000_v9, %v4864_v8  ;;  %v3014_v57 = vpop.f32.mrb[76].mxu0  ;;  %v3114_v47 = vpop.f32.mrb[76].mxu1  ;;  %v4870_v28 = vld [vmem:[#allocation49_spill] sm:$0xff] }
 0x176   :  { %v2802_v18 = vpack.c.bf16 %v2254_v43, %v2254_v43  ;;  %v2804_v0 = vpack.c.bf16 %v2256_v1, %v2256_v1  ;;  %v2007_v54 = vmax.f32 %v4865_v52, %v2006_v45  ;;  %v2016_v61 = vmax.f32 %v2014_v7, %v4866_v22  ;;  %v1357_v23 = vpop.f32.mrb[77].mxu0  ;;  %v4874_v22 = vld [vmem:[#allocation7_spill] sm:$0xff] }
 0x177   :  { %v2255_v59 = vmax.f32 %v2206_v42, 0.0  ;;  %v2257_v19 = vmax.f32 %v2208_v48, 0.0  ;;  %v2017_v49 = vsel %vm1836_vm3, %v1741_v2, -inf  ;;  %v2010_v53 = vsel %vm1836_vm3, %v4409_v46, -inf  ;;  %v1757_v46 = vpop.f32.mrb[77].mxu1  ;;  %v3015_v20 = vpop.f32.mrb[78].mxu0 }
 0x178   :  { %2501 = vst.msk [vmem:[%s4738_s3 + $0x4c] sm:$0xf] %vm2481_vm4, %v2802_v18  ;;  %2503 = vst.msk [vmem:[%s4738_s3 + $0x54] sm:$0xf] %vm2481_vm4, %v2804_v0  ;;  %v2004_v39 = vmax.f32 %v2002_v10, %v2003_v62  ;;  %v2009_v6 = vmax.f32 %v2007_v54, %v4867_v4  ;;  %v2023_v11 = vmax.f32 %v2021_v26, %v4868_v12  ;;  %v2024_v27 = vsel %vm1836_vm3, %v1744_v30, -inf  ;;  %v4487_v43 = vpop.f32.mrb[78].mxu1 }
 0x179   :  { %v2803_v3 = vpack.c.bf16 %v2255_v59, %v2255_v59  ;;  %v2805_v33 = vpack.c.bf16 %v2257_v19, %v2257_v19  ;;  %v2018_v55 = vmax.f32 %v2016_v61, %v2017_v49  ;;  %v2041_v2 = vsel %vm1836_vm3, %v3014_v57, -inf  ;;  %v1360_v30 = vpop.f32.mrb[79].mxu0  ;;  %v1760_v42 = vpop.f32.mrb[79].mxu1  ;;  %v4871_v26 = vld [vmem:[#allocation3_spill] sm:$0xff]  ;;  %v4872_v10 = vld [vmem:[#allocation4_spill] sm:$0xff]  ;;  %v4873_v59 = vld [vmem:[#allocation5_spill] sm:$0xff] }
 0x17a   :  { %v2209_v58 = vadd.f32 %v4204_v40, %v2004_v39  ;;  %v2011_v16 = vmax.f32 %v2009_v6, %v2010_v53  ;;  %v2025_v35 = vmax.f32 %v2023_v11, %v2024_v27  ;;  %v2031_v62 = vsel %vm1836_vm3, %v3110_v60, -inf  ;;  %v4875_v11 = vld [vmem:[#allocation48_spill] sm:$0xff] }
 0x17b   :  { %2502 = vst.msk [vmem:[%s4738_s3 + $0x50] sm:$0xf] %vm2481_vm4, %v2803_v3  ;;  %2504 = vst.msk [vmem:[%s4738_s3 + $0x58] sm:$0xf] %vm2481_vm4, %v2805_v33  ;;  %v2211_v44 = vadd.f32 %v4204_v40, %v2018_v55  ;;  %v2042_v7 = vmax.f32 %v4869_v32, %v2041_v2  ;;  %v2027_v31 = vsel %vm1836_vm3, %v1357_v23, -inf  ;;  %v2048_v60 = vsel %vm1836_vm3, %v3015_v20, -inf }
 0x17c   :  { %v2258_v1 = vmax.f32 %v2209_v58, 0.0  ;;  %v2210_v56 = vadd.f32 %v4204_v40, %v2011_v16  ;;  %v2212_v9 = vadd.f32 %v4204_v40, %v2025_v35  ;;  %v2028_v5 = vmax.f32 %v4870_v28, %v2027_v31  ;;  %v4876_v33 = vld [vmem:[#allocation8_spill] sm:$0xff] }
 0x17d   :  { %v2260_v48 = vmax.f32 %v2211_v44, 0.0  ;;  %v2034_v21 = vsel %vm1836_vm3, %v1360_v30, -inf  ;;  %v2044_v45 = vmax.f32 %v2042_v7, %v4871_v26  ;;  %v2049_v19 = vmax.f32 %v4873_v59, %v2048_v60  ;;  %v3018_v57 = vpop.f32.mrb[80].mxu0  ;;  %v3118_v58 = vpop.f32.mrb[80].mxu1  ;;  %v4878_v60 = vld [vmem:[#allocation13_spill] sm:$0xff]  ;;  %v4881_v59 = vld [vmem:[#allocation10_spill] sm:$0xff] }
 0x17e   :  { %v2806_v18 = vpack.c.bf16 %v2258_v1, %v2258_v1  ;;  %v2259_v0 = vmax.f32 %v2210_v56, 0.0  ;;  %v2261_v8 = vmax.f32 %v2212_v9, 0.0  ;;  %v2030_v52 = vmax.f32 %v2028_v5, %v4872_v10  ;;  %v1373_v23 = vpop.f32.mrb[81].mxu0  ;;  %v4877_v9 = vld [vmem:[#allocation9_spill] sm:$0xff] }
 0x17f   :  { %v2808_v54 = vpack.c.bf16 %v2260_v48, %v2260_v48  ;;  %v2035_v61 = vmax.f32 %v4874_v22, %v2034_v21  ;;  %v2045_v49 = vsel %vm1836_vm3, %v1757_v46, -inf  ;;  %v2038_v12 = vsel %vm1836_vm3, %v4448_v14, -inf  ;;  %v1773_v46 = vpop.f32.mrb[81].mxu1  ;;  %v3019_v31 = vpop.f32.mrb[82].mxu0 }
 0x180   :  { %2505 = vst.msk [vmem:[%s4738_s3 + $0x5c] sm:$0xf] %vm2481_vm4, %v2806_v18  ;;  %v2807_v53 = vpack.c.bf16 %v2259_v0, %v2259_v0  ;;  %v2809_v39 = vpack.c.bf16 %v2261_v8, %v2261_v8  ;;  %v2032_v4 = vmax.f32 %v2030_v52, %v2031_v62  ;;  %v2046_v6 = vmax.f32 %v2044_v45, %v2045_v49  ;;  %v4526_v20 = vpop.f32.mrb[82].mxu1  ;;  %v1376_v5 = vpop.f32.mrb[83].mxu0  ;;  %v4879_v18 = vld [vmem:[#allocation12_spill] sm:$0xff]  ;;  %v4880_v8 = vld [vmem:[#allocation15_spill] sm:$0xff] }
 0x181   :  { %2507 = vst.msk [vmem:[%s4738_s3 + $0x64] sm:$0xf] %vm2481_vm4, %v2808_v54  ;;  %v2037_v3 = vmax.f32 %v2035_v61, %v4875_v11  ;;  %v2051_v55 = vmax.f32 %v2049_v19, %v4876_v33  ;;  %v2052_v27 = vsel %vm1836_vm3, %v1760_v42, -inf  ;;  %v2059_v16 = vsel %vm1836_vm3, %v3114_v47, -inf  ;;  %v1776_v30 = vpop.f32.mrb[83].mxu1 }
 0x182   :  { %2506 = vst.msk [vmem:[%s4738_s3 + $0x60] sm:$0xf] %vm2481_vm4, %v2807_v53  ;;  %2508 = vst.msk [vmem:[%s4738_s3 + $0x68] sm:$0xf] %vm2481_vm4, %v2809_v39  ;;  %v2213_v14 = vadd.f32 %v4204_v40, %v2032_v4  ;;  %v2215_v35 = vadd.f32 %v4204_v40, %v2046_v6  ;;  %v2069_v2 = vsel %vm1836_vm3, %v3018_v57, -inf  ;;  %v2055_v7 = vsel %vm1836_vm3, %v1373_v23, -inf }
 0x183   :  { %v2039_v62 = vmax.f32 %v2037_v3, %v2038_v12  ;;  %v2053_v44 = vmax.f32 %v2051_v55, %v2052_v27  ;;  %v2070_v32 = vmax.f32 %v4138_v15, %v2069_v2  ;;  %v2056_v28 = vmax.f32 %v4877_v9, %v2055_v7  ;;  %v4882_v53 = vld [vmem:[#allocation6_spill] sm:$0xff]  ;;  %v4883_v4 = vld [vmem:[#allocation16_spill] sm:$0xff]  ;;  %v4884_v9 = vld [vmem:[#allocation17_spill] sm:$0xff] }
 0x184   :  { %v2262_v1 = vmax.f32 %v2213_v14, 0.0  ;;  %v2264_v56 = vmax.f32 %v2215_v35, 0.0  ;;  %v2076_v47 = vsel %vm1836_vm3, %v3019_v31, -inf  ;;  %v2062_v15 = vsel %vm1836_vm3, %v1376_v5, -inf }
 0x185   :  { %v2214_v42 = vadd.f32 %v4204_v40, %v2039_v62  ;;  %v2216_v48 = vadd.f32 %v4204_v40, %v2053_v44  ;;  %v2077_v21 = vmax.f32 %v4878_v60, %v2076_v47  ;;  %v2058_v0 = vmax.f32 %v2056_v28, %v4879_v18  ;;  %v3022_v55 = vpop.f32.mrb[84].mxu0  ;;  %v3122_v27 = vpop.f32.mrb[84].mxu1  ;;  %v4886_v18 = vld [vmem:[#allocation19_spill] sm:$0xff] }
 0x186   :  { %v2810_v26 = vpack.c.bf16 %v2262_v1, %v2262_v1  ;;  %v2812_v45 = vpack.c.bf16 %v2264_v56, %v2264_v56  ;;  %v2063_v10 = vmax.f32 %v4880_v8, %v2062_v15  ;;  %v2072_v19 = vmax.f32 %v2070_v32, %v4881_v59  ;;  %v1389_v23 = vpop.f32.mrb[85].mxu0  ;;  %v4885_v15 = vld [vmem:[#allocation18_spill] sm:$0xff] }
 0x187   :  { %v2263_v52 = vmax.f32 %v2214_v42, 0.0  ;;  %v2265_v54 = vmax.f32 %v2216_v48, 0.0  ;;  %v2073_v22 = vsel %vm1836_vm3, %v1773_v46, -inf  ;;  %v2066_v61 = vsel %vm1836_vm3, %v4487_v43, -inf  ;;  %v1789_v43 = vpop.f32.mrb[85].mxu1  ;;  %v3023_v32 = vpop.f32.mrb[86].mxu0 }
 0x188   :  { %2509 = vst.msk [vmem:[%s4738_s3 + $0x6c] sm:$0xf] %vm2481_vm4, %v2810_v26  ;;  %2511 = vst.msk [vmem:[%s4738_s3 + $0x74] sm:$0xf] %vm2481_vm4, %v2812_v45  ;;  %v2060_v49 = vmax.f32 %v2058_v0, %v2059_v16  ;;  %v2065_v39 = vmax.f32 %v2063_v10, %v4882_v53  ;;  %v2079_v6 = vmax.f32 %v2077_v21, %v4883_v4  ;;  %v2080_v33 = vsel %vm1836_vm3, %v1776_v30, -inf  ;;  %v4565_v7 = vpop.f32.mrb[86].mxu1 }
 0x189   :  { %v2811_v12 = vpack.c.bf16 %v2263_v52, %v2263_v52  ;;  %v2813_v11 = vpack.c.bf16 %v2265_v54, %v2265_v54  ;;  %v2074_v3 = vmax.f32 %v2072_v19, %v2073_v22  ;;  %v2097_v2 = vsel %vm1836_vm3, %v3022_v55, -inf  ;;  %v1392_v47 = vpop.f32.mrb[87].mxu0  ;;  %v1792_v5 = vpop.f32.mrb[87].mxu1 }
 0x18a   :  { %v2217_v57 = vadd.f32 %v4204_v40, %v2060_v49  ;;  %v2067_v14 = vmax.f32 %v2065_v39, %v2066_v61  ;;  %v2081_v35 = vmax.f32 %v2079_v6, %v2080_v33  ;;  %v2087_v16 = vsel %vm1836_vm3, %v3118_v58, -inf }
 0x18b   :  { %2510 = vst.msk [vmem:[%s4738_s3 + $0x70] sm:$0xf] %vm2481_vm4, %v2811_v12  ;;  %2512 = vst.msk [vmem:[%s4738_s3 + $0x78] sm:$0xf] %vm2481_vm4, %v2813_v11  ;;  %v2219_v46 = vadd.f32 %v4204_v40, %v2074_v3  ;;  %v2098_v62 = vmax.f32 %v4178_v25, %v2097_v2  ;;  %v2083_v44 = vsel %vm1836_vm3, %v1389_v23, -inf  ;;  %v2104_v58 = vsel %vm1836_vm3, %v3023_v32, -inf }
 0x18c   :  { %v2266_v31 = vmax.f32 %v2217_v57, 0.0  ;;  %v2218_v1 = vadd.f32 %v4204_v40, %v2067_v14  ;;  %v2220_v56 = vadd.f32 %v4204_v40, %v2081_v35  ;;  %v2084_v28 = vmax.f32 %v4884_v9, %v2083_v44  ;;  %v4888_v32 = vld [vmem:[#allocation23_spill] sm:$0xff]  ;;  %v4889_v9 = vld [vmem:[#allocation25_spill] sm:$0xff] }
 0x18d   :  { %v2268_v30 = vmax.f32 %v2219_v46, 0.0  ;;  %v2090_v42 = vsel %vm1836_vm3, %v1392_v47, -inf  ;;  %v2100_v25 = vmax.f32 %v2098_v62, %v4142_v24  ;;  %v2105_v0 = vmax.f32 %v4886_v18, %v2104_v58  ;;  %v3026_v53 = vpop.f32.mrb[88].mxu0  ;;  %v3126_v39 = vpop.f32.mrb[88].mxu1  ;;  %v4890_v47 = vld [vmem:[#allocation22_spill] sm:$0xff]  ;;  %v4891_v58 = vld [vmem:[#allocation21_spill] sm:$0xff] }
 0x18e   :  { %v2814_v48 = vpack.c.bf16 %v2266_v31, %v2266_v31  ;;  %v2267_v60 = vmax.f32 %v2218_v1, 0.0  ;;  %v2269_v21 = vmax.f32 %v2220_v56, 0.0  ;;  %v2086_v26 = vmax.f32 %v2084_v28, %v4885_v15  ;;  %v1405_v12 = vpop.f32.mrb[89].mxu0  ;;  %v1805_v11 = vpop.f32.mrb[89].mxu1 }
 0x18f   :  { %v2816_v45 = vpack.c.bf16 %v2268_v30, %v2268_v30  ;;  %v2091_v8 = vmax.f32 %v4163_v13, %v2090_v42  ;;  %v2101_v10 = vsel %vm1836_vm3, %v1789_v43, -inf  ;;  %v2094_v19 = vsel %vm1836_vm3, %v4526_v20, -inf  ;;  %v4887_v13 = vld [vmem:[#allocation14_spill] sm:$0xff]  ;;  %v3027_v14 = vpop.f32.mrb[90].mxu0  ;;  %v4604_v35 = vpop.f32.mrb[90].mxu1 }
 0x190   :  { %2513 = vst.msk [vmem:[%s4738_s3 + $0x7c] sm:$0xf] %vm2481_vm4, %v2814_v48  ;;  %v2815_v52 = vpack.c.bf16 %v2267_v60, %v2267_v60  ;;  %v2817_v54 = vpack.c.bf16 %v2269_v21, %v2269_v21  ;;  %v2088_v24 = vmax.f32 %v2086_v26, %v2087_v16  ;;  %v2102_v59 = vmax.f32 %v2100_v25, %v2101_v10  ;;  %v1408_v16 = vpop.f32.mrb[91].mxu0  ;;  %v1808_v46 = vpop.f32.mrb[91].mxu1  ;;  %v4892_v21 = vld [vmem:[#allocation20_spill] sm:$0xff]  ;;  %v4893_v26 = vld [vmem:[#allocation53_spill] sm:$0xff] }
 0x191   :  { %2515 = vst.msk [vmem:[%s4738_s3 + $0x84] sm:$0xf] %vm2481_vm4, %v2816_v45  ;;  %v2093_v22 = vmax.f32 %v2091_v8, %v4887_v13  ;;  %v2107_v61 = vmax.f32 %v2105_v0, %v4167_v17  ;;  %v2108_v49 = vsel %vm1836_vm3, %v1792_v5, -inf  ;;  %v2115_v4 = vsel %vm1836_vm3, %v3122_v27, -inf }
 0x192   :  { %2514 = vst.msk [vmem:[%s4738_s3 + $0x80] sm:$0xf] %vm2481_vm4, %v2815_v52  ;;  %2516 = vst.msk [vmem:[%s4738_s3 + $0x88] sm:$0xf] %vm2481_vm4, %v2817_v54  ;;  %v2221_v20 = vadd.f32 %v4204_v40, %v2088_v24  ;;  %v2223_v17 = vadd.f32 %v4204_v40, %v2102_v59  ;;  %v2125_v6 = vsel %vm1836_vm3, %v3026_v53, -inf  ;;  %v2111_v57 = vsel %vm1836_vm3, %v1405_v12, -inf }
 0x193   :  { %v2095_v3 = vmax.f32 %v2093_v22, %v2094_v19  ;;  %v2109_v33 = vmax.f32 %v2107_v61, %v2108_v49  ;;  %v2126_v55 = vmax.f32 %v4220_v29, %v2125_v6  ;;  %v2112_v43 = vmax.f32 %v4174_v38, %v2111_v57 }
 0x194   :  { %v2270_v2 = vmax.f32 %v2221_v20, 0.0  ;;  %v2272_v23 = vmax.f32 %v2223_v17, 0.0  ;;  %v2132_v27 = vsel %vm1836_vm3, %v3027_v14, -inf  ;;  %v2118_v29 = vsel %vm1836_vm3, %v1408_v16, -inf }
 0x195   :  { %v2222_v62 = vadd.f32 %v4204_v40, %v2095_v3  ;;  %v2224_v44 = vadd.f32 %v4204_v40, %v2109_v33  ;;  %v2133_v31 = vmax.f32 %v4888_v32, %v2132_v27  ;;  %v2114_v28 = vmax.f32 %v2112_v43, %v4889_v9  ;;  %v3030_v52 = vpop.f32.mrb[92].mxu0  ;;  %v3130_v54 = vpop.f32.mrb[92].mxu1  ;;  %v4894_v3 = vld [vmem:[#allocation26_spill] sm:$0xff]  ;;  %v4897_v32 = vld [vmem:[#allocation55_spill] sm:$0xff] }
 0x196   :  { %v2818_v1 = vpack.c.bf16 %v2270_v2, %v2270_v2  ;;  %v2820_v56 = vpack.c.bf16 %v2272_v23, %v2272_v23  ;;  %v2119_v5 = vmax.f32 %v4890_v47, %v2118_v29  ;;  %v2128_v42 = vmax.f32 %v2126_v55, %v4891_v58  ;;  %v1421_v22 = vpop.f32.mrb[93].mxu0  ;;  %v4898_v29 = vld [vmem:[#allocation57_spill] sm:$0xff] }
 0x197   :  { %v2271_v30 = vmax.f32 %v2222_v62, 0.0  ;;  %v2273_v38 = vmax.f32 %v2224_v44, 0.0  ;;  %v2129_v25 = vsel %vm1836_vm3, %v1805_v11, -inf  ;;  %v2122_v48 = vsel %vm1836_vm3, %v4565_v7, -inf  ;;  %v1821_v7 = vpop.f32.mrb[93].mxu1 }
 0x198   :  { %2517 = vst.msk [vmem:[%s4738_s3 + $0x8c] sm:$0xf] %vm2481_vm4, %v2818_v1  ;;  %2519 = vst.msk [vmem:[%s4738_s3 + $0x94] sm:$0xf] %vm2481_vm4, %v2820_v56  ;;  %v2116_v60 = vmax.f32 %v2114_v28, %v2115_v4  ;;  %v2121_v15 = vmax.f32 %v2119_v5, %v4892_v21  ;;  %v2135_v45 = vmax.f32 %v2133_v31, %v4893_v26  ;;  %v2136_v10 = vsel %vm1836_vm3, %v1808_v46, -inf  ;;  %v3031_v4 = vpop.f32.mrb[94].mxu0 }
 0x199   :  { %v2819_v18 = vpack.c.bf16 %v2271_v30, %v2271_v30  ;;  %v2821_v0 = vpack.c.bf16 %v2273_v38, %v2273_v38  ;;  %v2130_v8 = vmax.f32 %v2128_v42, %v2129_v25  ;;  %v2153_v13 = vsel %vm1836_vm3, %v3030_v52, -inf  ;;  %v4643_v17 = vpop.f32.mrb[94].mxu1  ;;  %v1424_v55 = vpop.f32.mrb[95].mxu0  ;;  %v4896_v46 = vld [vmem:[#allocation56_spill] sm:$0xff] }
 0x19a   :  { %v2225_v24 = vadd.f32 %v4204_v40, %v2116_v60  ;;  %v2123_v59 = vmax.f32 %v2121_v15, %v2122_v48  ;;  %v2137_v19 = vmax.f32 %v2135_v45, %v2136_v10  ;;  %v2143_v61 = vsel %vm1836_vm3, %v3126_v39, -inf  ;;  %v1824_v57 = vpop.f32.mrb[95].mxu1  ;;  %v4899_v38 = vld [vmem:[#allocation24_spill] sm:$0xff] }
 0x19b   :  { %2518 = vst.msk [vmem:[%s4738_s3 + $0x90] sm:$0xf] %vm2481_vm4, %v2819_v18  ;;  %2520 = vst.msk [vmem:[%s4738_s3 + $0x98] sm:$0xf] %vm2481_vm4, %v2821_v0  ;;  %v2227_v49 = vadd.f32 %v4204_v40, %v2130_v8  ;;  %v2154_v53 = vmax.f32 %v4261_v41, %v2153_v13  ;;  %v2139_v20 = vsel %vm1836_vm3, %v1421_v22, -inf  ;;  %v2160_v39 = vsel %vm1836_vm3, %v3031_v4, -inf }
 0x19c   :  { %v2274_v6 = vmax.f32 %v2225_v24, 0.0  ;;  %v2226_v12 = vadd.f32 %v4204_v40, %v2123_v59  ;;  %v2228_v11 = vadd.f32 %v4204_v40, %v2137_v19  ;;  %v2140_v33 = vmax.f32 %v4894_v3, %v2139_v20  ;;  %v4895_v41 = vld [vmem:[#allocation54_spill] sm:$0xff]  ;;  %v4900_v18 = vld [vmem:[#allocation27_spill] sm:$0xff]  ;;  %v4901_v0 = vld [vmem:[#allocation52_spill] sm:$0xff] }
 0x19d   :  { %v2276_v14 = vmax.f32 %v2227_v49, 0.0  ;;  %v2146_v2 = vsel %vm1836_vm3, %v1424_v55, -inf  ;;  %v2156_v23 = vmax.f32 %v2154_v53, %v4895_v41  ;;  %v2161_v31 = vmax.f32 %v4897_v32, %v2160_v39  ;;  %v3034_v48 = vpop.f32.mrb[96].mxu0  ;;  %v4903_v53 = vld [vmem:[#allocation30_spill] sm:$0xff]  ;;  %v4904_v20 = vld [vmem:[#allocation51_spill] sm:$0xff] }
 0x19e   :  { %v2822_v43 = vpack.c.bf16 %v2274_v6, %v2274_v6  ;;  %v2275_v27 = vmax.f32 %v2226_v12, 0.0  ;;  %v2277_v16 = vmax.f32 %v2228_v11, 0.0  ;;  %v2142_v62 = vmax.f32 %v2140_v33, %v4896_v46  ;;  %v1437_v15 = vpop.f32.mrb[97].mxu0 }
 0x19f   :  { %v2824_v44 = vpack.c.bf16 %v2276_v14, %v2276_v14  ;;  %v2147_v1 = vmax.f32 %v4898_v29, %v2146_v2  ;;  %v2157_v56 = vsel %vm1836_vm3, %v1821_v7, -inf  ;;  %v2150_v30 = vsel %vm1836_vm3, %v4604_v35, -inf  ;;  %v3035_v24 = vpop.f32.mrb[98].mxu0 }
 0x1a0   :  { %2521 = vst.msk [vmem:[%s4738_s3 + $0x9c] sm:$0xf] %vm2481_vm4, %v2822_v43  ;;  %v2823_v9 = vpack.c.bf16 %v2275_v27, %v2275_v27  ;;  %v2825_v28 = vpack.c.bf16 %v2277_v16, %v2277_v16  ;;  %v2144_v47 = vmax.f32 %v2142_v62, %v2143_v61  ;;  %v2158_v5 = vmax.f32 %v2156_v23, %v2157_v56  ;;  %v1440_v22 = vpop.f32.mrb[99].mxu0 }
 0x1a1   :  { %2523 = vst.msk [vmem:[%s4738_s3 + $0xa4] sm:$0xf] %vm2481_vm4, %v2824_v44  ;;  %v2149_v58 = vmax.f32 %v2147_v1, %v4899_v38  ;;  %v2163_v42 = vmax.f32 %v2161_v31, %v4249_v37  ;;  %v2164_v25 = vsel %vm1836_vm3, %v1824_v57, -inf  ;;  %v2171_v35 = vsel %vm1836_vm3, %v3130_v54, -inf  ;;  %v3237_v57 = vld [vmem:[%s4737_s2] ss:$0 sm:$0xff] }
 0x1a2   :  { %2522 = vst.msk [vmem:[%s4738_s3 + $0xa0] sm:$0xf] %vm2481_vm4, %v2823_v9  ;;  %2524 = vst.msk [vmem:[%s4738_s3 + $0xa8] sm:$0xf] %vm2481_vm4, %v2825_v28  ;;  %v2229_v60 = vadd.f32 %v4204_v40, %v2144_v47  ;;  %v2231_v21 = vadd.f32 %v4204_v40, %v2158_v5  ;;  %v1840_v37 = vsel %vm1836_vm3, %v3034_v48, -inf  ;;  %v4902_v8 = vmax.f32 %v4900_v18, %v4901_v0 }
 0x1a3   :  { %v2151_v26 = vmax.f32 %v2149_v58, %v2150_v30  ;;  %v2165_v45 = vmax.f32 %v2163_v42, %v2164_v25  ;;  %v2167_v52 = vsel %vm1836_vm3, %v1437_v15, -inf  ;;  %v1847_v54 = vsel %vm1836_vm3, %v3035_v24, -inf }
 0x1a4   :  { %v1841_v10 = vmax.f32 %v4902_v8, %v1840_v37  ;;  %v2278_v59 = vmax.f32 %v2229_v60, 0.0  ;;  %v2280_v19 = vmax.f32 %v2231_v21, 0.0  ;;  %v2168_v13 = vmax.f32 %v4256_v36, %v2167_v52 }
 0x1a5   :  { %v2230_v7 = vadd.f32 %v4204_v40, %v2151_v26  ;;  %v2232_v61 = vadd.f32 %v4204_v40, %v2165_v45  ;;  %v4905_v4 = vmax.f32 %v4903_v53, %v4904_v20  ;;  %v2174_v33 = vsel %vm1836_vm3, %v1440_v22, -inf }
 0x1a6   :  { %v1843_v49 = vmax.f32 %v1841_v10, %v4265_v63  ;;  %v2826_v12 = vpack.c.bf16 %v2278_v59, %v2278_v59  ;;  %v2828_v11 = vpack.c.bf16 %v2280_v19, %v2280_v19  ;;  %v2170_v3 = vmax.f32 %v2168_v13, %v4270_v51  ;;  %v4906_v63 = vld [vmem:[#allocation36_spill] sm:$0xff] }
 0x1a7   :  { %v1848_v6 = vmax.f32 %v4905_v4, %v1847_v54  ;;  %v2279_v36 = vmax.f32 %v2230_v7, 0.0  ;;  %v2281_v55 = vmax.f32 %v2232_v61, 0.0  ;;  %v2176_v39 = vsel %vm1836_vm3, %v4906_v63, -inf }
 0x1a8   :  { %v2186_v14 = vadd.f32 %v3237_v57, %v1843_v49  ;;  %2525 = vst.msk [vmem:[%s4738_s3 + $0xac] sm:$0xf] %vm2481_vm4, %v2826_v12  ;;  %2527 = vst.msk [vmem:[%s4738_s3 + $0xb4] sm:$0xf] %vm2481_vm4, %v2828_v11  ;;  %v2172_v51 = vmax.f32 %v2170_v3, %v2171_v35  ;;  %v2175_v2 = vmax.f32 %v4296_v34, %v2174_v33  ;;  %v2178_v46 = vsel %vm1836_vm3, %v4643_v17, -inf }
 0x1a9   :  { %v1850_v40 = vmax.f32 %v1848_v6, %v4312_v50  ;;  %v2827_v41 = vpack.c.bf16 %v2279_v36, %v2279_v36  ;;  %v2829_v23 = vpack.c.bf16 %v2281_v55, %v2281_v55 }
 0x1aa   :  { %v2235_v43 = vmax.f32 %v2186_v14, 0.0  ;;  %v2233_v27 = vadd.f32 %v3237_v57, %v2172_v51  ;;  %v2177_v16 = vmax.f32 %v2175_v2, %v2176_v39 }
 0x1ab   :  { %v2187_v50 = vadd.f32 %v3237_v57, %v1850_v40  ;;  %2526 = vst.msk [vmem:[%s4738_s3 + $0xb0] sm:$0xf] %vm2481_vm4, %v2827_v41  ;;  %2528 = vst.msk [vmem:[%s4738_s3 + $0xb8] sm:$0xf] %vm2481_vm4, %v2829_v23 }
 0x1ac   :  { %v2783_v34 = vpack.c.bf16 %v2235_v43, %v2235_v43  ;;  %v2282_v44 = vmax.f32 %v2233_v27, 0.0  ;;  %v2179_v32 = vmax.f32 %v2177_v16, %v2178_v46 }
 0x1ad   :  { %v2236_v62 = vmax.f32 %v2187_v50, 0.0 }
 0x1ae   :  { %2482 = vst.msk [vmem:[%s4738_s3] sm:$0xf] %vm2481_vm4, %v2783_v34  ;;  %v2830_v29 = vpack.c.bf16 %v2282_v44, %v2282_v44  ;;  %v2234_v1 = vadd.f32 %v3237_v57, %v2179_v32 }
 0x1af   :  { %v2784_v31 = vpack.c.bf16 %v2236_v62, %v2236_v62 }
 0x1b0   :  { %2529 = vst.msk [vmem:[%s4738_s3 + $0xbc] sm:$0xf] %vm2481_vm4, %v2830_v29  ;;  %v2283_v17 = vmax.f32 %v2234_v1, 0.0 }
 0x1b1   :  { %2483 = vst.msk [vmem:[%s4738_s3 + $0x4] sm:$0xf] %vm2481_vm4, %v2784_v31 }
 0x1b2   :  { %v2831_v56 = vpack.c.bf16 %v2283_v17, %v2283_v17 }
 0x1b4   :  { %2530 = vst.msk [vmem:[%s4738_s3 + $0xc0] sm:$0xf] %vm2481_vm4, %v2831_v56 }

// kernel: mnist_forward.7
= control target key start
LH: loop header
LB: loop body
LE: loop exit
PB: predicated region body
PF: predicated region fallthrough
CT: control target
= control target key end

     0   :  { %s3173_s18 = smov 0   ;;  %s3561_s0 = inlined_call_operand.vmem [shape: bf16[4,3584], index: 0, kind: input, shape index: {}]   ;;  %s3562_s1 = inlined_call_operand.vmem [shape: bf16[3584,512], index: 1, kind: input, shape index: {}]   ;;  %s3563_s2 = inlined_call_operand.vmem [shape: f32[1,512], index: 2, kind: input, shape index: {}]   ;;  %s3564_s3 = inlined_call_operand.vmem [shape: bf16[512,10], index: 3, kind: input, shape index: {}]   ;;  %s3565_s4 = inlined_call_operand.vmem [shape: f32[1,10], index: 4, kind: input, shape index: {}]   ;;  %s3566_s5 = inlined_call_operand.vmem [shape: f32[4,10], index: 5, kind: output, shape index: {}]  }
   0x1 LB: > { %s3179_s19 = sadd.s32 4294967295, %s3138_s18   ;;  %p2413_p0 = scmp.ge.s32.totalorder %s3138_s18, 1  ;;  %s3138_s18 = sphi %s3173_s18, %s15_s18  }
   0x2   : > { %p195_p1 = scmp.lt.s32.totalorder %s3138_s18, 5 }
   0x4   : > { %p196_p2 = pnand %p2413_p0, %p195_p1 }
   0x5   : > { %s224_s20 = smul.u32 (!%p196_p2), 7, %s3179_s19  ;;  %p2417_p5 = scmp.ne.s32.totalorder (!%p196_p2), %s3179_s19, 0 }
   0x6   : > { %199 = sbr.rel (%p196_p2) target bundleno = 1014 (0x3f6), region = 40 }
   0x7   : > { %s230_s21 = smul.u32 (!%p196_p2), 112, %s3179_s19  ;;  %p225_p3 = scmp.lt.s32.totalorder (!%p196_p2), %s224_s20, 27 }
   0x9   : > { %p231_p4 = scmp.lt.s32.totalorder (!%p196_p2), %s230_s21, 447 }
   0xd   : > { %s3568_s20 = smov (!%p225_p3, %s224_s20), 27  ;;  %s3570_s21 = smov (!%p231_p4, %s230_s21), 447 }
   0xe   : > { %s2414_s22 = sshll.u32 %s3568_s20, 1  ;;  %s2678_s26 = sshll.u32 %s3570_s21, 4  ;;  %v3140_v0 = vmov (!%p2417_p5), 0.0  }
   0xf   : > { %s3188_s25 = scalar_lea.vmem %s3561_s0, %s2414_s22  ;;  %s3193_s29 = scalar_lea.vmem %s3562_s1, %s2678_s26  ;;  %242 = vst [vmem:[#allocation2] sm:$0xff] (!%p2417_p5), %v3140_v0  ;;  %243 = vst [vmem:[#allocation2 + $0x8] sm:$0xff] (!%p2417_p5), %v3140_v0 }
  0x10   : > { %241 = sbr.rel (%p2417_p5) target bundleno = 23 (0x17), region = 44 }
  0x17 PF: > { %v2758_v1 = vld [vmem:[%s3193_s29 + $0x4] ss:$16 sps:$4 sm:$0xff]   ;;  %v2760_v2 = vld [vmem:[%s3193_s29 + $0xc] ss:$16 sps:$4 sm:$0xff]   ;;  %v2762_v3 = vld [vmem:[%s3193_s29] ss:$16 sps:$4 sm:$0xff]   ;;  %v478_v39 = vlaneseq }
  0x18   : > { %1634 = vmatprep.subr.bf16.mxu0 %v2758_v1  ;;  %v2763_v4 = vld [vmem:[%s3193_s29 + $0x8] ss:$16 sps:$4 sm:$0xff]   ;;  %1798 = vmatprep.subr.bf16.mxu1 %v2760_v2  ;;  %v2764_v5 = vld [vmem:[%s3193_s29 + $0x24] ss:$16 sps:$4 sm:$0xff]   ;;  %v2766_v6 = vld [vmem:[%s3193_s29 + $0x2c] ss:$16 sps:$4 sm:$0xff]  }
  0x19   : > { %1635 = vmatpush1.bf16.msra.mxu0 %v2762_v3  ;;  %1799 = vmatpush1.bf16.msra.mxu1 %v2763_v4  ;;  %v2768_v7 = vld [vmem:[%s3193_s29 + $0x20] ss:$16 sps:$4 sm:$0xff]   ;;  %v2769_v8 = vld [vmem:[%s3193_s29 + $0x28] ss:$16 sps:$4 sm:$0xff]   ;;  %v2770_v9 = vld [vmem:[%s3193_s29 + $0x44] ss:$16 sps:$4 sm:$0xff]  }
  0x1a   : > { %1636 = vmatprep.subr.bf16.mxu0 %v2764_v5  ;;  %1800 = vmatprep.subr.bf16.mxu1 %v2766_v6  ;;  %v2772_v10 = vld [vmem:[%s3193_s29 + $0x4c] ss:$16 sps:$4 sm:$0xff]   ;;  %v2774_v11 = vld [vmem:[%s3193_s29 + $0x40] ss:$16 sps:$4 sm:$0xff]   ;;  %v2775_v12 = vld [vmem:[%s3193_s29 + $0x48] ss:$16 sps:$4 sm:$0xff]  }
  0x1b   : > { %v2776_v13 = vld [vmem:[%s3193_s29 + $0x64] ss:$16 sps:$4 sm:$0xff]   ;;  %v2778_v14 = vld [vmem:[%s3193_s29 + $0x6c] ss:$16 sps:$4 sm:$0xff]   ;;  %v2780_v15 = vld [vmem:[%s3193_s29 + $0x60] ss:$16 sps:$4 sm:$0xff]  }
  0x1c   : > { %v2781_v16 = vld [vmem:[%s3193_s29 + $0x68] ss:$16 sps:$4 sm:$0xff]   ;;  %v2782_v17 = vld [vmem:[%s3193_s29 + $0x84] ss:$16 sps:$4 sm:$0xff]   ;;  %v2784_v18 = vld [vmem:[%s3193_s29 + $0x8c] ss:$16 sps:$4 sm:$0xff]  }
  0x1d   : > { %1637 = vmatpush1.bf16.msra.mxu0 %v2768_v7  ;;  %1801 = vmatpush1.bf16.msra.mxu1 %v2769_v8  ;;  %v2786_v19 = vld [vmem:[%s3193_s29 + $0x80] ss:$16 sps:$4 sm:$0xff]   ;;  %v2787_v20 = vld [vmem:[%s3193_s29 + $0x88] ss:$16 sps:$4 sm:$0xff]   ;;  %v2788_v21 = vld [vmem:[%s3193_s29 + $0xa4] ss:$16 sps:$4 sm:$0xff]  }
  0x1e   : > { %1638 = vmatprep.subr.bf16.mxu0 %v2770_v9  ;;  %1802 = vmatprep.subr.bf16.mxu1 %v2772_v10  ;;  %v2790_v22 = vld [vmem:[%s3193_s29 + $0xac] ss:$16 sps:$4 sm:$0xff]   ;;  %v2792_v23 = vld [vmem:[%s3193_s29 + $0xa0] ss:$16 sps:$4 sm:$0xff]   ;;  %v2793_v24 = vld [vmem:[%s3193_s29 + $0xa8] ss:$16 sps:$4 sm:$0xff]  }
  0x1f   : > { %v2794_v25 = vld [vmem:[%s3193_s29 + $0xc4] ss:$16 sps:$4 sm:$0xff]   ;;  %v2796_v26 = vld [vmem:[%s3193_s29 + $0xcc] ss:$16 sps:$4 sm:$0xff]   ;;  %v2798_v27 = vld [vmem:[%s3193_s29 + $0xc0] ss:$16 sps:$4 sm:$0xff]  }
  0x20   : > { %v2799_v28 = vld [vmem:[%s3193_s29 + $0xc8] ss:$16 sps:$4 sm:$0xff]   ;;  %v2800_v29 = vld [vmem:[%s3193_s29 + $0xe4] ss:$16 sps:$4 sm:$0xff]   ;;  %v2802_v30 = vld [vmem:[%s3193_s29 + $0xec] ss:$16 sps:$4 sm:$0xff]  }
  0x21   : > { %1639 = vmatpush1.bf16.msra.mxu0 %v2774_v11  ;;  %1803 = vmatpush1.bf16.msra.mxu1 %v2775_v12  ;;  %v2804_v31 = vld [vmem:[%s3193_s29 + $0xe0] ss:$16 sps:$4 sm:$0xff]   ;;  %v2805_v32 = vld [vmem:[%s3193_s29 + $0xe8] ss:$16 sps:$4 sm:$0xff]   ;;  %v2806_v33 = vld [vmem:[%s3193_s29 + $0x104] ss:$16 sps:$4 sm:$0xff]  }
  0x22   : > { %1640 = vmatprep.subr.bf16.mxu0 %v2776_v13  ;;  %1804 = vmatprep.subr.bf16.mxu1 %v2778_v14  ;;  %v2808_v34 = vld [vmem:[%s3193_s29 + $0x10c] ss:$16 sps:$4 sm:$0xff]   ;;  %v2810_v35 = vld [vmem:[%s3193_s29 + $0x100] ss:$16 sps:$4 sm:$0xff]   ;;  %v2811_v36 = vld [vmem:[%s3193_s29 + $0x108] ss:$16 sps:$4 sm:$0xff]  }
  0x23   : > { %v3141_v37 = vmov 1983009808   ;;  %v2812_v40 = vld [vmem:[%s3193_s29 + $0x124] ss:$16 sps:$4 sm:$0xff]   ;;  %v2814_v41 = vld [vmem:[%s3193_s29 + $0x12c] ss:$16 sps:$4 sm:$0xff]  }
  0x24   : > { %v476_v38 = vunpack.c.l.s4 %v3141_v37  ;;  %v2816_v42 = vld [vmem:[%s3193_s29 + $0x120] ss:$16 sps:$4 sm:$0xff]   ;;  %v3235_v44 = vshrl.u32 %v478_v39, 7  ;;  %v2817_v45 = vld [vmem:[%s3193_s29 + $0x128] ss:$16 sps:$4 sm:$0xff]   ;;  %p2642_p6 = scmp.ne.s32.totalorder %s3179_s19, 3 }
  0x25   : > { %1641 = vmatpush1.bf16.msra.mxu0 %v2780_v15  ;;  %1805 = vmatpush1.bf16.msra.mxu1 %v2781_v16  ;;  %v2818_v46 = vld [vmem:[%s3193_s29 + $0x144] ss:$16 sps:$4 sm:$0xff]   ;;  %v2820_v47 = vld [vmem:[%s3193_s29 + $0x14c] ss:$16 sps:$4 sm:$0xff]   ;;  %v2822_v48 = vld [vmem:[%s3193_s29 + $0x140] ss:$16 sps:$4 sm:$0xff]  }
  0x26   : > { %1642 = vmatprep.subr.bf16.mxu0 %v2782_v17  ;;  %1806 = vmatprep.subr.bf16.mxu1 %v2784_v18  ;;  %v477_v43 = vunpack.c.0.s8 %v476_v38  ;;  %v2823_v49 = vld [vmem:[%s3193_s29 + $0x148] ss:$16 sps:$4 sm:$0xff]   ;;  %v2824_v51 = vld [vmem:[%s3193_s29 + $0x164] ss:$16 sps:$4 sm:$0xff]   ;;  %v2826_v52 = vld [vmem:[%s3193_s29 + $0x16c] ss:$16 sps:$4 sm:$0xff]  }
  0x27   : > { %v246_v53 = vld [vmem:[%s3188_s25] sm:$0xff]  ;;  %v2829_v56 = vld [vmem:[%s3193_s29 + $0x168] ss:$16 sps:$4 sm:$0xff]   ;;  %v2832_v58 = vld [vmem:[%s3193_s29 + $0x18c] ss:$16 sps:$4 sm:$0xff]   ;;  %vm2357_vm0 = vcmask (!%p2642_p6), 76800  }
  0x28   : > { %v3243_v50 = vsub.s32 %v477_v43, %v3235_v44  ;;  %v2828_v54 = vld [vmem:[%s3193_s29 + $0x160] ss:$16 sps:$4 sm:$0xff]   ;;  %v2830_v57 = vld [vmem:[%s3193_s29 + $0x184] ss:$16 sps:$4 sm:$0xff]   ;;  %v2835_v61 = vld [vmem:[%s3193_s29 + $0x188] ss:$16 sps:$4 sm:$0xff]   ;;  %v474_v8 = vcombine.high %v246_v53, %v246_v53 }
  0x29   : > { %1643 = vmatpush1.bf16.msra.mxu0 %v2786_v19  ;;  %1807 = vmatpush1.bf16.msra.mxu1 %v2787_v20  ;;  %v2834_v60 = vld [vmem:[%s3193_s29 + $0x180] ss:$16 sps:$4 sm:$0xff]   ;;  %v2836_v62 = vld [vmem:[%s3193_s29 + $0x1a4] ss:$16 sps:$4 sm:$0xff]   ;;  %v2838_v63 = vld [vmem:[%s3193_s29 + $0x1ac] ss:$16 sps:$4 sm:$0xff]  }
  0x2a   : > { %1644 = vmatprep.subr.bf16.mxu0 %v2788_v21  ;;  %1808 = vmatprep.subr.bf16.mxu1 %v2790_v22  ;;  %v481_v55 = vrot.slane %v246_v53, %v3243_v50  ;;  %v2840_v0 = vld [vmem:[%s3193_s29 + $0x1a0] ss:$16 sps:$4 sm:$0xff]   ;;  %v2841_v1 = vld [vmem:[%s3193_s29 + $0x1a8] ss:$16 sps:$4 sm:$0xff]   ;;  %v2842_v2 = vld [vmem:[%s3193_s29 + $0x1c4] ss:$16 sps:$4 sm:$0xff]   ;;  %v3270_v13 = vrot.slane %v474_v8, %v3243_v50 }
  0x2b   : > { %v2844_v3 = vld [vmem:[%s3193_s29 + $0x1cc] ss:$16 sps:$4 sm:$0xff]   ;;  %v2846_v4 = vld [vmem:[%s3193_s29 + $0x1c0] ss:$16 sps:$4 sm:$0xff]   ;;  %v2847_v5 = vld [vmem:[%s3193_s29 + $0x1c8] ss:$16 sps:$4 sm:$0xff]  }
  0x2c   : > { %v489_v59 = vcombine.high %v481_v55, %v481_v55  ;;  %v2848_v6 = vld [vmem:[%s3193_s29 + $0x1e4] ss:$16 sps:$4 sm:$0xff]   ;;  %v2850_v7 = vld [vmem:[%s3193_s29 + $0x1ec] ss:$16 sps:$4 sm:$0xff]   ;;  %v2852_v9 = vld [vmem:[%s3193_s29 + $0x1e0] ss:$16 sps:$4 sm:$0xff]   ;;  %v490_v18 = vcombine.high %v3270_v13, %v3270_v13 }
  0x2d   : > { %1645 = vmatpush1.bf16.msra.mxu0 %v2792_v23  ;;  %1809 = vmatpush1.bf16.msra.mxu1 %v2793_v24  ;;  %v2853_v10 = vld [vmem:[%s3193_s29 + $0x1e8] ss:$16 sps:$4 sm:$0xff]   ;;  %v2857_v11 = vld [vmem:[%s3193_s29 + $0x204] ss:$16 sps:$4 sm:$0xff]   ;;  %v2860_v12 = vld [vmem:[%s3193_s29 + $0x20c] ss:$16 sps:$4 sm:$0xff]  }
  0x2e   : > { %1646 = vmatprep.subr.bf16.mxu0 %v2794_v25  ;;  %1810 = vmatprep.subr.bf16.mxu1 %v2796_v26  ;;  %v2855_v14 = vld [vmem:[%s3193_s29 + $0x200] ss:$16 sps:$4 sm:$0xff]   ;;  %v2858_v15 = vld [vmem:[%s3193_s29 + $0x208] ss:$16 sps:$4 sm:$0xff]   ;;  %v2863_v16 = vld [vmem:[%s3193_s29 + $0x224] ss:$16 sps:$4 sm:$0xff]  }
  0x2f   : > { %1666 = vmatprep.mubr.bf16.mxu0 %v489_v59  ;;  %1830 = vmatprep.mubr.bf16.mxu1 %v489_v59  ;;  %v2866_v17 = vld [vmem:[%s3193_s29 + $0x22c] ss:$16 sps:$4 sm:$0xff]   ;;  %v2861_v19 = vld [vmem:[%s3193_s29 + $0x220] ss:$16 sps:$4 sm:$0xff]   ;;  %v2864_v20 = vld [vmem:[%s3193_s29 + $0x228] ss:$16 sps:$4 sm:$0xff]  }
  0x30   : > { %v2869_v21 = vld [vmem:[%s3193_s29 + $0x244] ss:$16 sps:$4 sm:$0xff]   ;;  %v2872_v22 = vld [vmem:[%s3193_s29 + $0x24c] ss:$16 sps:$4 sm:$0xff]   ;;  %v2867_v23 = vld [vmem:[%s3193_s29 + $0x240] ss:$16 sps:$4 sm:$0xff]  }
  0x31   : > { %1647 = vmatpush1.bf16.msra.mxu0 %v2798_v27  ;;  %1811 = vmatpush1.bf16.msra.mxu1 %v2799_v28  ;;  %v2870_v24 = vld [vmem:[%s3193_s29 + $0x248] ss:$16 sps:$4 sm:$0xff]   ;;  %v2875_v25 = vld [vmem:[%s3193_s29 + $0x264] ss:$16 sps:$4 sm:$0xff]   ;;  %v2878_v26 = vld [vmem:[%s3193_s29 + $0x26c] ss:$16 sps:$4 sm:$0xff]  }
  0x32   : > { %1648 = vmatprep.subr.bf16.mxu0 %v2800_v29  ;;  %1812 = vmatprep.subr.bf16.mxu1 %v2802_v30  ;;  %v2873_v27 = vld [vmem:[%s3193_s29 + $0x260] ss:$16 sps:$4 sm:$0xff]   ;;  %v2876_v28 = vld [vmem:[%s3193_s29 + $0x268] ss:$16 sps:$4 sm:$0xff]   ;;  %v2881_v29 = vld [vmem:[%s3193_s29 + $0x284] ss:$16 sps:$4 sm:$0xff]  }
  0x33   : > { %v2884_v30 = vld [vmem:[%s3193_s29 + $0x28c] ss:$16 sps:$4 sm:$0xff]   ;;  %v2893_v37 = vld [vmem:[%s3193_s29 + $0x2c4] ss:$16 sps:$4 sm:$0xff]   ;;  %v2891_v39 = vld [vmem:[%s3193_s29 + $0x2c0] ss:$16 sps:$4 sm:$0xff]  }
  0x34   : > { %v2896_v38 = vld [vmem:[%s3193_s29 + $0x2cc] ss:$16 sps:$4 sm:$0xff]   ;;  %v2897_v43 = vld [vmem:[%s3193_s29 + $0x2e0] ss:$16 sps:$4 sm:$0xff]   ;;  %v2923_v59 = vld [vmem:[%s3193_s29 + $0x364] ss:$16 sps:$4 sm:$0xff]  }
  0x35   : > { %1649 = vmatpush1.bf16.msra.mxu0 %v2804_v31  ;;  %1813 = vmatpush1.bf16.msra.mxu1 %v2805_v32  ;;  %v2879_v31 = vld [vmem:[%s3193_s29 + $0x280] ss:$16 sps:$4 sm:$0xff]   ;;  %v2882_v32 = vld [vmem:[%s3193_s29 + $0x288] ss:$16 sps:$4 sm:$0xff]   ;;  %v2944_v8 = vld [vmem:[%s3193_s29 + $0x3cc] ss:$16 sps:$4 sm:$0xff]  }
  0x36   : > { %1650 = vmatprep.subr.bf16.mxu0 %v2806_v33  ;;  %1814 = vmatprep.subr.bf16.mxu1 %v2808_v34  ;;  %v2887_v33 = vld [vmem:[%s3193_s29 + $0x2a4] ss:$16 sps:$4 sm:$0xff]   ;;  %v2890_v34 = vld [vmem:[%s3193_s29 + $0x2ac] ss:$16 sps:$4 sm:$0xff]   ;;  %v2909_v53 = vld [vmem:[%s3193_s29 + $0x320] ss:$16 sps:$4 sm:$0xff]  }
  0x39   : > { %1651 = vmatpush1.bf16.msra.mxu0 %v2810_v35  ;;  %1815 = vmatpush1.bf16.msra.mxu1 %v2811_v36  ;;  %v2885_v35 = vld [vmem:[%s3193_s29 + $0x2a0] ss:$16 sps:$4 sm:$0xff]   ;;  %v2888_v36 = vld [vmem:[%s3193_s29 + $0x2a8] ss:$16 sps:$4 sm:$0xff]  }
  0x3a   : > { %1652 = vmatprep.subr.bf16.mxu0 %v2812_v40  ;;  %1816 = vmatprep.subr.bf16.mxu1 %v2814_v41  ;;  %v2894_v40 = vld [vmem:[%s3193_s29 + $0x2c8] ss:$16 sps:$4 sm:$0xff]   ;;  %v2899_v41 = vld [vmem:[%s3193_s29 + $0x2e4] ss:$16 sps:$4 sm:$0xff]  }
  0x3d   : > { %1653 = vmatpush1.bf16.msra.mxu0 %v2816_v42  ;;  %1817 = vmatpush1.bf16.msra.mxu1 %v2817_v45  ;;  %v2902_v42 = vld [vmem:[%s3193_s29 + $0x2ec] ss:$16 sps:$4 sm:$0xff]   ;;  %v2900_v45 = vld [vmem:[%s3193_s29 + $0x2e8] ss:$16 sps:$4 sm:$0xff]  }
  0x3e   : > { %1654 = vmatprep.subr.bf16.mxu0 %v2818_v46  ;;  %1818 = vmatprep.subr.bf16.mxu1 %v2820_v47  ;;  %v2905_v46 = vld [vmem:[%s3193_s29 + $0x304] ss:$16 sps:$4 sm:$0xff]   ;;  %v2908_v47 = vld [vmem:[%s3193_s29 + $0x30c] ss:$16 sps:$4 sm:$0xff]  }
  0x41   : > { %1655 = vmatpush1.bf16.msra.mxu0 %v2822_v48  ;;  %1819 = vmatpush1.bf16.msra.mxu1 %v2823_v49  ;;  %v2903_v48 = vld [vmem:[%s3193_s29 + $0x300] ss:$16 sps:$4 sm:$0xff]   ;;  %v2906_v49 = vld [vmem:[%s3193_s29 + $0x308] ss:$16 sps:$4 sm:$0xff]  }
  0x42   : > { %1656 = vmatprep.subr.bf16.mxu0 %v2824_v51  ;;  %1820 = vmatprep.subr.bf16.mxu1 %v2826_v52  ;;  %v2911_v51 = vld [vmem:[%s3193_s29 + $0x324] ss:$16 sps:$4 sm:$0xff]   ;;  %v2914_v52 = vld [vmem:[%s3193_s29 + $0x32c] ss:$16 sps:$4 sm:$0xff]  }
  0x45   : > { %1657 = vmatpush1.bf16.msra.mxu0 %v2828_v54  ;;  %1821 = vmatpush1.bf16.msra.mxu1 %v2829_v56  ;;  %v2912_v54 = vld [vmem:[%s3193_s29 + $0x328] ss:$16 sps:$4 sm:$0xff]   ;;  %v2920_v56 = vld [vmem:[%s3193_s29 + $0x34c] ss:$16 sps:$4 sm:$0xff]  }
  0x46   : > { %1658 = vmatprep.subr.bf16.mxu0 %v2830_v57  ;;  %1822 = vmatprep.subr.bf16.mxu1 %v2832_v58  ;;  %v2915_v57 = vld [vmem:[%s3193_s29 + $0x340] ss:$16 sps:$4 sm:$0xff]   ;;  %v2918_v58 = vld [vmem:[%s3193_s29 + $0x348] ss:$16 sps:$4 sm:$0xff]  }
  0x49   : > { %1659 = vmatpush1.bf16.msra.mxu0 %v2834_v60  ;;  %1823 = vmatpush1.bf16.msra.mxu1 %v2835_v61  ;;  %v2926_v60 = vld [vmem:[%s3193_s29 + $0x36c] ss:$16 sps:$4 sm:$0xff]   ;;  %v2921_v61 = vld [vmem:[%s3193_s29 + $0x360] ss:$16 sps:$4 sm:$0xff]  }
  0x4a   : > { %1660 = vmatprep.subr.bf16.mxu0 %v2836_v62  ;;  %1824 = vmatprep.subr.bf16.mxu1 %v2838_v63  ;;  %v2924_v62 = vld [vmem:[%s3193_s29 + $0x368] ss:$16 sps:$4 sm:$0xff]   ;;  %v2929_v63 = vld [vmem:[%s3193_s29 + $0x384] ss:$16 sps:$4 sm:$0xff]  }
  0x4d   : > { %1661 = vmatpush1.bf16.msra.mxu0 %v2840_v0  ;;  %1825 = vmatpush1.bf16.msra.mxu1 %v2841_v1  ;;  %v2932_v0 = vld [vmem:[%s3193_s29 + $0x38c] ss:$16 sps:$4 sm:$0xff]   ;;  %v2927_v1 = vld [vmem:[%s3193_s29 + $0x380] ss:$16 sps:$4 sm:$0xff]  }
  0x4e   : > { %1662 = vmatprep.subr.bf16.mxu0 %v2842_v2  ;;  %1826 = vmatprep.subr.bf16.mxu1 %v2844_v3  ;;  %v2930_v2 = vld [vmem:[%s3193_s29 + $0x388] ss:$16 sps:$4 sm:$0xff]   ;;  %v2935_v3 = vld [vmem:[%s3193_s29 + $0x3a4] ss:$16 sps:$4 sm:$0xff]  }
  0x51   : > { %1663 = vmatpush1.bf16.msra.mxu0 %v2846_v4  ;;  %1827 = vmatpush1.bf16.msra.mxu1 %v2847_v5  ;;  %v2938_v4 = vld [vmem:[%s3193_s29 + $0x3ac] ss:$16 sps:$4 sm:$0xff]   ;;  %v2933_v5 = vld [vmem:[%s3193_s29 + $0x3a0] ss:$16 sps:$4 sm:$0xff]  }
  0x52   : > { %1664 = vmatprep.subr.bf16.mxu0 %v2848_v6  ;;  %1828 = vmatprep.subr.bf16.mxu1 %v2850_v7  ;;  %v2936_v6 = vld [vmem:[%s3193_s29 + $0x3a8] ss:$16 sps:$4 sm:$0xff]   ;;  %v2941_v7 = vld [vmem:[%s3193_s29 + $0x3c4] ss:$16 sps:$4 sm:$0xff]  }
  0x55   : > { %1665 = vmatpush1.bf16.msra.mxu0 %v2852_v9  ;;  %1829 = vmatpush1.bf16.msra.mxu1 %v2853_v10  ;;  %v2939_v9 = vld [vmem:[%s3193_s29 + $0x3c0] ss:$16 sps:$4 sm:$0xff]   ;;  %v2942_v10 = vld [vmem:[%s3193_s29 + $0x3c8] ss:$16 sps:$4 sm:$0xff]  }
  0x56   : > { %1675 = vmatprep.subr.bf16.mxu0 %v2857_v11  ;;  %1839 = vmatprep.subr.bf16.mxu1 %v2860_v12  ;;  %v2947_v11 = vld [vmem:[%s3193_s29 + $0x3e4] ss:$16 sps:$4 sm:$0xff]   ;;  %v2950_v12 = vld [vmem:[%s3193_s29 + $0x3ec] ss:$16 sps:$4 sm:$0xff]  }
  0x58   : > { %1667 = vmatmul.mubr.bf16.vlgmr.msra.gmra.mrb[0].mxu0 %v481_v55  ;;  %1831 = vmatmul.mubr.bf16.vlgmr.msra.gmra.mrb[0].mxu1 %v481_v55  ;;  %v2917_v55 = vld [vmem:[%s3193_s29 + $0x344] ss:$16 sps:$4 sm:$0xff]  }
  0x59   : > { %1676 = vmatpush1.bf16.msra.mxu0 %v2855_v14  ;;  %1840 = vmatpush1.bf16.msra.mxu1 %v2858_v15  ;;  %v2945_v14 = vld [vmem:[%s3193_s29 + $0x3e0] ss:$16 sps:$4 sm:$0xff]   ;;  %v2948_v15 = vld [vmem:[%s3193_s29 + $0x3e8] ss:$16 sps:$4 sm:$0xff]  }
  0x5a   : > { %1677 = vmatprep.subr.bf16.mxu0 %v2863_v16  ;;  %1841 = vmatprep.subr.bf16.mxu1 %v2866_v17  ;;  %v2953_v16 = vld [vmem:[%s3193_s29 + $0x404] ss:$16 sps:$4 sm:$0xff]   ;;  %v2956_v17 = vld [vmem:[%s3193_s29 + $0x40c] ss:$16 sps:$4 sm:$0xff]  }
  0x5b   : > { %1707 = vmatprep.mubr.bf16.mxu0 %v490_v18  ;;  %1871 = vmatprep.mubr.bf16.mxu1 %v490_v18  ;;  %v2951_v18 = vld [vmem:[%s3193_s29 + $0x400] ss:$16 sps:$4 sm:$0xff]  }
  0x5d   : > { %1678 = vmatpush1.bf16.msra.mxu0 %v2861_v19  ;;  %1842 = vmatpush1.bf16.msra.mxu1 %v2864_v20  ;;  %v2954_v19 = vld [vmem:[%s3193_s29 + $0x408] ss:$16 sps:$4 sm:$0xff]  }
  0x5e   : > { %1679 = vmatprep.subr.bf16.mxu0 %v2869_v21  ;;  %1843 = vmatprep.subr.bf16.mxu1 %v2872_v22  ;;  %v3341_v20 = vld [vmem:[%s3188_s25 + $0x8] sm:$0x3f]  ;;  %v2959_v21 = vld [vmem:[%s3193_s29 + $0x424] ss:$16 sps:$4 sm:$0xff]  }
  0x5f   : > { %v2962_v22 = vld [vmem:[%s3193_s29 + $0x42c] ss:$16 sps:$4 sm:$0xff]  }
  0x61   : > { %1680 = vmatpush1.bf16.msra.mxu0 %v2867_v23  ;;  %1844 = vmatpush1.bf16.msra.mxu1 %v2870_v24  ;;  %v3347_v23 = vrot.slane %v3341_v20, %v3243_v50 }
  0x62   : > { %1681 = vmatprep.subr.bf16.mxu0 %v2875_v25  ;;  %1845 = vmatprep.subr.bf16.mxu1 %v2878_v26  ;;  %v2957_v25 = vld [vmem:[%s3193_s29 + $0x420] ss:$16 sps:$4 sm:$0xff]   ;;  %v2960_v26 = vld [vmem:[%s3193_s29 + $0x428] ss:$16 sps:$4 sm:$0xff]  }
  0x63   : > { %v506_v24 = vcombine.high %v3347_v23, %v3347_v23 }
  0x65   : > { %1682 = vmatpush1.bf16.msra.mxu0 %v2873_v27  ;;  %1846 = vmatpush1.bf16.msra.mxu1 %v2876_v28  ;;  %v2965_v27 = vld [vmem:[%s3193_s29 + $0x444] ss:$16 sps:$4 sm:$0xff]   ;;  %v2968_v28 = vld [vmem:[%s3193_s29 + $0x44c] ss:$16 sps:$4 sm:$0xff]  }
  0x66   : > { %1683 = vmatprep.subr.bf16.mxu0 %v2881_v29  ;;  %1847 = vmatprep.subr.bf16.mxu1 %v2884_v30  ;;  %v2966_v29 = vld [vmem:[%s3193_s29 + $0x448] ss:$16 sps:$4 sm:$0xff]   ;;  %v2971_v30 = vld [vmem:[%s3193_s29 + $0x464] ss:$16 sps:$4 sm:$0xff]  }
  0x69   : > { %1684 = vmatpush1.bf16.msra.mxu0 %v2879_v31  ;;  %1848 = vmatpush1.bf16.msra.mxu1 %v2882_v32  ;;  %v2974_v31 = vld [vmem:[%s3193_s29 + $0x46c] ss:$16 sps:$4 sm:$0xff]   ;;  %v2969_v32 = vld [vmem:[%s3193_s29 + $0x460] ss:$16 sps:$4 sm:$0xff]  }
  0x6a   : > { %1685 = vmatprep.subr.bf16.mxu0 %v2887_v33  ;;  %1849 = vmatprep.subr.bf16.mxu1 %v2890_v34  ;;  %v2972_v33 = vld [vmem:[%s3193_s29 + $0x468] ss:$16 sps:$4 sm:$0xff]   ;;  %v2977_v34 = vld [vmem:[%s3193_s29 + $0x484] ss:$16 sps:$4 sm:$0xff]  }
  0x6d   : > { %1686 = vmatpush1.bf16.msra.mxu0 %v2885_v35  ;;  %1850 = vmatpush1.bf16.msra.mxu1 %v2888_v36  ;;  %v2980_v35 = vld [vmem:[%s3193_s29 + $0x48c] ss:$16 sps:$4 sm:$0xff]   ;;  %v2975_v36 = vld [vmem:[%s3193_s29 + $0x480] ss:$16 sps:$4 sm:$0xff]  }
  0x6e   : > { %1687 = vmatprep.subr.bf16.mxu0 %v2893_v37  ;;  %1851 = vmatprep.subr.bf16.mxu1 %v2896_v38  ;;  %v2978_v37 = vld [vmem:[%s3193_s29 + $0x488] ss:$16 sps:$4 sm:$0xff]   ;;  %v2983_v38 = vld [vmem:[%s3193_s29 + $0x4a4] ss:$16 sps:$4 sm:$0xff]  }
  0x71   : > { %1688 = vmatpush1.bf16.msra.mxu0 %v2891_v39  ;;  %1852 = vmatpush1.bf16.msra.mxu1 %v2894_v40  ;;  %v2986_v39 = vld [vmem:[%s3193_s29 + $0x4ac] ss:$16 sps:$4 sm:$0xff]   ;;  %v2981_v40 = vld [vmem:[%s3193_s29 + $0x4a0] ss:$16 sps:$4 sm:$0xff]  }
  0x72   : > { %1689 = vmatprep.subr.bf16.mxu0 %v2899_v41  ;;  %1853 = vmatprep.subr.bf16.mxu1 %v2902_v42  ;;  %v2984_v41 = vld [vmem:[%s3193_s29 + $0x4a8] ss:$16 sps:$4 sm:$0xff]   ;;  %v2989_v42 = vld [vmem:[%s3193_s29 + $0x4c4] ss:$16 sps:$4 sm:$0xff]  }
  0x75   : > { %1690 = vmatpush1.bf16.msra.mxu0 %v2897_v43  ;;  %1854 = vmatpush1.bf16.msra.mxu1 %v2900_v45  ;;  %v2992_v43 = vld [vmem:[%s3193_s29 + $0x4cc] ss:$16 sps:$4 sm:$0xff]   ;;  %v2987_v45 = vld [vmem:[%s3193_s29 + $0x4c0] ss:$16 sps:$4 sm:$0xff]  }
  0x76   : > { %1691 = vmatprep.subr.bf16.mxu0 %v2905_v46  ;;  %1855 = vmatprep.subr.bf16.mxu1 %v2908_v47  ;;  %v2990_v46 = vld [vmem:[%s3193_s29 + $0x4c8] ss:$16 sps:$4 sm:$0xff]   ;;  %v2995_v47 = vld [vmem:[%s3193_s29 + $0x4e4] ss:$16 sps:$4 sm:$0xff]  }
  0x79   : > { %1692 = vmatpush1.bf16.msra.mxu0 %v2903_v48  ;;  %1856 = vmatpush1.bf16.msra.mxu1 %v2906_v49  ;;  %v2998_v48 = vld [vmem:[%s3193_s29 + $0x4ec] ss:$16 sps:$4 sm:$0xff]   ;;  %v2993_v49 = vld [vmem:[%s3193_s29 + $0x4e0] ss:$16 sps:$4 sm:$0xff]  }
  0x7a   : > { %1693 = vmatprep.subr.bf16.mxu0 %v2911_v51  ;;  %1857 = vmatprep.subr.bf16.mxu1 %v2914_v52  ;;  %v2996_v51 = vld [vmem:[%s3193_s29 + $0x4e8] ss:$16 sps:$4 sm:$0xff]   ;;  %v3001_v52 = vld [vmem:[%s3193_s29 + $0x504] ss:$16 sps:$4 sm:$0xff]  }
  0x7d   : > { %1694 = vmatpush1.bf16.msra.mxu0 %v2909_v53  ;;  %1858 = vmatpush1.bf16.msra.mxu1 %v2912_v54  ;;  %v3004_v53 = vld [vmem:[%s3193_s29 + $0x50c] ss:$16 sps:$4 sm:$0xff]   ;;  %v2999_v54 = vld [vmem:[%s3193_s29 + $0x500] ss:$16 sps:$4 sm:$0xff]  }
  0x7e   : > { %1695 = vmatprep.subr.bf16.mxu0 %v2917_v55  ;;  %1859 = vmatprep.subr.bf16.mxu1 %v2920_v56  ;;  %v3002_v55 = vld [vmem:[%s3193_s29 + $0x508] ss:$16 sps:$4 sm:$0xff]   ;;  %v3007_v56 = vld [vmem:[%s3193_s29 + $0x524] ss:$16 sps:$4 sm:$0xff]  }
  0x81   : > { %1696 = vmatpush1.bf16.msra.mxu0 %v2915_v57  ;;  %1860 = vmatpush1.bf16.msra.mxu1 %v2918_v58  ;;  %v3010_v57 = vld [vmem:[%s3193_s29 + $0x52c] ss:$16 sps:$4 sm:$0xff]   ;;  %v3005_v58 = vld [vmem:[%s3193_s29 + $0x520] ss:$16 sps:$4 sm:$0xff]  }
  0x82   : > { %1697 = vmatprep.subr.bf16.mxu0 %v2923_v59  ;;  %1861 = vmatprep.subr.bf16.mxu1 %v2926_v60  ;;  %v3008_v59 = vld [vmem:[%s3193_s29 + $0x528] ss:$16 sps:$4 sm:$0xff]   ;;  %v3013_v60 = vld [vmem:[%s3193_s29 + $0x544] ss:$16 sps:$4 sm:$0xff]  }
  0x85   : > { %1698 = vmatpush1.bf16.msra.mxu0 %v2921_v61  ;;  %1862 = vmatpush1.bf16.msra.mxu1 %v2924_v62  ;;  %v3016_v61 = vld [vmem:[%s3193_s29 + $0x54c] ss:$16 sps:$4 sm:$0xff]   ;;  %v3011_v62 = vld [vmem:[%s3193_s29 + $0x540] ss:$16 sps:$4 sm:$0xff]  }
  0x86   : > { %1699 = vmatprep.subr.bf16.mxu0 %v2929_v63  ;;  %1863 = vmatprep.subr.bf16.mxu1 %v2932_v0  ;;  %v3014_v63 = vld [vmem:[%s3193_s29 + $0x548] ss:$16 sps:$4 sm:$0xff]   ;;  %v3019_v0 = vld [vmem:[%s3193_s29 + $0x564] ss:$16 sps:$4 sm:$0xff]  }
  0x89   : > { %1700 = vmatpush1.bf16.msra.mxu0 %v2927_v1  ;;  %1864 = vmatpush1.bf16.msra.mxu1 %v2930_v2  ;;  %v3022_v1 = vld [vmem:[%s3193_s29 + $0x56c] ss:$16 sps:$4 sm:$0xff]   ;;  %v3017_v2 = vld [vmem:[%s3193_s29 + $0x560] ss:$16 sps:$4 sm:$0xff]  }
  0x8a   : > { %1701 = vmatprep.subr.bf16.mxu0 %v2935_v3  ;;  %1865 = vmatprep.subr.bf16.mxu1 %v2938_v4  ;;  %v3020_v3 = vld [vmem:[%s3193_s29 + $0x568] ss:$16 sps:$4 sm:$0xff]   ;;  %v3025_v4 = vld [vmem:[%s3193_s29 + $0x584] ss:$16 sps:$4 sm:$0xff]  }
  0x8d   : > { %1702 = vmatpush1.bf16.msra.mxu0 %v2933_v5  ;;  %1866 = vmatpush1.bf16.msra.mxu1 %v2936_v6  ;;  %v3028_v5 = vld [vmem:[%s3193_s29 + $0x58c] ss:$16 sps:$4 sm:$0xff]   ;;  %v3023_v6 = vld [vmem:[%s3193_s29 + $0x580] ss:$16 sps:$4 sm:$0xff]  }
  0x8e   : > { %1703 = vmatprep.subr.bf16.mxu0 %v2941_v7  ;;  %1867 = vmatprep.subr.bf16.mxu1 %v2944_v8  ;;  %v3026_v7 = vld [vmem:[%s3193_s29 + $0x588] ss:$16 sps:$4 sm:$0xff]   ;;  %v3031_v8 = vld [vmem:[%s3193_s29 + $0x5a4] ss:$16 sps:$4 sm:$0xff]  }
  0x91   : > { %1704 = vmatpush1.bf16.msra.mxu0 %v2939_v9  ;;  %1868 = vmatpush1.bf16.msra.mxu1 %v2942_v10  ;;  %v3034_v9 = vld [vmem:[%s3193_s29 + $0x5ac] ss:$16 sps:$4 sm:$0xff]   ;;  %v3029_v10 = vld [vmem:[%s3193_s29 + $0x5a0] ss:$16 sps:$4 sm:$0xff]  }
  0x92   : > { %1705 = vmatprep.subr.bf16.mxu0 %v2947_v11  ;;  %1869 = vmatprep.subr.bf16.mxu1 %v2950_v12  ;;  %v3032_v11 = vld [vmem:[%s3193_s29 + $0x5a8] ss:$16 sps:$4 sm:$0xff]   ;;  %v3037_v12 = vld [vmem:[%s3193_s29 + $0x5c4] ss:$16 sps:$4 sm:$0xff]  }
  0x95   : > { %1706 = vmatpush1.bf16.msra.mxu0 %v2945_v14  ;;  %1870 = vmatpush1.bf16.msra.mxu1 %v2948_v15  ;;  %v3040_v14 = vld [vmem:[%s3193_s29 + $0x5cc] ss:$16 sps:$4 sm:$0xff]   ;;  %v3035_v15 = vld [vmem:[%s3193_s29 + $0x5c0] ss:$16 sps:$4 sm:$0xff]  }
  0x96   : > { %1716 = vmatprep.subr.bf16.mxu0 %v2953_v16  ;;  %1880 = vmatprep.subr.bf16.mxu1 %v2956_v17  ;;  %v3038_v16 = vld [vmem:[%s3193_s29 + $0x5c8] ss:$16 sps:$4 sm:$0xff]   ;;  %v3043_v17 = vld [vmem:[%s3193_s29 + $0x5e4] ss:$16 sps:$4 sm:$0xff]  }
  0x98   : > { %1708 = vmatmul.mubr.bf16.vlgmr.msra.gmra.mrb[0].mxu0 %v3270_v13  ;;  %1872 = vmatmul.mubr.bf16.vlgmr.msra.gmra.mrb[0].mxu1 %v3270_v13  ;;  %v2963_v13 = vld [vmem:[%s3193_s29 + $0x440] ss:$16 sps:$4 sm:$0xff]  }
  0x99   : > { %1717 = vmatpush1.bf16.msra.mxu0 %v2951_v18  ;;  %1881 = vmatpush1.bf16.msra.mxu1 %v2954_v19  ;;  %v3046_v18 = vld [vmem:[%s3193_s29 + $0x5ec] ss:$16 sps:$4 sm:$0xff]   ;;  %v3041_v19 = vld [vmem:[%s3193_s29 + $0x5e0] ss:$16 sps:$4 sm:$0xff]  }
  0x9a   : > { %1718 = vmatprep.subr.bf16.mxu0 %v2959_v21  ;;  %1882 = vmatprep.subr.bf16.mxu1 %v2962_v22  ;;  %v3044_v21 = vld [vmem:[%s3193_s29 + $0x5e8] ss:$16 sps:$4 sm:$0xff]   ;;  %v3049_v22 = vld [vmem:[%s3193_s29 + $0x604] ss:$16 sps:$4 sm:$0xff]  }
  0x9b   : > { %1748 = vmatprep.mubr.bf16.mxu0 %v506_v24  ;;  %1912 = vmatprep.mubr.bf16.mxu1 %v506_v24  ;;  %v3052_v24 = vld [vmem:[%s3193_s29 + $0x60c] ss:$16 sps:$4 sm:$0xff]  }
  0x9d   : > { %1719 = vmatpush1.bf16.msra.mxu0 %v2957_v25  ;;  %1883 = vmatpush1.bf16.msra.mxu1 %v2960_v26  ;;  %v3047_v25 = vld [vmem:[%s3193_s29 + $0x600] ss:$16 sps:$4 sm:$0xff]   ;;  %v3050_v26 = vld [vmem:[%s3193_s29 + $0x608] ss:$16 sps:$4 sm:$0xff]  }
  0x9e   : > { %1720 = vmatprep.subr.bf16.mxu0 %v2965_v27  ;;  %1884 = vmatprep.subr.bf16.mxu1 %v2968_v28  ;;  %v3055_v27 = vld [vmem:[%s3193_s29 + $0x624] ss:$16 sps:$4 sm:$0xff]   ;;  %v3058_v28 = vld [vmem:[%s3193_s29 + $0x62c] ss:$16 sps:$4 sm:$0xff]  }
  0xa1   : > { %1721 = vmatpush1.bf16.msra.mxu0 %v2963_v13  ;;  %1885 = vmatpush1.bf16.msra.mxu1 %v2966_v29  ;;  %v3053_v13 = vld [vmem:[%s3193_s29 + $0x620] ss:$16 sps:$4 sm:$0xff]   ;;  %v3056_v29 = vld [vmem:[%s3193_s29 + $0x628] ss:$16 sps:$4 sm:$0xff]  }
  0xa2   : > { %1722 = vmatprep.subr.bf16.mxu0 %v2971_v30  ;;  %1886 = vmatprep.subr.bf16.mxu1 %v2974_v31  ;;  %v3061_v30 = vld [vmem:[%s3193_s29 + $0x644] ss:$16 sps:$4 sm:$0xff]   ;;  %v3064_v31 = vld [vmem:[%s3193_s29 + $0x64c] ss:$16 sps:$4 sm:$0xff]  }
  0xa5   : > { %1723 = vmatpush1.bf16.msra.mxu0 %v2969_v32  ;;  %1887 = vmatpush1.bf16.msra.mxu1 %v2972_v33  ;;  %v3142_v32 = vmov 0   ;;  %v3062_v33 = vld [vmem:[%s3193_s29 + $0x648] ss:$16 sps:$4 sm:$0xff]  }
  0xa6   : > { %1724 = vmatprep.subr.bf16.mxu0 %v2977_v34  ;;  %1888 = vmatprep.subr.bf16.mxu1 %v2980_v35  ;;  %v3067_v34 = vld [vmem:[%s3193_s29 + $0x664] ss:$16 sps:$4 sm:$0xff]   ;;  %v3070_v35 = vld [vmem:[%s3193_s29 + $0x66c] ss:$16 sps:$4 sm:$0xff]  }
  0xa9   : > { %1725 = vmatpush1.bf16.msra.mxu0 %v2975_v36  ;;  %1889 = vmatpush1.bf16.msra.mxu1 %v2978_v37  ;;  %v3065_v36 = vld [vmem:[%s3193_s29 + $0x660] ss:$16 sps:$4 sm:$0xff]   ;;  %v3068_v37 = vld [vmem:[%s3193_s29 + $0x668] ss:$16 sps:$4 sm:$0xff]  }
  0xaa   : > { %1726 = vmatprep.subr.bf16.mxu0 %v2983_v38  ;;  %1890 = vmatprep.subr.bf16.mxu1 %v2986_v39  ;;  %v3073_v38 = vld [vmem:[%s3193_s29 + $0x684] ss:$16 sps:$4 sm:$0xff]   ;;  %v3076_v39 = vld [vmem:[%s3193_s29 + $0x68c] ss:$16 sps:$4 sm:$0xff]  }
  0xad   : > { %1727 = vmatpush1.bf16.msra.mxu0 %v2981_v40  ;;  %1891 = vmatpush1.bf16.msra.mxu1 %v2984_v41  ;;  %v3071_v40 = vld [vmem:[%s3193_s29 + $0x680] ss:$16 sps:$4 sm:$0xff]   ;;  %v3074_v41 = vld [vmem:[%s3193_s29 + $0x688] ss:$16 sps:$4 sm:$0xff]  }
  0xae   : > { %1728 = vmatprep.subr.bf16.mxu0 %v2989_v42  ;;  %1892 = vmatprep.subr.bf16.mxu1 %v2992_v43  ;;  %v3079_v42 = vld [vmem:[%s3193_s29 + $0x6a4] ss:$16 sps:$4 sm:$0xff]   ;;  %v3082_v43 = vld [vmem:[%s3193_s29 + $0x6ac] ss:$16 sps:$4 sm:$0xff]  }
  0xb1   : > { %1729 = vmatpush1.bf16.msra.mxu0 %v2987_v45  ;;  %1893 = vmatpush1.bf16.msra.mxu1 %v2990_v46  ;;  %v3077_v45 = vld [vmem:[%s3193_s29 + $0x6a0] ss:$16 sps:$4 sm:$0xff]   ;;  %v3080_v46 = vld [vmem:[%s3193_s29 + $0x6a8] ss:$16 sps:$4 sm:$0xff]  }
  0xb2   : > { %1730 = vmatprep.subr.bf16.mxu0 %v2995_v47  ;;  %1894 = vmatprep.subr.bf16.mxu1 %v2998_v48  ;;  %v3085_v47 = vld [vmem:[%s3193_s29 + $0x6c4] ss:$16 sps:$4 sm:$0xff]   ;;  %v3088_v48 = vld [vmem:[%s3193_s29 + $0x6cc] ss:$16 sps:$4 sm:$0xff]  }
  0xb5   : > { %1731 = vmatpush1.bf16.msra.mxu0 %v2993_v49  ;;  %1895 = vmatpush1.bf16.msra.mxu1 %v2996_v51  ;;  %v3083_v49 = vld [vmem:[%s3193_s29 + $0x6c0] ss:$16 sps:$4 sm:$0xff]   ;;  %v3086_v51 = vld [vmem:[%s3193_s29 + $0x6c8] ss:$16 sps:$4 sm:$0xff]  }
  0xb6   : > { %1732 = vmatprep.subr.bf16.mxu0 %v3001_v52  ;;  %1896 = vmatprep.subr.bf16.mxu1 %v3004_v53  ;;  %v3091_v52 = vld [vmem:[%s3193_s29 + $0x6e4] ss:$16 sps:$4 sm:$0xff]   ;;  %v3094_v53 = vld [vmem:[%s3193_s29 + $0x6ec] ss:$16 sps:$4 sm:$0xff]  }
  0xb9   : > { %1733 = vmatpush1.bf16.msra.mxu0 %v2999_v54  ;;  %1897 = vmatpush1.bf16.msra.mxu1 %v3002_v55  ;;  %v491_v54 = vcombine.high %v3341_v20, %v3341_v20  ;;  %v3089_v55 = vld [vmem:[%s3193_s29 + $0x6e0] ss:$16 sps:$4 sm:$0xff]  }
  0xba   : > { %1734 = vmatprep.subr.bf16.mxu0 %v3007_v56  ;;  %1898 = vmatprep.subr.bf16.mxu1 %v3010_v57  ;;  %v3092_v56 = vld [vmem:[%s3193_s29 + $0x6e8] ss:$16 sps:$4 sm:$0xff]  }
  0xbb   : > { %v505_v57 = vrot.slane %v491_v54, %v3243_v50  ;;  %v3096_v50 = vld [vmem:[%s3564_s3 + $0x40] sm:$0xff] (!%p2642_p6)  }
  0xbd   : > { %1735 = vmatpush1.bf16.msra.mxu0 %v3005_v58  ;;  %1899 = vmatpush1.bf16.msra.mxu1 %v3008_v59 }
  0xbe   : > { %1736 = vmatprep.subr.bf16.mxu0 %v3013_v60  ;;  %1900 = vmatprep.subr.bf16.mxu1 %v3016_v61  ;;  %v244_v60 = vld [vmem:[#allocation2] sm:$0xff] }
  0xc1   : > { %1737 = vmatpush1.bf16.msra.mxu0 %v3011_v62  ;;  %1901 = vmatpush1.bf16.msra.mxu1 %v3014_v63  ;;  %v245_v62 = vld [vmem:[#allocation2 + $0x8] sm:$0xff] }
  0xc2   : > { %1738 = vmatprep.subr.bf16.mxu0 %v3019_v0  ;;  %1902 = vmatprep.subr.bf16.mxu1 %v3022_v1 }
  0xc5   : > { %1739 = vmatpush1.bf16.msra.mxu0 %v3017_v2  ;;  %1903 = vmatpush1.bf16.msra.mxu1 %v3020_v3 }
  0xc6   : > { %1740 = vmatprep.subr.bf16.mxu0 %v3025_v4  ;;  %1904 = vmatprep.subr.bf16.mxu1 %v3028_v5 }
  0xc9   : > { %1741 = vmatpush1.bf16.msra.mxu0 %v3023_v6  ;;  %1905 = vmatpush1.bf16.msra.mxu1 %v3026_v7  ;;  %v3097_v7 = vld [vmem:[%s3564_s3 + $0xc0] sm:$0xff] (!%p2642_p6)  }
  0xca   : > { %1742 = vmatprep.subr.bf16.mxu0 %v3031_v8  ;;  %1906 = vmatprep.subr.bf16.mxu1 %v3034_v9  ;;  %v3098_v8 = vld [vmem:[%s3564_s3] sm:$0xff] (!%p2642_p6)  }
  0xcb   : > { %v3099_v9 = vld [vmem:[%s3564_s3 + $0x80] sm:$0xff] (!%p2642_p6)  }
  0xcd   : > { %1743 = vmatpush1.bf16.msra.mxu0 %v3029_v10  ;;  %1907 = vmatpush1.bf16.msra.mxu1 %v3032_v11  ;;  %v3100_v10 = vld [vmem:[%s3564_s3 + $0x48] sm:$0xff] (!%p2642_p6)  }
  0xce   : > { %1744 = vmatprep.subr.bf16.mxu0 %v3037_v12  ;;  %1908 = vmatprep.subr.bf16.mxu1 %v3040_v14  ;;  %v3101_v11 = vld [vmem:[%s3564_s3 + $0xc8] sm:$0xff] (!%p2642_p6)  }
  0xcf   : > { %v3102_v12 = vld [vmem:[%s3564_s3 + $0x8] sm:$0xff] (!%p2642_p6)  }
  0xd0   : > { %v3103_v14 = vld [vmem:[%s3564_s3 + $0x88] sm:$0xff] (!%p2642_p6)  }
  0xd1   : > { %1745 = vmatpush1.bf16.msra.mxu0 %v3035_v15  ;;  %1909 = vmatpush1.bf16.msra.mxu1 %v3038_v16  ;;  %v3104_v15 = vld [vmem:[%s3564_s3 + $0x50] sm:$0xff] (!%p2642_p6)  }
  0xd2   : > { %1746 = vmatprep.subr.bf16.mxu0 %v3043_v17  ;;  %1910 = vmatprep.subr.bf16.mxu1 %v3046_v18  ;;  %v3105_v16 = vld [vmem:[%s3564_s3 + $0xd0] sm:$0xff] (!%p2642_p6)  }
  0xd3   : > { %v3106_v17 = vld [vmem:[%s3564_s3 + $0x10] sm:$0xff] (!%p2642_p6)  }
  0xd4   : > { %v3107_v18 = vld [vmem:[%s3564_s3 + $0x90] sm:$0xff] (!%p2642_p6)  }
  0xd5   : > { %1747 = vmatpush1.bf16.msra.mxu0 %v3041_v19  ;;  %1911 = vmatpush1.bf16.msra.mxu1 %v3044_v21  ;;  %v3108_v19 = vld [vmem:[%s3564_s3 + $0x58] sm:$0xff] (!%p2642_p6)  }
  0xd6   : > { %1757 = vmatprep.subr.bf16.mxu0 %v3049_v22  ;;  %1921 = vmatprep.subr.bf16.mxu1 %v3052_v24  ;;  %v3109_v21 = vld [vmem:[%s3564_s3 + $0xd8] sm:$0xff] (!%p2642_p6)  }
  0xd7   : > { %v3110_v22 = vld [vmem:[%s3564_s3 + $0x18] sm:$0xff] (!%p2642_p6)  }
  0xd8   : > { %1749 = vmatmul.mubr.bf16.vlgmr.msra.gmra.mrb[0].mxu0 %v3347_v23  ;;  %1913 = vmatmul.mubr.bf16.vlgmr.msra.gmra.mrb[0].mxu1 %v3347_v23  ;;  %v3059_v23 = vld [vmem:[%s3193_s29 + $0x640] ss:$16 sps:$4 sm:$0xff]   ;;  %v3111_v24 = vld [vmem:[%s3564_s3 + $0x98] sm:$0xff] (!%p2642_p6)  }
  0xd9   : > { %1758 = vmatpush1.bf16.msra.mxu0 %v3047_v25  ;;  %1922 = vmatpush1.bf16.msra.mxu1 %v3050_v26  ;;  %v3112_v25 = vld [vmem:[%s3564_s3 + $0x60] sm:$0xff] (!%p2642_p6)  }
  0xda   : > { %1759 = vmatprep.subr.bf16.mxu0 %v3055_v27  ;;  %1923 = vmatprep.subr.bf16.mxu1 %v3058_v28  ;;  %v3113_v26 = vld [vmem:[%s3564_s3 + $0xe0] sm:$0xff] (!%p2642_p6)  }
  0xdb   : > { %1789 = vmatprep.mubr.bf16.mxu0 %v3142_v32  ;;  %1953 = vmatprep.mubr.bf16.mxu1 %v3142_v32  ;;  %v3114_v27 = vld [vmem:[%s3564_s3 + $0x20] sm:$0xff] (!%p2642_p6)   ;;  %v3120_v32 = vld [vmem:[%s3564_s3 + $0x70] sm:$0xff] (!%p2642_p6)  }
  0xdc   : > { %v3115_v28 = vld [vmem:[%s3564_s3 + $0xa0] sm:$0xff] (!%p2642_p6)  }
  0xdd   : > { %1760 = vmatpush1.bf16.msra.mxu0 %v3053_v13  ;;  %1924 = vmatpush1.bf16.msra.mxu1 %v3056_v29  ;;  %v3116_v13 = vld [vmem:[%s3564_s3 + $0x68] sm:$0xff] (!%p2642_p6)  }
  0xde   : > { %1761 = vmatprep.subr.bf16.mxu0 %v3061_v30  ;;  %1925 = vmatprep.subr.bf16.mxu1 %v3064_v31  ;;  %v3117_v29 = vld [vmem:[%s3564_s3 + $0xe8] sm:$0xff] (!%p2642_p6)  }
  0xdf   : > { %v3118_v30 = vld [vmem:[%s3564_s3 + $0x28] sm:$0xff] (!%p2642_p6)  }
  0xe0   : > { %v3119_v31 = vld [vmem:[%s3564_s3 + $0xa8] sm:$0xff] (!%p2642_p6)  }
  0xe1   : > { %1762 = vmatpush1.bf16.msra.mxu0 %v3059_v23  ;;  %1926 = vmatpush1.bf16.msra.mxu1 %v3062_v33  ;;  %v3121_v23 = vld [vmem:[%s3564_s3 + $0xf0] sm:$0xff] (!%p2642_p6)  }
  0xe2   : > { %1763 = vmatprep.subr.bf16.mxu0 %v3067_v34  ;;  %1927 = vmatprep.subr.bf16.mxu1 %v3070_v35  ;;  %v3122_v33 = vld [vmem:[%s3564_s3 + $0x30] sm:$0xff] (!%p2642_p6)   ;;  %v1984_v34 = vsub.s32 (!%p2642_p6), 0, %v3235_v44 }
  0xe3   : > { %v3123_v35 = vld [vmem:[%s3564_s3 + $0xb0] sm:$0xff] (!%p2642_p6)  }
  0xe5   : > { %1764 = vmatpush1.bf16.msra.mxu0 %v3065_v36  ;;  %1928 = vmatpush1.bf16.msra.mxu1 %v3068_v37  ;;  %v1988_v36 = vsub.s32 (!%p2642_p6), 1, %v3235_v44  ;;  %v3124_v37 = vld [vmem:[%s3564_s3 + $0x78] sm:$0xff] (!%p2642_p6)  }
  0xe6   : > { %1765 = vmatprep.subr.bf16.mxu0 %v3073_v38  ;;  %1929 = vmatprep.subr.bf16.mxu1 %v3076_v39  ;;  %v1992_v38 = vsub.s32 (!%p2642_p6), 2, %v3235_v44  ;;  %v3125_v39 = vld [vmem:[%s3564_s3 + $0xf8] sm:$0xff] (!%p2642_p6)  }
  0xe9   : > { %1766 = vmatpush1.bf16.msra.mxu0 %v3071_v40  ;;  %1930 = vmatpush1.bf16.msra.mxu1 %v3074_v41  ;;  %v1996_v40 = vsub.s32 (!%p2642_p6), 3, %v3235_v44  ;;  %v3126_v41 = vld [vmem:[%s3564_s3 + $0x38] sm:$0xff] (!%p2642_p6)  }
  0xea   : > { %1767 = vmatprep.subr.bf16.mxu0 %v3079_v42  ;;  %1931 = vmatprep.subr.bf16.mxu1 %v3082_v43  ;;  %v3127_v42 = vld [vmem:[%s3564_s3 + $0xb8] sm:$0xff] (!%p2642_p6)   ;;  %v1980_v43 = vld [vmem:[%s3563_s2] sm:$0xf] (!%p2642_p6) }
  0xeb   : > { %v1997_v44 = vrot.slane (!%p2642_p6), %v1980_v43, %v1996_v40 }
  0xed   : > { %1768 = vmatpush1.bf16.msra.mxu0 %v3077_v45  ;;  %1932 = vmatpush1.bf16.msra.mxu1 %v3080_v46  ;;  %v1985_v45 = vrot.slane (!%p2642_p6), %v1980_v43, %v1984_v34  ;;  %v1989_v46 = vrot.slane (!%p2642_p6), %v1980_v43, %v1988_v36 }
  0xee   : > { %1769 = vmatprep.subr.bf16.mxu0 %v3085_v47  ;;  %1933 = vmatprep.subr.bf16.mxu1 %v3088_v48  ;;  %v1993_v47 = vrot.slane (!%p2642_p6), %v1980_v43, %v1992_v38 }
  0xf1   : > { %1770 = vmatpush1.bf16.msra.mxu0 %v3083_v49  ;;  %1934 = vmatpush1.bf16.msra.mxu1 %v3086_v51  ;;  %v1998_v51 = vcombine.low (!%p2642_p6), %v1985_v45, %v1989_v46 }
  0xf2   : > { %1771 = vmatprep.subr.bf16.mxu0 %v3091_v52  ;;  %1935 = vmatprep.subr.bf16.mxu1 %v3094_v53  ;;  %v1999_v52 = vcombine.low (!%p2642_p6), %v1993_v47, %v1997_v44 }
  0xf5   : > { %1772 = vmatpush1.bf16.msra.mxu0 %v3089_v55  ;;  %1936 = vmatpush1.bf16.msra.mxu1 %v3092_v56 }
  0xf6   : > { %2679 = vmatprep.subr.bf16.mxu0 (!%p2642_p6), %v3096_v50  ;;  %2701 = vmatprep.subr.bf16.mxu1 (!%p2642_p6), %v3097_v7 }
  0xf8   : > { %1790 = vmatmul.mubr.bf16.vlgmr.msra.gmra.mrb[0].mxu0 %v505_v57  ;;  %1954 = vmatmul.mubr.bf16.vlgmr.msra.gmra.mrb[0].mxu1 %v505_v57 }
  0xf9   : > { %2680 = vmatpush3.bf16.msra.mxu0 (!%p2642_p6), %v3098_v8  ;;  %2702 = vmatpush3.bf16.msra.mxu1 (!%p2642_p6), %v3099_v9 }
  0xfa   : > { %2681 = vmatprep.subr.bf16.mxu0 (!%p2642_p6), %v3100_v10  ;;  %2703 = vmatprep.subr.bf16.mxu1 (!%p2642_p6), %v3101_v11 }
  0xfd   : > { %2682 = vmatpush3.bf16.msra.mxu0 (!%p2642_p6), %v3102_v12  ;;  %2704 = vmatpush3.bf16.msra.mxu1 (!%p2642_p6), %v3103_v14 }
  0xfe   : > { %2683 = vmatprep.subr.bf16.mxu0 (!%p2642_p6), %v3104_v15  ;;  %2705 = vmatprep.subr.bf16.mxu1 (!%p2642_p6), %v3105_v16 }
 0x101   : > { %2684 = vmatpush3.bf16.msra.mxu0 (!%p2642_p6), %v3106_v17  ;;  %2706 = vmatpush3.bf16.msra.mxu1 (!%p2642_p6), %v3107_v18 }
 0x102   : > { %2685 = vmatprep.subr.bf16.mxu0 (!%p2642_p6), %v3108_v19  ;;  %2707 = vmatprep.subr.bf16.mxu1 (!%p2642_p6), %v3109_v21 }
 0x105   : > { %2686 = vmatpush3.bf16.msra.mxu0 (!%p2642_p6), %v3110_v22  ;;  %2708 = vmatpush3.bf16.msra.mxu1 (!%p2642_p6), %v3111_v24 }
 0x106   : > { %2687 = vmatprep.subr.bf16.mxu0 (!%p2642_p6), %v3112_v25  ;;  %2709 = vmatprep.subr.bf16.mxu1 (!%p2642_p6), %v3113_v26 }
 0x109   : > { %2688 = vmatpush3.bf16.msra.mxu0 (!%p2642_p6), %v3114_v27  ;;  %2710 = vmatpush3.bf16.msra.mxu1 (!%p2642_p6), %v3115_v28 }
 0x10a   : > { %2689 = vmatprep.subr.bf16.mxu0 (!%p2642_p6), %v3116_v13  ;;  %2711 = vmatprep.subr.bf16.mxu1 (!%p2642_p6), %v3117_v29 }
 0x10d   : > { %2690 = vmatpush3.bf16.msra.mxu0 (!%p2642_p6), %v3118_v30  ;;  %2712 = vmatpush3.bf16.msra.mxu1 (!%p2642_p6), %v3119_v31 }
 0x10e   : > { %2691 = vmatprep.subr.bf16.mxu0 (!%p2642_p6), %v3120_v32  ;;  %2713 = vmatprep.subr.bf16.mxu1 (!%p2642_p6), %v3121_v23 }
 0x111   : > { %2692 = vmatpush3.bf16.msra.mxu0 (!%p2642_p6), %v3122_v33  ;;  %2714 = vmatpush3.bf16.msra.mxu1 (!%p2642_p6), %v3123_v35 }
 0x112   : > { %2693 = vmatprep.subr.bf16.mxu0 (!%p2642_p6), %v3124_v37  ;;  %2715 = vmatprep.subr.bf16.mxu1 (!%p2642_p6), %v3125_v39 }
 0x115   : > { %2694 = vmatpush3.bf16.msra.mxu0 (!%p2642_p6), %v3126_v41  ;;  %2716 = vmatpush3.bf16.msra.mxu1 (!%p2642_p6), %v3127_v42 }
 0x1cb   : > { %v1791_v58 = vpop.f32.mrb[0].mxu0  ;;  %v1955_v59 = vpop.f32.mrb[0].mxu1  ;;  %1977 = sbr.rel (%p2642_p6) target bundleno = 1014 (0x3f6), region = 48 }
 0x1cc   : > { %v1793_v61 = vpop.f32.mrb[1].mxu0  ;;  %v1957_v63 = vpop.f32.mrb[1].mxu1 }
 0x1cd   : > { %v1966_v0 = vcombine.low %v1791_v58, %v1793_v61  ;;  %v1967_v20 = vcombine.low %v1955_v59, %v1957_v63  ;;  %v1795_v1 = vpop.f32.mrb[2].mxu0  ;;  %v1959_v2 = vpop.f32.mrb[2].mxu1  ;;  %v2643_v63 = vld [vmem:[%s3565_s4] ss:$0 sm:$0xff] (!%p2642_p6) }
 0x1ce   : > { %v1796_v3 = vpop.f32.mrb[3].mxu0  ;;  %v1960_v4 = vpop.f32.mrb[3].mxu1 }
 0x1cf   : > { %v1970_v5 = vadd.f32 %v1966_v0, %v244_v60  ;;  %v1971_v6 = vadd.f32 %v1967_v20, %v245_v62 }
 0x1d1   : > { %1972 = vst [vmem:[#allocation2] sm:$0xff] %v1970_v5  ;;  %1973 = vst [vmem:[#allocation2 + $0x8] sm:$0xff] %v1971_v6 }
 0x1d8   : > { %v1978_v48 = vld [vmem:[#allocation2] sm:$0xff]  ;;  %v1979_v49 = vld [vmem:[#allocation2 + $0x8] sm:$0xff] }
 0x1d9   : > { %v2002_v53 = vadd.f32 %v1998_v51, %v1978_v48  ;;  %v2003_v54 = vadd.f32 %v1999_v52, %v1979_v49 }
 0x1db   : > { %v2006_v55 = vcombine.high %v2002_v53, %v2002_v53  ;;  %v2007_v56 = vcombine.high %v2003_v54, %v2003_v54  ;;  %v2010_v57 = vpack.c.bf16 %v2002_v53, %v2002_v53  ;;  %v2012_v58 = vpack.c.bf16 %v2003_v54, %v2003_v54 }
 0x1dd   : > { %v2011_v59 = vpack.c.bf16 %v2006_v55, %v2006_v55  ;;  %v2013_v60 = vpack.c.bf16 %v2007_v56, %v2007_v56 }
 0x1df   : > { %2309 = vmatprep.mubr.bf16.mxu0 %v2011_v59  ;;  %2349 = vmatprep.mubr.bf16.mxu1 %v2013_v60 }
 0x1e0   : > { %2310 = vmatmul.mubr.bf16.vlgmr.msra.gmra.mrb[0].mxu0 %v2010_v57  ;;  %2350 = vmatmul.mubr.bf16.vlgmr.msra.gmra.mrb[0].mxu1 %v2012_v58 }
 0x2b3   : > { %v2695_v61 = vpop.f32.mrb[0].mxu0  ;;  %v2717_v62 = vpop.f32.mrb[0].mxu1 }
 0x2b4   : > { %v2696_v0 = vpop.f32.mrb[1].mxu0  ;;  %v2718_v20 = vpop.f32.mrb[1].mxu1 }
 0x2b5   : > { %v2697_v1 = vadd.f32 %v2696_v0, %v2695_v61  ;;  %v2719_v2 = vadd.f32 %v2718_v20, %v2717_v62  ;;  %v2698_v3 = vpop.f32.mrb[2].mxu0  ;;  %v2720_v4 = vpop.f32.mrb[2].mxu1 }
 0x2b6   : > { %v2699_v5 = vpop.f32.mrb[3].mxu0  ;;  %v2721_v6 = vpop.f32.mrb[3].mxu1 }
 0x2b7   : > { %v2312_v50 = vadd.f32 %v2697_v1, %v2643_v63 }
 0x2b9   : > { %v2352_v7 = vadd.f32 %v2719_v2, %v2312_v50 }
 0x2bb   : > { %v2358_v8 = vsel %vm2357_vm0, %v2352_v7, -inf }
 0x2bc   : > { %2359 = vmax.xlane.f32.xlu0 %v2358_v8 }
 0x349   : > { %v2360_v9 = vpop.xlane.xlu0 %2359 }
 0x34a   : > { %v2361_v10 = vsub.f32 %v2352_v7, %v2360_v9 }
 0x34c   : > { %v2362_v11 = vmul.f32 1.442695, %v2361_v10 }
 0x34e   : > { %3128 = vpow2.f32 %v2362_v11 }
 0x358   : > { %v3129_v12 = vpop.eup %3128 }
 0x359   : > { %v2364_v14 = vsel %vm2357_vm0, %v3129_v12, 0.0 }
 0x35a   : > { %2365 = vadd.xlane.f32.xlu0 %v2364_v14 }
 0x3e7   : > { %v2366_v15 = vpop.xlane.xlu0 %2365 }
 0x3e8   : > { %3130 = vrcp.f32 %v2366_v15 }
 0x3f2   : > { %v3131_v16 = vpop.eup %3130 }
 0x3f3   : > { %v2368_v17 = vmul.f32 %v3131_v16, %v3129_v12 }
 0x3f5   : > { %2369 = vst.msk [vmem:[%s3566_s5] sm:$0xf] %vm2357_vm0, %v2368_v17 }
 0x3f6 PF: > { %s15_s18 = sadd.s32 1, %s3138_s18  }
 0x3f7   : > { %p12_p7 = scmp.ge.s32.totalorder %s15_s18, 6  }
 0x3f9   :  { %14 = sbr.rel (!%p12_p7) target bundleno = 1 (0x1), region = 77 }

// kernel: mnist_forward.5
= control target key start
LH: loop header
LB: loop body
LE: loop exit
PB: predicated region body
PF: predicated region fallthrough
CT: control target
= control target key end

     0   :  { %v7348_v0 = vmov 0   ;;  %vm1543_vm0 = vcmask 261120   ;;  %vm2586_vm1 = vcmask 523264   ;;  %s9820_s2 = inlined_call_operand.vmem [shape: bf16[800,64], index: 2, kind: input, shape index: {}]   ;;  %s9821_s0 = inlined_call_operand.vmem [shape: bf16[4,104,800], index: 0, kind: input, shape index: {}]   ;;  %s9822_s3 = inlined_call_operand.vmem [shape: bf16[800,64], index: 3, kind: input, shape index: {}]   ;;  %s9823_s1 = inlined_call_operand.vmem [shape: bf16[4,104,800], index: 1, kind: input, shape index: {}]   ;;  %s9824_s5 = inlined_call_operand.vmem [shape: f32[1,64], index: 5, kind: input, shape index: {}]   ;;  %s9825_s4 = inlined_call_operand.vmem [shape: f32[1,64], index: 4, kind: input, shape index: {}]   ;;  %s9826_s6 = inlined_call_operand.vmem [shape: bf16[104,128], index: 6, kind: output, shape index: {}]  }
   0x1   :  { %1622 = vmatprep.subr.bf16.mxu0 %v7348_v0  ;;  %v6728_v1 = vld [vmem:[%s9820_s2] sm:$0xff]   ;;  %v6730_v3 = vld [vmem:[%s9820_s2 + $0x8] sm:$0xff]   ;;  %v6732_v5 = vld [vmem:[%s9821_s0 + $0x18] ss:$28 sps:$4 sm:$0xff]  }
   0x2   :  { %v6729_v2 = vld [vmem:[%s9820_s2 + $0x180] sm:$0xff]   ;;  %1623 = vmatpush1.bf16.msra.mxu0 %v6728_v1  ;;  %v6731_v4 = vld [vmem:[%s9820_s2 + $0x188] sm:$0xff]   ;;  %6168 = vmatprep.mubr.msk.bf16.mxu1 %vm1543_vm0, %v6732_v5  ;;  %v6733_v6 = vld [vmem:[%s9820_s2 + $0x10] sm:$0xff]  }
   0x3   :  { %6164 = vmatprep.subr.bf16.mxu1 %v6729_v2  ;;  %1624 = vmatprep.subr.bf16.mxu0 %v7348_v0  ;;  %v6734_v7 = vld [vmem:[%s9821_s0 + $0x50] ss:$28 sps:$4 sm:$0xff]   ;;  %v6736_v8 = vld [vmem:[%s9822_s3] sm:$0xff]   ;;  %v6735_v10 = vld [vmem:[%s9820_s2 + $0x18] sm:$0xff]  }
   0x4   :  { %6165 = vmatpush3.bf16.msra.mxu1 %v6729_v2  ;;  %v6737_v9 = vld [vmem:[%s9821_s0 + $0x88] ss:$28 sps:$4 sm:$0xff]   ;;  %v6739_v13 = vld [vmem:[%s9821_s0 + $0xc0] ss:$28 sps:$4 sm:$0xff]   ;;  %v6742_v14 = vld [vmem:[%s9821_s0 + $0xf8] ss:$28 sps:$4 sm:$0xff]  }
   0x5   :  { %6166 = vmatprep.subr.bf16.mxu1 %v6731_v4  ;;  %v6741_v11 = vld [vmem:[%s9822_s3 + $0x8] sm:$0xff]   ;;  %v6738_v12 = vld [vmem:[%s9820_s2 + $0x20] sm:$0xff]   ;;  %v6745_v15 = vld [vmem:[%s9822_s3 + $0x10] sm:$0xff]  }
   0x6   :  { %1625 = vmatpush1.bf16.msra.mxu0 %v6730_v3  ;;  %v6740_v16 = vld [vmem:[%s9820_s2 + $0x28] sm:$0xff]   ;;  %v6743_v17 = vld [vmem:[%s9820_s2 + $0x30] sm:$0xff]   ;;  %v6750_v18 = vld [vmem:[%s9822_s3 + $0x18] sm:$0xff]  }
   0x7   :  { %1626 = vmatprep.subr.bf16.mxu0 %v7348_v0  ;;  %v6744_v19 = vld [vmem:[%s9821_s0 + $0x130] ss:$28 sps:$4 sm:$0xff]   ;;  %v6747_v20 = vld [vmem:[%s9821_s0 + $0x168] ss:$28 sps:$4 sm:$0xff]   ;;  %v6746_v21 = vld [vmem:[%s9820_s2 + $0x38] sm:$0xff]  }
   0x8   :  { %6167 = vmatpush3.bf16.msra.mxu1 %v6731_v4  ;;  %v6755_v22 = vld [vmem:[%s9822_s3 + $0x20] sm:$0xff]   ;;  %v6758_v24 = vld [vmem:[%s9822_s3 + $0x28] sm:$0xff]   ;;  %v6752_v26 = vld [vmem:[%s9821_s0 + $0x1d8] ss:$28 sps:$4 sm:$0xff]  }
   0x9   :  { %4307 = vmatprep.subr.bf16.mxu1 %v7348_v0  ;;  %v6748_v23 = vld [vmem:[%s9820_s2 + $0x40] sm:$0xff]   ;;  %v6751_v27 = vld [vmem:[%s9820_s2 + $0x48] sm:$0xff]   ;;  %v6762_v28 = vld [vmem:[%s9822_s3 + $0x30] sm:$0xff]  }
   0xa   :  { %1627 = vmatpush1.bf16.msra.mxu0 %v6733_v6  ;;  %v6749_v25 = vld [vmem:[%s9821_s0 + $0x1a0] ss:$28 sps:$4 sm:$0xff]   ;;  %v6753_v29 = vld [vmem:[%s9820_s2 + $0x50] sm:$0xff]   ;;  %v6757_v32 = vld [vmem:[%s9821_s0 + $0x248] ss:$28 sps:$4 sm:$0xff]  }
   0xb   :  { %6169 = vmatmul.mubr.msk.bf16.vlgmr.msra.gmra.mrb[0].mxu1 %vm1543_vm0, %v6734_v7  ;;  %1628 = vmatprep.subr.bf16.mxu0 %v7348_v0  ;;  %v6754_v30 = vld [vmem:[%s9821_s0 + $0x210] ss:$28 sps:$4 sm:$0xff]   ;;  %v6767_v31 = vld [vmem:[%s9822_s3 + $0x38] sm:$0xff]   ;;  %v6770_v33 = vld [vmem:[%s9821_s0 + $0x4] ss:$28 sps:$4 sm:$0xff]  }
   0xc   :  { %4308 = vmatpush1.bf16.msra.mxu1 %v6736_v8  ;;  %6172 = vmatprep.mubr.msk.bf16.mxu1 %vm1543_vm0, %v6737_v9  ;;  %v6756_v34 = vld [vmem:[%s9820_s2 + $0x58] sm:$0xff]   ;;  %v6774_v35 = vld [vmem:[%s9822_s3 + $0x40] sm:$0xff]   ;;  %v6780_v39 = vld [vmem:[%s9822_s3 + $0x48] sm:$0xff]  }
   0xd   :  { %4309 = vmatprep.subr.bf16.mxu1 %v7348_v0  ;;  %1654 = vmatprep.mubr.bf16.mxu0 %v6770_v33  ;;  %v6759_v36 = vld [vmem:[%s9820_s2 + $0x60] sm:$0xff]   ;;  %v6763_v38 = vld [vmem:[%s9821_s0 + $0x2b8] ss:$28 sps:$4 sm:$0xff]   ;;  %v6761_v40 = vld [vmem:[%s9820_s2 + $0x68] sm:$0xff]  }
   0xe   :  { %1629 = vmatpush1.bf16.msra.mxu0 %v6735_v10  ;;  %v6760_v37 = vld [vmem:[%s9821_s0 + $0x280] ss:$28 sps:$4 sm:$0xff]   ;;  %v6764_v41 = vld [vmem:[%s9820_s2 + $0x70] sm:$0xff]   ;;  %v6771_v44 = vld [vmem:[%s9821_s0 + $0x328] ss:$28 sps:$4 sm:$0xff]  }
   0xf   :  { %1630 = vmatprep.subr.bf16.mxu0 %v7348_v0  ;;  %v6786_v42 = vld [vmem:[%s9822_s3 + $0x50] sm:$0xff]   ;;  %v6790_v45 = vld [vmem:[%s9822_s3 + $0x58] sm:$0xff]   ;;  %v6795_v48 = vld [vmem:[%s9822_s3 + $0x60] sm:$0xff]  }
  0x10   :  { %4310 = vmatpush1.bf16.msra.mxu1 %v6741_v11  ;;  %v6765_v43 = vld [vmem:[%s9821_s0 + $0x2f0] ss:$28 sps:$4 sm:$0xff]   ;;  %v6766_v46 = vld [vmem:[%s9820_s2 + $0x78] sm:$0xff]   ;;  %v6772_v49 = vld [vmem:[%s9820_s2 + $0x80] sm:$0xff]  }
  0x11   :  { %4311 = vmatprep.subr.bf16.mxu1 %v7348_v0  ;;  %v6768_v47 = vld [vmem:[%s9821_s0] ss:$28 sps:$4 sm:$0xff]   ;;  %v6778_v52 = vld [vmem:[%s9821_s0 + $0x398] ss:$28 sps:$4 sm:$0xff]   ;;  %v6801_v53 = vld [vmem:[%s9822_s3 + $0x68] sm:$0xff]  }
  0x12   :  { %1631 = vmatpush1.bf16.msra.mxu0 %v6738_v12  ;;  %v6775_v50 = vld [vmem:[%s9821_s0 + $0x3c] ss:$28 sps:$4 sm:$0xff]   ;;  %v6781_v54 = vld [vmem:[%s9820_s2 + $0x88] sm:$0xff]   ;;  %v6782_v56 = vld [vmem:[%s9821_s0 + $0x74] ss:$28 sps:$4 sm:$0xff]  }
  0x13   :  { %6173 = vmatmul.mubr.msk.bf16.gmra.mrb[4].mxu1 %vm1543_vm0, %v6739_v13  ;;  %1632 = vmatprep.subr.bf16.mxu0 %v7348_v0  ;;  %v6773_v51 = vld [vmem:[%s9821_s0 + $0x360] ss:$28 sps:$4 sm:$0xff]   ;;  %v6777_v55 = vld [vmem:[%s9821_s0 + $0x38] ss:$28 sps:$4 sm:$0xff]   ;;  %v6779_v57 = vld [vmem:[%s9821_s0 + $0x3d0] ss:$28 sps:$4 sm:$0xff]  }
  0x14   :  { %6176 = vmatprep.mubr.msk.bf16.mxu1 %vm1543_vm0, %v6742_v14  ;;  %4312 = vmatpush1.bf16.msra.mxu1 %v6745_v15  ;;  %v6794_v58 = vld [vmem:[%s9820_s2 + $0x90] sm:$0xff]   ;;  %v6785_v60 = vld [vmem:[%s9821_s0 + $0x408] ss:$28 sps:$4 sm:$0xff]   ;;  %v6809_v61 = vld [vmem:[%s9822_s3 + $0x78] sm:$0xff]  }
  0x15   :  { %4313 = vmatprep.subr.bf16.mxu1 %v7348_v0  ;;  %v6808_v59 = vld [vmem:[%s9822_s3 + $0x70] sm:$0xff]   ;;  %v6805_v62 = vld [vmem:[%s9820_s2 + $0x98] sm:$0xff]   ;;  %v6788_v1 = vld [vmem:[%s9821_s0 + $0xac] ss:$28 sps:$4 sm:$0xff]  }
  0x16   :  { %1633 = vmatpush1.bf16.msra.mxu0 %v6740_v16  ;;  %v6784_v63 = vld [vmem:[%s9821_s0 + $0x70] ss:$28 sps:$4 sm:$0xff]   ;;  %v6816_v2 = vld [vmem:[%s9820_s2 + $0xa0] sm:$0xff]   ;;  %v6792_v4 = vld [vmem:[%s9821_s0 + $0x478] ss:$28 sps:$4 sm:$0xff]  }
  0x17   :  { %1634 = vmatprep.subr.bf16.mxu0 %v7348_v0  ;;  %v6787_v3 = vld [vmem:[%s9821_s0 + $0x440] ss:$28 sps:$4 sm:$0xff]   ;;  %v6830_v5 = vld [vmem:[%s9820_s2 + $0xa8] sm:$0xff]   ;;  %v6840_v10 = vld [vmem:[%s9820_s2 + $0xb0] sm:$0xff]  }
  0x18   :  { %4314 = vmatpush1.bf16.msra.mxu1 %v6750_v18  ;;  %v6791_v6 = vld [vmem:[%s9821_s0 + $0xa8] ss:$28 sps:$4 sm:$0xff]   ;;  %v6793_v8 = vld [vmem:[%s9821_s0 + $0x4b0] ss:$28 sps:$4 sm:$0xff]   ;;  %v6798_v11 = vld [vmem:[%s9821_s0 + $0xe0] ss:$28 sps:$4 sm:$0xff]  }
  0x19   :  { %4315 = vmatprep.subr.bf16.mxu1 %v7348_v0  ;;  %v6796_v7 = vld [vmem:[%s9821_s0 + $0xe4] ss:$28 sps:$4 sm:$0xff]   ;;  %v6802_v12 = vld [vmem:[%s9821_s0 + $0x11c] ss:$28 sps:$4 sm:$0xff]   ;;  %v6810_v18 = vld [vmem:[%s9821_s0 + $0x154] ss:$28 sps:$4 sm:$0xff]  }
  0x1a   :  { %1635 = vmatpush1.bf16.msra.mxu0 %v6743_v17  ;;  %v6799_v9 = vld [vmem:[%s9821_s0 + $0x4e8] ss:$28 sps:$4 sm:$0xff]   ;;  %v6852_v13 = vld [vmem:[%s9820_s2 + $0xb8] sm:$0xff]   ;;  %v6845_v33 = vld [vmem:[%s9822_s3 + $0x90] sm:$0xff]  }
  0x1b   :  { %6177 = vmatmul.mubr.msk.bf16.gmra.mrb[8].mxu1 %vm1543_vm0, %v6744_v19  ;;  %1636 = vmatprep.subr.bf16.mxu0 %v7348_v0  ;;  %v6800_v14 = vld [vmem:[%s9821_s0 + $0x520] ss:$28 sps:$4 sm:$0xff]   ;;  %v6806_v15 = vld [vmem:[%s9821_s0 + $0x558] ss:$28 sps:$4 sm:$0xff]   ;;  %v6807_v19 = vld [vmem:[%s9821_s0 + $0x590] ss:$28 sps:$4 sm:$0xff]  }
  0x1c   :  { %6180 = vmatprep.mubr.msk.bf16.mxu1 %vm1543_vm0, %v6747_v20  ;;  %4316 = vmatpush1.bf16.msra.mxu1 %v6755_v22  ;;  %v6804_v16 = vld [vmem:[%s9821_s0 + $0x118] ss:$28 sps:$4 sm:$0xff]   ;;  %v6865_v17 = vld [vmem:[%s9820_s2 + $0xc0] sm:$0xff]   ;;  %v6812_v22 = vld [vmem:[%s9821_s0 + $0x150] ss:$28 sps:$4 sm:$0xff]  }
  0x1d   :  { %4317 = vmatprep.subr.bf16.mxu1 %v7348_v0  ;;  %v6815_v20 = vld [vmem:[%s9823_s1 + $0x4] ss:$28 sps:$4 sm:$0xff]  }
  0x1e   :  { %1637 = vmatpush1.bf16.msra.mxu0 %v6746_v21  ;;  %v6874_v21 = vld [vmem:[%s9820_s2 + $0xc8] sm:$0xff]  }
  0x1f   :  { %1638 = vmatprep.subr.bf16.mxu0 %v7348_v0 }
  0x20   :  { %4318 = vmatpush1.bf16.msra.mxu1 %v6758_v24  ;;  %v6813_v24 = vld [vmem:[%s9823_s1] ss:$28 sps:$4 sm:$0xff]  }
  0x21   :  { %4319 = vmatprep.subr.bf16.mxu1 %v7348_v0 }
  0x22   :  { %1639 = vmatpush1.bf16.msra.mxu0 %v6748_v23  ;;  %v6817_v23 = vld [vmem:[%s9821_s0 + $0x18c] ss:$28 sps:$4 sm:$0xff]  }
  0x23   :  { %6181 = vmatmul.mubr.msk.bf16.gmra.mrb[12].mxu1 %vm1543_vm0, %v6749_v25  ;;  %1640 = vmatprep.subr.bf16.mxu0 %v7348_v0  ;;  %v6819_v25 = vld [vmem:[%s9822_s3 + $0x80] sm:$0xff]  }
  0x24   :  { %6184 = vmatprep.mubr.msk.bf16.mxu1 %vm1543_vm0, %v6752_v26  ;;  %4320 = vmatpush1.bf16.msra.mxu1 %v6762_v28  ;;  %v6821_v26 = vld [vmem:[%s9823_s1 + $0x3c] ss:$28 sps:$4 sm:$0xff]   ;;  %v6820_v28 = vld [vmem:[%s9821_s0 + $0x188] ss:$28 sps:$4 sm:$0xff]  }
  0x25   :  { %4321 = vmatprep.subr.bf16.mxu1 %v7348_v0 }
  0x26   :  { %1641 = vmatpush1.bf16.msra.mxu0 %v6751_v27  ;;  %v6888_v27 = vld [vmem:[%s9820_s2 + $0xd0] sm:$0xff]  }
  0x27   :  { %1642 = vmatprep.subr.bf16.mxu0 %v7348_v0 }
  0x28   :  { %4322 = vmatpush1.bf16.msra.mxu1 %v6767_v31  ;;  %v6824_v31 = vld [vmem:[%s9821_s0 + $0x1c4] ss:$28 sps:$4 sm:$0xff]  }
  0x29   :  { %4323 = vmatprep.subr.bf16.mxu1 %v7348_v0 }
  0x2a   :  { %1643 = vmatpush1.bf16.msra.mxu0 %v6753_v29  ;;  %v6831_v29 = vld [vmem:[%s9822_s3 + $0x88] sm:$0xff]  }
  0x2b   :  { %6185 = vmatmul.mubr.msk.bf16.gmra.mrb[16].mxu1 %vm1543_vm0, %v6754_v30  ;;  %1644 = vmatprep.subr.bf16.mxu0 %v7348_v0  ;;  %v6823_v30 = vld [vmem:[%s9823_s1 + $0x38] ss:$28 sps:$4 sm:$0xff]  }
  0x2c   :  { %6188 = vmatprep.mubr.msk.bf16.mxu1 %vm1543_vm0, %v6757_v32  ;;  %4324 = vmatpush1.bf16.msra.mxu1 %v6774_v35  ;;  %v6827_v32 = vld [vmem:[%s9823_s1 + $0x74] ss:$28 sps:$4 sm:$0xff]   ;;  %v6826_v35 = vld [vmem:[%s9821_s0 + $0x1c0] ss:$28 sps:$4 sm:$0xff]  }
  0x2d   :  { %4325 = vmatprep.subr.bf16.mxu1 %v7348_v0 }
  0x2e   :  { %1645 = vmatpush1.bf16.msra.mxu0 %v6756_v34  ;;  %v6899_v34 = vld [vmem:[%s9820_s2 + $0xd8] sm:$0xff]  }
  0x2f   :  { %1646 = vmatprep.subr.bf16.mxu0 %v7348_v0 }
  0x30   :  { %4326 = vmatpush1.bf16.msra.mxu1 %v6780_v39  ;;  %v6829_v39 = vld [vmem:[%s9823_s1 + $0x70] ss:$28 sps:$4 sm:$0xff]  }
  0x31   :  { %4327 = vmatprep.subr.bf16.mxu1 %v7348_v0 }
  0x32   :  { %1647 = vmatpush1.bf16.msra.mxu0 %v6759_v36  ;;  %v6853_v36 = vld [vmem:[%s9822_s3 + $0x98] sm:$0xff]  }
  0x33   :  { %6189 = vmatmul.mubr.msk.bf16.gmra.mrb[20].mxu1 %vm1543_vm0, %v6760_v37  ;;  %1648 = vmatprep.subr.bf16.mxu0 %v7348_v0  ;;  %v6832_v37 = vld [vmem:[%s9821_s0 + $0x1fc] ss:$28 sps:$4 sm:$0xff]  }
  0x34   :  { %6192 = vmatprep.mubr.msk.bf16.mxu1 %vm1543_vm0, %v6763_v38  ;;  %4328 = vmatpush1.bf16.msra.mxu1 %v6786_v42  ;;  %v6910_v38 = vld [vmem:[%s9820_s2 + $0xe0] sm:$0xff]   ;;  %v6834_v42 = vld [vmem:[%s9821_s0 + $0x1f8] ss:$28 sps:$4 sm:$0xff]  }
  0x35   :  { %4329 = vmatprep.subr.bf16.mxu1 %v7348_v0 }
  0x36   :  { %1649 = vmatpush1.bf16.msra.mxu0 %v6761_v40  ;;  %v6835_v40 = vld [vmem:[%s9823_s1 + $0xac] ss:$28 sps:$4 sm:$0xff]  }
  0x37   :  { %1650 = vmatprep.subr.bf16.mxu0 %v7348_v0 }
  0x38   :  { %4330 = vmatpush1.bf16.msra.mxu1 %v6790_v45  ;;  %v6838_v45 = vld [vmem:[%s9821_s0 + $0x234] ss:$28 sps:$4 sm:$0xff]  }
  0x39   :  { %4331 = vmatprep.subr.bf16.mxu1 %v7348_v0 }
  0x3a   :  { %1651 = vmatpush1.bf16.msra.mxu0 %v6764_v41  ;;  %v6867_v41 = vld [vmem:[%s9822_s3 + $0xa0] sm:$0xff]  }
  0x3b   :  { %6193 = vmatmul.mubr.msk.bf16.gmra.mrb[24].mxu1 %vm1543_vm0, %v6765_v43  ;;  %1652 = vmatprep.subr.bf16.mxu0 %v7348_v0  ;;  %v6880_v43 = vld [vmem:[%s9822_s3 + $0xa8] sm:$0xff]  }
  0x3c   :  { %6196 = vmatprep.mubr.msk.bf16.mxu1 %vm1543_vm0, %v6771_v44  ;;  %4332 = vmatpush1.bf16.msra.mxu1 %v6795_v48  ;;  %v6924_v44 = vld [vmem:[%s9820_s2 + $0xe8] sm:$0xff]   ;;  %v6889_v48 = vld [vmem:[%s9822_s3 + $0xb0] sm:$0xff]  }
  0x3d   :  { %4333 = vmatprep.subr.bf16.mxu1 %v7348_v0 }
  0x3e   :  { %1653 = vmatpush1.bf16.msra.mxu0 %v6766_v46  ;;  %v6837_v46 = vld [vmem:[%s9823_s1 + $0xa8] ss:$28 sps:$4 sm:$0xff]  }
  0x3f   :  { %1863 = vmatprep.subr.bf16.mxu0 %v7348_v0 }
  0x40   :  { %4334 = vmatpush1.bf16.msra.mxu1 %v6801_v53  ;;  %v6844_v53 = vld [vmem:[%s9823_s1 + $0xe0] ss:$28 sps:$4 sm:$0xff]  }
  0x41   :  { %1655 = vmatmul.mubr.bf16.vlgmr.msra.gmra.mrb[0].mxu0 %v6768_v47  ;;  %4335 = vmatprep.subr.bf16.mxu1 %v7348_v0  ;;  %v6842_v47 = vld [vmem:[%s9823_s1 + $0xe4] ss:$28 sps:$4 sm:$0xff]  }
  0x42   :  { %1864 = vmatpush1.bf16.msra.mxu0 %v6772_v49  ;;  %1662 = vmatprep.mubr.bf16.mxu0 %v6775_v50  ;;  %v6934_v49 = vld [vmem:[%s9820_s2 + $0xf0] sm:$0xff]   ;;  %v6903_v50 = vld [vmem:[%s9822_s3 + $0xb8] sm:$0xff]  }
  0x43   :  { %6197 = vmatmul.mubr.msk.bf16.gmra.mrb[28].mxu1 %vm1543_vm0, %v6773_v51  ;;  %1865 = vmatprep.subr.bf16.mxu0 %v7348_v0  ;;  %v6841_v51 = vld [vmem:[%s9821_s0 + $0x230] ss:$28 sps:$4 sm:$0xff]  }
  0x44   :  { %6200 = vmatprep.mubr.msk.bf16.mxu1 %vm1543_vm0, %v6778_v52  ;;  %4336 = vmatpush1.bf16.msra.mxu1 %v6808_v59  ;;  %v6846_v52 = vld [vmem:[%s9821_s0 + $0x26c] ss:$28 sps:$4 sm:$0xff]   ;;  %v6854_v59 = vld [vmem:[%s9821_s0 + $0x2a4] ss:$28 sps:$4 sm:$0xff]  }
  0x45   :  { %4337 = vmatprep.subr.bf16.mxu1 %v7348_v0 }
  0x46   :  { %1866 = vmatpush1.bf16.msra.mxu0 %v6781_v54  ;;  %v6849_v54 = vld [vmem:[%s9823_s1 + $0x11c] ss:$28 sps:$4 sm:$0xff]  }
  0x47   :  { %1867 = vmatprep.subr.bf16.mxu0 %v7348_v0 }
  0x48   :  { %4338 = vmatpush1.bf16.msra.mxu1 %v6809_v61  ;;  %v6857_v61 = vld [vmem:[%s9823_s1 + $0x154] ss:$28 sps:$4 sm:$0xff]  }
  0x49   :  { %1663 = vmatmul.mubr.bf16.gmra.mrb[4].mxu0 %v6777_v55  ;;  %4548 = vmatprep.subr.bf16.mxu1 %v7348_v0  ;;  %v6913_v55 = vld [vmem:[%s9822_s3 + $0xc0] sm:$0xff]  }
  0x4a   :  { %1670 = vmatprep.mubr.bf16.mxu0 %v6782_v56  ;;  %1868 = vmatpush1.bf16.msra.mxu0 %v6794_v58  ;;  %v6946_v56 = vld [vmem:[%s9820_s2 + $0xf8] sm:$0xff]   ;;  %v6848_v58 = vld [vmem:[%s9821_s0 + $0x268] ss:$28 sps:$4 sm:$0xff]  }
  0x4b   :  { %6201 = vmatmul.mubr.msk.bf16.gmra.mrb[32].mxu1 %vm1543_vm0, %v6779_v57  ;;  %1869 = vmatprep.subr.bf16.mxu0 %v7348_v0  ;;  %v6925_v57 = vld [vmem:[%s9822_s3 + $0xc8] sm:$0xff]  }
  0x4c   :  { %6204 = vmatprep.mubr.msk.bf16.mxu1 %vm1543_vm0, %v6785_v60  ;;  %v6851_v60 = vld [vmem:[%s9823_s1 + $0x118] ss:$28 sps:$4 sm:$0xff]  }
  0x4e   :  { %1870 = vmatpush1.bf16.msra.mxu0 %v6805_v62  ;;  %v6939_v62 = vld [vmem:[%s9822_s3 + $0xd0] sm:$0xff]  }
  0x4f   :  { %1871 = vmatprep.subr.bf16.mxu0 %v7348_v0 }
  0x51   :  { %1671 = vmatmul.mubr.bf16.gmra.mrb[8].mxu0 %v6784_v63  ;;  %v6856_v63 = vld [vmem:[%s9821_s0 + $0x2a0] ss:$28 sps:$4 sm:$0xff]  }
  0x52   :  { %1678 = vmatprep.mubr.bf16.mxu0 %v6788_v1  ;;  %1872 = vmatpush1.bf16.msra.mxu0 %v6816_v2  ;;  %v6947_v1 = vld [vmem:[%s9822_s3 + $0xd8] sm:$0xff]   ;;  %v6859_v2 = vld [vmem:[%s9823_s1 + $0x150] ss:$28 sps:$4 sm:$0xff]  }
  0x53   :  { %6205 = vmatmul.mubr.msk.bf16.gmra.mrb[36].mxu1 %vm1543_vm0, %v6787_v3  ;;  %1873 = vmatprep.subr.bf16.mxu0 %v7348_v0  ;;  %v6860_v3 = vld [vmem:[%s9821_s0 + $0x2dc] ss:$28 sps:$4 sm:$0xff]  }
  0x54   :  { %6208 = vmatprep.mubr.msk.bf16.mxu1 %vm1543_vm0, %v6792_v4  ;;  %v6863_v4 = vld [vmem:[%s9823_s1 + $0x18c] ss:$28 sps:$4 sm:$0xff]  }
  0x56   :  { %1874 = vmatpush1.bf16.msra.mxu0 %v6830_v5  ;;  %v6961_v5 = vld [vmem:[%s9822_s3 + $0xe0] sm:$0xff]  }
  0x57   :  { %1875 = vmatprep.subr.bf16.mxu0 %v7348_v0 }
  0x59   :  { %1679 = vmatmul.mubr.bf16.gmra.mrb[12].mxu0 %v6791_v6  ;;  %v6862_v6 = vld [vmem:[%s9821_s0 + $0x2d8] ss:$28 sps:$4 sm:$0xff]  }
  0x5a   :  { %1686 = vmatprep.mubr.bf16.mxu0 %v6796_v7  ;;  %1876 = vmatpush1.bf16.msra.mxu0 %v6840_v10  ;;  %v6974_v7 = vld [vmem:[%s9822_s3 + $0xe8] sm:$0xff]   ;;  %v6871_v10 = vld [vmem:[%s9823_s1 + $0x1c4] ss:$28 sps:$4 sm:$0xff]  }
  0x5b   :  { %6209 = vmatmul.mubr.msk.bf16.gmra.mrb[40].mxu1 %vm1543_vm0, %v6793_v8  ;;  %1877 = vmatprep.subr.bf16.mxu0 %v7348_v0  ;;  %v6866_v8 = vld [vmem:[%s9823_s1 + $0x188] ss:$28 sps:$4 sm:$0xff]  }
  0x5c   :  { %6212 = vmatprep.mubr.msk.bf16.mxu1 %vm1543_vm0, %v6799_v9  ;;  %v6868_v9 = vld [vmem:[%s9821_s0 + $0x314] ss:$28 sps:$4 sm:$0xff]  }
  0x5e   :  { %1878 = vmatpush1.bf16.msra.mxu0 %v6852_v13  ;;  %v6873_v13 = vld [vmem:[%s9823_s1 + $0x1c0] ss:$28 sps:$4 sm:$0xff]  }
  0x5f   :  { %1879 = vmatprep.subr.bf16.mxu0 %v7348_v0 }
  0x61   :  { %1687 = vmatmul.mubr.bf16.gmra.mrb[16].mxu0 %v6798_v11  ;;  %v6870_v11 = vld [vmem:[%s9821_s0 + $0x310] ss:$28 sps:$4 sm:$0xff]  }
  0x62   :  { %1694 = vmatprep.mubr.bf16.mxu0 %v6802_v12  ;;  %1880 = vmatpush1.bf16.msra.mxu0 %v6865_v17  ;;  %v6983_v12 = vld [vmem:[%s9822_s3 + $0xf0] sm:$0xff]  }
  0x63   :  { %6213 = vmatmul.mubr.msk.bf16.gmra.mrb[44].mxu1 %vm1543_vm0, %v6800_v14  ;;  %1881 = vmatprep.subr.bf16.mxu0 %v7348_v0  ;;  %v6875_v14 = vld [vmem:[%s9821_s0 + $0x34c] ss:$28 sps:$4 sm:$0xff]   ;;  %v6881_v17 = vld [vmem:[%s9823_s1 + $0x1f8] ss:$28 sps:$4 sm:$0xff]  }
  0x64   :  { %6216 = vmatprep.mubr.msk.bf16.mxu1 %vm1543_vm0, %v6806_v15  ;;  %v6878_v15 = vld [vmem:[%s9823_s1 + $0x1fc] ss:$28 sps:$4 sm:$0xff]  }
  0x66   :  { %1882 = vmatpush1.bf16.msra.mxu0 %v6874_v21  ;;  %v6997_v21 = vld [vmem:[%s9822_s3 + $0xf8] sm:$0xff]  }
  0x67   :  { %1883 = vmatprep.subr.bf16.mxu0 %v7348_v0 }
  0x69   :  { %1695 = vmatmul.mubr.bf16.gmra.mrb[20].mxu0 %v6804_v16  ;;  %v6877_v16 = vld [vmem:[%s9821_s0 + $0x348] ss:$28 sps:$4 sm:$0xff]  }
  0x6a   :  { %1702 = vmatprep.mubr.bf16.mxu0 %v6810_v18  ;;  %1884 = vmatpush1.bf16.msra.mxu0 %v6888_v27  ;;  %v6882_v18 = vld [vmem:[%s9821_s0 + $0x384] ss:$28 sps:$4 sm:$0xff]  }
  0x6b   :  { %6217 = vmatmul.mubr.msk.bf16.gmra.mrb[48].mxu1 %vm1543_vm0, %v6807_v19  ;;  %1885 = vmatprep.subr.bf16.mxu0 %v7348_v0  ;;  %v6885_v19 = vld [vmem:[%s9823_s1 + $0x234] ss:$28 sps:$4 sm:$0xff]   ;;  %v6895_v27 = vld [vmem:[%s9823_s1 + $0x268] ss:$28 sps:$4 sm:$0xff]  }
  0x6c   :  { %4339 = vmatprep.mubr.bf16.mxu1 %v6815_v20  ;;  %v6884_v20 = vld [vmem:[%s9821_s0 + $0x380] ss:$28 sps:$4 sm:$0xff]  }
  0x6e   :  { %1886 = vmatpush1.bf16.msra.mxu0 %v6899_v34  ;;  %v6911_v34 = vld [vmem:[%s9821_s0 + $0x464] ss:$28 sps:$4 sm:$0xff]  }
  0x6f   :  { %1887 = vmatprep.subr.bf16.mxu0 %v7348_v0 }
  0x71   :  { %1703 = vmatmul.mubr.bf16.gmra.mrb[24].mxu0 %v6812_v22  ;;  %v6887_v22 = vld [vmem:[%s9823_s1 + $0x230] ss:$28 sps:$4 sm:$0xff]  }
  0x72   :  { %1710 = vmatprep.mubr.bf16.mxu0 %v6817_v23  ;;  %1888 = vmatpush1.bf16.msra.mxu0 %v6910_v38  ;;  %v6890_v23 = vld [vmem:[%s9821_s0 + $0x3bc] ss:$28 sps:$4 sm:$0xff]  }
  0x73   :  { %4340 = vmatmul.mubr.bf16.vlgmr.msra.gmra.mrb[52].mxu1 %v6813_v24  ;;  %1889 = vmatprep.subr.bf16.mxu0 %v7348_v0  ;;  %v6893_v24 = vld [vmem:[%s9823_s1 + $0x26c] ss:$28 sps:$4 sm:$0xff]   ;;  %v6918_v38 = vld [vmem:[%s9821_s0 + $0x49c] ss:$28 sps:$4 sm:$0xff]  }
  0x74   :  { %4549 = vmatpush1.bf16.msra.mxu1 %v6819_v25  ;;  %4347 = vmatprep.mubr.bf16.mxu1 %v6821_v26  ;;  %v6892_v25 = vld [vmem:[%s9821_s0 + $0x3b8] ss:$28 sps:$4 sm:$0xff]  }
  0x75   :  { %4550 = vmatprep.subr.bf16.mxu1 %v7348_v0  ;;  %v6896_v26 = vld [vmem:[%s9821_s0 + $0x3f4] ss:$28 sps:$4 sm:$0xff]  }
  0x76   :  { %1890 = vmatpush1.bf16.msra.mxu0 %v6924_v44 }
  0x77   :  { %1891 = vmatprep.subr.bf16.mxu0 %v7348_v0 }
  0x78   :  { %4551 = vmatpush1.bf16.msra.mxu1 %v6831_v29  ;;  %v6898_v29 = vld [vmem:[%s9821_s0 + $0x3f0] ss:$28 sps:$4 sm:$0xff]  }
  0x79   :  { %1711 = vmatmul.mubr.bf16.gmra.mrb[28].mxu0 %v6820_v28  ;;  %4552 = vmatprep.subr.bf16.mxu1 %v7348_v0  ;;  %v6900_v28 = vld [vmem:[%s9823_s1 + $0x2a4] ss:$28 sps:$4 sm:$0xff]  }
  0x7a   :  { %1718 = vmatprep.mubr.bf16.mxu0 %v6824_v31  ;;  %1892 = vmatpush1.bf16.msra.mxu0 %v6934_v49  ;;  %v6902_v31 = vld [vmem:[%s9823_s1 + $0x2a0] ss:$28 sps:$4 sm:$0xff]  }
  0x7b   :  { %4348 = vmatmul.mubr.bf16.gmra.mrb[56].mxu1 %v6823_v30  ;;  %1893 = vmatprep.subr.bf16.mxu0 %v7348_v0  ;;  %v6904_v30 = vld [vmem:[%s9821_s0 + $0x42c] ss:$28 sps:$4 sm:$0xff]  }
  0x7c   :  { %4355 = vmatprep.mubr.bf16.mxu1 %v6827_v32  ;;  %4553 = vmatpush1.bf16.msra.mxu1 %v6845_v33  ;;  %v6907_v32 = vld [vmem:[%s9823_s1 + $0x2dc] ss:$28 sps:$4 sm:$0xff]   ;;  %v6906_v33 = vld [vmem:[%s9821_s0 + $0x428] ss:$28 sps:$4 sm:$0xff]  }
  0x7d   :  { %4554 = vmatprep.subr.bf16.mxu1 %v7348_v0 }
  0x7e   :  { %1894 = vmatpush1.bf16.msra.mxu0 %v6946_v56 }
  0x7f   :  { %2104 = vmatprep.subr.bf16.mxu0 %v7348_v0 }
  0x80   :  { %4555 = vmatpush1.bf16.msra.mxu1 %v6853_v36  ;;  %v6915_v36 = vld [vmem:[%s9823_s1 + $0x314] ss:$28 sps:$4 sm:$0xff]  }
  0x81   :  { %1719 = vmatmul.mubr.bf16.gmra.mrb[32].mxu0 %v6826_v35  ;;  %4556 = vmatprep.subr.bf16.mxu1 %v7348_v0  ;;  %v6909_v35 = vld [vmem:[%s9823_s1 + $0x2d8] ss:$28 sps:$4 sm:$0xff]  }
  0x82   :  { %1726 = vmatprep.mubr.bf16.mxu0 %v6832_v37  ;;  %v6914_v37 = vld [vmem:[%s9821_s0 + $0x460] ss:$28 sps:$4 sm:$0xff]  }
  0x83   :  { %4356 = vmatmul.mubr.bf16.gmra.mrb[60].mxu1 %v6829_v39  ;;  %v6917_v39 = vld [vmem:[%s9823_s1 + $0x310] ss:$28 sps:$4 sm:$0xff]  }
  0x84   :  { %4363 = vmatprep.mubr.bf16.mxu1 %v6835_v40  ;;  %4557 = vmatpush1.bf16.msra.mxu1 %v6867_v41 }
  0x85   :  { %4558 = vmatprep.subr.bf16.mxu1 %v7348_v0 }
  0x88   :  { %4559 = vmatpush1.bf16.msra.mxu1 %v6880_v43  ;;  %v6921_v43 = vld [vmem:[%s9823_s1 + $0x34c] ss:$28 sps:$4 sm:$0xff]  }
  0x89   :  { %1727 = vmatmul.mubr.bf16.gmra.mrb[36].mxu0 %v6834_v42  ;;  %4560 = vmatprep.subr.bf16.mxu1 %v7348_v0 }
  0x8a   :  { %1734 = vmatprep.mubr.bf16.mxu0 %v6838_v45  ;;  %v6920_v45 = vld [vmem:[%s9821_s0 + $0x498] ss:$28 sps:$4 sm:$0xff]  }
  0x8b   :  { %4364 = vmatmul.mubr.bf16.gmra.mrb[64].mxu1 %v6837_v46  ;;  %v6926_v46 = vld [vmem:[%s9821_s0 + $0x4d4] ss:$28 sps:$4 sm:$0xff]  }
  0x8c   :  { %4371 = vmatprep.mubr.bf16.mxu1 %v6842_v47  ;;  %4561 = vmatpush1.bf16.msra.mxu1 %v6889_v48  ;;  %v6923_v47 = vld [vmem:[%s9823_s1 + $0x348] ss:$28 sps:$4 sm:$0xff]  }
  0x8d   :  { %4562 = vmatprep.subr.bf16.mxu1 %v7348_v0 }
  0x90   :  { %4563 = vmatpush1.bf16.msra.mxu1 %v6903_v50 }
  0x91   :  { %1735 = vmatmul.mubr.bf16.gmra.mrb[40].mxu0 %v6841_v51  ;;  %4564 = vmatprep.subr.bf16.mxu1 %v7348_v0  ;;  %v6929_v51 = vld [vmem:[%s9823_s1 + $0x384] ss:$28 sps:$4 sm:$0xff]  }
  0x92   :  { %1742 = vmatprep.mubr.bf16.mxu0 %v6846_v52 }
  0x93   :  { %4372 = vmatmul.mubr.bf16.gmra.mrb[68].mxu1 %v6844_v53  ;;  %v6928_v53 = vld [vmem:[%s9821_s0 + $0x4d0] ss:$28 sps:$4 sm:$0xff]  }
  0x94   :  { %4379 = vmatprep.mubr.bf16.mxu1 %v6849_v54  ;;  %4565 = vmatpush1.bf16.msra.mxu1 %v6913_v55  ;;  %v6932_v54 = vld [vmem:[%s9821_s0 + $0x50c] ss:$28 sps:$4 sm:$0xff]   ;;  %v6931_v55 = vld [vmem:[%s9823_s1 + $0x380] ss:$28 sps:$4 sm:$0xff]  }
  0x95   :  { %4566 = vmatprep.subr.bf16.mxu1 %v7348_v0 }
  0x98   :  { %4567 = vmatpush1.bf16.msra.mxu1 %v6925_v57 }
  0x99   :  { %1743 = vmatmul.mubr.bf16.gmra.mrb[44].mxu0 %v6848_v58  ;;  %4568 = vmatprep.subr.bf16.mxu1 %v7348_v0 }
  0x9a   :  { %1750 = vmatprep.mubr.bf16.mxu0 %v6854_v59  ;;  %v6936_v59 = vld [vmem:[%s9823_s1 + $0x3bc] ss:$28 sps:$4 sm:$0xff]  }
  0x9b   :  { %4380 = vmatmul.mubr.bf16.gmra.mrb[72].mxu1 %v6851_v60 }
  0x9c   :  { %4387 = vmatprep.mubr.bf16.mxu1 %v6857_v61  ;;  %4569 = vmatpush1.bf16.msra.mxu1 %v6939_v62  ;;  %v6935_v61 = vld [vmem:[%s9821_s0 + $0x508] ss:$28 sps:$4 sm:$0xff]  }
  0x9d   :  { %4570 = vmatprep.subr.bf16.mxu1 %v7348_v0  ;;  %v6940_v62 = vld [vmem:[%s9821_s0 + $0x544] ss:$28 sps:$4 sm:$0xff]  }
  0xa0   :  { %4571 = vmatpush1.bf16.msra.mxu1 %v6947_v1 }
  0xa1   :  { %1751 = vmatmul.mubr.bf16.gmra.mrb[48].mxu0 %v6856_v63  ;;  %4572 = vmatprep.subr.bf16.mxu1 %v7348_v0  ;;  %v6938_v63 = vld [vmem:[%s9823_s1 + $0x3b8] ss:$28 sps:$4 sm:$0xff]  }
  0xa2   :  { %1758 = vmatprep.mubr.bf16.mxu0 %v6860_v3 }
  0xa3   :  { %4388 = vmatmul.mubr.bf16.gmra.mrb[76].mxu1 %v6859_v2 }
  0xa4   :  { %4395 = vmatprep.mubr.bf16.mxu1 %v6863_v4  ;;  %4573 = vmatpush1.bf16.msra.mxu1 %v6961_v5  ;;  %v6943_v4 = vld [vmem:[%s9823_s1 + $0x3f4] ss:$28 sps:$4 sm:$0xff]  }
  0xa5   :  { %4574 = vmatprep.subr.bf16.mxu1 %v7348_v0 }
  0xa8   :  { %4575 = vmatpush1.bf16.msra.mxu1 %v6974_v7  ;;  %v6948_v7 = vld [vmem:[%s9821_s0 + $0x57c] ss:$28 sps:$4 sm:$0xff]  }
  0xa9   :  { %1759 = vmatmul.mubr.bf16.gmra.mrb[52].mxu0 %v6862_v6  ;;  %4576 = vmatprep.subr.bf16.mxu1 %v7348_v0  ;;  %v6942_v6 = vld [vmem:[%s9821_s0 + $0x540] ss:$28 sps:$4 sm:$0xff]  }
  0xaa   :  { %1766 = vmatprep.mubr.bf16.mxu0 %v6868_v9 }
  0xab   :  { %4396 = vmatmul.mubr.bf16.gmra.mrb[80].mxu1 %v6866_v8  ;;  %v6945_v8 = vld [vmem:[%s9823_s1 + $0x3f0] ss:$28 sps:$4 sm:$0xff]  }
  0xac   :  { %4403 = vmatprep.mubr.bf16.mxu1 %v6871_v10  ;;  %4577 = vmatpush1.bf16.msra.mxu1 %v6983_v12  ;;  %v6951_v12 = vld [vmem:[%s9823_s1 + $0x42c] ss:$28 sps:$4 sm:$0xff]  }
  0xad   :  { %4578 = vmatprep.subr.bf16.mxu1 %v7348_v0 }
  0xb0   :  { %4579 = vmatpush1.bf16.msra.mxu1 %v6997_v21 }
  0xb1   :  { %1767 = vmatmul.mubr.bf16.gmra.mrb[56].mxu0 %v6870_v11  ;;  %4789 = vmatprep.subr.bf16.mxu1 %v7348_v0 }
  0xb2   :  { %1774 = vmatprep.mubr.bf16.mxu0 %v6875_v14  ;;  %v6950_v14 = vld [vmem:[%s9821_s0 + $0x578] ss:$28 sps:$4 sm:$0xff]  }
  0xb3   :  { %4404 = vmatmul.mubr.bf16.gmra.mrb[84].mxu1 %v6873_v13 }
  0xb4   :  { %4411 = vmatprep.mubr.bf16.mxu1 %v6878_v15  ;;  %v6956_v15 = vld [vmem:[%s9821_s0 + $0xc] ss:$28 sps:$4 sm:$0xff]  }
  0xb9   :  { %1775 = vmatmul.mubr.bf16.gmra.mrb[60].mxu0 %v6877_v16  ;;  %v6953_v16 = vld [vmem:[%s9823_s1 + $0x428] ss:$28 sps:$4 sm:$0xff]  }
  0xba   :  { %1782 = vmatprep.mubr.bf16.mxu0 %v6882_v18 }
  0xbb   :  { %4412 = vmatmul.mubr.bf16.gmra.mrb[88].mxu1 %v6881_v17 }
  0xbc   :  { %4419 = vmatprep.mubr.bf16.mxu1 %v6885_v19 }
  0xc1   :  { %1783 = vmatmul.mubr.bf16.gmra.mrb[64].mxu0 %v6884_v20  ;;  %v6957_v20 = vld [vmem:[%s9823_s1 + $0x464] ss:$28 sps:$4 sm:$0xff]  }
  0xc2   :  { %1790 = vmatprep.mubr.bf16.mxu0 %v6890_v23  ;;  %v6959_v23 = vld [vmem:[%s9820_s2 + $0x100] sm:$0xff]  }
  0xc3   :  { %4420 = vmatmul.mubr.bf16.gmra.mrb[92].mxu1 %v6887_v22  ;;  %v6954_v22 = vld [vmem:[%s9821_s0 + $0x8] ss:$28 sps:$4 sm:$0xff]  }
  0xc4   :  { %4427 = vmatprep.mubr.bf16.mxu1 %v6893_v24  ;;  %v6962_v24 = vld [vmem:[%s9821_s0 + $0x44] ss:$28 sps:$4 sm:$0xff]  }
  0xc9   :  { %1791 = vmatmul.mubr.bf16.gmra.mrb[68].mxu0 %v6892_v25  ;;  %v6960_v25 = vld [vmem:[%s9823_s1 + $0x460] ss:$28 sps:$4 sm:$0xff]  }
  0xca   :  { %1798 = vmatprep.mubr.bf16.mxu0 %v6896_v26 }
  0xcb   :  { %4428 = vmatmul.mubr.bf16.gmra.mrb[96].mxu1 %v6895_v27 }
  0xcc   :  { %4435 = vmatprep.mubr.bf16.mxu1 %v6900_v28 }
  0xd1   :  { %1799 = vmatmul.mubr.bf16.gmra.mrb[72].mxu0 %v6898_v29  ;;  %v6965_v29 = vld [vmem:[%s9823_s1 + $0x49c] ss:$28 sps:$4 sm:$0xff]  }
  0xd2   :  { %1806 = vmatprep.mubr.bf16.mxu0 %v6904_v30 }
  0xd3   :  { %4436 = vmatmul.mubr.bf16.gmra.mrb[100].mxu1 %v6902_v31  ;;  %v6968_v31 = vld [vmem:[%s9820_s2 + $0x108] sm:$0xff]  }
  0xd4   :  { %4443 = vmatprep.mubr.bf16.mxu1 %v6907_v32  ;;  %v6964_v32 = vld [vmem:[%s9821_s0 + $0x40] ss:$28 sps:$4 sm:$0xff]  }
  0xd9   :  { %1807 = vmatmul.mubr.bf16.gmra.mrb[76].mxu0 %v6906_v33  ;;  %v6969_v33 = vld [vmem:[%s9821_s0 + $0x7c] ss:$28 sps:$4 sm:$0xff]  }
  0xda   :  { %1814 = vmatprep.mubr.bf16.mxu0 %v6911_v34  ;;  %v6982_v34 = vld [vmem:[%s9820_s2 + $0x110] sm:$0xff]  }
  0xdb   :  { %4444 = vmatmul.mubr.bf16.gmra.mrb[104].mxu1 %v6909_v35  ;;  %v6967_v35 = vld [vmem:[%s9823_s1 + $0x498] ss:$28 sps:$4 sm:$0xff]  }
  0xdc   :  { %4451 = vmatprep.mubr.bf16.mxu1 %v6915_v36 }
  0xde   :  { %v7972_v40 = vpop.f32.mrb[0].mxu1 }
  0xdf   :  { %v7974_v41 = vpop.f32.mrb[1].mxu1 }
  0xe0   :  { %v7976_v42 = vpop.f32.mrb[2].mxu1 }
  0xe1   :  { %1815 = vmatmul.mubr.bf16.gmra.mrb[80].mxu0 %v6914_v37  ;;  %v7981_v44 = vpop.f32.mrb[3].mxu1 }
  0xe2   :  { %1822 = vmatprep.mubr.bf16.mxu0 %v6918_v38 }
  0xe3   :  { %4452 = vmatmul.mubr.bf16.gmra.mrb[108].mxu1 %v6917_v39  ;;  %v6972_v39 = vld [vmem:[%s9823_s1 + $0x4d4] ss:$28 sps:$4 sm:$0xff]  }
  0xe4   :  { %4459 = vmatprep.mubr.bf16.mxu1 %v6921_v43 }
  0xe6   :  { %v7992_v48 = vpop.f32.mrb[4].mxu1 }
  0xe7   :  { %v7994_v49 = vpop.f32.mrb[5].mxu1 }
  0xe8   :  { %v7996_v50 = vpop.f32.mrb[6].mxu1 }
  0xe9   :  { %1823 = vmatmul.mubr.bf16.gmra.mrb[84].mxu0 %v6920_v45  ;;  %v8001_v52 = vpop.f32.mrb[7].mxu1  ;;  %v6993_v45 = vld [vmem:[%s9820_s2 + $0x118] sm:$0xff]  }
  0xea   :  { %1830 = vmatprep.mubr.bf16.mxu0 %v6926_v46  ;;  %v6971_v46 = vld [vmem:[%s9821_s0 + $0x78] ss:$28 sps:$4 sm:$0xff]  }
  0xeb   :  { %4460 = vmatmul.mubr.bf16.gmra.mrb[112].mxu1 %v6923_v47  ;;  %v6976_v47 = vld [vmem:[%s9821_s0 + $0xb4] ss:$28 sps:$4 sm:$0xff]  }
  0xec   :  { %4467 = vmatprep.mubr.bf16.mxu1 %v6929_v51  ;;  %v7004_v51 = vld [vmem:[%s9820_s2 + $0x120] sm:$0xff]  }
  0xee   :  { %v8012_v56 = vpop.f32.mrb[8].mxu1 }
  0xef   :  { %v8014_v57 = vpop.f32.mrb[9].mxu1 }
  0xf0   :  { %v8016_v58 = vpop.f32.mrb[10].mxu1 }
  0xf1   :  { %1831 = vmatmul.mubr.bf16.gmra.mrb[88].mxu0 %v6928_v53  ;;  %v8021_v60 = vpop.f32.mrb[11].mxu1  ;;  %v6975_v53 = vld [vmem:[%s9823_s1 + $0x4d0] ss:$28 sps:$4 sm:$0xff]  }
  0xf2   :  { %1838 = vmatprep.mubr.bf16.mxu0 %v6932_v54 }
  0xf3   :  { %4468 = vmatmul.mubr.bf16.gmra.mrb[116].mxu1 %v6931_v55 }
  0xf4   :  { %4475 = vmatprep.mubr.bf16.mxu1 %v6936_v59 }
  0xf6   :  { %v8032_v1 = vpop.f32.mrb[12].mxu1 }
  0xf7   :  { %v8034_v2 = vpop.f32.mrb[13].mxu1 }
  0xf8   :  { %v8036_v3 = vpop.f32.mrb[14].mxu1 }
  0xf9   :  { %1839 = vmatmul.mubr.bf16.gmra.mrb[92].mxu0 %v6935_v61  ;;  %v8041_v5 = vpop.f32.mrb[15].mxu1  ;;  %v6979_v61 = vld [vmem:[%s9823_s1 + $0x50c] ss:$28 sps:$4 sm:$0xff]  }
  0xfa   :  { %1846 = vmatprep.mubr.bf16.mxu0 %v6940_v62 }
  0xfb   :  { %4476 = vmatmul.mubr.bf16.gmra.mrb[120].mxu1 %v6938_v63  ;;  %v7018_v63 = vld [vmem:[%s9820_s2 + $0x128] sm:$0xff]  }
  0xfc   :  { %4483 = vmatprep.mubr.bf16.mxu1 %v6943_v4  ;;  %v6978_v4 = vld [vmem:[%s9821_s0 + $0xb0] ss:$28 sps:$4 sm:$0xff]  }
  0xfe   :  { %v8052_v9 = vpop.f32.mrb[16].mxu1 }
  0xff   :  { %v8054_v10 = vpop.f32.mrb[17].mxu1 }
 0x100   :  { %v8056_v11 = vpop.f32.mrb[18].mxu1 }
 0x101   :  { %1847 = vmatmul.mubr.bf16.gmra.mrb[96].mxu0 %v6942_v6  ;;  %v8061_v13 = vpop.f32.mrb[19].mxu1  ;;  %v6984_v6 = vld [vmem:[%s9821_s0 + $0xec] ss:$28 sps:$4 sm:$0xff]  }
 0x102   :  { %1854 = vmatprep.mubr.bf16.mxu0 %v6948_v7  ;;  %v6981_v7 = vld [vmem:[%s9823_s1 + $0x508] ss:$28 sps:$4 sm:$0xff]  }
 0x103   :  { %4484 = vmatmul.mubr.bf16.gmra.mrb[124].mxu1 %v6945_v8 }
 0x104   :  { %4491 = vmatprep.mubr.bf16.mxu1 %v6951_v12  ;;  %v7028_v12 = vld [vmem:[%s9820_s2 + $0x130] sm:$0xff]  }
 0x106   :  { %v8072_v17 = vpop.f32.mrb[20].mxu1 }
 0x107   :  { %v8074_v18 = vpop.f32.mrb[21].mxu1 }
 0x108   :  { %v8076_v19 = vpop.f32.mrb[22].mxu1 }
 0x109   :  { %1855 = vmatmul.mubr.bf16.gmra.mrb[100].mxu0 %v6950_v14  ;;  %v8081_v21 = vpop.f32.mrb[23].mxu1 }
 0x10a   :  { %1895 = vmatprep.mubr.bf16.mxu0 %v6956_v15 }
 0x10b   :  { %4492 = vmatmul.mubr.bf16.gmra.mrb[128].mxu1 %v6953_v16  ;;  %v6987_v16 = vld [vmem:[%s9823_s1 + $0x544] ss:$28 sps:$4 sm:$0xff]  }
 0x10c   :  { %4499 = vmatprep.mubr.bf16.mxu1 %v6957_v20 }
 0x10e   :  { %v8095_v26 = vpop.f32.mrb[24].mxu1 }
 0x10f   :  { %v8097_v27 = vpop.f32.mrb[25].mxu1 }
 0x110   :  { %v8099_v28 = vpop.f32.mrb[26].mxu1 }
 0x111   :  { %1896 = vmatmul.mubr.bf16.vlgmr.msra.gmra.mrb[0].mxu0 %v6954_v22  ;;  %v8104_v30 = vpop.f32.mrb[27].mxu1  ;;  %v7040_v22 = vld [vmem:[%s9820_s2 + $0x138] sm:$0xff]  }
 0x112   :  { %2105 = vmatpush1.bf16.msra.mxu0 %v6959_v23  ;;  %1903 = vmatprep.mubr.bf16.mxu0 %v6962_v24  ;;  %v6986_v23 = vld [vmem:[%s9821_s0 + $0xe8] ss:$28 sps:$4 sm:$0xff]  }
 0x113   :  { %4500 = vmatmul.mubr.bf16.gmra.mrb[132].mxu1 %v6960_v25  ;;  %2106 = vmatprep.subr.bf16.mxu0 %v7348_v0  ;;  %v6990_v24 = vld [vmem:[%s9821_s0 + $0x124] ss:$28 sps:$4 sm:$0xff]  }
 0x114   :  { %4507 = vmatprep.mubr.bf16.mxu1 %v6965_v29  ;;  %v7053_v29 = vld [vmem:[%s9820_s2 + $0x140] sm:$0xff]  }
 0x116   :  { %v8122_v36 = vpop.f32.mrb[28].mxu1  ;;  %2107 = vmatpush1.bf16.msra.mxu0 %v6968_v31 }
 0x117   :  { %v8124_v37 = vpop.f32.mrb[29].mxu1  ;;  %2108 = vmatprep.subr.bf16.mxu0 %v7348_v0 }
 0x118   :  { %v8127_v38 = vpop.f32.mrb[30].mxu1 }
 0x119   :  { %1904 = vmatmul.mubr.bf16.gmra.mrb[4].mxu0 %v6964_v32  ;;  %v8132_v43 = vpop.f32.mrb[31].mxu1  ;;  %v6989_v32 = vld [vmem:[%s9823_s1 + $0x540] ss:$28 sps:$4 sm:$0xff]  }
 0x11a   :  { %1911 = vmatprep.mubr.bf16.mxu0 %v6969_v33  ;;  %2109 = vmatpush1.bf16.msra.mxu0 %v6982_v34  ;;  %v6994_v34 = vld [vmem:[%s9823_s1 + $0x57c] ss:$28 sps:$4 sm:$0xff]  }
 0x11b   :  { %4508 = vmatmul.mubr.bf16.gmra.mrb[136].mxu1 %v6967_v35  ;;  %2110 = vmatprep.subr.bf16.mxu0 %v7348_v0 }
 0x11c   :  { %4515 = vmatprep.mubr.bf16.mxu1 %v6972_v39  ;;  %v7062_v39 = vld [vmem:[%s9820_s2 + $0x148] sm:$0xff]  }
 0x11e   :  { %v8150_v54 = vpop.f32.mrb[32].mxu1  ;;  %2111 = vmatpush1.bf16.msra.mxu0 %v6993_v45  ;;  %v6992_v45 = vld [vmem:[%s9821_s0 + $0x120] ss:$28 sps:$4 sm:$0xff]  }
 0x11f   :  { %v8152_v55 = vpop.f32.mrb[33].mxu1  ;;  %2112 = vmatprep.subr.bf16.mxu0 %v7348_v0 }
 0x120   :  { %v8155_v59 = vpop.f32.mrb[34].mxu1 }
 0x121   :  { %1912 = vmatmul.mubr.bf16.gmra.mrb[8].mxu0 %v6971_v46  ;;  %v8160_v62 = vpop.f32.mrb[35].mxu1 }
 0x122   :  { %1919 = vmatprep.mubr.bf16.mxu0 %v6976_v47  ;;  %2113 = vmatpush1.bf16.msra.mxu0 %v7004_v51  ;;  %v6998_v47 = vld [vmem:[%s9821_s0 + $0x15c] ss:$28 sps:$4 sm:$0xff]   ;;  %v7076_v51 = vld [vmem:[%s9820_s2 + $0x150] sm:$0xff]  }
 0x123   :  { %4516 = vmatmul.mubr.bf16.gmra.mrb[140].mxu1 %v6975_v53  ;;  %2114 = vmatprep.subr.bf16.mxu0 %v7348_v0 }
 0x124   :  { %4523 = vmatprep.mubr.bf16.mxu1 %v6979_v61  ;;  %v6996_v61 = vld [vmem:[%s9823_s1 + $0x578] ss:$28 sps:$4 sm:$0xff]  }
 0x126   :  { %v8175_v8 = vpop.f32.mrb[36].mxu1  ;;  %2115 = vmatpush1.bf16.msra.mxu0 %v7018_v63 }
 0x127   :  { %v8180_v14 = vpop.f32.mrb[37].mxu1  ;;  %2116 = vmatprep.subr.bf16.mxu0 %v7348_v0 }
 0x128   :  { %v8183_v15 = vpop.f32.mrb[38].mxu1 }
 0x129   :  { %1920 = vmatmul.mubr.bf16.gmra.mrb[12].mxu0 %v6978_v4  ;;  %v8188_v20 = vpop.f32.mrb[39].mxu1  ;;  %v7003_v4 = vld [vmem:[%s9823_s1 + $0xc] ss:$28 sps:$4 sm:$0xff]  }
 0x12a   :  { %1927 = vmatprep.mubr.bf16.mxu0 %v6984_v6  ;;  %2117 = vmatpush1.bf16.msra.mxu0 %v7028_v12  ;;  %v7000_v12 = vld [vmem:[%s9821_s0 + $0x158] ss:$28 sps:$4 sm:$0xff]  }
 0x12b   :  { %4524 = vmatmul.mubr.bf16.gmra.mrb[144].mxu1 %v6981_v7  ;;  %2118 = vmatprep.subr.bf16.mxu0 %v7348_v0  ;;  %v7087_v7 = vld [vmem:[%s9820_s2 + $0x158] sm:$0xff]  }
 0x12c   :  { %4531 = vmatprep.mubr.bf16.mxu1 %v6987_v16 }
 0x12e   :  { %v8200_v25 = vpop.f32.mrb[40].mxu1  ;;  %2119 = vmatpush1.bf16.msra.mxu0 %v7040_v22  ;;  %v7005_v22 = vld [vmem:[%s9821_s0 + $0x194] ss:$28 sps:$4 sm:$0xff]  }
 0x12f   :  { %v8205_v31 = vpop.f32.mrb[41].mxu1  ;;  %2120 = vmatprep.subr.bf16.mxu0 %v7348_v0 }
 0x130   :  { %v8211_v33 = vpop.f32.mrb[42].mxu1 }
 0x131   :  { %1928 = vmatmul.mubr.bf16.gmra.mrb[16].mxu0 %v6986_v23  ;;  %v8216_v35 = vpop.f32.mrb[43].mxu1  ;;  %v7098_v23 = vld [vmem:[%s9820_s2 + $0x160] sm:$0xff]  }
 0x132   :  { %1935 = vmatprep.mubr.bf16.mxu0 %v6990_v24  ;;  %2121 = vmatpush1.bf16.msra.mxu0 %v7053_v29  ;;  %v7001_v29 = vld [vmem:[%s9823_s1 + $0x8] ss:$28 sps:$4 sm:$0xff]  }
 0x133   :  { %4532 = vmatmul.mubr.bf16.gmra.mrb[148].mxu1 %v6989_v32  ;;  %2122 = vmatprep.subr.bf16.mxu0 %v7348_v0 }
 0x134   :  { %4539 = vmatprep.mubr.bf16.mxu1 %v6994_v34  ;;  %v7007_v34 = vld [vmem:[%s9822_s3 + $0x100] sm:$0xff]  }
 0x136   :  { %v8225_v46 = vpop.f32.mrb[44].mxu1  ;;  %2123 = vmatpush1.bf16.msra.mxu0 %v7062_v39  ;;  %v7009_v39 = vld [vmem:[%s9823_s1 + $0x44] ss:$28 sps:$4 sm:$0xff]  }
 0x137   :  { %v8233_v53 = vpop.f32.mrb[45].mxu1  ;;  %2124 = vmatprep.subr.bf16.mxu0 %v7348_v0 }
 0x138   :  { %v8239_v63 = vpop.f32.mrb[46].mxu1 }
 0x139   :  { %1936 = vmatmul.mubr.bf16.gmra.mrb[20].mxu0 %v6992_v45  ;;  %v8244_v6 = vpop.f32.mrb[47].mxu1 }
 0x13a   :  { %1943 = vmatprep.mubr.bf16.mxu0 %v6998_v47  ;;  %2125 = vmatpush1.bf16.msra.mxu0 %v7076_v51  ;;  %v7112_v47 = vld [vmem:[%s9820_s2 + $0x168] sm:$0xff]  }
 0x13b   :  { %4540 = vmatmul.mubr.bf16.gmra.mrb[152].mxu1 %v6996_v61  ;;  %2126 = vmatprep.subr.bf16.mxu0 %v7348_v0  ;;  %v7019_v51 = vld [vmem:[%s9822_s3 + $0x108] sm:$0xff]  }
 0x13c   :  { %4580 = vmatprep.mubr.bf16.mxu1 %v7003_v4  ;;  %v7008_v61 = vld [vmem:[%s9821_s0 + $0x190] ss:$28 sps:$4 sm:$0xff]  }
 0x13d   :  { %v7012_v4 = vld [vmem:[%s9821_s0 + $0x1cc] ss:$28 sps:$4 sm:$0xff]  }
 0x13e   :  { %v8253_v16 = vpop.f32.mrb[48].mxu1  ;;  %2127 = vmatpush1.bf16.msra.mxu0 %v7087_v7  ;;  %v7122_v7 = vld [vmem:[%s9820_s2 + $0x170] sm:$0xff]  }
 0x13f   :  { %v8261_v24 = vpop.f32.mrb[49].mxu1  ;;  %2128 = vmatprep.subr.bf16.mxu0 %v7348_v0 }
 0x140   :  { %v8267_v32 = vpop.f32.mrb[50].mxu1 }
 0x141   :  { %9853 = vst [vmem:[#allocation2_spill] sm:$0xff] %v8267_v32  ;;  %1944 = vmatmul.mubr.bf16.gmra.mrb[24].mxu0 %v7000_v12  ;;  %v8275_v45 = vpop.f32.mrb[51].mxu1  ;;  %v7011_v12 = vld [vmem:[%s9823_s1 + $0x40] ss:$28 sps:$4 sm:$0xff]  }
 0x142   :  { %1951 = vmatprep.mubr.bf16.mxu0 %v7005_v22  ;;  %2129 = vmatpush1.bf16.msra.mxu0 %v7098_v23  ;;  %v7015_v22 = vld [vmem:[%s9823_s1 + $0x7c] ss:$28 sps:$4 sm:$0xff]   ;;  %v7033_v23 = vld [vmem:[%s9822_s3 + $0x110] sm:$0xff]  }
 0x143   :  { %4581 = vmatmul.mubr.bf16.vlgmr.msra.gmra.mrb[52].mxu1 %v7001_v29  ;;  %2130 = vmatprep.subr.bf16.mxu0 %v7348_v0  ;;  %v7041_v29 = vld [vmem:[%s9822_s3 + $0x118] sm:$0xff]  }
 0x144   :  { %4790 = vmatpush1.bf16.msra.mxu1 %v7007_v34  ;;  %4588 = vmatprep.mubr.bf16.mxu1 %v7009_v39  ;;  %v7014_v34 = vld [vmem:[%s9821_s0 + $0x1c8] ss:$28 sps:$4 sm:$0xff]  }
 0x145   :  { %4791 = vmatprep.subr.bf16.mxu1 %v7348_v0  ;;  %v7020_v39 = vld [vmem:[%s9821_s0 + $0x204] ss:$28 sps:$4 sm:$0xff]  }
 0x146   :  { %2131 = vmatpush1.bf16.msra.mxu0 %v7112_v47  ;;  %v7017_v47 = vld [vmem:[%s9823_s1 + $0x78] ss:$28 sps:$4 sm:$0xff]  }
 0x147   :  { %2132 = vmatprep.subr.bf16.mxu0 %v7348_v0 }
 0x148   :  { %4792 = vmatpush1.bf16.msra.mxu1 %v7019_v51  ;;  %v7023_v51 = vld [vmem:[%s9823_s1 + $0xb4] ss:$28 sps:$4 sm:$0xff]  }
 0x149   :  { %1952 = vmatmul.mubr.bf16.gmra.mrb[28].mxu0 %v7008_v61  ;;  %4793 = vmatprep.subr.bf16.mxu1 %v7348_v0  ;;  %v7055_v61 = vld [vmem:[%s9822_s3 + $0x120] sm:$0xff]  }
 0x14a   :  { %1959 = vmatprep.mubr.bf16.mxu0 %v7012_v4  ;;  %2133 = vmatpush1.bf16.msra.mxu0 %v7122_v7  ;;  %v7134_v4 = vld [vmem:[%s9820_s2 + $0x178] sm:$0xff]   ;;  %v7068_v7 = vld [vmem:[%s9822_s3 + $0x128] sm:$0xff]  }
 0x14b   :  { %4589 = vmatmul.mubr.bf16.gmra.mrb[56].mxu1 %v7011_v12  ;;  %2134 = vmatprep.subr.bf16.mxu0 %v7348_v0  ;;  %v7022_v12 = vld [vmem:[%s9821_s0 + $0x200] ss:$28 sps:$4 sm:$0xff]  }
 0x14c   :  { %4596 = vmatprep.mubr.bf16.mxu1 %v7015_v22  ;;  %4794 = vmatpush1.bf16.msra.mxu1 %v7033_v23  ;;  %v7026_v22 = vld [vmem:[%s9821_s0 + $0x23c] ss:$28 sps:$4 sm:$0xff]   ;;  %v7025_v23 = vld [vmem:[%s9823_s1 + $0xb0] ss:$28 sps:$4 sm:$0xff]  }
 0x14d   :  { %4795 = vmatprep.subr.bf16.mxu1 %v7348_v0 }
 0x14e   :  { %2135 = vmatpush1.bf16.msra.mxu0 %v7134_v4  ;;  %v7037_v4 = vld [vmem:[%s9823_s1 + $0x124] ss:$28 sps:$4 sm:$0xff]  }
 0x150   :  { %4796 = vmatpush1.bf16.msra.mxu1 %v7041_v29  ;;  %v7030_v29 = vld [vmem:[%s9823_s1 + $0xec] ss:$28 sps:$4 sm:$0xff]  }
 0x151   :  { %1960 = vmatmul.mubr.bf16.gmra.mrb[32].mxu0 %v7014_v34  ;;  %4797 = vmatprep.subr.bf16.mxu1 %v7348_v0  ;;  %v7077_v34 = vld [vmem:[%s9822_s3 + $0x130] sm:$0xff]  }
 0x152   :  { %1967 = vmatprep.mubr.bf16.mxu0 %v7020_v39  ;;  %v7091_v39 = vld [vmem:[%s9822_s3 + $0x138] sm:$0xff]  }
 0x153   :  { %4597 = vmatmul.mubr.bf16.gmra.mrb[60].mxu1 %v7017_v47  ;;  %v7029_v47 = vld [vmem:[%s9821_s0 + $0x238] ss:$28 sps:$4 sm:$0xff]  }
 0x154   :  { %4604 = vmatprep.mubr.bf16.mxu1 %v7023_v51  ;;  %4798 = vmatpush1.bf16.msra.mxu1 %v7055_v61  ;;  %v7034_v51 = vld [vmem:[%s9821_s0 + $0x274] ss:$28 sps:$4 sm:$0xff]   ;;  %v7032_v61 = vld [vmem:[%s9823_s1 + $0xe8] ss:$28 sps:$4 sm:$0xff]  }
 0x155   :  { %4799 = vmatprep.subr.bf16.mxu1 %v7348_v0 }
 0x158   :  { %4800 = vmatpush1.bf16.msra.mxu1 %v7068_v7  ;;  %v7101_v7 = vld [vmem:[%s9822_s3 + $0x140] sm:$0xff]  }
 0x159   :  { %1968 = vmatmul.mubr.bf16.gmra.mrb[36].mxu0 %v7022_v12  ;;  %4801 = vmatprep.subr.bf16.mxu1 %v7348_v0  ;;  %v8372_v12 = vld [vmem:[%s9822_s3 + $0x180] sm:$0xff]  }
 0x15a   :  { %1975 = vmatprep.mubr.bf16.mxu0 %v7026_v22  ;;  %6220 = vmatprep.subr.bf16.mxu0 %v8372_v12  ;;  %v7113_v22 = vld [vmem:[%s9822_s3 + $0x148] sm:$0xff]  }
 0x15b   :  { %4605 = vmatmul.mubr.bf16.gmra.mrb[64].mxu1 %v7025_v23  ;;  %v7036_v23 = vld [vmem:[%s9821_s0 + $0x270] ss:$28 sps:$4 sm:$0xff]  }
 0x15c   :  { %4612 = vmatprep.mubr.bf16.mxu1 %v7030_v29  ;;  %4802 = vmatpush1.bf16.msra.mxu1 %v7077_v34  ;;  %v7042_v29 = vld [vmem:[%s9821_s0 + $0x2ac] ss:$28 sps:$4 sm:$0xff]   ;;  %v7039_v34 = vld [vmem:[%s9823_s1 + $0x120] ss:$28 sps:$4 sm:$0xff]  }
 0x15d   :  { %4803 = vmatprep.subr.bf16.mxu1 %v7348_v0 }
 0x160   :  { %4804 = vmatpush1.bf16.msra.mxu1 %v7091_v39  ;;  %v7045_v39 = vld [vmem:[%s9823_s1 + $0x15c] ss:$28 sps:$4 sm:$0xff]  }
 0x161   :  { %1976 = vmatmul.mubr.bf16.gmra.mrb[40].mxu0 %v7029_v47  ;;  %4805 = vmatprep.subr.bf16.mxu1 %v7348_v0  ;;  %v7127_v47 = vld [vmem:[%s9822_s3 + $0x150] sm:$0xff]  }
 0x162   :  { %1983 = vmatprep.mubr.bf16.mxu0 %v7034_v51  ;;  %v7135_v51 = vld [vmem:[%s9822_s3 + $0x158] sm:$0xff]  }
 0x163   :  { %4613 = vmatmul.mubr.bf16.gmra.mrb[68].mxu1 %v7032_v61  ;;  %v7044_v61 = vld [vmem:[%s9821_s0 + $0x2a8] ss:$28 sps:$4 sm:$0xff]  }
 0x164   :  { %4620 = vmatprep.mubr.bf16.mxu1 %v7037_v4  ;;  %4806 = vmatpush1.bf16.msra.mxu1 %v7101_v7  ;;  %v7048_v4 = vld [vmem:[%s9821_s0 + $0x2e4] ss:$28 sps:$4 sm:$0xff]   ;;  %v7047_v7 = vld [vmem:[%s9823_s1 + $0x158] ss:$28 sps:$4 sm:$0xff]  }
 0x165   :  { %4807 = vmatprep.subr.bf16.mxu1 %v7348_v0 }
 0x168   :  { %4808 = vmatpush1.bf16.msra.mxu1 %v7113_v22  ;;  %v7051_v22 = vld [vmem:[%s9823_s1 + $0x194] ss:$28 sps:$4 sm:$0xff]  }
 0x169   :  { %1984 = vmatmul.mubr.bf16.gmra.mrb[44].mxu0 %v7036_v23  ;;  %4809 = vmatprep.subr.bf16.mxu1 %v7348_v0  ;;  %v7149_v23 = vld [vmem:[%s9822_s3 + $0x160] sm:$0xff]  }
 0x16a   :  { %1991 = vmatprep.mubr.bf16.mxu0 %v7042_v29  ;;  %v7161_v29 = vld [vmem:[%s9822_s3 + $0x168] sm:$0xff]  }
 0x16b   :  { %4621 = vmatmul.mubr.bf16.gmra.mrb[72].mxu1 %v7039_v34  ;;  %v7050_v34 = vld [vmem:[%s9821_s0 + $0x2e0] ss:$28 sps:$4 sm:$0xff]  }
 0x16c   :  { %4628 = vmatprep.mubr.bf16.mxu1 %v7045_v39  ;;  %4810 = vmatpush1.bf16.msra.mxu1 %v7127_v47  ;;  %v7056_v39 = vld [vmem:[%s9821_s0 + $0x31c] ss:$28 sps:$4 sm:$0xff]   ;;  %v7054_v47 = vld [vmem:[%s9823_s1 + $0x190] ss:$28 sps:$4 sm:$0xff]  }
 0x16d   :  { %4811 = vmatprep.subr.bf16.mxu1 %v7348_v0 }
 0x170   :  { %4812 = vmatpush1.bf16.msra.mxu1 %v7135_v51  ;;  %v7059_v51 = vld [vmem:[%s9823_s1 + $0x1cc] ss:$28 sps:$4 sm:$0xff]  }
 0x171   :  { %1992 = vmatmul.mubr.bf16.gmra.mrb[48].mxu0 %v7044_v61  ;;  %4813 = vmatprep.subr.bf16.mxu1 %v7348_v0  ;;  %v7169_v61 = vld [vmem:[%s9822_s3 + $0x170] sm:$0xff]  }
 0x172   :  { %1999 = vmatprep.mubr.bf16.mxu0 %v7048_v4  ;;  %v7058_v4 = vld [vmem:[%s9821_s0 + $0x318] ss:$28 sps:$4 sm:$0xff]  }
 0x173   :  { %4629 = vmatmul.mubr.bf16.gmra.mrb[76].mxu1 %v7047_v7  ;;  %v7063_v7 = vld [vmem:[%s9821_s0 + $0x354] ss:$28 sps:$4 sm:$0xff]  }
 0x174   :  { %4636 = vmatprep.mubr.bf16.mxu1 %v7051_v22  ;;  %4814 = vmatpush1.bf16.msra.mxu1 %v7149_v23  ;;  %v7061_v22 = vld [vmem:[%s9823_s1 + $0x1c8] ss:$28 sps:$4 sm:$0xff]  }
 0x175   :  { %4815 = vmatprep.subr.bf16.mxu1 %v7348_v0  ;;  %v7066_v23 = vld [vmem:[%s9823_s1 + $0x204] ss:$28 sps:$4 sm:$0xff]  }
 0x178   :  { %4816 = vmatpush1.bf16.msra.mxu1 %v7161_v29  ;;  %v7065_v29 = vld [vmem:[%s9821_s0 + $0x350] ss:$28 sps:$4 sm:$0xff]  }
 0x179   :  { %2000 = vmatmul.mubr.bf16.gmra.mrb[52].mxu0 %v7050_v34  ;;  %4817 = vmatprep.subr.bf16.mxu1 %v7348_v0  ;;  %v7069_v34 = vld [vmem:[%s9823_s1 + $0x200] ss:$28 sps:$4 sm:$0xff]  }
 0x17a   :  { %2007 = vmatprep.mubr.bf16.mxu0 %v7056_v39  ;;  %v7073_v39 = vld [vmem:[%s9823_s1 + $0x23c] ss:$28 sps:$4 sm:$0xff]  }
 0x17b   :  { %4637 = vmatmul.mubr.bf16.gmra.mrb[80].mxu1 %v7054_v47  ;;  %v7182_v47 = vld [vmem:[%s9822_s3 + $0x178] sm:$0xff]  }
 0x17c   :  { %4644 = vmatprep.mubr.bf16.mxu1 %v7059_v51  ;;  %4818 = vmatpush1.bf16.msra.mxu1 %v7169_v61  ;;  %v7072_v51 = vld [vmem:[%s9821_s0 + $0x388] ss:$28 sps:$4 sm:$0xff]  }
 0x17d   :  { %4819 = vmatprep.subr.bf16.mxu1 %v7348_v0  ;;  %v7070_v0 = vld [vmem:[%s9821_s0 + $0x38c] ss:$28 sps:$4 sm:$0xff]   ;;  %v7078_v61 = vld [vmem:[%s9821_s0 + $0x3c4] ss:$28 sps:$4 sm:$0xff]  }
 0x180   :  { %4820 = vmatpush1.bf16.msra.mxu1 %v7182_v47  ;;  %v7090_v47 = vld [vmem:[%s9823_s1 + $0x2a8] ss:$28 sps:$4 sm:$0xff]  }
 0x181   :  { %2008 = vmatmul.mubr.bf16.gmra.mrb[56].mxu0 %v7058_v4  ;;  %6276 = vmatprep.subr.bf16.mxu1 %v8372_v12  ;;  %v7075_v4 = vld [vmem:[%s9823_s1 + $0x238] ss:$28 sps:$4 sm:$0xff]  }
 0x182   :  { %2015 = vmatprep.mubr.bf16.mxu0 %v7063_v7  ;;  %v7081_v7 = vld [vmem:[%s9823_s1 + $0x274] ss:$28 sps:$4 sm:$0xff]  }
 0x183   :  { %4645 = vmatmul.mubr.bf16.gmra.mrb[84].mxu1 %v7061_v22  ;;  %v7080_v22 = vld [vmem:[%s9821_s0 + $0x3c0] ss:$28 sps:$4 sm:$0xff]  }
 0x184   :  { %4652 = vmatprep.mubr.bf16.mxu1 %v7066_v23  ;;  %v7084_v23 = vld [vmem:[%s9821_s0 + $0x3fc] ss:$28 sps:$4 sm:$0xff]  }
 0x189   :  { %2016 = vmatmul.mubr.bf16.gmra.mrb[60].mxu0 %v7065_v29  ;;  %v7083_v29 = vld [vmem:[%s9823_s1 + $0x270] ss:$28 sps:$4 sm:$0xff]  }
 0x18a   :  { %2023 = vmatprep.mubr.bf16.mxu0 %v7070_v0  ;;  %v7088_v0 = vld [vmem:[%s9823_s1 + $0x2ac] ss:$28 sps:$4 sm:$0xff]  }
 0x18b   :  { %4653 = vmatmul.mubr.bf16.gmra.mrb[88].mxu1 %v7069_v34  ;;  %v7086_v34 = vld [vmem:[%s9821_s0 + $0x3f8] ss:$28 sps:$4 sm:$0xff]  }
 0x18c   :  { %4660 = vmatprep.mubr.bf16.mxu1 %v7073_v39  ;;  %v7092_v39 = vld [vmem:[%s9821_s0 + $0x434] ss:$28 sps:$4 sm:$0xff]  }
 0x191   :  { %2024 = vmatmul.mubr.bf16.gmra.mrb[64].mxu0 %v7072_v51  ;;  %v7095_v51 = vld [vmem:[%s9823_s1 + $0x2e4] ss:$28 sps:$4 sm:$0xff]  }
 0x192   :  { %2031 = vmatprep.mubr.bf16.mxu0 %v7078_v61  ;;  %v7094_v61 = vld [vmem:[%s9821_s0 + $0x430] ss:$28 sps:$4 sm:$0xff]  }
 0x193   :  { %4661 = vmatmul.mubr.bf16.gmra.mrb[92].mxu1 %v7075_v4  ;;  %v7099_v4 = vld [vmem:[%s9821_s0 + $0x46c] ss:$28 sps:$4 sm:$0xff]  }
 0x194   :  { %4668 = vmatprep.mubr.bf16.mxu1 %v7081_v7  ;;  %v7097_v7 = vld [vmem:[%s9823_s1 + $0x2e0] ss:$28 sps:$4 sm:$0xff]  }
 0x199   :  { %2032 = vmatmul.mubr.bf16.gmra.mrb[68].mxu0 %v7080_v22  ;;  %v7103_v22 = vld [vmem:[%s9823_s1 + $0x31c] ss:$28 sps:$4 sm:$0xff]  }
 0x19a   :  { %2039 = vmatprep.mubr.bf16.mxu0 %v7084_v23  ;;  %v7102_v23 = vld [vmem:[%s9821_s0 + $0x468] ss:$28 sps:$4 sm:$0xff]  }
 0x19b   :  { %4669 = vmatmul.mubr.bf16.gmra.mrb[96].mxu1 %v7083_v29  ;;  %v7106_v29 = vld [vmem:[%s9821_s0 + $0x4a4] ss:$28 sps:$4 sm:$0xff]  }
 0x19c   :  { %4676 = vmatprep.mubr.bf16.mxu1 %v7088_v0  ;;  %v7105_v0 = vld [vmem:[%s9823_s1 + $0x318] ss:$28 sps:$4 sm:$0xff]  }
 0x1a1   :  { %2040 = vmatmul.mubr.bf16.gmra.mrb[72].mxu0 %v7086_v34  ;;  %v7109_v34 = vld [vmem:[%s9823_s1 + $0x354] ss:$28 sps:$4 sm:$0xff]  }
 0x1a2   :  { %2047 = vmatprep.mubr.bf16.mxu0 %v7092_v39  ;;  %v7108_v39 = vld [vmem:[%s9821_s0 + $0x4a0] ss:$28 sps:$4 sm:$0xff]  }
 0x1a3   :  { %4677 = vmatmul.mubr.bf16.gmra.mrb[100].mxu1 %v7090_v47  ;;  %v7114_v47 = vld [vmem:[%s9821_s0 + $0x4dc] ss:$28 sps:$4 sm:$0xff]  }
 0x1a4   :  { %4684 = vmatprep.mubr.bf16.mxu1 %v7095_v51  ;;  %v7111_v51 = vld [vmem:[%s9823_s1 + $0x350] ss:$28 sps:$4 sm:$0xff]  }
 0x1a9   :  { %2048 = vmatmul.mubr.bf16.gmra.mrb[76].mxu0 %v7094_v61  ;;  %v7117_v61 = vld [vmem:[%s9823_s1 + $0x38c] ss:$28 sps:$4 sm:$0xff]  }
 0x1aa   :  { %2055 = vmatprep.mubr.bf16.mxu0 %v7099_v4  ;;  %v7116_v4 = vld [vmem:[%s9821_s0 + $0x4d8] ss:$28 sps:$4 sm:$0xff]  }
 0x1ab   :  { %4685 = vmatmul.mubr.bf16.gmra.mrb[104].mxu1 %v7097_v7  ;;  %v7120_v7 = vld [vmem:[%s9821_s0 + $0x514] ss:$28 sps:$4 sm:$0xff]  }
 0x1ac   :  { %4692 = vmatprep.mubr.bf16.mxu1 %v7103_v22  ;;  %v7119_v22 = vld [vmem:[%s9823_s1 + $0x388] ss:$28 sps:$4 sm:$0xff]  }
 0x1b1   :  { %2056 = vmatmul.mubr.bf16.gmra.mrb[80].mxu0 %v7102_v23  ;;  %v7124_v23 = vld [vmem:[%s9823_s1 + $0x3c4] ss:$28 sps:$4 sm:$0xff]  }
 0x1b2   :  { %2063 = vmatprep.mubr.bf16.mxu0 %v7106_v29  ;;  %v7123_v29 = vld [vmem:[%s9821_s0 + $0x510] ss:$28 sps:$4 sm:$0xff]  }
 0x1b3   :  { %4693 = vmatmul.mubr.bf16.gmra.mrb[108].mxu1 %v7105_v0  ;;  %v7128_v0 = vld [vmem:[%s9821_s0 + $0x54c] ss:$28 sps:$4 sm:$0xff]  }
 0x1b4   :  { %4700 = vmatprep.mubr.bf16.mxu1 %v7109_v34  ;;  %v7126_v34 = vld [vmem:[%s9823_s1 + $0x3c0] ss:$28 sps:$4 sm:$0xff]  }
 0x1b9   :  { %2064 = vmatmul.mubr.bf16.gmra.mrb[84].mxu0 %v7108_v39  ;;  %v7131_v39 = vld [vmem:[%s9823_s1 + $0x3fc] ss:$28 sps:$4 sm:$0xff]  }
 0x1ba   :  { %2071 = vmatprep.mubr.bf16.mxu0 %v7114_v47  ;;  %v7130_v47 = vld [vmem:[%s9821_s0 + $0x548] ss:$28 sps:$4 sm:$0xff]  }
 0x1bb   :  { %4701 = vmatmul.mubr.bf16.gmra.mrb[112].mxu1 %v7111_v51  ;;  %v7136_v51 = vld [vmem:[%s9821_s0 + $0x584] ss:$28 sps:$4 sm:$0xff]  }
 0x1bc   :  { %4708 = vmatprep.mubr.bf16.mxu1 %v7117_v61  ;;  %v7133_v61 = vld [vmem:[%s9823_s1 + $0x3f8] ss:$28 sps:$4 sm:$0xff]  }
 0x1c1   :  { %2072 = vmatmul.mubr.bf16.gmra.mrb[88].mxu0 %v7116_v4  ;;  %v7139_v4 = vld [vmem:[%s9823_s1 + $0x434] ss:$28 sps:$4 sm:$0xff]  }
 0x1c2   :  { %2079 = vmatprep.mubr.bf16.mxu0 %v7120_v7  ;;  %v7138_v7 = vld [vmem:[%s9821_s0 + $0x580] ss:$28 sps:$4 sm:$0xff]  }
 0x1c3   :  { %4709 = vmatmul.mubr.bf16.gmra.mrb[116].mxu1 %v7119_v22  ;;  %v7144_v22 = vld [vmem:[%s9821_s0 + $0x14] ss:$28 sps:$4 sm:$0xff]  }
 0x1c4   :  { %4716 = vmatprep.mubr.bf16.mxu1 %v7124_v23  ;;  %v7141_v23 = vld [vmem:[%s9823_s1 + $0x430] ss:$28 sps:$4 sm:$0xff]  }
 0x1c9   :  { %2080 = vmatmul.mubr.bf16.gmra.mrb[92].mxu0 %v7123_v29  ;;  %v7145_v29 = vld [vmem:[%s9823_s1 + $0x46c] ss:$28 sps:$4 sm:$0xff]  }
 0x1ca   :  { %2087 = vmatprep.mubr.bf16.mxu0 %v7128_v0  ;;  %v7142_v0 = vld [vmem:[%s9821_s0 + $0x10] ss:$28 sps:$4 sm:$0xff]  }
 0x1cb   :  { %4717 = vmatmul.mubr.bf16.gmra.mrb[120].mxu1 %v7126_v34  ;;  %v7150_v34 = vld [vmem:[%s9821_s0 + $0x4c] ss:$28 sps:$4 sm:$0xff]  }
 0x1cc   :  { %4724 = vmatprep.mubr.bf16.mxu1 %v7131_v39  ;;  %v7148_v39 = vld [vmem:[%s9823_s1 + $0x468] ss:$28 sps:$4 sm:$0xff]  }
 0x1d1   :  { %2088 = vmatmul.mubr.bf16.gmra.mrb[96].mxu0 %v7130_v47  ;;  %v7230_v47 = vld [vmem:[%s9822_s3 + $0x188] sm:$0xff]  }
 0x1d2   :  { %2095 = vmatprep.mubr.bf16.mxu0 %v7136_v51  ;;  %v7153_v51 = vld [vmem:[%s9823_s1 + $0x4a4] ss:$28 sps:$4 sm:$0xff]  }
 0x1d3   :  { %4725 = vmatmul.mubr.bf16.gmra.mrb[124].mxu1 %v7133_v61  ;;  %v7152_v61 = vld [vmem:[%s9821_s0 + $0x48] ss:$28 sps:$4 sm:$0xff]  }
 0x1d4   :  { %4732 = vmatprep.mubr.bf16.mxu1 %v7139_v4  ;;  %v7156_v4 = vld [vmem:[%s9821_s0 + $0x84] ss:$28 sps:$4 sm:$0xff]  }
 0x1d9   :  { %2096 = vmatmul.mubr.bf16.gmra.mrb[100].mxu0 %v7138_v7  ;;  %v7155_v7 = vld [vmem:[%s9823_s1 + $0x4a0] ss:$28 sps:$4 sm:$0xff]  }
 0x1da   :  { %2136 = vmatprep.mubr.bf16.mxu0 %v7144_v22  ;;  %v7159_v22 = vld [vmem:[%s9823_s1 + $0x4dc] ss:$28 sps:$4 sm:$0xff]  }
 0x1db   :  { %4733 = vmatmul.mubr.bf16.gmra.mrb[128].mxu1 %v7141_v23  ;;  %v7158_v23 = vld [vmem:[%s9821_s0 + $0x80] ss:$28 sps:$4 sm:$0xff]  }
 0x1dc   :  { %4740 = vmatprep.mubr.bf16.mxu1 %v7145_v29  ;;  %v7163_v29 = vld [vmem:[%s9821_s0 + $0xbc] ss:$28 sps:$4 sm:$0xff]  }
 0x1e1   :  { %2137 = vmatmul.mubr.bf16.vlgmr.msra.gmra.mrb[0].mxu0 %v7142_v0  ;;  %v7162_v0 = vld [vmem:[%s9823_s1 + $0x4d8] ss:$28 sps:$4 sm:$0xff]  }
 0x1e2   :  { %6221 = vmatpush3.bf16.msra.mxu0 %v8372_v12  ;;  %2144 = vmatprep.mubr.bf16.mxu0 %v7150_v34  ;;  %v7166_v34 = vld [vmem:[%s9823_s1 + $0x514] ss:$28 sps:$4 sm:$0xff]  }
 0x1e3   :  { %4741 = vmatmul.mubr.bf16.gmra.mrb[132].mxu1 %v7148_v39  ;;  %6222 = vmatprep.subr.bf16.mxu0 %v7230_v47  ;;  %v7165_v39 = vld [vmem:[%s9821_s0 + $0xb8] ss:$28 sps:$4 sm:$0xff]  }
 0x1e4   :  { %4748 = vmatprep.mubr.bf16.mxu1 %v7153_v51  ;;  %v7170_v51 = vld [vmem:[%s9821_s0 + $0xf4] ss:$28 sps:$4 sm:$0xff]  }
 0x1e6   :  { %6223 = vmatpush3.bf16.msra.mxu0 %v7230_v47 }
 0x1e9   :  { %2145 = vmatmul.mubr.bf16.gmra.mrb[4].mxu0 %v7152_v61  ;;  %v7168_v61 = vld [vmem:[%s9823_s1 + $0x510] ss:$28 sps:$4 sm:$0xff]  }
 0x1ea   :  { %2152 = vmatprep.mubr.bf16.mxu0 %v7156_v4  ;;  %v7173_v4 = vld [vmem:[%s9823_s1 + $0x54c] ss:$28 sps:$4 sm:$0xff]  }
 0x1eb   :  { %4749 = vmatmul.mubr.bf16.gmra.mrb[136].mxu1 %v7155_v7  ;;  %v7172_v7 = vld [vmem:[%s9821_s0 + $0xf0] ss:$28 sps:$4 sm:$0xff]  }
 0x1ec   :  { %4756 = vmatprep.mubr.bf16.mxu1 %v7159_v22  ;;  %v7176_v22 = vld [vmem:[%s9821_s0 + $0x12c] ss:$28 sps:$4 sm:$0xff]  }
 0x1f1   :  { %2153 = vmatmul.mubr.bf16.gmra.mrb[8].mxu0 %v7158_v23  ;;  %v7175_v23 = vld [vmem:[%s9823_s1 + $0x548] ss:$28 sps:$4 sm:$0xff]  }
 0x1f2   :  { %2160 = vmatprep.mubr.bf16.mxu0 %v7163_v29  ;;  %v7179_v29 = vld [vmem:[%s9823_s1 + $0x584] ss:$28 sps:$4 sm:$0xff]  }
 0x1f3   :  { %4757 = vmatmul.mubr.bf16.gmra.mrb[140].mxu1 %v7162_v0  ;;  %v7178_v0 = vld [vmem:[%s9821_s0 + $0x128] ss:$28 sps:$4 sm:$0xff]  }
 0x1f4   :  { %4764 = vmatprep.mubr.bf16.mxu1 %v7166_v34  ;;  %v7183_v34 = vld [vmem:[%s9821_s0 + $0x164] ss:$28 sps:$4 sm:$0xff]  }
 0x1f9   :  { %2161 = vmatmul.mubr.bf16.gmra.mrb[12].mxu0 %v7165_v39  ;;  %v7181_v39 = vld [vmem:[%s9823_s1 + $0x580] ss:$28 sps:$4 sm:$0xff]  }
 0x1fa   :  { %2168 = vmatprep.mubr.bf16.mxu0 %v7170_v51  ;;  %v7188_v51 = vld [vmem:[%s9823_s1 + $0x14] ss:$28 sps:$4 sm:$0xff]  }
 0x1fb   :  { %4765 = vmatmul.mubr.bf16.gmra.mrb[144].mxu1 %v7168_v61  ;;  %v7185_v61 = vld [vmem:[%s9821_s0 + $0x160] ss:$28 sps:$4 sm:$0xff]  }
 0x1fc   :  { %4772 = vmatprep.mubr.bf16.mxu1 %v7173_v4  ;;  %v7189_v4 = vld [vmem:[%s9821_s0 + $0x19c] ss:$28 sps:$4 sm:$0xff]  }
 0x201   :  { %2169 = vmatmul.mubr.bf16.gmra.mrb[16].mxu0 %v7172_v7  ;;  %v7186_v7 = vld [vmem:[%s9823_s1 + $0x10] ss:$28 sps:$4 sm:$0xff]  }
 0x202   :  { %2176 = vmatprep.mubr.bf16.mxu0 %v7176_v22  ;;  %v7192_v22 = vld [vmem:[%s9823_s1 + $0x4c] ss:$28 sps:$4 sm:$0xff]  }
 0x203   :  { %4773 = vmatmul.mubr.bf16.gmra.mrb[148].mxu1 %v7175_v23  ;;  %v7191_v23 = vld [vmem:[%s9821_s0 + $0x198] ss:$28 sps:$4 sm:$0xff]  }
 0x204   :  { %4780 = vmatprep.mubr.bf16.mxu1 %v7179_v29  ;;  %v7195_v29 = vld [vmem:[%s9821_s0 + $0x1d4] ss:$28 sps:$4 sm:$0xff]  }
 0x209   :  { %2177 = vmatmul.mubr.bf16.gmra.mrb[20].mxu0 %v7178_v0  ;;  %v7194_v0 = vld [vmem:[%s9823_s1 + $0x48] ss:$28 sps:$4 sm:$0xff]  }
 0x20a   :  { %2184 = vmatprep.mubr.bf16.mxu0 %v7183_v34  ;;  %v7198_v34 = vld [vmem:[%s9823_s1 + $0x84] ss:$28 sps:$4 sm:$0xff]  }
 0x20b   :  { %4781 = vmatmul.mubr.bf16.gmra.mrb[152].mxu1 %v7181_v39  ;;  %v7201_v39 = vld [vmem:[%s9821_s0 + $0x20c] ss:$28 sps:$4 sm:$0xff]  }
 0x20c   :  { %4821 = vmatprep.mubr.bf16.mxu1 %v7188_v51  ;;  %v7200_v51 = vld [vmem:[%s9823_s1 + $0x80] ss:$28 sps:$4 sm:$0xff]  }
 0x211   :  { %2185 = vmatmul.mubr.bf16.gmra.mrb[24].mxu0 %v7185_v61  ;;  %v7203_v61 = vld [vmem:[%s9821_s0 + $0x208] ss:$28 sps:$4 sm:$0xff]  }
 0x212   :  { %2192 = vmatprep.mubr.bf16.mxu0 %v7189_v4  ;;  %v7207_v4 = vld [vmem:[%s9821_s0 + $0x244] ss:$28 sps:$4 sm:$0xff]  }
 0x213   :  { %4822 = vmatmul.mubr.bf16.vlgmr.msra.gmra.mrb[52].mxu1 %v7186_v7  ;;  %v7206_v7 = vld [vmem:[%s9823_s1 + $0xb8] ss:$28 sps:$4 sm:$0xff]  }
 0x214   :  { %6278 = vmatpush3.bf16.msra.mxu1 %v8372_v12  ;;  %4829 = vmatprep.mubr.bf16.mxu1 %v7192_v22  ;;  %v7197_v12 = vld [vmem:[%s9821_s0 + $0x1d0] ss:$28 sps:$4 sm:$0xff]  }
 0x215   :  { %6277 = vmatprep.subr.bf16.mxu1 %v7230_v47  ;;  %v7210_v22 = vld [vmem:[%s9823_s1 + $0xf4] ss:$28 sps:$4 sm:$0xff]  }
 0x218   :  { %6279 = vmatpush3.bf16.msra.mxu1 %v7230_v47  ;;  %v7204_v47 = vld [vmem:[%s9823_s1 + $0xbc] ss:$28 sps:$4 sm:$0xff]  }
 0x219   :  { %2193 = vmatmul.mubr.bf16.gmra.mrb[28].mxu0 %v7191_v23  ;;  %v7209_v23 = vld [vmem:[%s9821_s0 + $0x240] ss:$28 sps:$4 sm:$0xff]  }
 0x21a   :  { %2200 = vmatprep.mubr.bf16.mxu0 %v7195_v29  ;;  %v7213_v29 = vld [vmem:[%s9821_s0 + $0x27c] ss:$28 sps:$4 sm:$0xff]  }
 0x21b   :  { %4830 = vmatmul.mubr.bf16.gmra.mrb[56].mxu1 %v7194_v0  ;;  %v7212_v0 = vld [vmem:[%s9823_s1 + $0xf0] ss:$28 sps:$4 sm:$0xff]  }
 0x21c   :  { %4837 = vmatprep.mubr.bf16.mxu1 %v7198_v34  ;;  %v7216_v34 = vld [vmem:[%s9823_s1 + $0x12c] ss:$28 sps:$4 sm:$0xff]  }
 0x221   :  { %2201 = vmatmul.mubr.bf16.gmra.mrb[32].mxu0 %v7197_v12  ;;  %v7215_v12 = vld [vmem:[%s9821_s0 + $0x278] ss:$28 sps:$4 sm:$0xff]  }
 0x222   :  { %2208 = vmatprep.mubr.bf16.mxu0 %v7201_v39  ;;  %v7219_v39 = vld [vmem:[%s9821_s0 + $0x2b4] ss:$28 sps:$4 sm:$0xff]  }
 0x223   :  { %4838 = vmatmul.mubr.bf16.gmra.mrb[60].mxu1 %v7200_v51  ;;  %v7218_v51 = vld [vmem:[%s9823_s1 + $0x128] ss:$28 sps:$4 sm:$0xff]  }
 0x224   :  { %4845 = vmatprep.mubr.bf16.mxu1 %v7204_v47  ;;  %v7222_v47 = vld [vmem:[%s9823_s1 + $0x164] ss:$28 sps:$4 sm:$0xff]  }
 0x229   :  { %2209 = vmatmul.mubr.bf16.gmra.mrb[36].mxu0 %v7203_v61  ;;  %v7221_v61 = vld [vmem:[%s9821_s0 + $0x2b0] ss:$28 sps:$4 sm:$0xff]  }
 0x22a   :  { %2216 = vmatprep.mubr.bf16.mxu0 %v7207_v4  ;;  %v7225_v4 = vld [vmem:[%s9821_s0 + $0x2ec] ss:$28 sps:$4 sm:$0xff]  }
 0x22b   :  { %4846 = vmatmul.mubr.bf16.gmra.mrb[64].mxu1 %v7206_v7  ;;  %v7224_v7 = vld [vmem:[%s9823_s1 + $0x160] ss:$28 sps:$4 sm:$0xff]  }
 0x22c   :  { %4853 = vmatprep.mubr.bf16.mxu1 %v7210_v22  ;;  %v7228_v22 = vld [vmem:[%s9823_s1 + $0x19c] ss:$28 sps:$4 sm:$0xff]  }
 0x231   :  { %2217 = vmatmul.mubr.bf16.gmra.mrb[40].mxu0 %v7209_v23  ;;  %v7227_v23 = vld [vmem:[%s9821_s0 + $0x2e8] ss:$28 sps:$4 sm:$0xff]  }
 0x232   :  { %2224 = vmatprep.mubr.bf16.mxu0 %v7213_v29  ;;  %v7232_v29 = vld [vmem:[%s9821_s0 + $0x324] ss:$28 sps:$4 sm:$0xff]  }
 0x233   :  { %4854 = vmatmul.mubr.bf16.gmra.mrb[68].mxu1 %v7212_v0  ;;  %v7231_v0 = vld [vmem:[%s9823_s1 + $0x198] ss:$28 sps:$4 sm:$0xff]  }
 0x234   :  { %4861 = vmatprep.mubr.bf16.mxu1 %v7216_v34  ;;  %v7235_v34 = vld [vmem:[%s9823_s1 + $0x1d4] ss:$28 sps:$4 sm:$0xff]  }
 0x239   :  { %2225 = vmatmul.mubr.bf16.gmra.mrb[44].mxu0 %v7215_v12  ;;  %v7234_v12 = vld [vmem:[%s9821_s0 + $0x320] ss:$28 sps:$4 sm:$0xff]  }
 0x23a   :  { %2232 = vmatprep.mubr.bf16.mxu0 %v7219_v39  ;;  %v7238_v39 = vld [vmem:[%s9821_s0 + $0x35c] ss:$28 sps:$4 sm:$0xff]  }
 0x23b   :  { %4862 = vmatmul.mubr.bf16.gmra.mrb[72].mxu1 %v7218_v51  ;;  %v7237_v51 = vld [vmem:[%s9823_s1 + $0x1d0] ss:$28 sps:$4 sm:$0xff]  }
 0x23c   :  { %4869 = vmatprep.mubr.bf16.mxu1 %v7222_v47  ;;  %v7241_v47 = vld [vmem:[%s9823_s1 + $0x20c] ss:$28 sps:$4 sm:$0xff]  }
 0x241   :  { %2233 = vmatmul.mubr.bf16.gmra.mrb[48].mxu0 %v7221_v61  ;;  %v7240_v61 = vld [vmem:[%s9821_s0 + $0x358] ss:$28 sps:$4 sm:$0xff]  }
 0x242   :  { %2240 = vmatprep.mubr.bf16.mxu0 %v7225_v4  ;;  %v7244_v4 = vld [vmem:[%s9821_s0 + $0x394] ss:$28 sps:$4 sm:$0xff]  }
 0x243   :  { %4870 = vmatmul.mubr.bf16.gmra.mrb[76].mxu1 %v7224_v7  ;;  %v7243_v7 = vld [vmem:[%s9823_s1 + $0x208] ss:$28 sps:$4 sm:$0xff]  }
 0x244   :  { %4877 = vmatprep.mubr.bf16.mxu1 %v7228_v22  ;;  %v7247_v22 = vld [vmem:[%s9823_s1 + $0x244] ss:$28 sps:$4 sm:$0xff]  }
 0x249   :  { %2241 = vmatmul.mubr.bf16.gmra.mrb[52].mxu0 %v7227_v23  ;;  %v7246_v23 = vld [vmem:[%s9821_s0 + $0x390] ss:$28 sps:$4 sm:$0xff]  }
 0x24a   :  { %2248 = vmatprep.mubr.bf16.mxu0 %v7232_v29  ;;  %v7250_v29 = vld [vmem:[%s9821_s0 + $0x3cc] ss:$28 sps:$4 sm:$0xff]  }
 0x24b   :  { %4878 = vmatmul.mubr.bf16.gmra.mrb[80].mxu1 %v7231_v0  ;;  %v7249_v0 = vld [vmem:[%s9823_s1 + $0x240] ss:$28 sps:$4 sm:$0xff]  }
 0x24c   :  { %4885 = vmatprep.mubr.bf16.mxu1 %v7235_v34  ;;  %v7253_v34 = vld [vmem:[%s9823_s1 + $0x27c] ss:$28 sps:$4 sm:$0xff]  }
 0x251   :  { %2249 = vmatmul.mubr.bf16.gmra.mrb[56].mxu0 %v7234_v12  ;;  %v7252_v12 = vld [vmem:[%s9821_s0 + $0x3c8] ss:$28 sps:$4 sm:$0xff]  }
 0x252   :  { %2256 = vmatprep.mubr.bf16.mxu0 %v7238_v39  ;;  %v7256_v39 = vld [vmem:[%s9821_s0 + $0x404] ss:$28 sps:$4 sm:$0xff]  }
 0x253   :  { %4886 = vmatmul.mubr.bf16.gmra.mrb[84].mxu1 %v7237_v51  ;;  %v7255_v51 = vld [vmem:[%s9823_s1 + $0x278] ss:$28 sps:$4 sm:$0xff]  }
 0x254   :  { %4893 = vmatprep.mubr.bf16.mxu1 %v7241_v47  ;;  %v7259_v47 = vld [vmem:[%s9823_s1 + $0x2b4] ss:$28 sps:$4 sm:$0xff]  }
 0x259   :  { %2257 = vmatmul.mubr.bf16.gmra.mrb[60].mxu0 %v7240_v61  ;;  %v7258_v61 = vld [vmem:[%s9821_s0 + $0x400] ss:$28 sps:$4 sm:$0xff]  }
 0x25a   :  { %2264 = vmatprep.mubr.bf16.mxu0 %v7244_v4  ;;  %v7262_v4 = vld [vmem:[%s9821_s0 + $0x43c] ss:$28 sps:$4 sm:$0xff]  }
 0x25b   :  { %4894 = vmatmul.mubr.bf16.gmra.mrb[88].mxu1 %v7243_v7  ;;  %v7261_v7 = vld [vmem:[%s9823_s1 + $0x2b0] ss:$28 sps:$4 sm:$0xff]  }
 0x25c   :  { %4901 = vmatprep.mubr.bf16.mxu1 %v7247_v22  ;;  %v7265_v22 = vld [vmem:[%s9823_s1 + $0x2ec] ss:$28 sps:$4 sm:$0xff]  }
 0x261   :  { %2265 = vmatmul.mubr.bf16.gmra.mrb[64].mxu0 %v7246_v23  ;;  %v7264_v23 = vld [vmem:[%s9821_s0 + $0x438] ss:$28 sps:$4 sm:$0xff]  }
 0x262   :  { %2272 = vmatprep.mubr.bf16.mxu0 %v7250_v29  ;;  %v7268_v29 = vld [vmem:[%s9821_s0 + $0x474] ss:$28 sps:$4 sm:$0xff]  }
 0x263   :  { %4902 = vmatmul.mubr.bf16.gmra.mrb[92].mxu1 %v7249_v0  ;;  %v7267_v0 = vld [vmem:[%s9823_s1 + $0x2e8] ss:$28 sps:$4 sm:$0xff]  }
 0x264   :  { %4909 = vmatprep.mubr.bf16.mxu1 %v7253_v34  ;;  %v7271_v34 = vld [vmem:[%s9823_s1 + $0x324] ss:$28 sps:$4 sm:$0xff]  }
 0x269   :  { %2273 = vmatmul.mubr.bf16.gmra.mrb[68].mxu0 %v7252_v12  ;;  %v7270_v12 = vld [vmem:[%s9821_s0 + $0x470] ss:$28 sps:$4 sm:$0xff]  }
 0x26a   :  { %2280 = vmatprep.mubr.bf16.mxu0 %v7256_v39  ;;  %v7274_v39 = vld [vmem:[%s9821_s0 + $0x4ac] ss:$28 sps:$4 sm:$0xff]  }
 0x26b   :  { %4910 = vmatmul.mubr.bf16.gmra.mrb[96].mxu1 %v7255_v51  ;;  %v7273_v51 = vld [vmem:[%s9823_s1 + $0x320] ss:$28 sps:$4 sm:$0xff]  }
 0x26c   :  { %4917 = vmatprep.mubr.bf16.mxu1 %v7259_v47  ;;  %v7277_v47 = vld [vmem:[%s9823_s1 + $0x35c] ss:$28 sps:$4 sm:$0xff]  }
 0x271   :  { %2281 = vmatmul.mubr.bf16.gmra.mrb[72].mxu0 %v7258_v61  ;;  %v7276_v61 = vld [vmem:[%s9821_s0 + $0x4a8] ss:$28 sps:$4 sm:$0xff]  }
 0x272   :  { %2288 = vmatprep.mubr.bf16.mxu0 %v7262_v4  ;;  %v7280_v4 = vld [vmem:[%s9821_s0 + $0x4e4] ss:$28 sps:$4 sm:$0xff]  }
 0x273   :  { %4918 = vmatmul.mubr.bf16.gmra.mrb[100].mxu1 %v7261_v7  ;;  %v7279_v7 = vld [vmem:[%s9823_s1 + $0x358] ss:$28 sps:$4 sm:$0xff]  }
 0x274   :  { %4925 = vmatprep.mubr.bf16.mxu1 %v7265_v22  ;;  %v7283_v22 = vld [vmem:[%s9823_s1 + $0x394] ss:$28 sps:$4 sm:$0xff]  }
 0x279   :  { %2289 = vmatmul.mubr.bf16.gmra.mrb[76].mxu0 %v7264_v23  ;;  %v7282_v23 = vld [vmem:[%s9821_s0 + $0x4e0] ss:$28 sps:$4 sm:$0xff]  }
 0x27a   :  { %2296 = vmatprep.mubr.bf16.mxu0 %v7268_v29  ;;  %v7286_v29 = vld [vmem:[%s9821_s0 + $0x51c] ss:$28 sps:$4 sm:$0xff]  }
 0x27b   :  { %4926 = vmatmul.mubr.bf16.gmra.mrb[104].mxu1 %v7267_v0  ;;  %v7285_v0 = vld [vmem:[%s9823_s1 + $0x390] ss:$28 sps:$4 sm:$0xff]  }
 0x27c   :  { %4933 = vmatprep.mubr.bf16.mxu1 %v7271_v34  ;;  %v7289_v34 = vld [vmem:[%s9823_s1 + $0x3cc] ss:$28 sps:$4 sm:$0xff]  }
 0x281   :  { %2297 = vmatmul.mubr.bf16.gmra.mrb[80].mxu0 %v7270_v12  ;;  %v7288_v12 = vld [vmem:[%s9821_s0 + $0x518] ss:$28 sps:$4 sm:$0xff]  }
 0x282   :  { %2304 = vmatprep.mubr.bf16.mxu0 %v7274_v39  ;;  %v7292_v39 = vld [vmem:[%s9821_s0 + $0x554] ss:$28 sps:$4 sm:$0xff]  }
 0x283   :  { %4934 = vmatmul.mubr.bf16.gmra.mrb[108].mxu1 %v7273_v51  ;;  %v7291_v51 = vld [vmem:[%s9823_s1 + $0x3c8] ss:$28 sps:$4 sm:$0xff]  }
 0x284   :  { %4941 = vmatprep.mubr.bf16.mxu1 %v7277_v47  ;;  %v7295_v47 = vld [vmem:[%s9823_s1 + $0x404] ss:$28 sps:$4 sm:$0xff]  }
 0x289   :  { %2305 = vmatmul.mubr.bf16.gmra.mrb[84].mxu0 %v7276_v61  ;;  %v7294_v61 = vld [vmem:[%s9821_s0 + $0x550] ss:$28 sps:$4 sm:$0xff]  }
 0x28a   :  { %2312 = vmatprep.mubr.bf16.mxu0 %v7280_v4  ;;  %v7298_v4 = vld [vmem:[%s9821_s0 + $0x58c] ss:$28 sps:$4 sm:$0xff]  }
 0x28b   :  { %4942 = vmatmul.mubr.bf16.gmra.mrb[112].mxu1 %v7279_v7  ;;  %v7297_v7 = vld [vmem:[%s9823_s1 + $0x400] ss:$28 sps:$4 sm:$0xff]  }
 0x28c   :  { %4949 = vmatprep.mubr.bf16.mxu1 %v7283_v22  ;;  %v7301_v22 = vld [vmem:[%s9823_s1 + $0x43c] ss:$28 sps:$4 sm:$0xff]  }
 0x291   :  { %2313 = vmatmul.mubr.bf16.gmra.mrb[88].mxu0 %v7282_v23  ;;  %v7300_v23 = vld [vmem:[%s9821_s0 + $0x588] ss:$28 sps:$4 sm:$0xff]  }
 0x292   :  { %2320 = vmatprep.mubr.bf16.mxu0 %v7286_v29  ;;  %v7304_v29 = vld [vmem:[%s9823_s1 + $0x18] ss:$28 sps:$4 sm:$0xff]  }
 0x293   :  { %4950 = vmatmul.mubr.bf16.gmra.mrb[116].mxu1 %v7285_v0  ;;  %v7303_v0 = vld [vmem:[%s9823_s1 + $0x438] ss:$28 sps:$4 sm:$0xff]  }
 0x294   :  { %4957 = vmatprep.mubr.bf16.mxu1 %v7289_v34  ;;  %v7305_v34 = vld [vmem:[%s9823_s1 + $0x474] ss:$28 sps:$4 sm:$0xff]  }
 0x299   :  { %2321 = vmatmul.mubr.bf16.gmra.mrb[92].mxu0 %v7288_v12  ;;  %v7307_v12 = vld [vmem:[%s9823_s1 + $0x50] ss:$28 sps:$4 sm:$0xff]  }
 0x29a   :  { %2328 = vmatprep.mubr.bf16.mxu0 %v7292_v39  ;;  %v7309_v39 = vld [vmem:[%s9823_s1 + $0x88] ss:$28 sps:$4 sm:$0xff]  }
 0x29b   :  { %4958 = vmatmul.mubr.bf16.gmra.mrb[120].mxu1 %v7291_v51  ;;  %v7308_v51 = vld [vmem:[%s9823_s1 + $0x470] ss:$28 sps:$4 sm:$0xff]  }
 0x29c   :  { %4965 = vmatprep.mubr.bf16.mxu1 %v7295_v47  ;;  %v7310_v47 = vld [vmem:[%s9823_s1 + $0x4ac] ss:$28 sps:$4 sm:$0xff]  }
 0x2a1   :  { %2329 = vmatmul.mubr.bf16.gmra.mrb[96].mxu0 %v7294_v61 }
 0x2a2   :  { %2336 = vmatprep.mubr.bf16.mxu0 %v7298_v4 }
 0x2a3   :  { %4966 = vmatmul.mubr.bf16.gmra.mrb[124].mxu1 %v7297_v7 }
 0x2a4   :  { %4973 = vmatprep.mubr.bf16.mxu1 %v7301_v22  ;;  %v7312_v22 = vld [vmem:[%s9823_s1 + $0xc0] ss:$28 sps:$4 sm:$0xff]  }
 0x2a9   :  { %2337 = vmatmul.mubr.bf16.gmra.mrb[100].mxu0 %v7300_v23 }
 0x2aa   :  { %6224 = vmatprep.mubr.msk.bf16.mxu0 %vm1543_vm0, %v7304_v29  ;;  %v7314_v29 = vld [vmem:[%s9823_s1 + $0xf8] ss:$28 sps:$4 sm:$0xff]  }
 0x2ab   :  { %4974 = vmatmul.mubr.bf16.gmra.mrb[128].mxu1 %v7303_v0 }
 0x2ac   :  { %4981 = vmatprep.mubr.bf16.mxu1 %v7305_v34 }
 0x2b1   :  { %6225 = vmatmul.mubr.msk.bf16.vlgmr.msra.gmra.mrb[104].mxu0 %vm1543_vm0, %v7307_v12  ;;  %v7313_v12 = vld [vmem:[%s9823_s1 + $0x4a8] ss:$28 sps:$4 sm:$0xff]  }
 0x2b2   :  { %6228 = vmatprep.mubr.msk.bf16.mxu0 %vm1543_vm0, %v7309_v39 }
 0x2b3   :  { %4982 = vmatmul.mubr.bf16.gmra.mrb[132].mxu1 %v7308_v51 }
 0x2b4   :  { %v2138_v61 = vpop.f32.mrb[0].mxu0  ;;  %4989 = vmatprep.mubr.bf16.mxu1 %v7310_v47  ;;  %v7317_v47 = vld [vmem:[%s9823_s1 + $0x130] ss:$28 sps:$4 sm:$0xff]  }
 0x2b5   :  { %v8917_v4 = vadd.f32 %v7974_v41, %v2138_v61  ;;  %v2140_v7 = vpop.f32.mrb[1].mxu0  ;;  %v7315_v41 = vld [vmem:[%s9823_s1 + $0x4e4] ss:$28 sps:$4 sm:$0xff]  }
 0x2b6   :  { %v2141_v23 = vpop.f32.mrb[2].mxu0  ;;  %v7319_v7 = vld [vmem:[%s9823_s1 + $0x168] ss:$28 sps:$4 sm:$0xff]  }
 0x2b7   :  { %v8926_v0 = vadd.f32 %v7981_v44, %v2141_v23  ;;  %v2143_v34 = vpop.f32.mrb[3].mxu0 }
 0x2b9   :  { %6229 = vmatmul.mubr.msk.bf16.gmra.mrb[108].mxu0 %vm1543_vm0, %v7312_v22 }
 0x2ba   :  { %6232 = vmatprep.mubr.msk.bf16.mxu0 %vm1543_vm0, %v7314_v29  ;;  %v7318_v29 = vld [vmem:[%s9823_s1 + $0x4e0] ss:$28 sps:$4 sm:$0xff]  }
 0x2bb   :  { %4990 = vmatmul.mubr.bf16.gmra.mrb[136].mxu1 %v7313_v12 }
 0x2bc   :  { %v2146_v39 = vpop.f32.mrb[4].mxu0  ;;  %4997 = vmatprep.mubr.bf16.mxu1 %v7315_v41  ;;  %v7322_v41 = vld [vmem:[%s9823_s1 + $0x1a0] ss:$28 sps:$4 sm:$0xff]  }
 0x2bd   :  { %v8937_v51 = vadd.f32 %v7972_v40, %v2146_v39  ;;  %v2148_v44 = vpop.f32.mrb[5].mxu0  ;;  %v7320_v40 = vld [vmem:[%s9823_s1 + $0x51c] ss:$28 sps:$4 sm:$0xff]  }
 0x2be   :  { %v2149_v61 = vpop.f32.mrb[6].mxu0  ;;  %v7324_v44 = vld [vmem:[%s9823_s1 + $0x1d8] ss:$28 sps:$4 sm:$0xff]  }
 0x2bf   :  { %v8946_v22 = vadd.f32 %v7976_v42, %v2149_v61  ;;  %v2151_v23 = vpop.f32.mrb[7].mxu0 }
 0x2c1   :  { %6233 = vmatmul.mubr.msk.bf16.gmra.mrb[112].mxu0 %vm1543_vm0, %v7317_v47 }
 0x2c2   :  { %6236 = vmatprep.mubr.msk.bf16.mxu0 %vm1543_vm0, %v7319_v7  ;;  %v7323_v7 = vld [vmem:[%s9823_s1 + $0x518] ss:$28 sps:$4 sm:$0xff]  }
 0x2c3   :  { %4998 = vmatmul.mubr.bf16.gmra.mrb[140].mxu1 %v7318_v29 }
 0x2c4   :  { %v2154_v34 = vpop.f32.mrb[8].mxu0  ;;  %5005 = vmatprep.mubr.bf16.mxu1 %v7320_v40  ;;  %v7327_v40 = vld [vmem:[%s9823_s1 + $0x210] ss:$28 sps:$4 sm:$0xff]  }
 0x2c5   :  { %v8957_v12 = vadd.f32 %v7994_v49, %v2154_v34  ;;  %v2156_v42 = vpop.f32.mrb[9].mxu0  ;;  %v7325_v49 = vld [vmem:[%s9823_s1 + $0x554] ss:$28 sps:$4 sm:$0xff]  }
 0x2c6   :  { %v2157_v39 = vpop.f32.mrb[10].mxu0  ;;  %v7329_v42 = vld [vmem:[%s9823_s1 + $0x248] ss:$28 sps:$4 sm:$0xff]  }
 0x2c7   :  { %v8966_v47 = vadd.f32 %v8001_v52, %v2157_v39  ;;  %v2159_v61 = vpop.f32.mrb[11].mxu0 }
 0x2c9   :  { %6237 = vmatmul.mubr.msk.bf16.gmra.mrb[116].mxu0 %vm1543_vm0, %v7322_v41 }
 0x2ca   :  { %6240 = vmatprep.mubr.msk.bf16.mxu0 %vm1543_vm0, %v7324_v44  ;;  %v7328_v44 = vld [vmem:[%s9823_s1 + $0x550] ss:$28 sps:$4 sm:$0xff]  }
 0x2cb   :  { %5006 = vmatmul.mubr.bf16.gmra.mrb[144].mxu1 %v7323_v7 }
 0x2cc   :  { %v2162_v23 = vpop.f32.mrb[12].mxu0  ;;  %5013 = vmatprep.mubr.bf16.mxu1 %v7325_v49  ;;  %v7332_v49 = vld [vmem:[%s9823_s1 + $0x280] ss:$28 sps:$4 sm:$0xff]  }
 0x2cd   :  { %v8977_v29 = vadd.f32 %v7992_v48, %v2162_v23  ;;  %v2164_v52 = vpop.f32.mrb[13].mxu0  ;;  %v7330_v48 = vld [vmem:[%s9823_s1 + $0x58c] ss:$28 sps:$4 sm:$0xff]  }
 0x2ce   :  { %v2165_v34 = vpop.f32.mrb[14].mxu0  ;;  %v7334_v52 = vld [vmem:[%s9823_s1 + $0x2b8] ss:$28 sps:$4 sm:$0xff]  }
 0x2cf   :  { %v8986_v41 = vadd.f32 %v7996_v50, %v2165_v34  ;;  %v2167_v39 = vpop.f32.mrb[15].mxu0 }
 0x2d1   :  { %6241 = vmatmul.mubr.msk.bf16.gmra.mrb[120].mxu0 %vm1543_vm0, %v7327_v40 }
 0x2d2   :  { %6244 = vmatprep.mubr.msk.bf16.mxu0 %vm1543_vm0, %v7329_v42  ;;  %v7333_v42 = vld [vmem:[%s9823_s1 + $0x588] ss:$28 sps:$4 sm:$0xff]  }
 0x2d3   :  { %5014 = vmatmul.mubr.bf16.gmra.mrb[148].mxu1 %v7328_v44 }
 0x2d4   :  { %v2170_v61 = vpop.f32.mrb[16].mxu0  ;;  %5021 = vmatprep.mubr.bf16.mxu1 %v7330_v48  ;;  %v7335_v48 = vld [vmem:[%s9823_s1 + $0x2f0] ss:$28 sps:$4 sm:$0xff]  }
 0x2d5   :  { %v8997_v7 = vadd.f32 %v8014_v57, %v2170_v61  ;;  %v2172_v50 = vpop.f32.mrb[17].mxu0  ;;  %v7336_v57 = vld [vmem:[%s9823_s1 + $0x478] ss:$28 sps:$4 sm:$0xff]  }
 0x2d6   :  { %v2173_v23 = vpop.f32.mrb[18].mxu0  ;;  %v7338_v50 = vld [vmem:[%s9823_s1 + $0x328] ss:$28 sps:$4 sm:$0xff]  }
 0x2d7   :  { %v9006_v40 = vadd.f32 %v8021_v60, %v2173_v23  ;;  %v2175_v34 = vpop.f32.mrb[19].mxu0 }
 0x2d9   :  { %6245 = vmatmul.mubr.msk.bf16.gmra.mrb[124].mxu0 %vm1543_vm0, %v7332_v49 }
 0x2da   :  { %6248 = vmatprep.mubr.msk.bf16.mxu0 %vm1543_vm0, %v7334_v52  ;;  %v7337_v52 = vld [vmem:[%s9823_s1 + $0x4b0] ss:$28 sps:$4 sm:$0xff]  }
 0x2db   :  { %5022 = vmatmul.mubr.bf16.gmra.mrb[152].mxu1 %v7333_v42 }
 0x2dc   :  { %v2178_v39 = vpop.f32.mrb[20].mxu0  ;;  %6264 = vmatprep.mubr.msk.bf16.mxu1 %vm1543_vm0, %v7336_v57  ;;  %v7339_v57 = vld [vmem:[%s9823_s1 + $0x360] ss:$28 sps:$4 sm:$0xff]  }
 0x2dd   :  { %v9018_v60 = vadd.f32 %v8012_v56, %v2178_v39  ;;  %v2180_v44 = vpop.f32.mrb[21].mxu0  ;;  %v7340_v56 = vld [vmem:[%s9823_s1 + $0x4e8] ss:$28 sps:$4 sm:$0xff]  }
 0x2de   :  { %v2181_v61 = vpop.f32.mrb[22].mxu0 }
 0x2df   :  { %v9027_v49 = vadd.f32 %v8016_v58, %v2181_v61  ;;  %v2183_v23 = vpop.f32.mrb[23].mxu0 }
 0x2e1   :  { %6249 = vmatmul.mubr.msk.bf16.gmra.mrb[128].mxu0 %vm1543_vm0, %v7335_v48  ;;  %v7342_v48 = vld [vmem:[%s9823_s1 + $0x398] ss:$28 sps:$4 sm:$0xff]  }
 0x2e2   :  { %6252 = vmatprep.mubr.msk.bf16.mxu0 %vm1543_vm0, %v7338_v50 }
 0x2e3   :  { %6265 = vmatmul.mubr.msk.bf16.vlgmr.msra.gmra.mrb[156].mxu1 %vm1543_vm0, %v7337_v52 }
 0x2e4   :  { %v2186_v34 = vpop.f32.mrb[24].mxu0  ;;  %6268 = vmatprep.mubr.msk.bf16.mxu1 %vm1543_vm0, %v7340_v56  ;;  %v7344_v56 = vld [vmem:[%s9823_s1 + $0x558] ss:$28 sps:$4 sm:$0xff]  }
 0x2e5   :  { %v9040_v58 = vadd.f32 %v8034_v2, %v2186_v34  ;;  %v2188_v42 = vpop.f32.mrb[25].mxu0  ;;  %v7341_v2 = vld [vmem:[%s9823_s1 + $0x520] ss:$28 sps:$4 sm:$0xff]   ;;  %v9061_v34 = vsel %vm2586_vm1, %v8917_v4, -inf }
 0x2e6   :  { %v9045_v39 = vpop.f32.mrb[52].mxu1  ;;  %v2189_v44 = vpop.f32.mrb[26].mxu0 }
 0x2e7   :  { %9854 = vst [vmem:[#allocation3_spill] sm:$0xff] %v9045_v39  ;;  %v2431_v61 = vadd.f32 %v8041_v5, %v2189_v44  ;;  %v4825_v50 = vpop.f32.mrb[53].mxu1  ;;  %v2191_v23 = vpop.f32.mrb[27].mxu0  ;;  %v7346_v44 = vld [vmem:[%s9823_s1 + $0x408] ss:$28 sps:$4 sm:$0xff]  }
 0x2e8   :  { %v9054_v52 = vpop.f32.mrb[54].mxu1 }
 0x2e9   :  { %9855 = vst [vmem:[#allocation4_spill] sm:$0xff] %v9054_v52  ;;  %v9064_v42 = vsel %vm2586_vm1, %v2431_v61, -inf  ;;  %v4828_v5 = vpop.f32.mrb[55].mxu1  ;;  %6253 = vmatmul.mubr.msk.bf16.gmra.mrb[132].mxu0 %vm1543_vm0, %v7339_v57  ;;  %v7343_v61 = vld [vmem:[%s9823_s1 + $0x3d0] ss:$28 sps:$4 sm:$0xff]  }
 0x2ea   :  { %6256 = vmatprep.mubr.msk.bf16.mxu0 %vm1543_vm0, %v7342_v48  ;;  %v9083_v48 = vsel %vm2586_vm1, %v8926_v0, -inf  ;;  %v9098_v0 = vsel %vm2586_vm1, %v8937_v51, -inf  ;;  %v7347_v51 = vld [vmem:[%s9823_s1 + $0x440] ss:$28 sps:$4 sm:$0xff]  }
 0x2eb   :  { %6269 = vmatmul.mubr.msk.bf16.gmra.mrb[160].mxu1 %vm1543_vm0, %v7341_v2 }
 0x2ec   :  { %v2194_v50 = vpop.f32.mrb[28].mxu0  ;;  %6272 = vmatprep.mubr.msk.bf16.mxu1 %vm1543_vm0, %v7344_v56 }
 0x2ed   :  { %v2436_v23 = vadd.f32 %v8032_v1, %v2194_v50  ;;  %v2196_v4 = vpop.f32.mrb[29].mxu0 }
 0x2ee   :  { %v9076_v5 = vpop.f32.mrb[56].mxu1  ;;  %v2197_v57 = vpop.f32.mrb[30].mxu0  ;;  %v7345_v4 = vld [vmem:[%s9823_s1 + $0x590] ss:$28 sps:$4 sm:$0xff]  }
 0x2ef   :  { %9856 = vst [vmem:[#allocation5_spill] sm:$0xff] %v9076_v5  ;;  %v9086_v2 = vsel %vm2586_vm1, %v2436_v23, -inf  ;;  %v2439_v1 = vadd.f32 %v8036_v3, %v2197_v57  ;;  %v4833_v56 = vpop.f32.mrb[57].mxu1  ;;  %v2199_v50 = vpop.f32.mrb[31].mxu0 }
 0x2f0   :  { %v9094_v39 = vpop.f32.mrb[58].mxu1 }
 0x2f1   :  { %9857 = vst [vmem:[#allocation6_spill] sm:$0xff] %v9094_v39  ;;  %v9101_v23 = vsel %vm2586_vm1, %v2439_v1, -inf  ;;  %v4836_v5 = vpop.f32.mrb[59].mxu1  ;;  %6257 = vmatmul.mubr.msk.bf16.gmra.mrb[136].mxu0 %vm1543_vm0, %v7343_v61  ;;  %v9116_v61 = vsel %vm2586_vm1, %v8946_v22, -inf }
 0x2f2   :  { %6260 = vmatprep.mubr.msk.bf16.mxu0 %vm1543_vm0, %v7346_v44 }
 0x2f3   :  { %6273 = vmatmul.mubr.msk.bf16.gmra.mrb[164].mxu1 %vm1543_vm0, %v7345_v4 }
 0x2f4   :  { %v2202_v57 = vpop.f32.mrb[32].mxu0 }
 0x2f5   :  { %v2444_v56 = vadd.f32 %v8054_v10, %v2202_v57  ;;  %v2204_v50 = vpop.f32.mrb[33].mxu0 }
 0x2f6   :  { %v9112_v1 = vpop.f32.mrb[60].mxu1  ;;  %v2205_v5 = vpop.f32.mrb[34].mxu0  ;;  %v9128_v50 = vsel %vm2586_vm1, %v8957_v12, -inf  ;;  %v9141_v12 = vsel %vm2586_vm1, %v8966_v47, -inf }
 0x2f7   :  { %9858 = vst [vmem:[#allocation7_spill] sm:$0xff] %v9112_v1  ;;  %v9119_v3 = vsel %vm2586_vm1, %v2444_v56, -inf  ;;  %v2447_v44 = vadd.f32 %v8061_v13, %v2205_v5  ;;  %v4841_v4 = vpop.f32.mrb[61].mxu1  ;;  %v2207_v52 = vpop.f32.mrb[35].mxu0  ;;  %v9165_v13 = vsel %vm2586_vm1, %v8986_v41, -inf }
 0x2f8   :  { %v9124_v57 = vpop.f32.mrb[62].mxu1 }
 0x2f9   :  { %9859 = vst [vmem:[#allocation8_spill] sm:$0xff] %v9124_v57  ;;  %v9131_v1 = vsel %vm2586_vm1, %v2447_v44, -inf  ;;  %v4844_v22 = vpop.f32.mrb[63].mxu1  ;;  %6261 = vmatmul.mubr.msk.bf16.gmra.mrb[140].mxu0 %vm1543_vm0, %v7347_v51 }
 0x2fc   :  { %v2210_v56 = vpop.f32.mrb[36].mxu0 }
 0x2fd   :  { %v2452_v52 = vadd.f32 %v8052_v9, %v2210_v56  ;;  %v2212_v5 = vpop.f32.mrb[37].mxu0  ;;  %v9153_v9 = vsel %vm2586_vm1, %v8977_v29, -inf }
 0x2fe   :  { %v9137_v4 = vpop.f32.mrb[64].mxu1  ;;  %v2213_v10 = vpop.f32.mrb[38].mxu0 }
 0x2ff   :  { %9860 = vst [vmem:[#allocation9_spill] sm:$0xff] %v9137_v4  ;;  %v9144_v44 = vsel %vm2586_vm1, %v2452_v52, -inf  ;;  %v2455_v22 = vadd.f32 %v8056_v11, %v2213_v10  ;;  %v4849_v51 = vpop.f32.mrb[65].mxu1  ;;  %v2215_v57 = vpop.f32.mrb[39].mxu0  ;;  %v9189_v52 = vsel %vm2586_vm1, %v9006_v40, -inf }
 0x300   :  { %v9149_v39 = vpop.f32.mrb[66].mxu1 }
 0x301   :  { %9861 = vst [vmem:[#allocation10_spill] sm:$0xff] %v9149_v39  ;;  %v9156_v56 = vsel %vm2586_vm1, %v2455_v22, -inf  ;;  %v4852_v47 = vpop.f32.mrb[67].mxu1 }
 0x304   :  { %v2218_v5 = vpop.f32.mrb[40].mxu0 }
 0x305   :  { %v2460_v11 = vadd.f32 %v8074_v18, %v2218_v5  ;;  %v2220_v10 = vpop.f32.mrb[41].mxu0  ;;  %v9177_v18 = vsel %vm2586_vm1, %v8997_v7, -inf }
 0x306   :  { %v9161_v57 = vpop.f32.mrb[68].mxu1  ;;  %v2221_v51 = vpop.f32.mrb[42].mxu0 }
 0x307   :  { %9862 = vst [vmem:[#allocation11_spill] sm:$0xff] %v9161_v57  ;;  %v9168_v29 = vsel %vm2586_vm1, %v2460_v11, -inf  ;;  %v2463_v22 = vadd.f32 %v8081_v21, %v2221_v51  ;;  %v4857_v47 = vpop.f32.mrb[69].mxu1  ;;  %v2223_v39 = vpop.f32.mrb[43].mxu0  ;;  %v9213_v11 = vsel %vm2586_vm1, %v9027_v49, -inf }
 0x308   :  { %v9173_v4 = vpop.f32.mrb[70].mxu1 }
 0x309   :  { %9863 = vst [vmem:[#allocation12_spill] sm:$0xff] %v9173_v4  ;;  %v9180_v5 = vsel %vm2586_vm1, %v2463_v22, -inf  ;;  %v4860_v41 = vpop.f32.mrb[71].mxu1 }
 0x30c   :  { %v2226_v10 = vpop.f32.mrb[44].mxu0 }
 0x30d   :  { %v2468_v21 = vadd.f32 %v8072_v17, %v2226_v10  ;;  %v2228_v39 = vpop.f32.mrb[45].mxu0  ;;  %v9201_v17 = vsel %vm2586_vm1, %v9018_v60, -inf }
 0x30e   :  { %v9185_v51 = vpop.f32.mrb[72].mxu1  ;;  %v2229_v47 = vpop.f32.mrb[46].mxu0 }
 0x30f   :  { %9864 = vst [vmem:[#allocation13_spill] sm:$0xff] %v9185_v51  ;;  %v9192_v7 = vsel %vm2586_vm1, %v2468_v21, -inf  ;;  %v2471_v22 = vadd.f32 %v8076_v19, %v2229_v47  ;;  %v4865_v41 = vpop.f32.mrb[73].mxu1  ;;  %v2231_v4 = vpop.f32.mrb[47].mxu0 }
 0x310   :  { %v9197_v57 = vpop.f32.mrb[74].mxu1 }
 0x311   :  { %9865 = vst [vmem:[#allocation14_spill] sm:$0xff] %v9197_v57  ;;  %v9204_v10 = vsel %vm2586_vm1, %v2471_v22, -inf  ;;  %v4868_v40 = vpop.f32.mrb[75].mxu1 }
 0x314   :  { %v2234_v39 = vpop.f32.mrb[48].mxu0 }
 0x315   :  { %v2476_v19 = vadd.f32 %v8097_v27, %v2234_v39  ;;  %v2236_v4 = vpop.f32.mrb[49].mxu0  ;;  %v9225_v27 = vsel %vm2586_vm1, %v9040_v58, -inf }
 0x316   :  { %v9209_v47 = vpop.f32.mrb[76].mxu1  ;;  %v2237_v41 = vpop.f32.mrb[50].mxu0 }
 0x317   :  { %9866 = vst [vmem:[#allocation15_spill] sm:$0xff] %v9209_v47  ;;  %v9216_v60 = vsel %vm2586_vm1, %v2476_v19, -inf  ;;  %v2479_v22 = vadd.f32 %v8104_v30, %v2237_v41  ;;  %v4873_v40 = vpop.f32.mrb[77].mxu1  ;;  %v2239_v57 = vpop.f32.mrb[51].mxu0 }
 0x318   :  { %v9221_v51 = vpop.f32.mrb[78].mxu1 }
 0x319   :  { %9867 = vst [vmem:[#allocation16_spill] sm:$0xff] %v9221_v51  ;;  %v9228_v39 = vsel %vm2586_vm1, %v2479_v22, -inf  ;;  %v4876_v49 = vpop.f32.mrb[79].mxu1  ;;  %v9868_v22 = vmax.f32 %v9061_v34, %v9064_v42 }
 0x31c   :  { %v2242_v4 = vpop.f32.mrb[52].mxu0 }
 0x31d   :  { %v2484_v30 = vadd.f32 %v8095_v26, %v2242_v4  ;;  %v2244_v57 = vpop.f32.mrb[53].mxu0  ;;  %v9870_v4 = vmax.f32 %v9083_v48, %v9086_v2 }
 0x31e   :  { %v9233_v41 = vpop.f32.mrb[80].mxu1  ;;  %v2245_v40 = vpop.f32.mrb[54].mxu0 }
 0x31f   :  { %v2590_v21 = vsel %vm2586_vm1, %v2484_v30, -inf  ;;  %v2487_v51 = vadd.f32 %v8099_v28, %v2245_v40  ;;  %v4881_v58 = vpop.f32.mrb[81].mxu1  ;;  %v2247_v47 = vpop.f32.mrb[55].mxu0 }
 0x320   :  { %v9240_v49 = vmax.f32 %v9868_v22, %v2590_v21  ;;  %v9242_v32 = vpop.f32.mrb[82].mxu1 }
 0x321   :  { %v2597_v19 = vsel %vm2586_vm1, %v2487_v51, -inf  ;;  %v4884_v26 = vpop.f32.mrb[83].mxu1  ;;  %v9872_v51 = vmax.f32 %v9098_v0, %v9101_v23 }
 0x322   :  { %9869 = vst [vmem:[#allocation17_spill] sm:$0xff] %v9240_v49  ;;  %v9248_v57 = vmax.f32 %v9870_v4, %v2597_v19  ;;  %v9874_v19 = vmax.f32 %v9116_v61, %v9119_v3 }
 0x324   :  { %9871 = vst [vmem:[#allocation18_spill] sm:$0xff] %v9248_v57  ;;  %v2250_v30 = vpop.f32.mrb[56].mxu0 }
 0x325   :  { %v2492_v28 = vadd.f32 %v8124_v37, %v2250_v30  ;;  %v2252_v40 = vpop.f32.mrb[57].mxu0 }
 0x326   :  { %v9251_v47 = vpop.f32.mrb[84].mxu1  ;;  %v2253_v58 = vpop.f32.mrb[58].mxu0 }
 0x327   :  { %v2604_v34 = vsel %vm2586_vm1, %v2492_v28, -inf  ;;  %v2495_v42 = vadd.f32 %v8132_v43, %v2253_v58  ;;  %v4889_v21 = vpop.f32.mrb[85].mxu1  ;;  %v2255_v22 = vpop.f32.mrb[59].mxu0 }
 0x328   :  { %v9258_v26 = vmax.f32 %v9872_v51, %v2604_v34  ;;  %v9260_v48 = vpop.f32.mrb[86].mxu1  ;;  %v9878_v51 = vmax.f32 %v9141_v12, %v9144_v44 }
 0x329   :  { %v2611_v2 = vsel %vm2586_vm1, %v2495_v42, -inf  ;;  %v4892_v37 = vpop.f32.mrb[87].mxu1  ;;  %v9876_v42 = vmax.f32 %v9128_v50, %v9131_v1 }
 0x32a   :  { %9873 = vst [vmem:[#allocation19_spill] sm:$0xff] %v9258_v26  ;;  %v9266_v4 = vmax.f32 %v9874_v19, %v2611_v2 }
 0x32c   :  { %9875 = vst [vmem:[#allocation20_spill] sm:$0xff] %v9266_v4  ;;  %v2258_v30 = vpop.f32.mrb[60].mxu0 }
 0x32d   :  { %v2500_v43 = vadd.f32 %v8122_v36, %v2258_v30  ;;  %v2260_v28 = vpop.f32.mrb[61].mxu0 }
 0x32e   :  { %v9269_v40 = vpop.f32.mrb[88].mxu1  ;;  %v2261_v58 = vpop.f32.mrb[62].mxu0 }
 0x32f   :  { %v2618_v0 = vsel %vm2586_vm1, %v2500_v43, -inf  ;;  %v2503_v23 = vadd.f32 %v8127_v38, %v2261_v58  ;;  %v4897_v34 = vpop.f32.mrb[89].mxu1  ;;  %v2263_v21 = vpop.f32.mrb[63].mxu0 }
 0x330   :  { %v9276_v22 = vmax.f32 %v9876_v42, %v2618_v0  ;;  %v9278_v3 = vpop.f32.mrb[90].mxu1  ;;  %v9880_v0 = vmax.f32 %v9153_v9, %v9156_v56  ;;  %v9882_v34 = vmax.f32 %v9165_v13, %v9168_v29 }
 0x331   :  { %v2625_v61 = vsel %vm2586_vm1, %v2503_v23, -inf  ;;  %v4900_v36 = vpop.f32.mrb[91].mxu1 }
 0x332   :  { %9877 = vst [vmem:[#allocation21_spill] sm:$0xff] %v9276_v22  ;;  %v9284_v2 = vmax.f32 %v9878_v51, %v2625_v61 }
 0x334   :  { %9879 = vst [vmem:[#allocation22_spill] sm:$0xff] %v9284_v2  ;;  %v2266_v37 = vpop.f32.mrb[64].mxu0 }
 0x335   :  { %v2508_v38 = vadd.f32 %v8152_v55, %v2266_v37  ;;  %v2268_v19 = vpop.f32.mrb[65].mxu0 }
 0x336   :  { %v9287_v30 = vpop.f32.mrb[92].mxu1  ;;  %v2269_v43 = vpop.f32.mrb[66].mxu0  ;;  %v9884_v19 = vmax.f32 %v9177_v18, %v9180_v5 }
 0x337   :  { %v2632_v1 = vsel %vm2586_vm1, %v2508_v38, -inf  ;;  %v2511_v50 = vadd.f32 %v8160_v62, %v2269_v43  ;;  %v4905_v28 = vpop.f32.mrb[93].mxu1  ;;  %v2271_v58 = vpop.f32.mrb[67].mxu0 }
 0x338   :  { %v9294_v23 = vmax.f32 %v9880_v0, %v2632_v1  ;;  %v9296_v12 = vpop.f32.mrb[94].mxu1  ;;  %v9886_v1 = vmax.f32 %v9189_v52, %v9192_v7 }
 0x339   :  { %v2639_v44 = vsel %vm2586_vm1, %v2511_v50, -inf  ;;  %v4908_v55 = vpop.f32.mrb[95].mxu1 }
 0x33a   :  { %9881 = vst [vmem:[#allocation23_spill] sm:$0xff] %v9294_v23  ;;  %v9302_v21 = vmax.f32 %v9882_v34, %v2639_v44  ;;  %v9917_v23 = vld [vmem:[#allocation11_spill] sm:$0xff] }
 0x33c   :  { %9883 = vst [vmem:[#allocation24_spill] sm:$0xff] %v9302_v21  ;;  %v2274_v42 = vpop.f32.mrb[68].mxu0 }
 0x33d   :  { %v2516_v62 = vadd.f32 %v8150_v54, %v2274_v42  ;;  %v2276_v61 = vpop.f32.mrb[69].mxu0  ;;  %v9888_v42 = vmax.f32 %v9201_v17, %v9204_v10 }
 0x33e   :  { %v9305_v36 = vpop.f32.mrb[96].mxu1  ;;  %v2277_v51 = vpop.f32.mrb[70].mxu0  ;;  %v9890_v61 = vmax.f32 %v9213_v11, %v9216_v60 }
 0x33f   :  { %v2646_v9 = vsel %vm2586_vm1, %v2516_v62, -inf  ;;  %v2519_v56 = vadd.f32 %v8155_v59, %v2277_v51  ;;  %v4913_v37 = vpop.f32.mrb[97].mxu1  ;;  %v2279_v38 = vpop.f32.mrb[71].mxu0 }
 0x340   :  { %v9312_v43 = vmax.f32 %v9884_v19, %v2646_v9  ;;  %v9314_v13 = vpop.f32.mrb[98].mxu1 }
 0x341   :  { %v2653_v29 = vsel %vm2586_vm1, %v2519_v56, -inf  ;;  %v4916_v54 = vpop.f32.mrb[99].mxu1 }
 0x342   :  { %9885 = vst [vmem:[#allocation25_spill] sm:$0xff] %v9312_v43  ;;  %v9320_v50 = vmax.f32 %v9886_v1, %v2653_v29  ;;  %v9892_v54 = vmax.f32 %v9225_v27, %v9228_v39 }
 0x344   :  { %9887 = vst [vmem:[#allocation26_spill] sm:$0xff] %v9320_v50  ;;  %v2282_v28 = vpop.f32.mrb[72].mxu0 }
 0x345   :  { %v2524_v59 = vadd.f32 %v8180_v14, %v2282_v28  ;;  %v2284_v58 = vpop.f32.mrb[73].mxu0 }
 0x346   :  { %v9323_v0 = vpop.f32.mrb[100].mxu1  ;;  %v2285_v44 = vpop.f32.mrb[74].mxu0 }
 0x347   :  { %v2660_v18 = vsel %vm2586_vm1, %v2524_v59, -inf  ;;  %v2527_v5 = vadd.f32 %v8188_v20, %v2285_v44  ;;  %v4921_v55 = vpop.f32.mrb[101].mxu1  ;;  %v2287_v34 = vpop.f32.mrb[75].mxu0 }
 0x348   :  { %v9330_v62 = vmax.f32 %v9888_v42, %v2660_v18  ;;  %v9332_v52 = vpop.f32.mrb[102].mxu1 }
 0x349   :  { %v2667_v7 = vsel %vm2586_vm1, %v2527_v5, -inf  ;;  %v4924_v14 = vpop.f32.mrb[103].mxu1 }
 0x34a   :  { %9889 = vst [vmem:[#allocation27_spill] sm:$0xff] %v9330_v62  ;;  %v9338_v51 = vmax.f32 %v9890_v61, %v2667_v7 }
 0x34c   :  { %9891 = vst [vmem:[#allocation28_spill] sm:$0xff] %v9338_v51  ;;  %v2290_v9 = vpop.f32.mrb[76].mxu0 }
 0x34d   :  { %v2532_v20 = vadd.f32 %v8175_v8, %v2290_v9  ;;  %v2292_v56 = vpop.f32.mrb[77].mxu0 }
 0x34e   :  { %v9341_v37 = vpop.f32.mrb[104].mxu1  ;;  %v2293_v38 = vpop.f32.mrb[78].mxu0 }
 0x34f   :  { %v2674_v17 = vsel %vm2586_vm1, %v2532_v20, -inf  ;;  %v2535_v10 = vadd.f32 %v8183_v15, %v2293_v38  ;;  %v4929_v19 = vpop.f32.mrb[105].mxu1  ;;  %v2295_v29 = vpop.f32.mrb[79].mxu0 }
 0x350   :  { %v9348_v1 = vmax.f32 %v9892_v54, %v2674_v17  ;;  %v9350_v11 = vpop.f32.mrb[106].mxu1  ;;  %v9908_v29 = vld [vmem:[#allocation5_spill] sm:$0xff] }
 0x351   :  { %v9353_v60 = vsel %vm2586_vm1, %v2535_v10, -inf  ;;  %v4932_v8 = vpop.f32.mrb[107].mxu1 }
 0x352   :  { %9893 = vst [vmem:[#allocation29_spill] sm:$0xff] %v9348_v1  ;;  %9894 = vst [vmem:[#allocation30_spill] sm:$0xff] %v9353_v60 }
 0x354   :  { %v2298_v59 = vpop.f32.mrb[80].mxu0 }
 0x355   :  { %v2540_v58 = vadd.f32 %v8205_v31, %v2298_v59  ;;  %v2300_v15 = vpop.f32.mrb[81].mxu0 }
 0x356   :  { %v9358_v44 = vpop.f32.mrb[108].mxu1  ;;  %v2301_v18 = vpop.f32.mrb[82].mxu0 }
 0x357   :  { %v9361_v27 = vsel %vm2586_vm1, %v2540_v58, -inf  ;;  %v2543_v39 = vadd.f32 %v8216_v35, %v2301_v18  ;;  %v4937_v5 = vpop.f32.mrb[109].mxu1  ;;  %v2303_v55 = vpop.f32.mrb[83].mxu0 }
 0x358   :  { %9895 = vst [vmem:[#allocation31_spill] sm:$0xff] %v9361_v27  ;;  %v9366_v42 = vpop.f32.mrb[110].mxu1 }
 0x359   :  { %v9369_v7 = vsel %vm2586_vm1, %v2543_v39, -inf  ;;  %v4940_v31 = vpop.f32.mrb[111].mxu1 }
 0x35a   :  { %9896 = vst [vmem:[#allocation32_spill] sm:$0xff] %v9369_v7 }
 0x35c   :  { %v2306_v61 = vpop.f32.mrb[84].mxu0 }
 0x35d   :  { %v2548_v9 = vadd.f32 %v8200_v25, %v2306_v61  ;;  %v2308_v20 = vpop.f32.mrb[85].mxu0 }
 0x35e   :  { %v9374_v56 = vpop.f32.mrb[112].mxu1  ;;  %v2309_v35 = vpop.f32.mrb[86].mxu0 }
 0x35f   :  { %v9377_v38 = vsel %vm2586_vm1, %v2548_v9, -inf  ;;  %v2551_v17 = vadd.f32 %v8211_v33, %v2309_v35  ;;  %v4945_v10 = vpop.f32.mrb[113].mxu1  ;;  %v2311_v19 = vpop.f32.mrb[87].mxu0 }
 0x360   :  { %9897 = vst [vmem:[#allocation33_spill] sm:$0xff] %v9377_v38  ;;  %v9382_v54 = vpop.f32.mrb[114].mxu1 }
 0x361   :  { %v9385_v8 = vsel %vm2586_vm1, %v2551_v17, -inf  ;;  %v4948_v25 = vpop.f32.mrb[115].mxu1 }
 0x362   :  { %9898 = vst [vmem:[#allocation34_spill] sm:$0xff] %v9385_v8 }
 0x364   :  { %v2314_v58 = vpop.f32.mrb[88].mxu0 }
 0x365   :  { %v2556_v15 = vadd.f32 %v8233_v53, %v2314_v58  ;;  %v2316_v18 = vpop.f32.mrb[89].mxu0 }
 0x366   :  { %v9390_v39 = vpop.f32.mrb[116].mxu1  ;;  %v2317_v33 = vpop.f32.mrb[90].mxu0 }
 0x367   :  { %v9393_v5 = vsel %vm2586_vm1, %v2556_v15, -inf  ;;  %v2559_v55 = vadd.f32 %v8244_v6, %v2317_v33  ;;  %v4953_v31 = vpop.f32.mrb[117].mxu1  ;;  %v2319_v61 = vpop.f32.mrb[91].mxu0 }
 0x368   :  { %9899 = vst [vmem:[#allocation35_spill] sm:$0xff] %v9393_v5  ;;  %v9398_v20 = vpop.f32.mrb[118].mxu1  ;;  %v9920_v5 = vld [vmem:[#allocation15_spill] sm:$0xff] }
 0x369   :  { %v9401_v35 = vsel %vm2586_vm1, %v2559_v55, -inf  ;;  %v4956_v53 = vpop.f32.mrb[119].mxu1 }
 0x36a   :  { %9900 = vst [vmem:[#allocation36_spill] sm:$0xff] %v9401_v35 }
 0x36c   :  { %v2322_v10 = vpop.f32.mrb[92].mxu0 }
 0x36d   :  { %v2564_v19 = vadd.f32 %v8225_v46, %v2322_v10  ;;  %v2324_v25 = vpop.f32.mrb[93].mxu0 }
 0x36e   :  { %v9406_v58 = vpop.f32.mrb[120].mxu1  ;;  %v2325_v6 = vpop.f32.mrb[94].mxu0 }
 0x36f   :  { %v9409_v15 = vsel %vm2586_vm1, %v2564_v19, -inf  ;;  %v2567_v18 = vadd.f32 %v8239_v63, %v2325_v6  ;;  %v4961_v33 = vpop.f32.mrb[121].mxu1  ;;  %v2327_v31 = vpop.f32.mrb[95].mxu0 }
 0x370   :  { %9901 = vst [vmem:[#allocation37_spill] sm:$0xff] %v9409_v15  ;;  %v9414_v61 = vpop.f32.mrb[122].mxu1  ;;  %v9915_v15 = vld [vmem:[#allocation8_spill] sm:$0xff] }
 0x371   :  { %v9417_v53 = vsel %vm2586_vm1, %v2567_v18, -inf  ;;  %v4964_v46 = vpop.f32.mrb[123].mxu1 }
 0x372   :  { %9902 = vst [vmem:[#allocation38_spill] sm:$0xff] %v9417_v53 }
 0x374   :  { %v2330_v25 = vpop.f32.mrb[96].mxu0 }
 0x375   :  { %v2572_v19 = vadd.f32 %v8261_v24, %v2330_v25  ;;  %v2332_v34 = vpop.f32.mrb[97].mxu0 }
 0x376   :  { %v9422_v28 = vpop.f32.mrb[124].mxu1  ;;  %v2333_v63 = vpop.f32.mrb[98].mxu0 }
 0x377   :  { %v9425_v6 = vsel %vm2586_vm1, %v2572_v19, -inf  ;;  %v2575_v33 = vadd.f32 %v8275_v45, %v2333_v63  ;;  %v4969_v31 = vpop.f32.mrb[125].mxu1  ;;  %v2335_v55 = vpop.f32.mrb[99].mxu0  ;;  %v9906_v63 = vld [vmem:[#allocation2_spill] sm:$0xff] }
 0x378   :  { %9903 = vst [vmem:[#allocation39_spill] sm:$0xff] %v9425_v6  ;;  %v9430_v46 = vpop.f32.mrb[126].mxu1 }
 0x379   :  { %v9433_v17 = vsel %vm2586_vm1, %v2575_v33, -inf  ;;  %v4972_v24 = vpop.f32.mrb[127].mxu1  ;;  %v9910_v33 = vld [vmem:[#allocation6_spill] sm:$0xff] }
 0x37a   :  { %9904 = vst [vmem:[#allocation40_spill] sm:$0xff] %v9433_v17 }
 0x37c   :  { %v2338_v25 = vpop.f32.mrb[100].mxu0 }
 0x37d   :  { %v2580_v19 = vadd.f32 %v8253_v16, %v2338_v25  ;;  %v2340_v10 = vpop.f32.mrb[101].mxu0 }
 0x37e   :  { %v9438_v9 = vpop.f32.mrb[128].mxu1  ;;  %v2341_v45 = vpop.f32.mrb[102].mxu0  ;;  %v9912_v10 = vld [vmem:[#allocation9_spill] sm:$0xff] }
 0x37f   :  { %v9441_v55 = vsel %vm2586_vm1, %v2580_v19, -inf  ;;  %v2583_v31 = vadd.f32 %v9906_v63, %v2341_v45  ;;  %v4977_v18 = vpop.f32.mrb[129].mxu1  ;;  %v2343_v59 = vpop.f32.mrb[103].mxu0 }
 0x380   :  { %9905 = vst [vmem:[#allocation41_spill] sm:$0xff] %v9441_v55  ;;  %v9446_v24 = vpop.f32.mrb[130].mxu1  ;;  %v9909_v18 = vld [vmem:[#allocation3_spill] sm:$0xff] }
 0x381   :  { %v9449_v34 = vsel %vm2586_vm1, %v2583_v31, -inf  ;;  %v4980_v16 = vpop.f32.mrb[131].mxu1  ;;  %v9911_v31 = vld [vmem:[#allocation4_spill] sm:$0xff] }
 0x382   :  { %9907 = vst [vmem:[#allocation2_spill] sm:$0xff] %v9449_v34 }
 0x384   :  { %v6226_v25 = vpop.f32.mrb[104].mxu0 }
 0x385   :  { %v5073_v19 = vadd.f32 %v6226_v25, %v9908_v29  ;;  %v5064_v14 = vpop.f32.mrb[105].mxu0  ;;  %v9913_v25 = vld [vmem:[#allocation7_spill] sm:$0xff] }
 0x386   :  { %v9454_v17 = vpop.f32.mrb[132].mxu1  ;;  %v5065_v59 = vadd.f32 %v5064_v14, %v9909_v18  ;;  %v6227_v45 = vpop.f32.mrb[106].mxu0  ;;  %v9914_v18 = vld [vmem:[#allocation10_spill] sm:$0xff] }
 0x387   :  { %v4985_v63 = vpop.f32.mrb[133].mxu1  ;;  %v5076_v55 = vadd.f32 %v6227_v45, %v9910_v33  ;;  %v5067_v51 = vpop.f32.mrb[107].mxu0 }
 0x388   :  { %v9458_v62 = vpop.f32.mrb[134].mxu1  ;;  %v5068_v16 = vadd.f32 %v5067_v51, %v9911_v31  ;;  %v9916_v31 = vld [vmem:[#allocation13_spill] sm:$0xff] }
 0x389   :  { %v4988_v27 = vpop.f32.mrb[135].mxu1 }
 0x38c   :  { %v6230_v57 = vpop.f32.mrb[108].mxu0 }
 0x38d   :  { %v5089_v34 = vadd.f32 %v6230_v57, %v9912_v10  ;;  %v5080_v1 = vpop.f32.mrb[109].mxu0 }
 0x38e   :  { %v9462_v29 = vpop.f32.mrb[136].mxu1  ;;  %v5081_v60 = vadd.f32 %v5080_v1, %v9913_v25  ;;  %v6231_v49 = vpop.f32.mrb[110].mxu0 }
 0x38f   :  { %v4993_v14 = vpop.f32.mrb[137].mxu1  ;;  %v9466_v63 = vadd.f32 %v6231_v49, %v9914_v18  ;;  %v5083_v33 = vpop.f32.mrb[111].mxu0  ;;  %v9918_v49 = vld [vmem:[#allocation14_spill] sm:$0xff] }
 0x390   :  { %v9468_v45 = vpop.f32.mrb[138].mxu1  ;;  %v5084_v21 = vadd.f32 %v5083_v33, %v9915_v15  ;;  %v9919_v15 = vld [vmem:[#allocation12_spill] sm:$0xff] }
 0x391   :  { %v4996_v51 = vpop.f32.mrb[139].mxu1 }
 0x394   :  { %v6234_v27 = vpop.f32.mrb[112].mxu0 }
 0x395   :  { %v9472_v35 = vadd.f32 %v6234_v27, %v9916_v31  ;;  %v5096_v57 = vpop.f32.mrb[113].mxu0 }
 0x396   :  { %v9474_v10 = vpop.f32.mrb[140].mxu1  ;;  %v9477_v1 = vadd.f32 %v5096_v57, %v9917_v23  ;;  %v6235_v25 = vpop.f32.mrb[114].mxu0 }
 0x397   :  { %v5001_v14 = vpop.f32.mrb[141].mxu1  ;;  %v9480_v18 = vadd.f32 %v6235_v25, %v9918_v49  ;;  %v5099_v6 = vpop.f32.mrb[115].mxu0 }
 0x398   :  { %v9482_v50 = vpop.f32.mrb[142].mxu1  ;;  %v5100_v33 = vadd.f32 %v5099_v6, %v9919_v15  ;;  %v9492_v14 = vsel %vm2586_vm1, %v5068_v16, -inf }
 0x399   :  { %v5004_v51 = vpop.f32.mrb[143].mxu1 }
 0x39a   :  { %v9921_v51 = vld [vmem:[#allocation16_spill] sm:$0xff] }
 0x39c   :  { %v6238_v53 = vpop.f32.mrb[116].mxu0 }
 0x39d   :  { %v5121_v27 = vadd.f32 %v6238_v53, %v9233_v41  ;;  %v5112_v31 = vpop.f32.mrb[117].mxu0 }
 0x39e   :  { %v9486_v43 = vpop.f32.mrb[144].mxu1  ;;  %v9489_v23 = vadd.f32 %v5112_v31, %v9920_v5  ;;  %v6239_v57 = vpop.f32.mrb[118].mxu0  ;;  %v9504_v5 = vsel %vm2586_vm1, %v5073_v19, -inf }
 0x39f   :  { %v9495_v25 = vsel %vm2586_vm1, %v5121_v27, -inf  ;;  %v5009_v49 = vpop.f32.mrb[145].mxu1  ;;  %v5124_v6 = vadd.f32 %v6239_v57, %v9242_v32  ;;  %v5115_v15 = vpop.f32.mrb[119].mxu0  ;;  %v9510_v27 = vsel %vm2586_vm1, %v5065_v59, -inf  ;;  %v9524_v59 = vsel %vm2586_vm1, %v5084_v21, -inf }
 0x3a0   :  { %v9500_v53 = vpop.f32.mrb[146].mxu1  ;;  %v5116_v2 = vadd.f32 %v5115_v15, %v9921_v51 }
 0x3a1   :  { %v9507_v16 = vsel %vm2586_vm1, %v5124_v6, -inf  ;;  %v5012_v31 = vpop.f32.mrb[147].mxu1 }
 0x3a2   :  { %v9515_v57 = vsel %vm2586_vm1, %v5116_v2, -inf }
 0x3a3   :  { %v5273_v49 = vmax.f32 %v9510_v27, %v9515_v57  ;;  %v9531_v27 = vsel %vm2586_vm1, %v5076_v55, -inf }
 0x3a4   :  { %v6242_v15 = vpop.f32.mrb[120].mxu0 }
 0x3a5   :  { %v5137_v19 = vadd.f32 %v6242_v15, %v9269_v40  ;;  %v5128_v51 = vpop.f32.mrb[121].mxu0  ;;  %v9542_v15 = vsel %vm2586_vm1, %v5089_v34, -inf }
 0x3a6   :  { %v9520_v41 = vpop.f32.mrb[148].mxu1  ;;  %v5129_v6 = vadd.f32 %v5128_v51, %v9251_v47  ;;  %v6243_v31 = vpop.f32.mrb[122].mxu0  ;;  %v9550_v51 = vsel %vm2586_vm1, %v5081_v60, -inf  ;;  %v9564_v60 = vsel %vm2586_vm1, %v5100_v33, -inf }
 0x3a7   :  { %v9527_v32 = vsel %vm2586_vm1, %v5137_v19, -inf  ;;  %v5017_v2 = vpop.f32.mrb[149].mxu1  ;;  %v5140_v8 = vadd.f32 %v6243_v31, %v9278_v3  ;;  %v5131_v22 = vpop.f32.mrb[123].mxu0 }
 0x3a8   :  { %v9536_v57 = vsel %vm2586_vm1, %v5129_v6, -inf  ;;  %v9538_v47 = vpop.f32.mrb[150].mxu1  ;;  %v5132_v21 = vadd.f32 %v5131_v22, %v9260_v48  ;;  %v9572_v48 = vsel %vm2586_vm1, %v9466_v63, -inf }
 0x3a9   :  { %v9547_v19 = vsel %vm2586_vm1, %v5140_v8, -inf  ;;  %v5020_v55 = vpop.f32.mrb[151].mxu1 }
 0x3aa   :  { %v9555_v31 = vsel %vm2586_vm1, %v5132_v21, -inf }
 0x3ac   :  { %v6246_v22 = vpop.f32.mrb[124].mxu0 }
 0x3ad   :  { %v5153_v34 = vadd.f32 %v6246_v22, %v9305_v36  ;;  %v5144_v2 = vpop.f32.mrb[125].mxu0 }
 0x3ae   :  { %v9560_v3 = vpop.f32.mrb[152].mxu1  ;;  %v5145_v8 = vadd.f32 %v5144_v2, %v9287_v30  ;;  %v6247_v55 = vpop.f32.mrb[126].mxu0 }
 0x3af   :  { %v9567_v6 = vsel %vm2586_vm1, %v5153_v34, -inf  ;;  %v5025_v21 = vpop.f32.mrb[153].mxu1  ;;  %v5156_v40 = vadd.f32 %v6247_v55, %v9314_v13  ;;  %v5147_v38 = vpop.f32.mrb[127].mxu0  ;;  %v9584_v34 = vsel %vm2586_vm1, %v9472_v35, -inf  ;;  %v9593_v55 = vsel %vm2586_vm1, %v9477_v1, -inf }
 0x3b0   :  { %v9577_v30 = vsel %vm2586_vm1, %v5145_v8, -inf  ;;  %v9579_v22 = vpop.f32.mrb[154].mxu1  ;;  %v5148_v33 = vadd.f32 %v5147_v38, %v9296_v12  ;;  %v9606_v1 = vsel %vm2586_vm1, %v9480_v18, -inf }
 0x3b1   :  { %v9589_v63 = vsel %vm2586_vm1, %v5156_v40, -inf  ;;  %v5028_v2 = vpop.f32.mrb[155].mxu1 }
 0x3b2   :  { %v9598_v12 = vsel %vm2586_vm1, %v5148_v33, -inf }
 0x3b4   :  { %v6250_v35 = vpop.f32.mrb[128].mxu0 }
 0x3b5   :  { %v5169_v21 = vadd.f32 %v6250_v35, %v9341_v37  ;;  %v5160_v13 = vpop.f32.mrb[129].mxu0 }
 0x3b6   :  { %v5161_v40 = vadd.f32 %v5160_v13, %v9323_v0  ;;  %v6266_v2 = vpop.f32.mrb[156].mxu1  ;;  %v6251_v36 = vpop.f32.mrb[130].mxu0 }
 0x3b7   :  { %v5274_v8 = vsel %vm2586_vm1, %v5169_v21, -inf  ;;  %v5233_v33 = vadd.f32 %v6266_v2, %v9462_v29  ;;  %v5172_v4 = vadd.f32 %v6251_v36, %v9350_v11  ;;  %v5224_v7 = vpop.f32.mrb[157].mxu1  ;;  %v5163_v38 = vpop.f32.mrb[131].mxu0  ;;  %v9922_v36 = vmax.f32 %v9492_v14, %v9495_v25 }
 0x3b8   :  { %v9611_v26 = vmax.f32 %v5273_v49, %v5274_v8  ;;  %v9614_v37 = vsel %vm2586_vm1, %v5161_v40, -inf  ;;  %v5225_v0 = vadd.f32 %v5224_v7, %v9454_v17  ;;  %v5164_v13 = vadd.f32 %v5163_v38, %v9332_v52  ;;  %v6267_v35 = vpop.f32.mrb[158].mxu1 }
 0x3b9   :  { %v5350_v18 = vmax.f32 %v9606_v1, %v9614_v37  ;;  %v5281_v21 = vsel %vm2586_vm1, %v5172_v4, -inf  ;;  %v5236_v29 = vadd.f32 %v6267_v35, %v9468_v45  ;;  %v5227_v11 = vpop.f32.mrb[159].mxu1  ;;  %v9624_v49 = vsel %vm2586_vm1, %v9489_v23, -inf }
 0x3ba   :  { %v5282_v8 = vmax.f32 %v9922_v36, %v5281_v21  ;;  %v9630_v7 = vsel %vm2586_vm1, %v5164_v13, -inf  ;;  %v5228_v52 = vadd.f32 %v5227_v11, %v9458_v62  ;;  %v5283_v17 = vsel %vm2586_vm1, %v5225_v0, -inf }
 0x3bb   :  { %v5357_v4 = vmax.f32 %v9624_v49, %v9630_v7  ;;  %v9923_v11 = vmax.f32 %v9550_v51, %v9555_v31 }
 0x3bc   :  { %v5284_v45 = vmax.f32 %v5282_v8, %v5283_v17  ;;  %v6254_v38 = vpop.f32.mrb[132].mxu0 }
 0x3bd   :  { %v5185_v40 = vadd.f32 %v6254_v38, %v9374_v56  ;;  %v5176_v23 = vpop.f32.mrb[133].mxu0  ;;  %v9650_v38 = vld [vmem:[%s9824_s5] ss:$0 sm:$0xff]  ;;  %s7349_s5 = smov 64  }
 0x3be   :  { %v5177_v2 = vadd.f32 %v5176_v23, %v9358_v44  ;;  %v6270_v35 = vpop.f32.mrb[160].mxu1  ;;  %v6255_v14 = vpop.f32.mrb[134].mxu0 }
 0x3bf   :  { %v5302_v25 = vsel %vm2586_vm1, %v5185_v40, -inf  ;;  %v5249_v13 = vadd.f32 %v6270_v35, %v9486_v43  ;;  %v5188_v62 = vadd.f32 %v6255_v14, %v9382_v54  ;;  %v5240_v21 = vpop.f32.mrb[161].mxu1  ;;  %v5179_v0 = vpop.f32.mrb[135].mxu0  ;;  %v5304_v43 = vsel %vm2586_vm1, %v5236_v29, -inf }
 0x3c0   :  { %v5303_v36 = vmax.f32 %v9923_v11, %v5302_v25  ;;  %v5288_v8 = vsel %vm2586_vm1, %v5177_v2, -inf  ;;  %v5241_v56 = vadd.f32 %v5240_v21, %v9474_v10  ;;  %v5180_v44 = vadd.f32 %v5179_v0, %v9366_v42  ;;  %v6271_v17 = vpop.f32.mrb[162].mxu1 }
 0x3c1   :  { %v9924_v54 = vmax.f32 %v9504_v5, %v9507_v16  ;;  %v5309_v51 = vsel %vm2586_vm1, %v5188_v62, -inf  ;;  %v5252_v31 = vadd.f32 %v6271_v17, %v9500_v53  ;;  %v5243_v23 = vpop.f32.mrb[163].mxu1  ;;  %v5290_v10 = vsel %vm2586_vm1, %v5228_v52, -inf }
 0x3c2   :  { %v5305_v42 = vmax.f32 %v5303_v36, %v5304_v43  ;;  %v9925_v2 = vmax.f32 %v9524_v59, %v9527_v32  ;;  %v5295_v14 = vsel %vm2586_vm1, %v5180_v44, -inf  ;;  %v5311_v29 = vsel %vm2586_vm1, %v5241_v56, -inf }
 0x3c3   :  { %v5289_v40 = vmax.f32 %v9924_v54, %v5288_v8  ;;  %v9926_v5 = vmax.f32 %v9531_v27, %v9536_v57  ;;  %v5244_v62 = vadd.f32 %v5243_v23, %v9482_v50  ;;  %v5297_v53 = vsel %vm2586_vm1, %v5233_v33, -inf }
 0x3c4   :  { %v5310_v35 = vmax.f32 %v9925_v2, %v5309_v51  ;;  %v9670_v52 = vadd.f32 %v9650_v38, %v5284_v45  ;;  %v6258_v0 = vpop.f32.mrb[136].mxu0  ;;  %v9673_v32 = vsel %vm2586_vm1, %v5249_v13, -inf  ;;  %v5332_v11 = vsel %vm2586_vm1, %v5252_v31, -inf }
 0x3c5   :  { %v5291_v25 = vmax.f32 %v5289_v40, %v5290_v10  ;;  %v5296_v16 = vmax.f32 %v9926_v5, %v5295_v14  ;;  %v5201_v36 = vadd.f32 %v6258_v0, %v9406_v58  ;;  %v5192_v8 = vpop.f32.mrb[137].mxu0  ;;  %v5372_v33 = vadd.f32 %v9650_v38, %v5305_v42 }
 0x3c6   :  { %v5312_v21 = vmax.f32 %v5310_v35, %v5311_v29  ;;  %v5193_v27 = vadd.f32 %v5192_v8, %v9390_v39  ;;  %v6274_v57 = vpop.f32.mrb[164].mxu1  ;;  %v6259_v50 = vpop.f32.mrb[138].mxu0  ;;  %v9927_v39 = vmax.f32 %v9593_v55, %v9598_v12  ;;  %v5318_v42 = vsel %vm2586_vm1, %v5244_v62, -inf }
 0x3c7   :  { %v5298_v59 = vmax.f32 %v5296_v16, %v5297_v53  ;;  %v5370_v56 = vadd.f32 %v9650_v38, %v5291_v25  ;;  %v5330_v44 = vsel %vm2586_vm1, %v5201_v36, -inf  ;;  %v5265_v13 = vadd.f32 %v6274_v57, %v9560_v3  ;;  %v5256_v43 = vpop.f32.mrb[165].mxu1  ;;  %v5195_v54 = vpop.f32.mrb[139].mxu0 }
 0x3c8   :  { %v5373_v45 = vadd.f32 %v9650_v38, %v5312_v21  ;;  %v5204_v17 = vadd.f32 %v6259_v50, %v9414_v61  ;;  %v5331_v40 = vmax.f32 %v9927_v39, %v5330_v44  ;;  %v5316_v51 = vsel %vm2586_vm1, %v5193_v27, -inf  ;;  %v6275_v10 = vpop.f32.mrb[166].mxu1 }
 0x3c9   :  { %v5371_v58 = vadd.f32 %v9650_v38, %v5298_v59  ;;  %v5257_v31 = vadd.f32 %v5256_v43, %v9520_v41  ;;  %v5196_v23 = vadd.f32 %v5195_v54, %v9398_v20  ;;  %v9928_v61 = vmax.f32 %v9542_v15, %v9547_v19  ;;  %v5259_v14 = vpop.f32.mrb[167].mxu1 }
 0x3ca   :  { %v5337_v2 = vsel %vm2586_vm1, %v5204_v17, -inf  ;;  %v5268_v35 = vadd.f32 %v6275_v10, %v9579_v22  ;;  %v5333_v55 = vmax.f32 %v5331_v40, %v5332_v11  ;;  %v9929_v12 = vmax.f32 %v9564_v60, %v9567_v6 }
 0x3cb   :  { %v5317_v3 = vmax.f32 %v9928_v61, %v5316_v51  ;;  %v5323_v41 = vsel %vm2586_vm1, %v5196_v23, -inf  ;;  %v5385_v20 = vmax.f32 %v5372_v33, 0.0  ;;  %v5339_v5 = vsel %vm2586_vm1, %v5257_v31, -inf }
 0x3cc   :  { %v5338_v25 = vmax.f32 %v9929_v12, %v5337_v2  ;;  %v9930_v15 = vmax.f32 %v9572_v48, %v9577_v30  ;;  %v5260_v16 = vadd.f32 %v5259_v14, %v9538_v47  ;;  %v6262_v22 = vpop.f32.mrb[140].mxu0  ;;  %v5386_v53 = vmax.f32 %v5373_v45, 0.0  ;;  %v9932_v14 = vld [vmem:[#allocation19_spill] sm:$0xff] }
 0x3cd   :  { %v5319_v29 = vmax.f32 %v5317_v3, %v5318_v42  ;;  %v5383_v21 = vmax.f32 %v5370_v56, 0.0  ;;  %v5384_v0 = vmax.f32 %v5371_v58, 0.0  ;;  %v5360_v60 = vsel %vm2586_vm1, %v5268_v35, -inf  ;;  %v5208_v11 = vpop.f32.mrb[141].mxu0 }
 0x3ce   :  { %v5324_v19 = vmax.f32 %v9930_v15, %v5323_v41  ;;  %v5340_v62 = vmax.f32 %v5338_v25, %v5339_v5  ;;  %v5217_v59 = vadd.f32 %v6262_v22, %v9438_v9  ;;  %v5376_v36 = vadd.f32 %v9650_v38, %v5333_v55  ;;  %v6263_v27 = vpop.f32.mrb[142].mxu0  ;;  %v9933_v55 = vld [vmem:[#allocation32_spill] sm:$0xff]  ;;  %v9938_v5 = vld [vmem:[#allocation21_spill] sm:$0xff]  ;;  %v9939_v15 = vld [vmem:[#allocation34_spill] sm:$0xff] }
 0x3cf   :  { %v6698_v48 = vpack.i.bf16 %v5386_v53, %v5385_v20  ;;  %v5209_v30 = vadd.f32 %v5208_v11, %v9422_v28  ;;  %v6703_v47 = vpack.i.bf16 %v5384_v0, %v5383_v21  ;;  %v5220_v50 = vadd.f32 %v6263_v27, %v9446_v24  ;;  %v5211_v33 = vpop.f32.mrb[143].mxu0  ;;  %v9935_v41 = vld [vmem:[#allocation20_spill] sm:$0xff]  ;;  %v9942_v22 = vld [vmem:[#allocation35_spill] sm:$0xff]  ;;  %v9944_v11 = vld [vmem:[#allocation25_spill] sm:$0xff] }
 0x3d0   :  { %v5326_v6 = vmax.f32 %v5324_v19, %v9673_v32  ;;  %v5377_v8 = vadd.f32 %v9650_v38, %v5340_v62  ;;  %v5358_v57 = vsel %vm2586_vm1, %v5217_v59, -inf  ;;  %v5389_v32 = vmax.f32 %v5376_v36, 0.0  ;;  %v9941_v62 = vld [vmem:[#allocation22_spill] sm:$0xff] }
 0x3d1   :  { %v5374_v45 = vadd.f32 %v9650_v38, %v5319_v29  ;;  %v5359_v9 = vmax.f32 %v5357_v4, %v5358_v57  ;;  %6699 = vrot.lane.b32.xlu1 %v6698_v48, %s7349_s5  ;;  %v5344_v56 = vsel %vm2586_vm1, %v5209_v30, -inf  ;;  %6704 = vrot.lane.b32.xlu0 %v6703_v47, %s7349_s5  ;;  %v5212_v28 = vadd.f32 %v5211_v33, %v9430_v46  ;;  %v9945_v36 = vld [vmem:[#allocation38_spill] sm:$0xff]  ;;  %v9948_v47 = vld [vmem:[#allocation39_spill] sm:$0xff] }
 0x3d2   :  { %v5390_v44 = vmax.f32 %v5377_v8, 0.0  ;;  %v5346_v24 = vsel %vm2586_vm1, %v5260_v16, -inf  ;;  %v9931_v17 = vmax.f32 %v9584_v34, %v9589_v63  ;;  %v5276_v54 = vsel %vm2586_vm1, %v5220_v50, -inf  ;;  %v9947_v30 = vld [vmem:[#allocation26_spill] sm:$0xff] }
 0x3d3   :  { %v5375_v49 = vadd.f32 %v9650_v38, %v5326_v6  ;;  %v5361_v7 = vmax.f32 %v5359_v9, %v5360_v60  ;;  %v5277_v4 = vmax.f32 %v9611_v26, %v5276_v54  ;;  %v5351_v58 = vsel %vm2586_vm1, %v5212_v28, -inf  ;;  %v9950_v28 = vld [vmem:[#allocation23_spill] sm:$0xff] }
 0x3d4   :  { %v5345_v43 = vmax.f32 %v9931_v17, %v5344_v56  ;;  %v6708_v39 = vpack.i.bf16 %v5390_v44, %v5389_v32  ;;  %v5352_v46 = vmax.f32 %v5350_v18, %v5351_v58  ;;  %v5387_v51 = vmax.f32 %v5374_v45, 0.0  ;;  %v9951_v44 = vld [vmem:[#allocation36_spill] sm:$0xff]  ;;  %v9954_v58 = vld [vmem:[#allocation37_spill] sm:$0xff] }
 0x3d5   :  { %v5388_v31 = vmax.f32 %v5375_v49, 0.0  ;;  %v5353_v34 = vsel %vm2586_vm1, %v5265_v13, -inf  ;;  %v5368_v63 = vadd.f32 %v9650_v38, %v5277_v4  ;;  %v5382_v61 = vmax.f32 %v9670_v52, 0.0  ;;  %v5787_v52 = vld [vmem:[%s9825_s4] ss:$0 sm:$0xff]  ;;  %v9953_v4 = vld [vmem:[#allocation24_spill] sm:$0xff] }
 0x3d6   :  { %v5347_v40 = vmax.f32 %v5345_v43, %v5346_v24  ;;  %6709 = vrot.lane.b32.xlu0 %v6708_v39, %s7349_s5  ;;  %v5354_v23 = vmax.f32 %v5352_v46, %v5353_v34  ;;  %v5380_v18 = vadd.f32 %v9650_v38, %v5361_v7  ;;  %v9934_v12 = vmax.f32 %v9932_v14, %v9933_v55 }
 0x3d7   :  { %v6713_v10 = vpack.i.bf16 %v5388_v31, %v5387_v51  ;;  %v5381_v42 = vmax.f32 %v5368_v63, 0.0  ;;  %v9940_v19 = vmax.f32 %v9938_v5, %v9939_v15  ;;  %v9943_v53 = vmax.f32 %v9941_v62, %v9942_v22 }
 0x3d8   :  { %v5378_v26 = vadd.f32 %v9650_v38, %v5347_v40  ;;  %v5379_v1 = vadd.f32 %v9650_v38, %v5354_v23  ;;  %v5393_v35 = vmax.f32 %v5380_v18, 0.0  ;;  %v2686_v25 = vadd.f32 %v5787_v52, %v9934_v12  ;;  %v9936_v38 = vld [vmem:[#allocation33_spill] sm:$0xff]  ;;  %v9960_v18 = vld [vmem:[#allocation31_spill] sm:$0xff] }
 0x3d9   :  { %6714 = vrot.lane.b32.xlu1 %v6713_v10, %s7349_s5  ;;  %v6718_v37 = vpack.i.bf16 %v5382_v61, %v5381_v42  ;;  %v9937_v20 = vmax.f32 %v9935_v41, %v9936_v38  ;;  %v2688_v16 = vadd.f32 %v5787_v52, %v9940_v19  ;;  %v2689_v21 = vadd.f32 %v5787_v52, %v9943_v53  ;;  %v9957_v42 = vld [vmem:[#allocation30_spill] sm:$0xff]  ;;  %v9965_v19 = vld [vmem:[#allocation29_spill] sm:$0xff] }
 0x3da   :  { %v5391_v3 = vmax.f32 %v5378_v26, 0.0  ;;  %v5392_v13 = vmax.f32 %v5379_v1, 0.0  ;;  %v2699_v0 = vmax.f32 %v2686_v25, 0.0  ;;  %v9946_v8 = vmax.f32 %v9944_v11, %v9945_v36  ;;  %v9956_v26 = vld [vmem:[#allocation17_spill] sm:$0xff] }
 0x3db   :  { %6719 = vrot.lane.b32.xlu0 %v6718_v37, %s7349_s5  ;;  %v2687_v29 = vadd.f32 %v5787_v52, %v9937_v20  ;;  %v2701_v60 = vmax.f32 %v2688_v16, 0.0  ;;  %v2702_v59 = vmax.f32 %v2689_v21, 0.0  ;;  %v9949_v27 = vmax.f32 %v9947_v30, %v9948_v47  ;;  %v9959_v37 = vld [vmem:[#allocation18_spill] sm:$0xff]  ;;  %v9962_v20 = vld [vmem:[#allocation27_spill] sm:$0xff]  ;;  %v9968_v21 = vld [vmem:[#allocation28_spill] sm:$0xff] }
 0x3dc   :  { %v6723_v2 = vpack.i.bf16 %v5392_v13, %v5391_v3  ;;  %v2692_v48 = vadd.f32 %v5787_v52, %v9946_v8  ;;  %v9952_v24 = vmax.f32 %v9950_v28, %v9951_v44  ;;  %v9955_v39 = vmax.f32 %v9953_v4, %v9954_v58  ;;  %v9966_v16 = vld [vmem:[#allocation2_spill] sm:$0xff] }
 0x3dd   :  { %v2700_v6 = vmax.f32 %v2687_v29, 0.0  ;;  %v2693_v57 = vadd.f32 %v5787_v52, %v9949_v27  ;;  %v9958_v61 = vmax.f32 %v9956_v26, %v9957_v42  ;;  %v9961_v3 = vmax.f32 %v9959_v37, %v9960_v18  ;;  %v9963_v29 = vld [vmem:[#allocation40_spill] sm:$0xff] }
 0x3de   :  { %6724 = vrot.lane.b32.xlu1 %v6723_v2, %s7349_s5  ;;  %v2690_v17 = vadd.f32 %v5787_v52, %v9952_v24  ;;  %v2691_v40 = vadd.f32 %v5787_v52, %v9955_v39  ;;  %v2705_v34 = vmax.f32 %v2692_v48, 0.0  ;;  %v9964_v5 = vmax.f32 %v9962_v20, %v9963_v29 }
 0x3df   :  { %5431 = vrot.lane.b32.xlu0 %v5393_v35, %s7349_s5  ;;  %v2706_v63 = vmax.f32 %v2693_v57, 0.0  ;;  %v2684_v1 = vadd.f32 %v5787_v52, %v9958_v61  ;;  %v2685_v13 = vadd.f32 %v5787_v52, %v9961_v3  ;;  %v9967_v62 = vmax.f32 %v9965_v19, %v9966_v16 }
 0x3e0   :  { %v2703_v2 = vmax.f32 %v2690_v17, 0.0  ;;  %v2704_v12 = vmax.f32 %v2691_v40, 0.0  ;;  %v2694_v15 = vadd.f32 %v5787_v52, %v9964_v5 }
 0x3e1   :  { %v2696_v22 = vadd.f32 %v5787_v52, %v9967_v62  ;;  %v2697_v53 = vmax.f32 %v2684_v1, 0.0  ;;  %v2698_v8 = vmax.f32 %v2685_v13, 0.0 }
 0x3e2   :  { %v2707_v27 = vmax.f32 %v2694_v15, 0.0 }
 0x3e3   :  { %v2709_v57 = vmax.f32 %v2696_v22, 0.0 }
 0x443   :  { %v6700_v50 = vpop.permute.xlu1 %6699  ;;  %v6705_v33 = vpop.permute.xlu0 %6704 }
 0x444   :  { %v6702_v32 = vunpack.i.h.bf16 %v6700_v50  ;;  %v6701_v45 = vunpack.i.l.bf16 %v6700_v50  ;;  %v6707_v9 = vunpack.i.h.bf16 %v6705_v33  ;;  %v6706_v56 = vunpack.i.l.bf16 %v6705_v33 }
 0x446   :  { %v5451_v43 = vsel %vm2586_vm1, %v2702_v59, %v6702_v32  ;;  %v5450_v54 = vsel %vm2586_vm1, %v2701_v60, %v6701_v45  ;;  %v5449_v49 = vsel %vm2586_vm1, %v2700_v6, %v6707_v9  ;;  %v5448_v7 = vsel %vm2586_vm1, %v2699_v0, %v6706_v56  ;;  %v9969_v0 = vld [vmem:[#allocation41_spill] sm:$0xff] }
 0x447   :  { %v6086_v46 = vpack.c.bf16 %v5451_v43, %v5450_v54  ;;  %v6081_v51 = vpack.c.bf16 %v5449_v49, %v5448_v7  ;;  %v9970_v6 = vmax.f32 %v9968_v21, %v9969_v0 }
 0x448   :  { %v6710_v31 = vpop.permute.xlu0 %6709 }
 0x449   :  { %v6712_v23 = vunpack.i.h.bf16 %v6710_v31  ;;  %v6711_v10 = vunpack.i.l.bf16 %v6710_v31  ;;  %6104 = vst [vmem:[%s9826_s6 + $0x10] sm:$0xff] %v6086_v46   ;;  %6103 = vst [vmem:[%s9826_s6 + $0x8] sm:$0xff] %v6081_v51   ;;  %v2695_v60 = vadd.f32 %v5787_v52, %v9970_v6 }
 0x44b   :  { %v5455_v35 = vsel %vm2586_vm1, %v2706_v63, %v6712_v23  ;;  %v5454_v14 = vsel %vm2586_vm1, %v2705_v34, %v6711_v10  ;;  %v6715_v55 = vpop.permute.xlu1 %6714  ;;  %v2708_v32 = vmax.f32 %v2695_v60, 0.0 }
 0x44c   :  { %v6096_v25 = vpack.c.bf16 %v5455_v35, %v5454_v14  ;;  %v6717_v41 = vunpack.i.h.bf16 %v6715_v55  ;;  %v6716_v38 = vunpack.i.l.bf16 %v6715_v55 }
 0x44d   :  { %v6720_v36 = vpop.permute.xlu0 %6719 }
 0x44e   :  { %6106 = vst [vmem:[%s9826_s6 + $0x20] sm:$0xff] %v6096_v25   ;;  %v5453_v59 = vsel %vm2586_vm1, %v2704_v12, %v6717_v41  ;;  %v5452_v11 = vsel %vm2586_vm1, %v2703_v2, %v6716_v38  ;;  %v6722_v30 = vunpack.i.h.bf16 %v6720_v36  ;;  %v6721_v47 = vunpack.i.l.bf16 %v6720_v36 }
 0x44f   :  { %v6091_v48 = vpack.c.bf16 %v5453_v59, %v5452_v11 }
 0x450   :  { %v5447_v52 = vsel %vm2586_vm1, %v2698_v8, %v6722_v30  ;;  %v5446_v50 = vsel %vm2586_vm1, %v2697_v53, %v6721_v47  ;;  %v6725_v33 = vpop.permute.xlu1 %6724 }
 0x451   :  { %6105 = vst [vmem:[%s9826_s6 + $0x18] sm:$0xff] %v6091_v48   ;;  %v6076_v45 = vpack.c.bf16 %v5447_v52, %v5446_v50  ;;  %v6727_v9 = vunpack.i.h.bf16 %v6725_v33  ;;  %v6726_v56 = vunpack.i.l.bf16 %v6725_v33  ;;  %v5432_v28 = vpop.permute.xlu0 %5431 }
 0x452   :  { %v5458_v44 = vsel %vm2586_vm1, %v2709_v57, %v5432_v28 }
 0x453   :  { %6077 = vst [vmem:[%s9826_s6] sm:$0xff] %v6076_v45   ;;  %v5457_v24 = vsel %vm2586_vm1, %v2708_v32, %v6727_v9  ;;  %v5456_v17 = vsel %vm2586_vm1, %v2707_v27, %v6726_v56  ;;  %v6072_v43 = vpack.c.bf16 %v5458_v44, %v5458_v44 }
 0x454   :  { %v6101_v54 = vpack.c.bf16 %v5457_v24, %v5456_v17 }
 0x455   :  { %5524 = vst [vmem:[%s9826_s6 + $0x30] sm:$0xf] %v6072_v43 }
 0x456   :  { %6107 = vst [vmem:[%s9826_s6 + $0x28] sm:$0xff] %v6101_v54  }

// kernel: mnist_forward.6
= control target key start
LH: loop header
LB: loop body
LE: loop exit
PB: predicated region body
PF: predicated region fallthrough
CT: control target
= control target key end

     0   :  { %10 = vsyncpa [#allocation4], 0  ;;  %s3262_s18 = smov 0   ;;  %s3684_s0 = inlined_call_operand.vmem [shape: bf16[2,6272], index: 0, kind: input, shape index: {}]   ;;  %s3685_s1 = inlined_call_operand.vmem [shape: bf16[6272,512], index: 1, kind: input, shape index: {}]   ;;  %s3686_s2 = inlined_call_operand.vmem [shape: f32[1,512], index: 2, kind: input, shape index: {}]   ;;  %s3687_s3 = inlined_call_operand.vmem [shape: bf16[512,10], index: 3, kind: input, shape index: {}]   ;;  %s3688_s4 = inlined_call_operand.vmem [shape: f32[1,10], index: 4, kind: input, shape index: {}]   ;;  %s3689_s5 = inlined_call_operand.hbm [shape: f32[2,10], index: 5, kind: output, shape index: {}]  }
   0x1 LB: > { %s3268_s19 = sadd.s32 4294967295, %s3225_s18   ;;  %p2466_p0 = scmp.ge.s32.totalorder %s3225_s18, 1  ;;  %s3225_s18 = sphi %s3262_s18, %s16_s18  }
   0x2   : > { %p195_p1 = scmp.lt.s32.totalorder %s3225_s18, 8 }
   0x4   : > { %p196_p2 = pnand %p2466_p0, %p195_p1 }
   0x5   : > { %s223_s20 = smul.u32 (!%p196_p2), 7, %s3268_s19  ;;  %p2469_p5 = scmp.ne.s32.totalorder (!%p196_p2), %s3268_s19, 0 }
   0x6   : > { %199 = sbr.rel (%p196_p2) target bundleno = 730 (0x2da), region = 40 }
   0x7   : > { %s228_s21 = smul.u32 (!%p196_p2), 112, %s3268_s19  ;;  %p224_p3 = scmp.lt.s32.totalorder (!%p196_p2), %s223_s20, 48 }
   0x9   : > { %p229_p4 = scmp.lt.s32.totalorder (!%p196_p2), %s228_s21, 783 }
   0xd   : > { %s3691_s20 = smov (!%p224_p3, %s223_s20), 48  ;;  %s3693_s21 = smov (!%p229_p4, %s228_s21), 783 }
   0xe   : > { %s226_s24 = scalar_lea.vmem %s3684_s0, %s3691_s20  ;;  %s2732_s25 = sshll.u32 %s3693_s21, 4  ;;  %v3227_v0 = vmov (!%p2469_p5), 0.0  }
   0xf   : > { %s3283_s28 = scalar_lea.vmem %s3685_s1, %s2732_s25  ;;  %239 = sbr.rel (%p2469_p5) target bundleno = 22 (0x16), region = 44  ;;  %240 = vst [vmem:[#allocation2] sm:$0xff] (!%p2469_p5), %v3227_v0 }
  0x16 PF: > { %v2820_v1 = vld [vmem:[%s3283_s28 + $0x4] ss:$16 sps:$4 sm:$0xff]   ;;  %v2822_v2 = vld [vmem:[%s3283_s28 + $0xc] ss:$16 sps:$4 sm:$0xff]   ;;  %v2824_v3 = vld [vmem:[%s3283_s28] ss:$16 sps:$4 sm:$0xff]   ;;  %v472_v39 = vlaneseq }
  0x17   : > { %1643 = vmatprep.subr.bf16.mxu0 %v2820_v1  ;;  %v2825_v4 = vld [vmem:[%s3283_s28 + $0x8] ss:$16 sps:$4 sm:$0xff]   ;;  %1807 = vmatprep.subr.bf16.mxu1 %v2822_v2  ;;  %v2826_v5 = vld [vmem:[%s3283_s28 + $0x24] ss:$16 sps:$4 sm:$0xff]   ;;  %v2828_v6 = vld [vmem:[%s3283_s28 + $0x2c] ss:$16 sps:$4 sm:$0xff]  }
  0x18   : > { %1644 = vmatpush1.bf16.msra.mxu0 %v2824_v3  ;;  %1808 = vmatpush1.bf16.msra.mxu1 %v2825_v4  ;;  %v2830_v7 = vld [vmem:[%s3283_s28 + $0x20] ss:$16 sps:$4 sm:$0xff]   ;;  %v2831_v8 = vld [vmem:[%s3283_s28 + $0x28] ss:$16 sps:$4 sm:$0xff]   ;;  %v2832_v9 = vld [vmem:[%s3283_s28 + $0x44] ss:$16 sps:$4 sm:$0xff]  }
  0x19   : > { %1645 = vmatprep.subr.bf16.mxu0 %v2826_v5  ;;  %1809 = vmatprep.subr.bf16.mxu1 %v2828_v6  ;;  %v2834_v10 = vld [vmem:[%s3283_s28 + $0x4c] ss:$16 sps:$4 sm:$0xff]   ;;  %v2836_v11 = vld [vmem:[%s3283_s28 + $0x40] ss:$16 sps:$4 sm:$0xff]   ;;  %v2837_v12 = vld [vmem:[%s3283_s28 + $0x48] ss:$16 sps:$4 sm:$0xff]  }
  0x1a   : > { %v2838_v13 = vld [vmem:[%s3283_s28 + $0x64] ss:$16 sps:$4 sm:$0xff]   ;;  %v2840_v14 = vld [vmem:[%s3283_s28 + $0x6c] ss:$16 sps:$4 sm:$0xff]   ;;  %v2842_v15 = vld [vmem:[%s3283_s28 + $0x60] ss:$16 sps:$4 sm:$0xff]  }
  0x1b   : > { %v2843_v16 = vld [vmem:[%s3283_s28 + $0x68] ss:$16 sps:$4 sm:$0xff]   ;;  %v2844_v17 = vld [vmem:[%s3283_s28 + $0x84] ss:$16 sps:$4 sm:$0xff]   ;;  %v2846_v18 = vld [vmem:[%s3283_s28 + $0x8c] ss:$16 sps:$4 sm:$0xff]  }
  0x1c   : > { %1646 = vmatpush1.bf16.msra.mxu0 %v2830_v7  ;;  %1810 = vmatpush1.bf16.msra.mxu1 %v2831_v8  ;;  %v2848_v19 = vld [vmem:[%s3283_s28 + $0x80] ss:$16 sps:$4 sm:$0xff]   ;;  %v2849_v20 = vld [vmem:[%s3283_s28 + $0x88] ss:$16 sps:$4 sm:$0xff]   ;;  %v2850_v21 = vld [vmem:[%s3283_s28 + $0xa4] ss:$16 sps:$4 sm:$0xff]  }
  0x1d   : > { %1647 = vmatprep.subr.bf16.mxu0 %v2832_v9  ;;  %1811 = vmatprep.subr.bf16.mxu1 %v2834_v10  ;;  %v2852_v22 = vld [vmem:[%s3283_s28 + $0xac] ss:$16 sps:$4 sm:$0xff]   ;;  %v2854_v23 = vld [vmem:[%s3283_s28 + $0xa0] ss:$16 sps:$4 sm:$0xff]   ;;  %v2855_v24 = vld [vmem:[%s3283_s28 + $0xa8] ss:$16 sps:$4 sm:$0xff]  }
  0x1e   : > { %v2856_v25 = vld [vmem:[%s3283_s28 + $0xc4] ss:$16 sps:$4 sm:$0xff]   ;;  %v2858_v26 = vld [vmem:[%s3283_s28 + $0xcc] ss:$16 sps:$4 sm:$0xff]   ;;  %v2860_v27 = vld [vmem:[%s3283_s28 + $0xc0] ss:$16 sps:$4 sm:$0xff]  }
  0x1f   : > { %v2861_v28 = vld [vmem:[%s3283_s28 + $0xc8] ss:$16 sps:$4 sm:$0xff]   ;;  %v2862_v29 = vld [vmem:[%s3283_s28 + $0xe4] ss:$16 sps:$4 sm:$0xff]   ;;  %v2864_v30 = vld [vmem:[%s3283_s28 + $0xec] ss:$16 sps:$4 sm:$0xff]  }
  0x20   : > { %1648 = vmatpush1.bf16.msra.mxu0 %v2836_v11  ;;  %1812 = vmatpush1.bf16.msra.mxu1 %v2837_v12  ;;  %v2866_v31 = vld [vmem:[%s3283_s28 + $0xe0] ss:$16 sps:$4 sm:$0xff]   ;;  %v2867_v32 = vld [vmem:[%s3283_s28 + $0xe8] ss:$16 sps:$4 sm:$0xff]   ;;  %v2868_v33 = vld [vmem:[%s3283_s28 + $0x104] ss:$16 sps:$4 sm:$0xff]  }
  0x21   : > { %1649 = vmatprep.subr.bf16.mxu0 %v2838_v13  ;;  %1813 = vmatprep.subr.bf16.mxu1 %v2840_v14  ;;  %v2870_v34 = vld [vmem:[%s3283_s28 + $0x10c] ss:$16 sps:$4 sm:$0xff]   ;;  %v2872_v35 = vld [vmem:[%s3283_s28 + $0x100] ss:$16 sps:$4 sm:$0xff]   ;;  %v2873_v36 = vld [vmem:[%s3283_s28 + $0x108] ss:$16 sps:$4 sm:$0xff]  }
  0x22   : > { %v3228_v37 = vmov 1966171168   ;;  %v2874_v40 = vld [vmem:[%s3283_s28 + $0x124] ss:$16 sps:$4 sm:$0xff]   ;;  %v2876_v41 = vld [vmem:[%s3283_s28 + $0x12c] ss:$16 sps:$4 sm:$0xff]  }
  0x23   : > { %v470_v38 = vunpack.c.l.s4 %v3228_v37  ;;  %v2878_v42 = vld [vmem:[%s3283_s28 + $0x120] ss:$16 sps:$4 sm:$0xff]   ;;  %v3325_v44 = vshrl.u32 %v472_v39, 7  ;;  %v2879_v45 = vld [vmem:[%s3283_s28 + $0x128] ss:$16 sps:$4 sm:$0xff]   ;;  %p2694_p6 = scmp.ne.s32.totalorder %s3268_s19, 6 }
  0x24   : > { %1650 = vmatpush1.bf16.msra.mxu0 %v2842_v15  ;;  %1814 = vmatpush1.bf16.msra.mxu1 %v2843_v16  ;;  %v2880_v46 = vld [vmem:[%s3283_s28 + $0x144] ss:$16 sps:$4 sm:$0xff]   ;;  %v2882_v47 = vld [vmem:[%s3283_s28 + $0x14c] ss:$16 sps:$4 sm:$0xff]   ;;  %v2884_v48 = vld [vmem:[%s3283_s28 + $0x140] ss:$16 sps:$4 sm:$0xff]  }
  0x25   : > { %1651 = vmatprep.subr.bf16.mxu0 %v2844_v17  ;;  %1815 = vmatprep.subr.bf16.mxu1 %v2846_v18  ;;  %v471_v43 = vunpack.c.0.s8 %v470_v38  ;;  %v2885_v49 = vld [vmem:[%s3283_s28 + $0x148] ss:$16 sps:$4 sm:$0xff]   ;;  %v2886_v51 = vld [vmem:[%s3283_s28 + $0x164] ss:$16 sps:$4 sm:$0xff]   ;;  %v2888_v52 = vld [vmem:[%s3283_s28 + $0x16c] ss:$16 sps:$4 sm:$0xff]  }
  0x26   : > { %v242_v53 = vld [vmem:[%s226_s24] sm:$0x7f]  ;;  %v2891_v56 = vld [vmem:[%s3283_s28 + $0x168] ss:$16 sps:$4 sm:$0xff]   ;;  %v2894_v58 = vld [vmem:[%s3283_s28 + $0x18c] ss:$16 sps:$4 sm:$0xff]  }
  0x27   : > { %v3333_v50 = vsub.s32 %v471_v43, %v3325_v44  ;;  %v2890_v54 = vld [vmem:[%s3283_s28 + $0x160] ss:$16 sps:$4 sm:$0xff]   ;;  %v2892_v57 = vld [vmem:[%s3283_s28 + $0x184] ss:$16 sps:$4 sm:$0xff]   ;;  %v2897_v62 = vld [vmem:[%s3283_s28 + $0x188] ss:$16 sps:$4 sm:$0xff]   ;;  %v468_v10 = vcombine.high %v242_v53, %v242_v53 }
  0x28   : > { %1652 = vmatpush1.bf16.msra.mxu0 %v2848_v19  ;;  %1816 = vmatpush1.bf16.msra.mxu1 %v2849_v20  ;;  %v2896_v60 = vld [vmem:[%s3283_s28 + $0x180] ss:$16 sps:$4 sm:$0xff]   ;;  %v2898_v63 = vld [vmem:[%s3283_s28 + $0x1a4] ss:$16 sps:$4 sm:$0xff]   ;;  %v2900_v0 = vld [vmem:[%s3283_s28 + $0x1ac] ss:$16 sps:$4 sm:$0xff]  }
  0x29   : > { %1653 = vmatprep.subr.bf16.mxu0 %v2850_v21  ;;  %1817 = vmatprep.subr.bf16.mxu1 %v2852_v22  ;;  %v475_v55 = vrot.slane %v242_v53, %v3333_v50  ;;  %v2902_v1 = vld [vmem:[%s3283_s28 + $0x1a0] ss:$16 sps:$4 sm:$0xff]   ;;  %v2903_v2 = vld [vmem:[%s3283_s28 + $0x1a8] ss:$16 sps:$4 sm:$0xff]   ;;  %v2904_v3 = vld [vmem:[%s3283_s28 + $0x1c4] ss:$16 sps:$4 sm:$0xff]   ;;  %v482_v14 = vrot.slane %v468_v10, %v3333_v50 }
  0x2a   : > { %v2906_v4 = vld [vmem:[%s3283_s28 + $0x1cc] ss:$16 sps:$4 sm:$0xff]   ;;  %v2908_v5 = vld [vmem:[%s3283_s28 + $0x1c0] ss:$16 sps:$4 sm:$0xff]   ;;  %v2909_v6 = vld [vmem:[%s3283_s28 + $0x1c8] ss:$16 sps:$4 sm:$0xff]  }
  0x2b   : > { %v483_v59 = vcombine.high %v475_v55, %v475_v55  ;;  %v2910_v7 = vld [vmem:[%s3283_s28 + $0x1e4] ss:$16 sps:$4 sm:$0xff]   ;;  %v2912_v8 = vld [vmem:[%s3283_s28 + $0x1ec] ss:$16 sps:$4 sm:$0xff]   ;;  %v2914_v9 = vld [vmem:[%s3283_s28 + $0x1e0] ss:$16 sps:$4 sm:$0xff]   ;;  %v3367_v16 = vrot.slane %v475_v55, %v3333_v50  ;;  %v484_v17 = vcombine.high %v482_v14, %v482_v14  ;;  %v3376_v22 = vrot.slane %v482_v14, %v3333_v50 }
  0x2c   : > { %1654 = vmatpush1.bf16.msra.mxu0 %v2854_v23  ;;  %1818 = vmatpush1.bf16.msra.mxu1 %v2855_v24  ;;  %v2915_v11 = vld [vmem:[%s3283_s28 + $0x1e8] ss:$16 sps:$4 sm:$0xff]   ;;  %v2918_v12 = vld [vmem:[%s3283_s28 + $0x204] ss:$16 sps:$4 sm:$0xff]   ;;  %v2921_v13 = vld [vmem:[%s3283_s28 + $0x20c] ss:$16 sps:$4 sm:$0xff]  }
  0x2d   : > { %1655 = vmatprep.subr.bf16.mxu0 %v2856_v25  ;;  %1819 = vmatprep.subr.bf16.mxu1 %v2858_v26  ;;  %v505_v61 = vrot.slane %v483_v59, %v3333_v50  ;;  %v2916_v15 = vld [vmem:[%s3283_s28 + $0x200] ss:$16 sps:$4 sm:$0xff]   ;;  %v2919_v18 = vld [vmem:[%s3283_s28 + $0x208] ss:$16 sps:$4 sm:$0xff]   ;;  %v2924_v19 = vld [vmem:[%s3283_s28 + $0x224] ss:$16 sps:$4 sm:$0xff]   ;;  %v3373_v21 = vrot.slane %v484_v17, %v3333_v50 }
  0x2e   : > { %v2927_v20 = vld [vmem:[%s3283_s28 + $0x22c] ss:$16 sps:$4 sm:$0xff]   ;;  %v2922_v24 = vld [vmem:[%s3283_s28 + $0x220] ss:$16 sps:$4 sm:$0xff]   ;;  %v2925_v25 = vld [vmem:[%s3283_s28 + $0x228] ss:$16 sps:$4 sm:$0xff]  }
  0x2f   : > { %1675 = vmatprep.mubr.bf16.mxu0 %v505_v61  ;;  %1839 = vmatprep.mubr.bf16.mxu1 %v505_v61  ;;  %v515_v23 = vcombine.high %v505_v61, %v505_v61  ;;  %v2930_v26 = vld [vmem:[%s3283_s28 + $0x244] ss:$16 sps:$4 sm:$0xff]   ;;  %v2943_v37 = vld [vmem:[%s3283_s28 + $0x288] ss:$16 sps:$4 sm:$0xff]   ;;  %v2951_v39 = vld [vmem:[%s3283_s28 + $0x2ac] ss:$16 sps:$4 sm:$0xff]  }
  0x30   : > { %1656 = vmatpush1.bf16.msra.mxu0 %v2860_v27  ;;  %1820 = vmatpush1.bf16.msra.mxu1 %v2861_v28  ;;  %v2933_v27 = vld [vmem:[%s3283_s28 + $0x24c] ss:$16 sps:$4 sm:$0xff]   ;;  %v2928_v28 = vld [vmem:[%s3283_s28 + $0x240] ss:$16 sps:$4 sm:$0xff]   ;;  %v2948_v38 = vld [vmem:[%s3283_s28 + $0x2a4] ss:$16 sps:$4 sm:$0xff]  }
  0x31   : > { %1657 = vmatprep.subr.bf16.mxu0 %v2862_v29  ;;  %1821 = vmatprep.subr.bf16.mxu1 %v2864_v30  ;;  %v2931_v29 = vld [vmem:[%s3283_s28 + $0x248] ss:$16 sps:$4 sm:$0xff]   ;;  %v2936_v30 = vld [vmem:[%s3283_s28 + $0x264] ss:$16 sps:$4 sm:$0xff]   ;;  %v2957_v43 = vld [vmem:[%s3283_s28 + $0x2cc] ss:$16 sps:$4 sm:$0xff]  }
  0x32   : > { %v2961_v50 = vld [vmem:[%s3283_s28 + $0x2e8] ss:$16 sps:$4 sm:$0xff]   ;;  %v2964_v53 = vld [vmem:[%s3283_s28 + $0x300] ss:$16 sps:$4 sm:$0xff]   ;;  %v2972_v55 = vld [vmem:[%s3283_s28 + $0x324] ss:$16 sps:$4 sm:$0xff]  }
  0x33   : > { %v2978_v59 = vld [vmem:[%s3283_s28 + $0x344] ss:$16 sps:$4 sm:$0xff]   ;;  %v2976_v61 = vld [vmem:[%s3283_s28 + $0x340] ss:$16 sps:$4 sm:$0xff]   ;;  %v2997_v10 = vld [vmem:[%s3283_s28 + $0x3a8] ss:$16 sps:$4 sm:$0xff]  }
  0x34   : > { %1658 = vmatpush1.bf16.msra.mxu0 %v2866_v31  ;;  %1822 = vmatpush1.bf16.msra.mxu1 %v2867_v32  ;;  %v2939_v31 = vld [vmem:[%s3283_s28 + $0x26c] ss:$16 sps:$4 sm:$0xff]   ;;  %v2934_v32 = vld [vmem:[%s3283_s28 + $0x260] ss:$16 sps:$4 sm:$0xff]   ;;  %v3003_v14 = vld [vmem:[%s3283_s28 + $0x3c8] ss:$16 sps:$4 sm:$0xff]  }
  0x35   : > { %1659 = vmatprep.subr.bf16.mxu0 %v2868_v33  ;;  %1823 = vmatprep.subr.bf16.mxu1 %v2870_v34  ;;  %v2937_v33 = vld [vmem:[%s3283_s28 + $0x268] ss:$16 sps:$4 sm:$0xff]   ;;  %v2942_v34 = vld [vmem:[%s3283_s28 + $0x284] ss:$16 sps:$4 sm:$0xff]   ;;  %v3011_v17 = vld [vmem:[%s3283_s28 + $0x3ec] ss:$16 sps:$4 sm:$0xff]  }
  0x36   : > { %vm2406_vm0 = vcmask (!%p2694_p6), 74752  }
  0x38   : > { %1660 = vmatpush1.bf16.msra.mxu0 %v2872_v35  ;;  %1824 = vmatpush1.bf16.msra.mxu1 %v2873_v36  ;;  %v2945_v35 = vld [vmem:[%s3283_s28 + $0x28c] ss:$16 sps:$4 sm:$0xff]   ;;  %v2940_v36 = vld [vmem:[%s3283_s28 + $0x280] ss:$16 sps:$4 sm:$0xff]  }
  0x39   : > { %1661 = vmatprep.subr.bf16.mxu0 %v2874_v40  ;;  %1825 = vmatprep.subr.bf16.mxu1 %v2876_v41  ;;  %v2946_v40 = vld [vmem:[%s3283_s28 + $0x2a0] ss:$16 sps:$4 sm:$0xff]   ;;  %v2949_v41 = vld [vmem:[%s3283_s28 + $0x2a8] ss:$16 sps:$4 sm:$0xff]  }
  0x3c   : > { %1662 = vmatpush1.bf16.msra.mxu0 %v2878_v42  ;;  %1826 = vmatpush1.bf16.msra.mxu1 %v2879_v45  ;;  %v2954_v42 = vld [vmem:[%s3283_s28 + $0x2c4] ss:$16 sps:$4 sm:$0xff]   ;;  %v2952_v45 = vld [vmem:[%s3283_s28 + $0x2c0] ss:$16 sps:$4 sm:$0xff]  }
  0x3d   : > { %1663 = vmatprep.subr.bf16.mxu0 %v2880_v46  ;;  %1827 = vmatprep.subr.bf16.mxu1 %v2882_v47  ;;  %v2955_v46 = vld [vmem:[%s3283_s28 + $0x2c8] ss:$16 sps:$4 sm:$0xff]   ;;  %v2960_v47 = vld [vmem:[%s3283_s28 + $0x2e4] ss:$16 sps:$4 sm:$0xff]  }
  0x40   : > { %1664 = vmatpush1.bf16.msra.mxu0 %v2884_v48  ;;  %1828 = vmatpush1.bf16.msra.mxu1 %v2885_v49  ;;  %v2963_v48 = vld [vmem:[%s3283_s28 + $0x2ec] ss:$16 sps:$4 sm:$0xff]   ;;  %v2958_v49 = vld [vmem:[%s3283_s28 + $0x2e0] ss:$16 sps:$4 sm:$0xff]  }
  0x41   : > { %1665 = vmatprep.subr.bf16.mxu0 %v2886_v51  ;;  %1829 = vmatprep.subr.bf16.mxu1 %v2888_v52  ;;  %v2966_v51 = vld [vmem:[%s3283_s28 + $0x304] ss:$16 sps:$4 sm:$0xff]   ;;  %v2969_v52 = vld [vmem:[%s3283_s28 + $0x30c] ss:$16 sps:$4 sm:$0xff]  }
  0x44   : > { %1666 = vmatpush1.bf16.msra.mxu0 %v2890_v54  ;;  %1830 = vmatpush1.bf16.msra.mxu1 %v2891_v56  ;;  %v2967_v54 = vld [vmem:[%s3283_s28 + $0x308] ss:$16 sps:$4 sm:$0xff]   ;;  %v2975_v56 = vld [vmem:[%s3283_s28 + $0x32c] ss:$16 sps:$4 sm:$0xff]  }
  0x45   : > { %1667 = vmatprep.subr.bf16.mxu0 %v2892_v57  ;;  %1831 = vmatprep.subr.bf16.mxu1 %v2894_v58  ;;  %v2970_v57 = vld [vmem:[%s3283_s28 + $0x320] ss:$16 sps:$4 sm:$0xff]   ;;  %v2973_v58 = vld [vmem:[%s3283_s28 + $0x328] ss:$16 sps:$4 sm:$0xff]  }
  0x48   : > { %1668 = vmatpush1.bf16.msra.mxu0 %v2896_v60  ;;  %1832 = vmatpush1.bf16.msra.mxu1 %v2897_v62  ;;  %v2981_v60 = vld [vmem:[%s3283_s28 + $0x34c] ss:$16 sps:$4 sm:$0xff]   ;;  %v2979_v62 = vld [vmem:[%s3283_s28 + $0x348] ss:$16 sps:$4 sm:$0xff]  }
  0x49   : > { %1669 = vmatprep.subr.bf16.mxu0 %v2898_v63  ;;  %1833 = vmatprep.subr.bf16.mxu1 %v2900_v0  ;;  %v2984_v63 = vld [vmem:[%s3283_s28 + $0x364] ss:$16 sps:$4 sm:$0xff]   ;;  %v2987_v0 = vld [vmem:[%s3283_s28 + $0x36c] ss:$16 sps:$4 sm:$0xff]  }
  0x4c   : > { %1670 = vmatpush1.bf16.msra.mxu0 %v2902_v1  ;;  %1834 = vmatpush1.bf16.msra.mxu1 %v2903_v2  ;;  %v2982_v1 = vld [vmem:[%s3283_s28 + $0x360] ss:$16 sps:$4 sm:$0xff]   ;;  %v2985_v2 = vld [vmem:[%s3283_s28 + $0x368] ss:$16 sps:$4 sm:$0xff]  }
  0x4d   : > { %1671 = vmatprep.subr.bf16.mxu0 %v2904_v3  ;;  %1835 = vmatprep.subr.bf16.mxu1 %v2906_v4  ;;  %v2990_v3 = vld [vmem:[%s3283_s28 + $0x384] ss:$16 sps:$4 sm:$0xff]   ;;  %v2993_v4 = vld [vmem:[%s3283_s28 + $0x38c] ss:$16 sps:$4 sm:$0xff]  }
  0x50   : > { %1672 = vmatpush1.bf16.msra.mxu0 %v2908_v5  ;;  %1836 = vmatpush1.bf16.msra.mxu1 %v2909_v6  ;;  %v2988_v5 = vld [vmem:[%s3283_s28 + $0x380] ss:$16 sps:$4 sm:$0xff]   ;;  %v2991_v6 = vld [vmem:[%s3283_s28 + $0x388] ss:$16 sps:$4 sm:$0xff]  }
  0x51   : > { %1673 = vmatprep.subr.bf16.mxu0 %v2910_v7  ;;  %1837 = vmatprep.subr.bf16.mxu1 %v2912_v8  ;;  %v2996_v7 = vld [vmem:[%s3283_s28 + $0x3a4] ss:$16 sps:$4 sm:$0xff]   ;;  %v2999_v8 = vld [vmem:[%s3283_s28 + $0x3ac] ss:$16 sps:$4 sm:$0xff]  }
  0x54   : > { %1674 = vmatpush1.bf16.msra.mxu0 %v2914_v9  ;;  %1838 = vmatpush1.bf16.msra.mxu1 %v2915_v11  ;;  %v2994_v9 = vld [vmem:[%s3283_s28 + $0x3a0] ss:$16 sps:$4 sm:$0xff]   ;;  %v3002_v11 = vld [vmem:[%s3283_s28 + $0x3c4] ss:$16 sps:$4 sm:$0xff]  }
  0x55   : > { %1684 = vmatprep.subr.bf16.mxu0 %v2918_v12  ;;  %1848 = vmatprep.subr.bf16.mxu1 %v2921_v13  ;;  %v3005_v12 = vld [vmem:[%s3283_s28 + $0x3cc] ss:$16 sps:$4 sm:$0xff]   ;;  %v3000_v13 = vld [vmem:[%s3283_s28 + $0x3c0] ss:$16 sps:$4 sm:$0xff]  }
  0x57   : > { %1676 = vmatmul.mubr.bf16.vlgmr.msra.gmra.mrb[0].mxu0 %v3367_v16  ;;  %1840 = vmatmul.mubr.bf16.vlgmr.msra.gmra.mrb[0].mxu1 %v3367_v16 }
  0x58   : > { %1685 = vmatpush1.bf16.msra.mxu0 %v2916_v15  ;;  %1849 = vmatpush1.bf16.msra.mxu1 %v2919_v18  ;;  %v3008_v15 = vld [vmem:[%s3283_s28 + $0x3e4] ss:$16 sps:$4 sm:$0xff]   ;;  %v3006_v18 = vld [vmem:[%s3283_s28 + $0x3e0] ss:$16 sps:$4 sm:$0xff]  }
  0x59   : > { %1686 = vmatprep.subr.bf16.mxu0 %v2924_v19  ;;  %1850 = vmatprep.subr.bf16.mxu1 %v2927_v20  ;;  %v3009_v19 = vld [vmem:[%s3283_s28 + $0x3e8] ss:$16 sps:$4 sm:$0xff]   ;;  %v3014_v20 = vld [vmem:[%s3283_s28 + $0x404] ss:$16 sps:$4 sm:$0xff]  }
  0x5a   : > { %1716 = vmatprep.mubr.bf16.mxu0 %v515_v23  ;;  %1880 = vmatprep.mubr.bf16.mxu1 %v515_v23  ;;  %v3017_v23 = vld [vmem:[%s3283_s28 + $0x40c] ss:$16 sps:$4 sm:$0xff]  }
  0x5c   : > { %1687 = vmatpush1.bf16.msra.mxu0 %v2922_v24  ;;  %1851 = vmatpush1.bf16.msra.mxu1 %v2925_v25  ;;  %v3012_v24 = vld [vmem:[%s3283_s28 + $0x400] ss:$16 sps:$4 sm:$0xff]   ;;  %v513_v25 = vcombine.high %v3367_v16, %v3367_v16  ;;  %v3021_v16 = vld [vmem:[%s3283_s28 + $0x428] ss:$16 sps:$4 sm:$0xff]  }
  0x5d   : > { %1688 = vmatprep.subr.bf16.mxu0 %v2930_v26  ;;  %1852 = vmatprep.subr.bf16.mxu1 %v2933_v27  ;;  %v3015_v26 = vld [vmem:[%s3283_s28 + $0x408] ss:$16 sps:$4 sm:$0xff]   ;;  %v3020_v27 = vld [vmem:[%s3283_s28 + $0x424] ss:$16 sps:$4 sm:$0xff]  }
  0x60   : > { %1689 = vmatpush1.bf16.msra.mxu0 %v2928_v28  ;;  %1853 = vmatpush1.bf16.msra.mxu1 %v2931_v29  ;;  %v3023_v28 = vld [vmem:[%s3283_s28 + $0x42c] ss:$16 sps:$4 sm:$0xff]   ;;  %v3018_v29 = vld [vmem:[%s3283_s28 + $0x420] ss:$16 sps:$4 sm:$0xff]  }
  0x61   : > { %1690 = vmatprep.subr.bf16.mxu0 %v2936_v30  ;;  %1854 = vmatprep.subr.bf16.mxu1 %v2939_v31  ;;  %v3026_v30 = vld [vmem:[%s3283_s28 + $0x444] ss:$16 sps:$4 sm:$0xff]   ;;  %v3029_v31 = vld [vmem:[%s3283_s28 + $0x44c] ss:$16 sps:$4 sm:$0xff]  }
  0x64   : > { %1691 = vmatpush1.bf16.msra.mxu0 %v2934_v32  ;;  %1855 = vmatpush1.bf16.msra.mxu1 %v2937_v33  ;;  %v3024_v32 = vld [vmem:[%s3283_s28 + $0x440] ss:$16 sps:$4 sm:$0xff]   ;;  %v3027_v33 = vld [vmem:[%s3283_s28 + $0x448] ss:$16 sps:$4 sm:$0xff]  }
  0x65   : > { %1692 = vmatprep.subr.bf16.mxu0 %v2942_v34  ;;  %1856 = vmatprep.subr.bf16.mxu1 %v2945_v35  ;;  %v3032_v34 = vld [vmem:[%s3283_s28 + $0x464] ss:$16 sps:$4 sm:$0xff]   ;;  %v3035_v35 = vld [vmem:[%s3283_s28 + $0x46c] ss:$16 sps:$4 sm:$0xff]  }
  0x68   : > { %1693 = vmatpush1.bf16.msra.mxu0 %v2940_v36  ;;  %1857 = vmatpush1.bf16.msra.mxu1 %v2943_v37  ;;  %v3030_v36 = vld [vmem:[%s3283_s28 + $0x460] ss:$16 sps:$4 sm:$0xff]   ;;  %v3033_v37 = vld [vmem:[%s3283_s28 + $0x468] ss:$16 sps:$4 sm:$0xff]  }
  0x69   : > { %1694 = vmatprep.subr.bf16.mxu0 %v2948_v38  ;;  %1858 = vmatprep.subr.bf16.mxu1 %v2951_v39  ;;  %v3041_v38 = vld [vmem:[%s3283_s28 + $0x48c] ss:$16 sps:$4 sm:$0xff]   ;;  %v3036_v39 = vld [vmem:[%s3283_s28 + $0x480] ss:$16 sps:$4 sm:$0xff]  }
  0x6c   : > { %1695 = vmatpush1.bf16.msra.mxu0 %v2946_v40  ;;  %1859 = vmatpush1.bf16.msra.mxu1 %v2949_v41  ;;  %v3039_v40 = vld [vmem:[%s3283_s28 + $0x488] ss:$16 sps:$4 sm:$0xff]   ;;  %v3044_v41 = vld [vmem:[%s3283_s28 + $0x4a4] ss:$16 sps:$4 sm:$0xff]  }
  0x6d   : > { %1696 = vmatprep.subr.bf16.mxu0 %v2954_v42  ;;  %1860 = vmatprep.subr.bf16.mxu1 %v2957_v43  ;;  %v3047_v42 = vld [vmem:[%s3283_s28 + $0x4ac] ss:$16 sps:$4 sm:$0xff]   ;;  %v3042_v43 = vld [vmem:[%s3283_s28 + $0x4a0] ss:$16 sps:$4 sm:$0xff]  }
  0x70   : > { %1697 = vmatpush1.bf16.msra.mxu0 %v2952_v45  ;;  %1861 = vmatpush1.bf16.msra.mxu1 %v2955_v46  ;;  %v3045_v45 = vld [vmem:[%s3283_s28 + $0x4a8] ss:$16 sps:$4 sm:$0xff]   ;;  %v3050_v46 = vld [vmem:[%s3283_s28 + $0x4c4] ss:$16 sps:$4 sm:$0xff]  }
  0x71   : > { %1698 = vmatprep.subr.bf16.mxu0 %v2960_v47  ;;  %1862 = vmatprep.subr.bf16.mxu1 %v2963_v48  ;;  %v3053_v47 = vld [vmem:[%s3283_s28 + $0x4cc] ss:$16 sps:$4 sm:$0xff]   ;;  %v3048_v48 = vld [vmem:[%s3283_s28 + $0x4c0] ss:$16 sps:$4 sm:$0xff]  }
  0x74   : > { %1699 = vmatpush1.bf16.msra.mxu0 %v2958_v49  ;;  %1863 = vmatpush1.bf16.msra.mxu1 %v2961_v50  ;;  %v3051_v49 = vld [vmem:[%s3283_s28 + $0x4c8] ss:$16 sps:$4 sm:$0xff]   ;;  %v3056_v50 = vld [vmem:[%s3283_s28 + $0x4e4] ss:$16 sps:$4 sm:$0xff]  }
  0x75   : > { %1700 = vmatprep.subr.bf16.mxu0 %v2966_v51  ;;  %1864 = vmatprep.subr.bf16.mxu1 %v2969_v52  ;;  %v3059_v51 = vld [vmem:[%s3283_s28 + $0x4ec] ss:$16 sps:$4 sm:$0xff]   ;;  %v3054_v52 = vld [vmem:[%s3283_s28 + $0x4e0] ss:$16 sps:$4 sm:$0xff]  }
  0x78   : > { %1701 = vmatpush1.bf16.msra.mxu0 %v2964_v53  ;;  %1865 = vmatpush1.bf16.msra.mxu1 %v2967_v54  ;;  %v3057_v53 = vld [vmem:[%s3283_s28 + $0x4e8] ss:$16 sps:$4 sm:$0xff]   ;;  %v3062_v54 = vld [vmem:[%s3283_s28 + $0x504] ss:$16 sps:$4 sm:$0xff]  }
  0x79   : > { %1702 = vmatprep.subr.bf16.mxu0 %v2972_v55  ;;  %1866 = vmatprep.subr.bf16.mxu1 %v2975_v56  ;;  %v3065_v55 = vld [vmem:[%s3283_s28 + $0x50c] ss:$16 sps:$4 sm:$0xff]   ;;  %v3060_v56 = vld [vmem:[%s3283_s28 + $0x500] ss:$16 sps:$4 sm:$0xff]  }
  0x7c   : > { %1703 = vmatpush1.bf16.msra.mxu0 %v2970_v57  ;;  %1867 = vmatpush1.bf16.msra.mxu1 %v2973_v58  ;;  %v3063_v57 = vld [vmem:[%s3283_s28 + $0x508] ss:$16 sps:$4 sm:$0xff]   ;;  %v3068_v58 = vld [vmem:[%s3283_s28 + $0x524] ss:$16 sps:$4 sm:$0xff]  }
  0x7d   : > { %1704 = vmatprep.subr.bf16.mxu0 %v2978_v59  ;;  %1868 = vmatprep.subr.bf16.mxu1 %v2981_v60  ;;  %v3071_v59 = vld [vmem:[%s3283_s28 + $0x52c] ss:$16 sps:$4 sm:$0xff]   ;;  %v3066_v60 = vld [vmem:[%s3283_s28 + $0x520] ss:$16 sps:$4 sm:$0xff]  }
  0x80   : > { %1705 = vmatpush1.bf16.msra.mxu0 %v2976_v61  ;;  %1869 = vmatpush1.bf16.msra.mxu1 %v2979_v62  ;;  %v3069_v61 = vld [vmem:[%s3283_s28 + $0x528] ss:$16 sps:$4 sm:$0xff]   ;;  %v3074_v62 = vld [vmem:[%s3283_s28 + $0x544] ss:$16 sps:$4 sm:$0xff]  }
  0x81   : > { %1706 = vmatprep.subr.bf16.mxu0 %v2984_v63  ;;  %1870 = vmatprep.subr.bf16.mxu1 %v2987_v0  ;;  %v3077_v63 = vld [vmem:[%s3283_s28 + $0x54c] ss:$16 sps:$4 sm:$0xff]   ;;  %v3072_v0 = vld [vmem:[%s3283_s28 + $0x540] ss:$16 sps:$4 sm:$0xff]  }
  0x84   : > { %1707 = vmatpush1.bf16.msra.mxu0 %v2982_v1  ;;  %1871 = vmatpush1.bf16.msra.mxu1 %v2985_v2  ;;  %v3075_v1 = vld [vmem:[%s3283_s28 + $0x548] ss:$16 sps:$4 sm:$0xff]   ;;  %v3080_v2 = vld [vmem:[%s3283_s28 + $0x564] ss:$16 sps:$4 sm:$0xff]  }
  0x85   : > { %1708 = vmatprep.subr.bf16.mxu0 %v2990_v3  ;;  %1872 = vmatprep.subr.bf16.mxu1 %v2993_v4  ;;  %v3083_v3 = vld [vmem:[%s3283_s28 + $0x56c] ss:$16 sps:$4 sm:$0xff]   ;;  %v3078_v4 = vld [vmem:[%s3283_s28 + $0x560] ss:$16 sps:$4 sm:$0xff]  }
  0x88   : > { %1709 = vmatpush1.bf16.msra.mxu0 %v2988_v5  ;;  %1873 = vmatpush1.bf16.msra.mxu1 %v2991_v6  ;;  %v3081_v5 = vld [vmem:[%s3283_s28 + $0x568] ss:$16 sps:$4 sm:$0xff]   ;;  %v3086_v6 = vld [vmem:[%s3283_s28 + $0x584] ss:$16 sps:$4 sm:$0xff]  }
  0x89   : > { %1710 = vmatprep.subr.bf16.mxu0 %v2996_v7  ;;  %1874 = vmatprep.subr.bf16.mxu1 %v2999_v8  ;;  %v3089_v7 = vld [vmem:[%s3283_s28 + $0x58c] ss:$16 sps:$4 sm:$0xff]   ;;  %v3084_v8 = vld [vmem:[%s3283_s28 + $0x580] ss:$16 sps:$4 sm:$0xff]  }
  0x8c   : > { %1711 = vmatpush1.bf16.msra.mxu0 %v2994_v9  ;;  %1875 = vmatpush1.bf16.msra.mxu1 %v2997_v10  ;;  %v3087_v9 = vld [vmem:[%s3283_s28 + $0x588] ss:$16 sps:$4 sm:$0xff]   ;;  %v3092_v10 = vld [vmem:[%s3283_s28 + $0x5a4] ss:$16 sps:$4 sm:$0xff]  }
  0x8d   : > { %1712 = vmatprep.subr.bf16.mxu0 %v3002_v11  ;;  %1876 = vmatprep.subr.bf16.mxu1 %v3005_v12  ;;  %v3095_v11 = vld [vmem:[%s3283_s28 + $0x5ac] ss:$16 sps:$4 sm:$0xff]   ;;  %v3090_v12 = vld [vmem:[%s3283_s28 + $0x5a0] ss:$16 sps:$4 sm:$0xff]  }
  0x90   : > { %1713 = vmatpush1.bf16.msra.mxu0 %v3000_v13  ;;  %1877 = vmatpush1.bf16.msra.mxu1 %v3003_v14  ;;  %v3093_v13 = vld [vmem:[%s3283_s28 + $0x5a8] ss:$16 sps:$4 sm:$0xff]   ;;  %v3098_v14 = vld [vmem:[%s3283_s28 + $0x5c4] ss:$16 sps:$4 sm:$0xff]  }
  0x91   : > { %1714 = vmatprep.subr.bf16.mxu0 %v3008_v15  ;;  %1878 = vmatprep.subr.bf16.mxu1 %v3011_v17  ;;  %v3101_v15 = vld [vmem:[%s3283_s28 + $0x5cc] ss:$16 sps:$4 sm:$0xff]   ;;  %v3096_v17 = vld [vmem:[%s3283_s28 + $0x5c0] ss:$16 sps:$4 sm:$0xff]  }
  0x94   : > { %1715 = vmatpush1.bf16.msra.mxu0 %v3006_v18  ;;  %1879 = vmatpush1.bf16.msra.mxu1 %v3009_v19  ;;  %v3099_v18 = vld [vmem:[%s3283_s28 + $0x5c8] ss:$16 sps:$4 sm:$0xff]   ;;  %v3104_v19 = vld [vmem:[%s3283_s28 + $0x5e4] ss:$16 sps:$4 sm:$0xff]  }
  0x95   : > { %1725 = vmatprep.subr.bf16.mxu0 %v3014_v20  ;;  %1889 = vmatprep.subr.bf16.mxu1 %v3017_v23  ;;  %v3107_v20 = vld [vmem:[%s3283_s28 + $0x5ec] ss:$16 sps:$4 sm:$0xff]   ;;  %v3102_v23 = vld [vmem:[%s3283_s28 + $0x5e0] ss:$16 sps:$4 sm:$0xff]  }
  0x97   : > { %1717 = vmatmul.mubr.bf16.vlgmr.msra.gmra.mrb[0].mxu0 %v513_v25  ;;  %1881 = vmatmul.mubr.bf16.vlgmr.msra.gmra.mrb[0].mxu1 %v513_v25  ;;  %v3111_v25 = vld [vmem:[%s3283_s28 + $0x604] ss:$16 sps:$4 sm:$0xff]  }
  0x98   : > { %1726 = vmatpush1.bf16.msra.mxu0 %v3012_v24  ;;  %1890 = vmatpush1.bf16.msra.mxu1 %v3015_v26  ;;  %v3105_v24 = vld [vmem:[%s3283_s28 + $0x5e8] ss:$16 sps:$4 sm:$0xff]   ;;  %v3114_v26 = vld [vmem:[%s3283_s28 + $0x60c] ss:$16 sps:$4 sm:$0xff]  }
  0x99   : > { %1727 = vmatprep.subr.bf16.mxu0 %v3020_v27  ;;  %1891 = vmatprep.subr.bf16.mxu1 %v3023_v28  ;;  %v3109_v27 = vld [vmem:[%s3283_s28 + $0x600] ss:$16 sps:$4 sm:$0xff]   ;;  %v3112_v28 = vld [vmem:[%s3283_s28 + $0x608] ss:$16 sps:$4 sm:$0xff]  }
  0x9a   : > { %1757 = vmatprep.mubr.bf16.mxu0 %v3373_v21  ;;  %1921 = vmatprep.mubr.bf16.mxu1 %v3373_v21  ;;  %v3038_v21 = vld [vmem:[%s3283_s28 + $0x484] ss:$16 sps:$4 sm:$0xff]  }
  0x9c   : > { %1728 = vmatpush1.bf16.msra.mxu0 %v3018_v29  ;;  %1892 = vmatpush1.bf16.msra.mxu1 %v3021_v16  ;;  %v3117_v29 = vld [vmem:[%s3283_s28 + $0x624] ss:$16 sps:$4 sm:$0xff]   ;;  %v3120_v16 = vld [vmem:[%s3283_s28 + $0x62c] ss:$16 sps:$4 sm:$0xff]  }
  0x9d   : > { %1729 = vmatprep.subr.bf16.mxu0 %v3026_v30  ;;  %1893 = vmatprep.subr.bf16.mxu1 %v3029_v31  ;;  %v3115_v30 = vld [vmem:[%s3283_s28 + $0x620] ss:$16 sps:$4 sm:$0xff]   ;;  %v3118_v31 = vld [vmem:[%s3283_s28 + $0x628] ss:$16 sps:$4 sm:$0xff]  }
  0xa0   : > { %1730 = vmatpush1.bf16.msra.mxu0 %v3024_v32  ;;  %1894 = vmatpush1.bf16.msra.mxu1 %v3027_v33  ;;  %v3123_v32 = vld [vmem:[%s3283_s28 + $0x644] ss:$16 sps:$4 sm:$0xff]   ;;  %v3126_v33 = vld [vmem:[%s3283_s28 + $0x64c] ss:$16 sps:$4 sm:$0xff]  }
  0xa1   : > { %1731 = vmatprep.subr.bf16.mxu0 %v3032_v34  ;;  %1895 = vmatprep.subr.bf16.mxu1 %v3035_v35  ;;  %v3229_v34 = vmov 0   ;;  %v3121_v35 = vld [vmem:[%s3283_s28 + $0x640] ss:$16 sps:$4 sm:$0xff]  }
  0xa4   : > { %1732 = vmatpush1.bf16.msra.mxu0 %v3030_v36  ;;  %1896 = vmatpush1.bf16.msra.mxu1 %v3033_v37  ;;  %v3124_v36 = vld [vmem:[%s3283_s28 + $0x648] ss:$16 sps:$4 sm:$0xff]   ;;  %v3129_v37 = vld [vmem:[%s3283_s28 + $0x664] ss:$16 sps:$4 sm:$0xff]  }
  0xa5   : > { %1733 = vmatprep.subr.bf16.mxu0 %v3038_v21  ;;  %1897 = vmatprep.subr.bf16.mxu1 %v3041_v38  ;;  %v3132_v21 = vld [vmem:[%s3283_s28 + $0x66c] ss:$16 sps:$4 sm:$0xff]   ;;  %v3127_v38 = vld [vmem:[%s3283_s28 + $0x660] ss:$16 sps:$4 sm:$0xff]  }
  0xa8   : > { %1734 = vmatpush1.bf16.msra.mxu0 %v3036_v39  ;;  %1898 = vmatpush1.bf16.msra.mxu1 %v3039_v40  ;;  %v3130_v39 = vld [vmem:[%s3283_s28 + $0x668] ss:$16 sps:$4 sm:$0xff]   ;;  %v3135_v40 = vld [vmem:[%s3283_s28 + $0x684] ss:$16 sps:$4 sm:$0xff]  }
  0xa9   : > { %1735 = vmatprep.subr.bf16.mxu0 %v3044_v41  ;;  %1899 = vmatprep.subr.bf16.mxu1 %v3047_v42  ;;  %v3138_v41 = vld [vmem:[%s3283_s28 + $0x68c] ss:$16 sps:$4 sm:$0xff]   ;;  %v3133_v42 = vld [vmem:[%s3283_s28 + $0x680] ss:$16 sps:$4 sm:$0xff]  }
  0xac   : > { %1736 = vmatpush1.bf16.msra.mxu0 %v3042_v43  ;;  %1900 = vmatpush1.bf16.msra.mxu1 %v3045_v45  ;;  %v3136_v43 = vld [vmem:[%s3283_s28 + $0x688] ss:$16 sps:$4 sm:$0xff]   ;;  %v3141_v45 = vld [vmem:[%s3283_s28 + $0x6a4] ss:$16 sps:$4 sm:$0xff]  }
  0xad   : > { %1737 = vmatprep.subr.bf16.mxu0 %v3050_v46  ;;  %1901 = vmatprep.subr.bf16.mxu1 %v3053_v47  ;;  %v3144_v46 = vld [vmem:[%s3283_s28 + $0x6ac] ss:$16 sps:$4 sm:$0xff]   ;;  %v3139_v47 = vld [vmem:[%s3283_s28 + $0x6a0] ss:$16 sps:$4 sm:$0xff]  }
  0xb0   : > { %1738 = vmatpush1.bf16.msra.mxu0 %v3048_v48  ;;  %1902 = vmatpush1.bf16.msra.mxu1 %v3051_v49  ;;  %v3142_v48 = vld [vmem:[%s3283_s28 + $0x6a8] ss:$16 sps:$4 sm:$0xff]   ;;  %v3147_v49 = vld [vmem:[%s3283_s28 + $0x6c4] ss:$16 sps:$4 sm:$0xff]  }
  0xb1   : > { %1739 = vmatprep.subr.bf16.mxu0 %v3056_v50  ;;  %1903 = vmatprep.subr.bf16.mxu1 %v3059_v51  ;;  %v3150_v50 = vld [vmem:[%s3283_s28 + $0x6cc] ss:$16 sps:$4 sm:$0xff]   ;;  %v3145_v51 = vld [vmem:[%s3283_s28 + $0x6c0] ss:$16 sps:$4 sm:$0xff]  }
  0xb4   : > { %1740 = vmatpush1.bf16.msra.mxu0 %v3054_v52  ;;  %1904 = vmatpush1.bf16.msra.mxu1 %v3057_v53  ;;  %v3148_v52 = vld [vmem:[%s3283_s28 + $0x6c8] ss:$16 sps:$4 sm:$0xff]   ;;  %v3153_v53 = vld [vmem:[%s3283_s28 + $0x6e4] ss:$16 sps:$4 sm:$0xff]  }
  0xb5   : > { %1741 = vmatprep.subr.bf16.mxu0 %v3062_v54  ;;  %1905 = vmatprep.subr.bf16.mxu1 %v3065_v55  ;;  %v3156_v54 = vld [vmem:[%s3283_s28 + $0x6ec] ss:$16 sps:$4 sm:$0xff]   ;;  %v3151_v55 = vld [vmem:[%s3283_s28 + $0x6e0] ss:$16 sps:$4 sm:$0xff]  }
  0xb8   : > { %1742 = vmatpush1.bf16.msra.mxu0 %v3060_v56  ;;  %1906 = vmatpush1.bf16.msra.mxu1 %v3063_v57  ;;  %v3154_v56 = vld [vmem:[%s3283_s28 + $0x6e8] ss:$16 sps:$4 sm:$0xff]   ;;  %v514_v57 = vcombine.high %v3376_v22, %v3376_v22 }
  0xb9   : > { %1743 = vmatprep.subr.bf16.mxu0 %v3068_v58  ;;  %1907 = vmatprep.subr.bf16.mxu1 %v3071_v59  ;;  %v3230_v58 = vmov 1983009808  }
  0xba   : > { %v1978_v59 = vunpack.c.l.s4 %v3230_v58 }
  0xbc   : > { %1744 = vmatpush1.bf16.msra.mxu0 %v3066_v60  ;;  %1908 = vmatpush1.bf16.msra.mxu1 %v3069_v61  ;;  %v1979_v60 = vunpack.c.0.s8 %v1978_v59 }
  0xbd   : > { %1745 = vmatprep.subr.bf16.mxu0 %v3074_v62  ;;  %1909 = vmatprep.subr.bf16.mxu1 %v3077_v63 }
  0xbe   : > { %v3543_v63 = vsub.s32 %v1979_v60, %v3325_v44 }
  0xc0   : > { %1746 = vmatpush1.bf16.msra.mxu0 %v3072_v0  ;;  %1910 = vmatpush1.bf16.msra.mxu1 %v3075_v1 }
  0xc1   : > { %1747 = vmatprep.subr.bf16.mxu0 %v3080_v2  ;;  %1911 = vmatprep.subr.bf16.mxu1 %v3083_v3 }
  0xc4   : > { %1748 = vmatpush1.bf16.msra.mxu0 %v3078_v4  ;;  %1912 = vmatpush1.bf16.msra.mxu1 %v3081_v5 }
  0xc5   : > { %1749 = vmatprep.subr.bf16.mxu0 %v3086_v6  ;;  %1913 = vmatprep.subr.bf16.mxu1 %v3089_v7 }
  0xc8   : > { %1750 = vmatpush1.bf16.msra.mxu0 %v3084_v8  ;;  %1914 = vmatpush1.bf16.msra.mxu1 %v3087_v9  ;;  %v241_v9 = vld [vmem:[#allocation2] sm:$0xff] }
  0xc9   : > { %1751 = vmatprep.subr.bf16.mxu0 %v3092_v10  ;;  %1915 = vmatprep.subr.bf16.mxu1 %v3095_v11 }
  0xcc   : > { %1752 = vmatpush1.bf16.msra.mxu0 %v3090_v12  ;;  %1916 = vmatpush1.bf16.msra.mxu1 %v3093_v13  ;;  %v3157_v12 = vld [vmem:[%s3687_s3 + $0x40] sm:$0xff] (!%p2694_p6)  }
  0xcd   : > { %1753 = vmatprep.subr.bf16.mxu0 %v3098_v14  ;;  %1917 = vmatprep.subr.bf16.mxu1 %v3101_v15  ;;  %v3158_v13 = vld [vmem:[%s3687_s3 + $0xc0] sm:$0xff] (!%p2694_p6)  }
  0xce   : > { %v3159_v14 = vld [vmem:[%s3687_s3] sm:$0xff] (!%p2694_p6)  }
  0xcf   : > { %v3160_v15 = vld [vmem:[%s3687_s3 + $0x80] sm:$0xff] (!%p2694_p6)  }
  0xd0   : > { %1754 = vmatpush1.bf16.msra.mxu0 %v3096_v17  ;;  %1918 = vmatpush1.bf16.msra.mxu1 %v3099_v18  ;;  %v3161_v17 = vld [vmem:[%s3687_s3 + $0x48] sm:$0xff] (!%p2694_p6)  }
  0xd1   : > { %1755 = vmatprep.subr.bf16.mxu0 %v3104_v19  ;;  %1919 = vmatprep.subr.bf16.mxu1 %v3107_v20  ;;  %v3162_v18 = vld [vmem:[%s3687_s3 + $0xc8] sm:$0xff] (!%p2694_p6)  }
  0xd2   : > { %v3163_v19 = vld [vmem:[%s3687_s3 + $0x8] sm:$0xff] (!%p2694_p6)  }
  0xd3   : > { %v3164_v20 = vld [vmem:[%s3687_s3 + $0x88] sm:$0xff] (!%p2694_p6)  }
  0xd4   : > { %1756 = vmatpush1.bf16.msra.mxu0 %v3102_v23  ;;  %1920 = vmatpush1.bf16.msra.mxu1 %v3105_v24  ;;  %v3165_v23 = vld [vmem:[%s3687_s3 + $0x50] sm:$0xff] (!%p2694_p6)  }
  0xd5   : > { %1766 = vmatprep.subr.bf16.mxu0 %v3111_v25  ;;  %1930 = vmatprep.subr.bf16.mxu1 %v3114_v26  ;;  %v3166_v24 = vld [vmem:[%s3687_s3 + $0xd0] sm:$0xff] (!%p2694_p6)  }
  0xd6   : > { %v3167_v25 = vld [vmem:[%s3687_s3 + $0x10] sm:$0xff] (!%p2694_p6)  }
  0xd7   : > { %1758 = vmatmul.mubr.bf16.vlgmr.msra.gmra.mrb[0].mxu0 %v3376_v22  ;;  %1922 = vmatmul.mubr.bf16.vlgmr.msra.gmra.mrb[0].mxu1 %v3376_v22  ;;  %v3168_v26 = vld [vmem:[%s3687_s3 + $0x90] sm:$0xff] (!%p2694_p6)  }
  0xd8   : > { %1767 = vmatpush1.bf16.msra.mxu0 %v3109_v27  ;;  %1931 = vmatpush1.bf16.msra.mxu1 %v3112_v28  ;;  %v3169_v27 = vld [vmem:[%s3687_s3 + $0x58] sm:$0xff] (!%p2694_p6)  }
  0xd9   : > { %1768 = vmatprep.subr.bf16.mxu0 %v3117_v29  ;;  %1932 = vmatprep.subr.bf16.mxu1 %v3120_v16  ;;  %v3170_v28 = vld [vmem:[%s3687_s3 + $0xd8] sm:$0xff] (!%p2694_p6)  }
  0xda   : > { %1798 = vmatprep.mubr.bf16.mxu0 %v3229_v34  ;;  %1962 = vmatprep.mubr.bf16.mxu1 %v3229_v34  ;;  %v3171_v29 = vld [vmem:[%s3687_s3 + $0x18] sm:$0xff] (!%p2694_p6)   ;;  %v3177_v34 = vld [vmem:[%s3687_s3 + $0x68] sm:$0xff] (!%p2694_p6)  }
  0xdb   : > { %v3172_v16 = vld [vmem:[%s3687_s3 + $0x98] sm:$0xff] (!%p2694_p6)  }
  0xdc   : > { %1769 = vmatpush1.bf16.msra.mxu0 %v3115_v30  ;;  %1933 = vmatpush1.bf16.msra.mxu1 %v3118_v31  ;;  %v3173_v30 = vld [vmem:[%s3687_s3 + $0x60] sm:$0xff] (!%p2694_p6)  }
  0xdd   : > { %1770 = vmatprep.subr.bf16.mxu0 %v3123_v32  ;;  %1934 = vmatprep.subr.bf16.mxu1 %v3126_v33  ;;  %v3174_v31 = vld [vmem:[%s3687_s3 + $0xe0] sm:$0xff] (!%p2694_p6)  }
  0xde   : > { %v3175_v32 = vld [vmem:[%s3687_s3 + $0x20] sm:$0xff] (!%p2694_p6)  }
  0xdf   : > { %v3176_v33 = vld [vmem:[%s3687_s3 + $0xa0] sm:$0xff] (!%p2694_p6)  }
  0xe0   : > { %1771 = vmatpush1.bf16.msra.mxu0 %v3121_v35  ;;  %1935 = vmatpush1.bf16.msra.mxu1 %v3124_v36  ;;  %v3178_v35 = vld [vmem:[%s3687_s3 + $0xe8] sm:$0xff] (!%p2694_p6)  }
  0xe1   : > { %1772 = vmatprep.subr.bf16.mxu0 %v3129_v37  ;;  %1936 = vmatprep.subr.bf16.mxu1 %v3132_v21  ;;  %v3179_v36 = vld [vmem:[%s3687_s3 + $0x28] sm:$0xff] (!%p2694_p6)   ;;  %v3181_v21 = vld [vmem:[%s3687_s3 + $0x70] sm:$0xff] (!%p2694_p6)  }
  0xe2   : > { %v3180_v37 = vld [vmem:[%s3687_s3 + $0xa8] sm:$0xff] (!%p2694_p6)  }
  0xe4   : > { %1773 = vmatpush1.bf16.msra.mxu0 %v3127_v38  ;;  %1937 = vmatpush1.bf16.msra.mxu1 %v3130_v39  ;;  %v3182_v38 = vld [vmem:[%s3687_s3 + $0xf0] sm:$0xff] (!%p2694_p6)  }
  0xe5   : > { %1774 = vmatprep.subr.bf16.mxu0 %v3135_v40  ;;  %1938 = vmatprep.subr.bf16.mxu1 %v3138_v41  ;;  %v3183_v39 = vld [vmem:[%s3687_s3 + $0x30] sm:$0xff] (!%p2694_p6)   ;;  %v2004_v40 = vsub.s32 (!%p2694_p6), 0, %v3325_v44 }
  0xe6   : > { %v3184_v41 = vld [vmem:[%s3687_s3 + $0xb0] sm:$0xff] (!%p2694_p6)  }
  0xe8   : > { %1775 = vmatpush1.bf16.msra.mxu0 %v3133_v42  ;;  %1939 = vmatpush1.bf16.msra.mxu1 %v3136_v43  ;;  %v2008_v42 = vsub.s32 (!%p2694_p6), 1, %v3325_v44  ;;  %v3185_v43 = vld [vmem:[%s3687_s3 + $0x78] sm:$0xff] (!%p2694_p6)  }
  0xe9   : > { %1776 = vmatprep.subr.bf16.mxu0 %v3141_v45  ;;  %1940 = vmatprep.subr.bf16.mxu1 %v3144_v46  ;;  %v2012_v45 = vsub.s32 (!%p2694_p6), 2, %v3325_v44  ;;  %v3186_v46 = vld [vmem:[%s3687_s3 + $0xf8] sm:$0xff] (!%p2694_p6)  }
  0xec   : > { %1777 = vmatpush1.bf16.msra.mxu0 %v3139_v47  ;;  %1941 = vmatpush1.bf16.msra.mxu1 %v3142_v48  ;;  %v2016_v47 = vsub.s32 (!%p2694_p6), 3, %v3325_v44  ;;  %v3187_v48 = vld [vmem:[%s3687_s3 + $0x38] sm:$0xff] (!%p2694_p6)  }
  0xed   : > { %1778 = vmatprep.subr.bf16.mxu0 %v3147_v49  ;;  %1942 = vmatprep.subr.bf16.mxu1 %v3150_v50  ;;  %v3188_v49 = vld [vmem:[%s3687_s3 + $0xb8] sm:$0xff] (!%p2694_p6)   ;;  %v2000_v50 = vld [vmem:[%s3686_s2] sm:$0xf] (!%p2694_p6) }
  0xee   : > { %v2017_v44 = vrot.slane (!%p2694_p6), %v2000_v50, %v2016_v47 }
  0xf0   : > { %1779 = vmatpush1.bf16.msra.mxu0 %v3145_v51  ;;  %1943 = vmatpush1.bf16.msra.mxu1 %v3148_v52  ;;  %v2005_v51 = vrot.slane (!%p2694_p6), %v2000_v50, %v2004_v40  ;;  %v2009_v52 = vrot.slane (!%p2694_p6), %v2000_v50, %v2008_v42 }
  0xf1   : > { %1780 = vmatprep.subr.bf16.mxu0 %v3153_v53  ;;  %1944 = vmatprep.subr.bf16.mxu1 %v3156_v54  ;;  %v2013_v53 = vrot.slane (!%p2694_p6), %v2000_v50, %v2012_v45 }
  0xf2   : > { %v2018_v54 = vcombine.low (!%p2694_p6), %v2005_v51, %v2009_v52 }
  0xf4   : > { %1781 = vmatpush1.bf16.msra.mxu0 %v3151_v55  ;;  %1945 = vmatpush1.bf16.msra.mxu1 %v3154_v56  ;;  %v2019_v55 = vcombine.low (!%p2694_p6), %v2013_v53, %v2017_v44  ;;  %v2026_v56 = vrot.slane (!%p2694_p6), %v2018_v54, %v3543_v63 }
  0xf5   : > { %2733 = vmatprep.subr.bf16.mxu0 (!%p2694_p6), %v3157_v12  ;;  %2755 = vmatprep.subr.bf16.mxu1 (!%p2694_p6), %v3158_v13 }
  0xf7   : > { %1799 = vmatmul.mubr.bf16.vlgmr.msra.gmra.mrb[0].mxu0 %v514_v57  ;;  %1963 = vmatmul.mubr.bf16.vlgmr.msra.gmra.mrb[0].mxu1 %v514_v57  ;;  %v2033_v57 = vrot.slane (!%p2694_p6), %v2019_v55, %v3543_v63 }
  0xf8   : > { %2734 = vmatpush3.bf16.msra.mxu0 (!%p2694_p6), %v3159_v14  ;;  %2756 = vmatpush3.bf16.msra.mxu1 (!%p2694_p6), %v3160_v15 }
  0xf9   : > { %2735 = vmatprep.subr.bf16.mxu0 (!%p2694_p6), %v3161_v17  ;;  %2757 = vmatprep.subr.bf16.mxu1 (!%p2694_p6), %v3162_v18  ;;  %v2034_v59 = vcombine.low (!%p2694_p6), %v2026_v56, %v2033_v57 }
  0xfc   : > { %2736 = vmatpush3.bf16.msra.mxu0 (!%p2694_p6), %v3163_v19  ;;  %2758 = vmatpush3.bf16.msra.mxu1 (!%p2694_p6), %v3164_v20 }
  0xfd   : > { %2737 = vmatprep.subr.bf16.mxu0 (!%p2694_p6), %v3165_v23  ;;  %2759 = vmatprep.subr.bf16.mxu1 (!%p2694_p6), %v3166_v24 }
 0x100   : > { %2738 = vmatpush3.bf16.msra.mxu0 (!%p2694_p6), %v3167_v25  ;;  %2760 = vmatpush3.bf16.msra.mxu1 (!%p2694_p6), %v3168_v26 }
 0x101   : > { %2739 = vmatprep.subr.bf16.mxu0 (!%p2694_p6), %v3169_v27  ;;  %2761 = vmatprep.subr.bf16.mxu1 (!%p2694_p6), %v3170_v28 }
 0x104   : > { %2740 = vmatpush3.bf16.msra.mxu0 (!%p2694_p6), %v3171_v29  ;;  %2762 = vmatpush3.bf16.msra.mxu1 (!%p2694_p6), %v3172_v16 }
 0x105   : > { %2741 = vmatprep.subr.bf16.mxu0 (!%p2694_p6), %v3173_v30  ;;  %2763 = vmatprep.subr.bf16.mxu1 (!%p2694_p6), %v3174_v31 }
 0x108   : > { %2742 = vmatpush3.bf16.msra.mxu0 (!%p2694_p6), %v3175_v32  ;;  %2764 = vmatpush3.bf16.msra.mxu1 (!%p2694_p6), %v3176_v33 }
 0x109   : > { %2743 = vmatprep.subr.bf16.mxu0 (!%p2694_p6), %v3177_v34  ;;  %2765 = vmatprep.subr.bf16.mxu1 (!%p2694_p6), %v3178_v35 }
 0x10c   : > { %2744 = vmatpush3.bf16.msra.mxu0 (!%p2694_p6), %v3179_v36  ;;  %2766 = vmatpush3.bf16.msra.mxu1 (!%p2694_p6), %v3180_v37 }
 0x10d   : > { %2745 = vmatprep.subr.bf16.mxu0 (!%p2694_p6), %v3181_v21  ;;  %2767 = vmatprep.subr.bf16.mxu1 (!%p2694_p6), %v3182_v38 }
 0x110   : > { %2746 = vmatpush3.bf16.msra.mxu0 (!%p2694_p6), %v3183_v39  ;;  %2768 = vmatpush3.bf16.msra.mxu1 (!%p2694_p6), %v3184_v41 }
 0x111   : > { %2747 = vmatprep.subr.bf16.mxu0 (!%p2694_p6), %v3185_v43  ;;  %2769 = vmatprep.subr.bf16.mxu1 (!%p2694_p6), %v3186_v46 }
 0x114   : > { %2748 = vmatpush3.bf16.msra.mxu0 (!%p2694_p6), %v3187_v48  ;;  %2770 = vmatpush3.bf16.msra.mxu1 (!%p2694_p6), %v3188_v49 }
 0x1ca   : > { %v1800_v61 = vpop.f32.mrb[0].mxu0  ;;  %v1964_v62 = vpop.f32.mrb[0].mxu1 }
 0x1cb   : > { %v1802_v0 = vpop.f32.mrb[1].mxu0  ;;  %v1966_v1 = vpop.f32.mrb[1].mxu1 }
 0x1cc   : > { %v1975_v2 = vcombine.low %v1800_v61, %v1802_v0  ;;  %v1976_v3 = vcombine.low %v1964_v62, %v1966_v1  ;;  %v1804_v4 = vpop.f32.mrb[2].mxu0  ;;  %v1968_v5 = vpop.f32.mrb[2].mxu1 }
 0x1cd   : > { %v1805_v6 = vpop.f32.mrb[3].mxu0  ;;  %v1969_v22 = vpop.f32.mrb[3].mxu1 }
 0x1ce   : > { %v1983_v7 = vrot.slane %v1975_v2, %v3543_v63  ;;  %v1990_v8 = vrot.slane %v1976_v3, %v3543_v63  ;;  %1998 = sbr.rel (%p2694_p6) target bundleno = 705 (0x2c1), region = 48 }
 0x1d0   : > { %v1991_v10 = vcombine.low %v1983_v7, %v1990_v8  ;;  %v2695_v7 = vld [vmem:[%s3688_s4] ss:$0 sm:$0xff] (!%p2694_p6) }
 0x1d2   : > { %v1993_v11 = vadd.f32 %v1991_v10, %v241_v9 }
 0x1d4   : > { %1994 = vst [vmem:[#allocation2] sm:$0xff] %v1993_v11 }
 0x1db   : > { %v1999_v58 = vld [vmem:[#allocation2] sm:$0xff] }
 0x1dc   : > { %v2036_v60 = vadd.f32 %v2034_v59, %v1999_v58 }
 0x1de   : > { %v2045_v61 = vrot.slane %v2036_v60, %v3543_v63  ;;  %v2038_v62 = vcombine.high %v2036_v60, %v2036_v60 }
 0x1e0   : > { %v2053_v0 = vcombine.high %v2045_v61, %v2045_v61  ;;  %v2052_v1 = vrot.slane %v2038_v62, %v3543_v63  ;;  %v2059_v2 = vpack.c.bf16 %v2045_v61, %v2045_v61 }
 0x1e2   : > { %v2060_v3 = vpack.c.bf16 %v2053_v0, %v2053_v0  ;;  %v2054_v4 = vcombine.high %v2052_v1, %v2052_v1  ;;  %v2061_v5 = vpack.c.bf16 %v2052_v1, %v2052_v1 }
 0x1e4   : > { %2358 = vmatprep.mubr.bf16.mxu0 %v2060_v3  ;;  %v2062_v6 = vpack.c.bf16 %v2054_v4, %v2054_v4 }
 0x1e5   : > { %2359 = vmatmul.mubr.bf16.vlgmr.msra.gmra.mrb[0].mxu0 %v2059_v2 }
 0x1e6   : > { %2398 = vmatprep.mubr.bf16.mxu1 %v2062_v6 }
 0x1e7   : > { %2399 = vmatmul.mubr.bf16.vlgmr.msra.gmra.mrb[0].mxu1 %v2061_v5 }
 0x2b8   : > { %v2749_v22 = vpop.f32.mrb[0].mxu0 }
 0x2b9   : > { %v2750_v8 = vpop.f32.mrb[1].mxu0 }
 0x2ba   : > { %v2771_v9 = vpop.f32.mrb[0].mxu1  ;;  %v2751_v10 = vadd.f32 %v2750_v8, %v2749_v22  ;;  %v2752_v11 = vpop.f32.mrb[2].mxu0 }
 0x2bb   : > { %v2772_v12 = vpop.f32.mrb[1].mxu1  ;;  %v2753_v63 = vpop.f32.mrb[3].mxu0 }
 0x2bc   : > { %v2361_v13 = vadd.f32 %v2751_v10, %v2695_v7  ;;  %v2773_v14 = vadd.f32 %v2772_v12, %v2771_v9  ;;  %v2774_v15 = vpop.f32.mrb[2].mxu1 }
 0x2bd   : > { %v2775_v17 = vpop.f32.mrb[3].mxu1 }
 0x2be   : > { %v2401_v18 = vadd.f32 %v2773_v14, %v2361_v13 }
 0x2c0   : > { %2407 = vst.msk [vmem:[#allocation3] sm:$0x3] %vm2406_vm0, %v2401_v18 }
 0x2c1 PF: > { %p2805_p7 = scmp.eq.s32.totalorder %s3268_s19, 6  ;;  %s3231_s30 = smov [#allocation3]  }
 0x2c2   : > { %s2415_s6 = sshll.u32 %s3231_s30, 4  ;;  %s2416_s6 = int_to_ptr.vmem [resolvable:$true] %s2415_s6 }
 0x2c3   : > { %s3189_s7 = scalar_lea.vmem %s2416_s6, 32  ;;  %p3196_p11 = scmp.lt.s32.totalorder %s2416_s6, %s2416_s6 }
 0x2c4   : > { %p3190_p8 = scmp.ne.s32.totalorder %s2416_s6, %s3189_s7  ;;  %p3197_p12 = scmp.lt.s32.totalorder %s3189_s7, %s3189_s7 }
 0x2c6   : > { %p3191_p9 = pnand %p3190_p8, %p2805_p7  ;;  %p3198_p13 = por %p3197_p12, %p3196_p11 }
 0x2c8   : > { %p3192_p10 = pneg %p3191_p9 }
 0x2ca   : > { %p3199_p0 = pnand %p3198_p13, %p3192_p10 }
 0x2cc   : > { %3202 = shalt.err (!%p3199_p0)
}
 0x2cd   : > { %s3203_s10 = scalar_lea.hbm %s3689_s5, 32 }
 0x2ce   : > { %p3204_p1 = scmp.ne.s32.totalorder %s3689_s5, %s3203_s10  ;;  %p3209_p4 = scmp.lt.u32.totalorder %s3203_s10, %s3689_s5 }
 0x2d0   : > { %p3205_p2 = pnand %p3204_p1, %p2805_p7 }
 0x2d2   : > { %p3206_p3 = pneg %p3205_p2 }
 0x2d4   : > { %p3211_p5 = pnand %p3209_p4, %p3206_p3 }
 0x2d6   : > { %3214 = shalt.err (!%p3211_p5)
}
 0x2d7   : > { %2802 = dma.vmem_to_hbm [thread:$0]  (%p2805_p7), %s2416_s6, 32, %s3689_s5, [#allocation4]  }
 0x2d8   : > { %3220 = dma.done.wait (%p2805_p7), [#allocation4], 32  }
 0x2d9   : > { %3222 = vsyncadd (%p2805_p7), [#allocation4], 4294967264 }
 0x2da PF: > { %s16_s18 = sadd.s32 1, %s3225_s18  }
 0x2db   : > { %p13_p6 = scmp.ge.s32.totalorder %s16_s18, 9  }
 0x2dd   :  { %15 = sbr.rel (!%p13_p6) target bundleno = 1 (0x1), region = 78 }
 0x2e4   :  { %2428 = vsyncpa [#allocation4], 1 }
 0x2e5   :  { %2430 = vsyncpa [#allocation4 + $0x1], 1 }

</bundles_post_ra>
